<compile_context>
chip_gen: v7x
topology: tpu7x:2x2x1
jax: 0.10.0
libtpu: 0.0.40
codegen_flags: <defaults>
</compile_context>

<pallas_src>
import functools

import jax
import jax.numpy as jnp
from jax import lax
from jax.experimental import pallas as pl
from jax.experimental.pallas import tpu as pltpu


# --------------------------------------------------------------------------
# Kernel 1: fused conv1 + pool + conv2 + pool  (one batch TILE per grid step)
# --------------------------------------------------------------------------

def conv_stack_kernel(x_ref, w1_ref, w2_ref, o_ref,
                      xb_s, t1_s, hp_s, a1_s, lhs_s, t2_s, *, bt):
    # x_ref : (1, 784, bt) f32   pixels (r = h*28+w) on sublanes, tile samples on lanes
    # w1_ref: (16, 128)    f32   conv1 taps [ki*3+kj, cout_pad]  (rows 9..15 zero)
    # w2_ref: (1152, 64)   bf16  conv2 weights [tap*128 + cin_pad, cout_pad]
    # o_ref : (bt, 25, 64) bf16  pooled conv2 features (p = ph*5+pw, c_pad)
    # xb_s  : (800, 128)   f32   one sample's input broadcast across lanes
    # t1_s  : (728, 128)   f32   conv1+ReLU map, row r = oh*28+ow
    # hp_s  : (368, 128)   f32   horizontally pooled conv1, row i = oh*14 + pw
    # a1_s  : (176, 128)   f32   pooled conv1, row r = ph*13 + pw
    # lhs_s : (bt*128, 1152) bf16  conv2 im2col LHS for the whole batch tile
    # t2_s  : (bt*128, 64) f32   conv2+ReLU map, row = s*128 + oh*13 + ow

    # conv1 tap rows, hoisted once per grid step (9 vregs live).
    w1_rows = [w1_ref[k:k + 1, :] for k in range(9)]

    # Rows 784..799 of the broadcast slab are touched by the last conv1 chunk
    # but never map to real pixels; zero them once so the garbage stays finite.
    xb_s[784:800, :] = jnp.zeros((16, 128), jnp.float32)

    def per_sample(s, carry):
        # ---- select sample s (lane s) and broadcast across 128 lanes ONCE.
        xall = x_ref[0]                                            # (784, bt)
        sel = lax.broadcasted_iota(jnp.int32, (1, bt), 1) == s
        col = jnp.sum(jnp.where(sel, xall, 0.0), axis=1, keepdims=True)
        xb_s[0:784, :] = jnp.broadcast_to(col, (784, 128))

        # ---- conv1: 9 shifted broadcast-FMA taps on the VPU, chunked so the
        #      live accumulator is only 13 vregs (104 x 128 f32).
        for c in range(7):                                         # 7 * 104 = 728
            acc = jnp.zeros((104, 128), jnp.float32)
            for ki in range(3):
                for kj in range(3):
                    acc = acc + (xb_s[pl.ds(c * 104 + ki * 28 + kj, 104), :]
                                 * w1_rows[ki * 3 + kj])
            t1_s[c * 104:(c + 1) * 104, :] = jnp.maximum(acc, 0.0)

        # ---- pool1 (2x2/2): horizontal stride-2 max over the whole map, then
        #      13 contiguous vertical maxes.  hp row i = oh*14 + pw.
        hp_s[0:364, :] = jnp.maximum(t1_s[pl.ds(0, 364, stride=2), :],
                                     t1_s[pl.ds(1, 364, stride=2), :])
        for ph in range(13):
            a1_s[ph * 13:(ph + 1) * 13, :] = jnp.maximum(
                hp_s[pl.ds(28 * ph, 13), :], hp_s[pl.ds(28 * ph + 14, 13), :])

        # ---- conv2 im2col: 9 shifted (128,128) windows of pooled conv1, cast
        #      to bf16 once, stacked along K (= tap*128 + cin) and along M by
        #      sample, so conv2 becomes a single big MXU matmul below.
        row0 = pl.multiple_of(s * 128, 128)
        for ki in range(3):
            for kj in range(3):
                k = ki * 3 + kj
                lhs_s[pl.ds(row0, 128), k * 128:(k + 1) * 128] = (
                    a1_s[pl.ds(ki * 13 + kj, 128), :].astype(jnp.bfloat16))
        return carry

    lax.fori_loop(0, bt, per_sample, 0)

    # ---- conv2: ONE MXU matmul for the whole batch tile, f32 accumulate+ReLU.
    t2_s[...] = jnp.maximum(
        jnp.dot(lhs_s[...], w2_ref[...], preferred_element_type=jnp.float32),
        0.0)

    # ---- pool2 (2x2/2) + store pooled features (one (5,64) row-block per ph).
    for s in range(bt):
        base = s * 128
        for a in range(5):
            r = base + 26 * a
            q00 = t2_s[pl.ds(r, 5, stride=2), :]
            q01 = t2_s[pl.ds(r + 1, 5, stride=2), :]
            q10 = t2_s[pl.ds(r + 13, 5, stride=2), :]
            q11 = t2_s[pl.ds(r + 14, 5, stride=2), :]
            o_ref[s, a * 5:(a + 1) * 5, :] = jnp.maximum(
                jnp.maximum(q00, q01), jnp.maximum(q10, q11)).astype(o_ref.dtype)


def conv_features(xt, w1p, w2p, *, bt):
    T = xt.shape[0]
    Bp = T * bt
    kernel = functools.partial(conv_stack_kernel, bt=bt)
    return pl.pallas_call(
        kernel,
        out_shape=jax.ShapeDtypeStruct((Bp, 25, 64), jnp.bfloat16),
        grid=(T,),
        in_specs=[
            pl.BlockSpec((1, 784, bt), lambda t: (t, 0, 0)),
            pl.BlockSpec((16, 128), lambda t: (0, 0)),
            pl.BlockSpec((1152, 64), lambda t: (0, 0)),
        ],
        out_specs=pl.BlockSpec((bt, 25, 64), lambda t: (t, 0, 0)),
        scratch_shapes=[
            pltpu.VMEM((800, 128), jnp.float32),      # xb_s
            pltpu.VMEM((728, 128), jnp.float32),      # t1_s
            pltpu.VMEM((368, 128), jnp.float32),      # hp_s
            pltpu.VMEM((176, 128), jnp.float32),      # a1_s
            pltpu.VMEM((bt * 128, 1152), jnp.bfloat16),  # lhs_s (im2col)
            pltpu.VMEM((bt * 128, 64), jnp.float32),  # t2_s
        ],
        compiler_params=pltpu.CompilerParams(
            dimension_semantics=("parallel",),
            vmem_limit_bytes=32 * 1024 * 1024,
        ),
    )(xt, w1p, w2p)


# --------------------------------------------------------------------------
# Kernel 2: fused fc1 + ReLU + fc2 + log_softmax (batch-tiled grid)
# --------------------------------------------------------------------------

def fc_head_kernel(x_ref, w1_ref, b1_ref, w2_ref, b2_ref, o_ref):
    x = x_ref[...]                                            # (TB, 1600) bf16
    h = jnp.dot(x, w1_ref[...], preferred_element_type=jnp.float32) + b1_ref[...]
    h = jnp.maximum(h, 0.0).astype(jnp.bfloat16)              # (TB, 512)
    z = jnp.dot(h, w2_ref[...], preferred_element_type=jnp.float32) + b2_ref[...]
    m = jnp.max(z, axis=-1, keepdims=True)
    sz = z - m
    lse = jnp.log(jnp.sum(jnp.exp(sz), axis=-1, keepdims=True))
    o_ref[...] = sz - lse                                     # (TB, 128) f32


def _fc_tile(n):
    for c in (512, 256, 128, 64, 32, 16, 8):
        if n >= c and n % c == 0:
            return c
    return n


def fc_head(a2, fc1_wp, fc1_bp, fc2_wp, fc2_bp):
    B = a2.shape[0]
    TB = _fc_tile(B)
    return pl.pallas_call(
        fc_head_kernel,
        out_shape=jax.ShapeDtypeStruct((B, 128), jnp.float32),
        grid=(B // TB,),
        in_specs=[
            pl.BlockSpec((TB, 1600), lambda i: (i, 0)),
            pl.BlockSpec((1600, 512), lambda i: (0, 0)),
            pl.BlockSpec((1, 512), lambda i: (0, 0)),
            pl.BlockSpec((512, 128), lambda i: (0, 0)),
            pl.BlockSpec((1, 128), lambda i: (0, 0)),
        ],
        out_specs=pl.BlockSpec((TB, 128), lambda i: (i, 0)),
        compiler_params=pltpu.CompilerParams(
            dimension_semantics=("parallel",),
            vmem_limit_bytes=32 * 1024 * 1024,
        ),
    )(a2, fc1_wp, fc1_bp, fc2_wp, fc2_bp)


# --------------------------------------------------------------------------
# Parameters (raw PyTorch layout) and one-time packing for the kernels
# --------------------------------------------------------------------------

def init_params(key):
    k1, k2, k3, k4, k5, k6 = jax.random.split(key, 6)
    w1 = jax.random.normal(k1, (100, 1, 3, 3), jnp.float32) * 0.1
    w2 = jax.random.normal(k2, (50, 100, 3, 3), jnp.float32) * 0.05
    fc1_w = jax.random.normal(k3, (500, 1250), jnp.float32) * 0.02
    fc1_b = jax.random.normal(k4, (500,), jnp.float32) * 0.02
    fc2_w = jax.random.normal(k5, (10, 500), jnp.float32) * 0.05
    fc2_b = jax.random.normal(k6, (10,), jnp.float32) * 0.05
    return dict(w1=w1, w2=w2, fc1_w=fc1_w, fc1_b=fc1_b, fc2_w=fc2_w, fc2_b=fc2_b)


def pack_params(p):
    # conv1: (100,1,3,3) -> (16, 128) f32, [tap, cout_pad]; Cout 100 -> 128.
    w1p = jnp.transpose(p["w1"][:, 0], (1, 2, 0)).reshape(9, 100)
    w1p = jnp.pad(w1p, ((0, 7), (0, 28))).astype(jnp.float32)

    # conv2: (50,100,3,3) -> (1152, 64) bf16, row = tap*128 + cin_pad.
    w2p = jnp.transpose(p["w2"], (2, 3, 1, 0)).reshape(9, 100, 50)
    w2p = jnp.pad(w2p, ((0, 0), (0, 28), (0, 14)))
    w2p = w2p.reshape(9 * 128, 64).astype(jnp.bfloat16)

    # fc1: torch flatten order is (c,h,w); our features flatten as (h,w,c_pad64).
    fc1 = p["fc1_w"].reshape(500, 50, 5, 5)            # [o, c, h, w]
    fc1 = jnp.transpose(fc1, (2, 3, 1, 0))             # [h, w, c, o]
    fc1 = jnp.pad(fc1, ((0, 0), (0, 0), (0, 14), (0, 12)))
    fc1_wp = fc1.reshape(5 * 5 * 64, 512).astype(jnp.bfloat16)
    fc1_bp = jnp.pad(p["fc1_b"], (0, 12)).reshape(1, 512).astype(jnp.float32)

    # fc2: (10,500) -> (512,128); padded logit columns get -1e30 bias so they
    # contribute nothing to log_softmax (logits stay f32).
    fc2_wp = jnp.pad(p["fc2_w"].T, ((0, 12), (0, 118))).astype(jnp.bfloat16)
    fc2_bp = jnp.pad(p["fc2_b"], (0, 118), constant_values=-1e30)
    fc2_bp = fc2_bp.reshape(1, 128).astype(jnp.float32)

    return dict(w1p=w1p, w2p=w2p, fc1_wp=fc1_wp, fc1_bp=fc1_bp,
                fc2_wp=fc2_wp, fc2_bp=fc2_bp)


# --------------------------------------------------------------------------
# Forward pass
# --------------------------------------------------------------------------

def net_forward(pp, x_nchw):
    """x_nchw: [B, 1, 28, 28] float32 -> log-probs [B, 10]."""
    B = x_nchw.shape[0]
    bt = 8 if B >= 8 else B                 # conv batch tile
    T = (B + bt - 1) // bt
    Bp = T * bt
    xf = x_nchw.astype(jnp.float32).reshape(B, 784)
    if Bp > B:
        xf = jnp.pad(xf, ((0, Bp - B), (0, 0)))
    # (T, 784, bt): pixels on sublanes, tile samples on lanes (one-time relayout).
    xt = jnp.transpose(xf.reshape(T, bt, 784), (0, 2, 1))
    feat = conv_features(xt, pp["w1p"], pp["w2p"], bt=bt)       # (Bp, 25, 64) bf16
    a2 = feat.reshape(Bp, 25 * 64)                              # metadata-only
    logits = fc_head(a2, pp["fc1_wp"], pp["fc1_bp"], pp["fc2_wp"], pp["fc2_bp"])
    return logits[:B, :10]


# --------------------------------------------------------------------------
# Pure-JAX reference (mirrors the PyTorch module) for a correctness check
# --------------------------------------------------------------------------

def reference_forward(p, x):
    hp = jax.lax.Precision.HIGHEST
    y = jax.lax.conv_general_dilated(
        x, p["w1"], (1, 1), "VALID",
        dimension_numbers=("NCHW", "OIHW", "NCHW"), precision=hp)
    y = jnp.maximum(y, 0.0)
    y = jax.lax.reduce_window(y, -jnp.inf, jax.lax.max,
                              (1, 1, 2, 2), (1, 1, 2, 2), "VALID")
    y = jax.lax.conv_general_dilated(
        y, p["w2"], (1, 1), "VALID",
        dimension_numbers=("NCHW", "OIHW", "NCHW"), precision=hp)
    y = jnp.maximum(y, 0.0)
    y = jax.lax.reduce_window(y, -jnp.inf, jax.lax.max,
                              (1, 1, 2, 2), (1, 1, 2, 2), "VALID")
    y = y.reshape(y.shape[0], -1)
    y = jnp.maximum(jnp.dot(y, p["fc1_w"].T, precision=hp) + p["fc1_b"], 0.0)
    y = jnp.dot(y, p["fc2_w"].T, precision=hp) + p["fc2_b"]
    return jax.nn.log_softmax(y, axis=-1)


if __name__ == "__main__":
    key = jax.random.PRNGKey(0)
    kx, kp = jax.random.split(key)
    # 28x28 single-channel input is forced by fc1's 5*5*50 flatten.
    x = jax.random.normal(kx, (2, 1, 28, 28), jnp.float32)
    params = init_params(kp)
    packed = pack_params(params)

    fwd = jax.jit(net_forward)
    out = jax.block_until_ready(fwd(packed, x))

    assert out.shape == (2, 10), out.shape
    # log_softmax sanity: rows exponentiate-and-sum to 1.
    row_sums = jnp.exp(out).sum(axis=-1)
    assert bool(jnp.all(jnp.abs(row_sums - 1.0) < 1e-3)), row_sums
    # Numerical check against the pure-JAX (f32) reference (bf16 matmul tolerance).
    ref = jax.jit(reference_forward)(params, x)
    max_err = float(jnp.max(jnp.abs(out - ref)))
    assert max_err < 0.1, max_err

    print("KERNEL_OK")
</pallas_src>

<mosaic_0001>
module attributes {stable_mosaic.version = 11 : i64} {
  func.func @conv_stack_kernel(%arg0: i32, %arg1: memref<1x784x2xf32, #tpu.memory_space<vmem>>, %arg2: memref<16x128xf32, #tpu.memory_space<vmem>>, %arg3: memref<1152x64xbf16, #tpu.memory_space<vmem>>, %arg4: memref<2x25x64xbf16, #tpu.memory_space<vmem>>, %arg5: memref<800x128xf32, #tpu.memory_space<vmem>>, %arg6: memref<728x128xf32, #tpu.memory_space<vmem>>, %arg7: memref<368x128xf32, #tpu.memory_space<vmem>>, %arg8: memref<176x128xf32, #tpu.memory_space<vmem>>, %arg9: memref<256x1152xbf16, #tpu.memory_space<vmem>>, %arg10: memref<256x64xf32, #tpu.memory_space<vmem>>) attributes {dimension_semantics = [#tpu.dimension_semantics<parallel>], iteration_bounds = array<i64: 1>, scalar_prefetch = 0 : i64, scratch_operands = 6 : i64, tpu.core_type = #tpu.core_type<tc>, window_params = [{transform_indices = @transform_0, window_bounds = array<i64: 1, 784, 2>}, {pipeline_mode = #tpu.pipeline_mode<synchronous>, transform_indices = @transform_1, window_bounds = array<i64: 16, 128>}, {pipeline_mode = #tpu.pipeline_mode<synchronous>, transform_indices = @transform_2, window_bounds = array<i64: 1152, 64>}, {transform_indices = @transform_3, window_bounds = array<i64: 2, 25, 64>}]} {
    %c0 = arith.constant 0 : index
    %c0_0 = arith.constant 0 : index
    %0 = vector.load %arg2[%c0, %c0_0] : memref<16x128xf32, #tpu.memory_space<vmem>>, vector<1x128xf32>
    %c1 = arith.constant 1 : index
    %c0_1 = arith.constant 0 : index
    %1 = vector.load %arg2[%c1, %c0_1] : memref<16x128xf32, #tpu.memory_space<vmem>>, vector<1x128xf32>
    %c2 = arith.constant 2 : index
    %c0_2 = arith.constant 0 : index
    %2 = vector.load %arg2[%c2, %c0_2] : memref<16x128xf32, #tpu.memory_space<vmem>>, vector<1x128xf32>
    %c3 = arith.constant 3 : index
    %c0_3 = arith.constant 0 : index
    %3 = vector.load %arg2[%c3, %c0_3] : memref<16x128xf32, #tpu.memory_space<vmem>>, vector<1x128xf32>
    %c4 = arith.constant 4 : index
    %c0_4 = arith.constant 0 : index
    %4 = vector.load %arg2[%c4, %c0_4] : memref<16x128xf32, #tpu.memory_space<vmem>>, vector<1x128xf32>
    %c5 = arith.constant 5 : index
    %c0_5 = arith.constant 0 : index
    %5 = vector.load %arg2[%c5, %c0_5] : memref<16x128xf32, #tpu.memory_space<vmem>>, vector<1x128xf32>
    %c6 = arith.constant 6 : index
    %c0_6 = arith.constant 0 : index
    %6 = vector.load %arg2[%c6, %c0_6] : memref<16x128xf32, #tpu.memory_space<vmem>>, vector<1x128xf32>
    %c7 = arith.constant 7 : index
    %c0_7 = arith.constant 0 : index
    %7 = vector.load %arg2[%c7, %c0_7] : memref<16x128xf32, #tpu.memory_space<vmem>>, vector<1x128xf32>
    %c8 = arith.constant 8 : index
    %c0_8 = arith.constant 0 : index
    %8 = vector.load %arg2[%c8, %c0_8] : memref<16x128xf32, #tpu.memory_space<vmem>>, vector<1x128xf32>
    %cst = arith.constant 0.000000e+00 : f32
    %9 = vector.broadcast %cst : f32 to vector<16x128xf32>
    %c784 = arith.constant 784 : index
    %c0_9 = arith.constant 0 : index
    %10 = vector.load %arg5[%c784, %c0_9] : memref<800x128xf32, #tpu.memory_space<vmem>>, vector<16x128xf32>
    tpu.vector_store %arg5[%c784, %c0_9], %9 {strides = array<i32>} : memref<800x128xf32, #tpu.memory_space<vmem>>, vector<16x128xf32>,
    %c0_i32 = arith.constant 0 : i32
    %c2_i32 = arith.constant 2 : i32
    %11 = arith.addi %c0_i32, %c2_i32 : i32
    %c1_i32 = arith.constant 1 : i32
    scf.for %arg11 = %c0_i32 to %11 step %c1_i32  : i32 {
      %c0_88 = arith.constant 0 : index
      %c0_89 = arith.constant 0 : index
      %c0_90 = arith.constant 0 : index
      %128 = vector.load %arg1[%c0_88, %c0_89, %c0_90] : memref<1x784x2xf32, #tpu.memory_space<vmem>>, vector<1x784x2xf32>
      %129 = vector.shape_cast %128 : vector<1x784x2xf32> to vector<784x2xf32>
      %130 = tpu.iota {dimensions = array<i32: 1>} : vector<1x2xi32>
      %131 = vector.broadcast %arg11 : i32 to vector<1x2xi32>
      %132 = arith.cmpi eq, %130, %131 : vector<1x2xi32>
      %cst_91 = arith.constant 0.000000e+00 : f32
      %133 = vector.shape_cast %132 : vector<1x2xi1> to vector<1x2xi1>
      %134 = vector.broadcast %133 : vector<1x2xi1> to vector<784x2xi1>
      %135 = vector.broadcast %cst_91 : f32 to vector<784x2xf32>
      %136 = arith.select %134, %129, %135 : vector<784x2xi1>, vector<784x2xf32>
      %cst_92 = arith.constant dense<0.000000e+00> : vector<784xf32>
      %137 = vector.multi_reduction <add>, %136, %cst_92 [1] : vector<784x2xf32> to vector<784xf32>
      %138 = vector.shape_cast %137 : vector<784xf32> to vector<784x1xf32>
      %139 = vector.shape_cast %138 : vector<784x1xf32> to vector<784x1xf32>
      %140 = vector.broadcast %139 : vector<784x1xf32> to vector<784x128xf32>
      %c0_93 = arith.constant 0 : index
      %c0_94 = arith.constant 0 : index
      %141 = vector.load %arg5[%c0_93, %c0_94] : memref<800x128xf32, #tpu.memory_space<vmem>>, vector<784x128xf32>
      tpu.vector_store %arg5[%c0_93, %c0_94], %140 {strides = array<i32>} : memref<800x128xf32, #tpu.memory_space<vmem>>, vector<784x128xf32>,
      %cst_95 = arith.constant 0.000000e+00 : f32
      %142 = vector.broadcast %cst_95 : f32 to vector<104x128xf32>
      %c0_96 = arith.constant 0 : index
      %c0_97 = arith.constant 0 : index
      %143 = vector.load %arg5[%c0_96, %c0_97] : memref<800x128xf32, #tpu.memory_space<vmem>>, vector<104x128xf32>
      %144 = vector.broadcast %0 : vector<1x128xf32> to vector<104x128xf32>
      %145 = arith.mulf %143, %144 : vector<104x128xf32>
      %146 = arith.addf %142, %145 : vector<104x128xf32>
      %c1_98 = arith.constant 1 : index
      %c0_99 = arith.constant 0 : index
      %147 = vector.load %arg5[%c1_98, %c0_99] : memref<800x128xf32, #tpu.memory_space<vmem>>, vector<104x128xf32>
      %148 = vector.broadcast %1 : vector<1x128xf32> to vector<104x128xf32>
      %149 = arith.mulf %147, %148 : vector<104x128xf32>
      %150 = arith.addf %146, %149 : vector<104x128xf32>
      %c2_100 = arith.constant 2 : index
      %c0_101 = arith.constant 0 : index
      %151 = vector.load %arg5[%c2_100, %c0_101] : memref<800x128xf32, #tpu.memory_space<vmem>>, vector<104x128xf32>
      %152 = vector.broadcast %2 : vector<1x128xf32> to vector<104x128xf32>
      %153 = arith.mulf %151, %152 : vector<104x128xf32>
      %154 = arith.addf %150, %153 : vector<104x128xf32>
      %c28 = arith.constant 28 : index
      %c0_102 = arith.constant 0 : index
      %155 = vector.load %arg5[%c28, %c0_102] : memref<800x128xf32, #tpu.memory_space<vmem>>, vector<104x128xf32>
      %156 = vector.broadcast %3 : vector<1x128xf32> to vector<104x128xf32>
      %157 = arith.mulf %155, %156 : vector<104x128xf32>
      %158 = arith.addf %154, %157 : vector<104x128xf32>
      %c29 = arith.constant 29 : index
      %c0_103 = arith.constant 0 : index
      %159 = vector.load %arg5[%c29, %c0_103] : memref<800x128xf32, #tpu.memory_space<vmem>>, vector<104x128xf32>
      %160 = vector.broadcast %4 : vector<1x128xf32> to vector<104x128xf32>
      %161 = arith.mulf %159, %160 : vector<104x128xf32>
      %162 = arith.addf %158, %161 : vector<104x128xf32>
      %c30 = arith.constant 30 : index
      %c0_104 = arith.constant 0 : index
      %163 = vector.load %arg5[%c30, %c0_104] : memref<800x128xf32, #tpu.memory_space<vmem>>, vector<104x128xf32>
      %164 = vector.broadcast %5 : vector<1x128xf32> to vector<104x128xf32>
      %165 = arith.mulf %163, %164 : vector<104x128xf32>
      %166 = arith.addf %162, %165 : vector<104x128xf32>
      %c56 = arith.constant 56 : index
      %c0_105 = arith.constant 0 : index
      %167 = vector.load %arg5[%c56, %c0_105] : memref<800x128xf32, #tpu.memory_space<vmem>>, vector<104x128xf32>
      %168 = vector.broadcast %6 : vector<1x128xf32> to vector<104x128xf32>
      %169 = arith.mulf %167, %168 : vector<104x128xf32>
      %170 = arith.addf %166, %169 : vector<104x128xf32>
      %c57 = arith.constant 57 : index
      %c0_106 = arith.constant 0 : index
      %171 = vector.load %arg5[%c57, %c0_106] : memref<800x128xf32, #tpu.memory_space<vmem>>, vector<104x128xf32>
      %172 = vector.broadcast %7 : vector<1x128xf32> to vector<104x128xf32>
      %173 = arith.mulf %171, %172 : vector<104x128xf32>
      %174 = arith.addf %170, %173 : vector<104x128xf32>
      %c58 = arith.constant 58 : index
      %c0_107 = arith.constant 0 : index
      %175 = vector.load %arg5[%c58, %c0_107] : memref<800x128xf32, #tpu.memory_space<vmem>>, vector<104x128xf32>
      %176 = vector.broadcast %8 : vector<1x128xf32> to vector<104x128xf32>
      %177 = arith.mulf %175, %176 : vector<104x128xf32>
      %178 = arith.addf %174, %177 : vector<104x128xf32>
      %cst_108 = arith.constant 0.000000e+00 : f32
      %179 = vector.broadcast %cst_108 : f32 to vector<104x128xf32>
      %180 = arith.maximumf %178, %179 : vector<104x128xf32>
      %c0_109 = arith.constant 0 : index
      %c0_110 = arith.constant 0 : index
      %181 = vector.load %arg6[%c0_109, %c0_110] : memref<728x128xf32, #tpu.memory_space<vmem>>, vector<104x128xf32>
      tpu.vector_store %arg6[%c0_109, %c0_110], %180 {strides = array<i32>} : memref<728x128xf32, #tpu.memory_space<vmem>>, vector<104x128xf32>,
      %cst_111 = arith.constant 0.000000e+00 : f32
      %182 = vector.broadcast %cst_111 : f32 to vector<104x128xf32>
      %c104_112 = arith.constant 104 : index
      %c0_113 = arith.constant 0 : index
      %183 = vector.load %arg5[%c104_112, %c0_113] : memref<800x128xf32, #tpu.memory_space<vmem>>, vector<104x128xf32>
      %184 = vector.broadcast %0 : vector<1x128xf32> to vector<104x128xf32>
      %185 = arith.mulf %183, %184 : vector<104x128xf32>
      %186 = arith.addf %182, %185 : vector<104x128xf32>
      %c105_114 = arith.constant 105 : index
      %c0_115 = arith.constant 0 : index
      %187 = vector.load %arg5[%c105_114, %c0_115] : memref<800x128xf32, #tpu.memory_space<vmem>>, vector<104x128xf32>
      %188 = vector.broadcast %1 : vector<1x128xf32> to vector<104x128xf32>
      %189 = arith.mulf %187, %188 : vector<104x128xf32>
      %190 = arith.addf %186, %189 : vector<104x128xf32>
      %c106 = arith.constant 106 : index
      %c0_116 = arith.constant 0 : index
      %191 = vector.load %arg5[%c106, %c0_116] : memref<800x128xf32, #tpu.memory_space<vmem>>, vector<104x128xf32>
      %192 = vector.broadcast %2 : vector<1x128xf32> to vector<104x128xf32>
      %193 = arith.mulf %191, %192 : vector<104x128xf32>
      %194 = arith.addf %190, %193 : vector<104x128xf32>
      %c132 = arith.constant 132 : index
      %c0_117 = arith.constant 0 : index
      %195 = vector.load %arg5[%c132, %c0_117] : memref<800x128xf32, #tpu.memory_space<vmem>>, vector<104x128xf32>
      %196 = vector.broadcast %3 : vector<1x128xf32> to vector<104x128xf32>
      %197 = arith.mulf %195, %196 : vector<104x128xf32>
      %198 = arith.addf %194, %197 : vector<104x128xf32>
      %c133 = arith.constant 133 : index
      %c0_118 = arith.constant 0 : index
      %199 = vector.load %arg5[%c133, %c0_118] : memref<800x128xf32, #tpu.memory_space<vmem>>, vector<104x128xf32>
      %200 = vector.broadcast %4 : vector<1x128xf32> to vector<104x128xf32>
      %201 = arith.mulf %199, %200 : vector<104x128xf32>
      %202 = arith.addf %198, %201 : vector<104x128xf32>
      %c134 = arith.constant 134 : index
      %c0_119 = arith.constant 0 : index
      %203 = vector.load %arg5[%c134, %c0_119] : memref<800x128xf32, #tpu.memory_space<vmem>>, vector<104x128xf32>
      %204 = vector.broadcast %5 : vector<1x128xf32> to vector<104x128xf32>
      %205 = arith.mulf %203, %204 : vector<104x128xf32>
      %206 = arith.addf %202, %205 : vector<104x128xf32>
      %c160 = arith.constant 160 : index
      %c0_120 = arith.constant 0 : index
      %207 = vector.load %arg5[%c160, %c0_120] : memref<800x128xf32, #tpu.memory_space<vmem>>, vector<104x128xf32>
      %208 = vector.broadcast %6 : vector<1x128xf32> to vector<104x128xf32>
      %209 = arith.mulf %207, %208 : vector<104x128xf32>
      %210 = arith.addf %206, %209 : vector<104x128xf32>
      %c161 = arith.constant 161 : index
      %c0_121 = arith.constant 0 : index
      %211 = vector.load %arg5[%c161, %c0_121] : memref<800x128xf32, #tpu.memory_space<vmem>>, vector<104x128xf32>
      %212 = vector.broadcast %7 : vector<1x128xf32> to vector<104x128xf32>
      %213 = arith.mulf %211, %212 : vector<104x128xf32>
      %214 = arith.addf %210, %213 : vector<104x128xf32>
      %c162 = arith.constant 162 : index
      %c0_122 = arith.constant 0 : index
      %215 = vector.load %arg5[%c162, %c0_122] : memref<800x128xf32, #tpu.memory_space<vmem>>, vector<104x128xf32>
      %216 = vector.broadcast %8 : vector<1x128xf32> to vector<104x128xf32>
      %217 = arith.mulf %215, %216 : vector<104x128xf32>
      %218 = arith.addf %214, %217 : vector<104x128xf32>
      %cst_123 = arith.constant 0.000000e+00 : f32
      %219 = vector.broadcast %cst_123 : f32 to vector<104x128xf32>
      %220 = arith.maximumf %218, %219 : vector<104x128xf32>
      %c104_124 = arith.constant 104 : index
      %c0_125 = arith.constant 0 : index
      %221 = vector.load %arg6[%c104_124, %c0_125] : memref<728x128xf32, #tpu.memory_space<vmem>>, vector<104x128xf32>
      tpu.vector_store %arg6[%c104_124, %c0_125], %220 {strides = array<i32>} : memref<728x128xf32, #tpu.memory_space<vmem>>, vector<104x128xf32>,
      %cst_126 = arith.constant 0.000000e+00 : f32
      %222 = vector.broadcast %cst_126 : f32 to vector<104x128xf32>
      %c208 = arith.constant 208 : index
      %c0_127 = arith.constant 0 : index
      %223 = vector.load %arg5[%c208, %c0_127] : memref<800x128xf32, #tpu.memory_space<vmem>>, vector<104x128xf32>
      %224 = vector.broadcast %0 : vector<1x128xf32> to vector<104x128xf32>
      %225 = arith.mulf %223, %224 : vector<104x128xf32>
      %226 = arith.addf %222, %225 : vector<104x128xf32>
      %c209 = arith.constant 209 : index
      %c0_128 = arith.constant 0 : index
      %227 = vector.load %arg5[%c209, %c0_128] : memref<800x128xf32, #tpu.memory_space<vmem>>, vector<104x128xf32>
      %228 = vector.broadcast %1 : vector<1x128xf32> to vector<104x128xf32>
      %229 = arith.mulf %227, %228 : vector<104x128xf32>
      %230 = arith.addf %226, %229 : vector<104x128xf32>
      %c210 = arith.constant 210 : index
      %c0_129 = arith.constant 0 : index
      %231 = vector.load %arg5[%c210, %c0_129] : memref<800x128xf32, #tpu.memory_space<vmem>>, vector<104x128xf32>
      %232 = vector.broadcast %2 : vector<1x128xf32> to vector<104x128xf32>
      %233 = arith.mulf %231, %232 : vector<104x128xf32>
      %234 = arith.addf %230, %233 : vector<104x128xf32>
      %c236 = arith.constant 236 : index
      %c0_130 = arith.constant 0 : index
      %235 = vector.load %arg5[%c236, %c0_130] : memref<800x128xf32, #tpu.memory_space<vmem>>, vector<104x128xf32>
      %236 = vector.broadcast %3 : vector<1x128xf32> to vector<104x128xf32>
      %237 = arith.mulf %235, %236 : vector<104x128xf32>
      %238 = arith.addf %234, %237 : vector<104x128xf32>
      %c237 = arith.constant 237 : index
      %c0_131 = arith.constant 0 : index
      %239 = vector.load %arg5[%c237, %c0_131] : memref<800x128xf32, #tpu.memory_space<vmem>>, vector<104x128xf32>
      %240 = vector.broadcast %4 : vector<1x128xf32> to vector<104x128xf32>
      %241 = arith.mulf %239, %240 : vector<104x128xf32>
      %242 = arith.addf %238, %241 : vector<104x128xf32>
      %c238 = arith.constant 238 : index
      %c0_132 = arith.constant 0 : index
      %243 = vector.load %arg5[%c238, %c0_132] : memref<800x128xf32, #tpu.memory_space<vmem>>, vector<104x128xf32>
      %244 = vector.broadcast %5 : vector<1x128xf32> to vector<104x128xf32>
      %245 = arith.mulf %243, %244 : vector<104x128xf32>
      %246 = arith.addf %242, %245 : vector<104x128xf32>
      %c264 = arith.constant 264 : index
      %c0_133 = arith.constant 0 : index
      %247 = vector.load %arg5[%c264, %c0_133] : memref<800x128xf32, #tpu.memory_space<vmem>>, vector<104x128xf32>
      %248 = vector.broadcast %6 : vector<1x128xf32> to vector<104x128xf32>
      %249 = arith.mulf %247, %248 : vector<104x128xf32>
      %250 = arith.addf %246, %249 : vector<104x128xf32>
      %c265 = arith.constant 265 : index
      %c0_134 = arith.constant 0 : index
      %251 = vector.load %arg5[%c265, %c0_134] : memref<800x128xf32, #tpu.memory_space<vmem>>, vector<104x128xf32>
      %252 = vector.broadcast %7 : vector<1x128xf32> to vector<104x128xf32>
      %253 = arith.mulf %251, %252 : vector<104x128xf32>
      %254 = arith.addf %250, %253 : vector<104x128xf32>
      %c266 = arith.constant 266 : index
      %c0_135 = arith.constant 0 : index
      %255 = vector.load %arg5[%c266, %c0_135] : memref<800x128xf32, #tpu.memory_space<vmem>>, vector<104x128xf32>
      %256 = vector.broadcast %8 : vector<1x128xf32> to vector<104x128xf32>
      %257 = arith.mulf %255, %256 : vector<104x128xf32>
      %258 = arith.addf %254, %257 : vector<104x128xf32>
      %cst_136 = arith.constant 0.000000e+00 : f32
      %259 = vector.broadcast %cst_136 : f32 to vector<104x128xf32>
      %260 = arith.maximumf %258, %259 : vector<104x128xf32>
      %c208_137 = arith.constant 208 : index
      %c0_138 = arith.constant 0 : index
      %261 = vector.load %arg6[%c208_137, %c0_138] : memref<728x128xf32, #tpu.memory_space<vmem>>, vector<104x128xf32>
      tpu.vector_store %arg6[%c208_137, %c0_138], %260 {strides = array<i32>} : memref<728x128xf32, #tpu.memory_space<vmem>>, vector<104x128xf32>,
      %cst_139 = arith.constant 0.000000e+00 : f32
      %262 = vector.broadcast %cst_139 : f32 to vector<104x128xf32>
      %c312 = arith.constant 312 : index
      %c0_140 = arith.constant 0 : index
      %263 = vector.load %arg5[%c312, %c0_140] : memref<800x128xf32, #tpu.memory_space<vmem>>, vector<104x128xf32>
      %264 = vector.broadcast %0 : vector<1x128xf32> to vector<104x128xf32>
      %265 = arith.mulf %263, %264 : vector<104x128xf32>
      %266 = arith.addf %262, %265 : vector<104x128xf32>
      %c313 = arith.constant 313 : index
      %c0_141 = arith.constant 0 : index
      %267 = vector.load %arg5[%c313, %c0_141] : memref<800x128xf32, #tpu.memory_space<vmem>>, vector<104x128xf32>
      %268 = vector.broadcast %1 : vector<1x128xf32> to vector<104x128xf32>
      %269 = arith.mulf %267, %268 : vector<104x128xf32>
      %270 = arith.addf %266, %269 : vector<104x128xf32>
      %c314 = arith.constant 314 : index
      %c0_142 = arith.constant 0 : index
      %271 = vector.load %arg5[%c314, %c0_142] : memref<800x128xf32, #tpu.memory_space<vmem>>, vector<104x128xf32>
      %272 = vector.broadcast %2 : vector<1x128xf32> to vector<104x128xf32>
      %273 = arith.mulf %271, %272 : vector<104x128xf32>
      %274 = arith.addf %270, %273 : vector<104x128xf32>
      %c340 = arith.constant 340 : index
      %c0_143 = arith.constant 0 : index
      %275 = vector.load %arg5[%c340, %c0_143] : memref<800x128xf32, #tpu.memory_space<vmem>>, vector<104x128xf32>
      %276 = vector.broadcast %3 : vector<1x128xf32> to vector<104x128xf32>
      %277 = arith.mulf %275, %276 : vector<104x128xf32>
      %278 = arith.addf %274, %277 : vector<104x128xf32>
      %c341 = arith.constant 341 : index
      %c0_144 = arith.constant 0 : index
      %279 = vector.load %arg5[%c341, %c0_144] : memref<800x128xf32, #tpu.memory_space<vmem>>, vector<104x128xf32>
      %280 = vector.broadcast %4 : vector<1x128xf32> to vector<104x128xf32>
      %281 = arith.mulf %279, %280 : vector<104x128xf32>
      %282 = arith.addf %278, %281 : vector<104x128xf32>
      %c342 = arith.constant 342 : index
      %c0_145 = arith.constant 0 : index
      %283 = vector.load %arg5[%c342, %c0_145] : memref<800x128xf32, #tpu.memory_space<vmem>>, vector<104x128xf32>
      %284 = vector.broadcast %5 : vector<1x128xf32> to vector<104x128xf32>
      %285 = arith.mulf %283, %284 : vector<104x128xf32>
      %286 = arith.addf %282, %285 : vector<104x128xf32>
      %c368 = arith.constant 368 : index
      %c0_146 = arith.constant 0 : index
      %287 = vector.load %arg5[%c368, %c0_146] : memref<800x128xf32, #tpu.memory_space<vmem>>, vector<104x128xf32>
      %288 = vector.broadcast %6 : vector<1x128xf32> to vector<104x128xf32>
      %289 = arith.mulf %287, %288 : vector<104x128xf32>
      %290 = arith.addf %286, %289 : vector<104x128xf32>
      %c369 = arith.constant 369 : index
      %c0_147 = arith.constant 0 : index
      %291 = vector.load %arg5[%c369, %c0_147] : memref<800x128xf32, #tpu.memory_space<vmem>>, vector<104x128xf32>
      %292 = vector.broadcast %7 : vector<1x128xf32> to vector<104x128xf32>
      %293 = arith.mulf %291, %292 : vector<104x128xf32>
      %294 = arith.addf %290, %293 : vector<104x128xf32>
      %c370 = arith.constant 370 : index
      %c0_148 = arith.constant 0 : index
      %295 = vector.load %arg5[%c370, %c0_148] : memref<800x128xf32, #tpu.memory_space<vmem>>, vector<104x128xf32>
      %296 = vector.broadcast %8 : vector<1x128xf32> to vector<104x128xf32>
      %297 = arith.mulf %295, %296 : vector<104x128xf32>
      %298 = arith.addf %294, %297 : vector<104x128xf32>
      %cst_149 = arith.constant 0.000000e+00 : f32
      %299 = vector.broadcast %cst_149 : f32 to vector<104x128xf32>
      %300 = arith.maximumf %298, %299 : vector<104x128xf32>
      %c312_150 = arith.constant 312 : index
      %c0_151 = arith.constant 0 : index
      %301 = vector.load %arg6[%c312_150, %c0_151] : memref<728x128xf32, #tpu.memory_space<vmem>>, vector<104x128xf32>
      tpu.vector_store %arg6[%c312_150, %c0_151], %300 {strides = array<i32>} : memref<728x128xf32, #tpu.memory_space<vmem>>, vector<104x128xf32>,
      %cst_152 = arith.constant 0.000000e+00 : f32
      %302 = vector.broadcast %cst_152 : f32 to vector<104x128xf32>
      %c416 = arith.constant 416 : index
      %c0_153 = arith.constant 0 : index
      %303 = vector.load %arg5[%c416, %c0_153] : memref<800x128xf32, #tpu.memory_space<vmem>>, vector<104x128xf32>
      %304 = vector.broadcast %0 : vector<1x128xf32> to vector<104x128xf32>
      %305 = arith.mulf %303, %304 : vector<104x128xf32>
      %306 = arith.addf %302, %305 : vector<104x128xf32>
      %c417 = arith.constant 417 : index
      %c0_154 = arith.constant 0 : index
      %307 = vector.load %arg5[%c417, %c0_154] : memref<800x128xf32, #tpu.memory_space<vmem>>, vector<104x128xf32>
      %308 = vector.broadcast %1 : vector<1x128xf32> to vector<104x128xf32>
      %309 = arith.mulf %307, %308 : vector<104x128xf32>
      %310 = arith.addf %306, %309 : vector<104x128xf32>
      %c418 = arith.constant 418 : index
      %c0_155 = arith.constant 0 : index
      %311 = vector.load %arg5[%c418, %c0_155] : memref<800x128xf32, #tpu.memory_space<vmem>>, vector<104x128xf32>
      %312 = vector.broadcast %2 : vector<1x128xf32> to vector<104x128xf32>
      %313 = arith.mulf %311, %312 : vector<104x128xf32>
      %314 = arith.addf %310, %313 : vector<104x128xf32>
      %c444 = arith.constant 444 : index
      %c0_156 = arith.constant 0 : index
      %315 = vector.load %arg5[%c444, %c0_156] : memref<800x128xf32, #tpu.memory_space<vmem>>, vector<104x128xf32>
      %316 = vector.broadcast %3 : vector<1x128xf32> to vector<104x128xf32>
      %317 = arith.mulf %315, %316 : vector<104x128xf32>
      %318 = arith.addf %314, %317 : vector<104x128xf32>
      %c445 = arith.constant 445 : index
      %c0_157 = arith.constant 0 : index
      %319 = vector.load %arg5[%c445, %c0_157] : memref<800x128xf32, #tpu.memory_space<vmem>>, vector<104x128xf32>
      %320 = vector.broadcast %4 : vector<1x128xf32> to vector<104x128xf32>
      %321 = arith.mulf %319, %320 : vector<104x128xf32>
      %322 = arith.addf %318, %321 : vector<104x128xf32>
      %c446 = arith.constant 446 : index
      %c0_158 = arith.constant 0 : index
      %323 = vector.load %arg5[%c446, %c0_158] : memref<800x128xf32, #tpu.memory_space<vmem>>, vector<104x128xf32>
      %324 = vector.broadcast %5 : vector<1x128xf32> to vector<104x128xf32>
      %325 = arith.mulf %323, %324 : vector<104x128xf32>
      %326 = arith.addf %322, %325 : vector<104x128xf32>
      %c472 = arith.constant 472 : index
      %c0_159 = arith.constant 0 : index
      %327 = vector.load %arg5[%c472, %c0_159] : memref<800x128xf32, #tpu.memory_space<vmem>>, vector<104x128xf32>
      %328 = vector.broadcast %6 : vector<1x128xf32> to vector<104x128xf32>
      %329 = arith.mulf %327, %328 : vector<104x128xf32>
      %330 = arith.addf %326, %329 : vector<104x128xf32>
      %c473 = arith.constant 473 : index
      %c0_160 = arith.constant 0 : index
      %331 = vector.load %arg5[%c473, %c0_160] : memref<800x128xf32, #tpu.memory_space<vmem>>, vector<104x128xf32>
      %332 = vector.broadcast %7 : vector<1x128xf32> to vector<104x128xf32>
      %333 = arith.mulf %331, %332 : vector<104x128xf32>
      %334 = arith.addf %330, %333 : vector<104x128xf32>
      %c474 = arith.constant 474 : index
      %c0_161 = arith.constant 0 : index
      %335 = vector.load %arg5[%c474, %c0_161] : memref<800x128xf32, #tpu.memory_space<vmem>>, vector<104x128xf32>
      %336 = vector.broadcast %8 : vector<1x128xf32> to vector<104x128xf32>
      %337 = arith.mulf %335, %336 : vector<104x128xf32>
      %338 = arith.addf %334, %337 : vector<104x128xf32>
      %cst_162 = arith.constant 0.000000e+00 : f32
      %339 = vector.broadcast %cst_162 : f32 to vector<104x128xf32>
      %340 = arith.maximumf %338, %339 : vector<104x128xf32>
      %c416_163 = arith.constant 416 : index
      %c0_164 = arith.constant 0 : index
      %341 = vector.load %arg6[%c416_163, %c0_164] : memref<728x128xf32, #tpu.memory_space<vmem>>, vector<104x128xf32>
      tpu.vector_store %arg6[%c416_163, %c0_164], %340 {strides = array<i32>} : memref<728x128xf32, #tpu.memory_space<vmem>>, vector<104x128xf32>,
      %cst_165 = arith.constant 0.000000e+00 : f32
      %342 = vector.broadcast %cst_165 : f32 to vector<104x128xf32>
      %c520 = arith.constant 520 : index
      %c0_166 = arith.constant 0 : index
      %343 = vector.load %arg5[%c520, %c0_166] : memref<800x128xf32, #tpu.memory_space<vmem>>, vector<104x128xf32>
      %344 = vector.broadcast %0 : vector<1x128xf32> to vector<104x128xf32>
      %345 = arith.mulf %343, %344 : vector<104x128xf32>
      %346 = arith.addf %342, %345 : vector<104x128xf32>
      %c521 = arith.constant 521 : index
      %c0_167 = arith.constant 0 : index
      %347 = vector.load %arg5[%c521, %c0_167] : memref<800x128xf32, #tpu.memory_space<vmem>>, vector<104x128xf32>
      %348 = vector.broadcast %1 : vector<1x128xf32> to vector<104x128xf32>
      %349 = arith.mulf %347, %348 : vector<104x128xf32>
      %350 = arith.addf %346, %349 : vector<104x128xf32>
      %c522 = arith.constant 522 : index
      %c0_168 = arith.constant 0 : index
      %351 = vector.load %arg5[%c522, %c0_168] : memref<800x128xf32, #tpu.memory_space<vmem>>, vector<104x128xf32>
      %352 = vector.broadcast %2 : vector<1x128xf32> to vector<104x128xf32>
      %353 = arith.mulf %351, %352 : vector<104x128xf32>
      %354 = arith.addf %350, %353 : vector<104x128xf32>
      %c548 = arith.constant 548 : index
      %c0_169 = arith.constant 0 : index
      %355 = vector.load %arg5[%c548, %c0_169] : memref<800x128xf32, #tpu.memory_space<vmem>>, vector<104x128xf32>
      %356 = vector.broadcast %3 : vector<1x128xf32> to vector<104x128xf32>
      %357 = arith.mulf %355, %356 : vector<104x128xf32>
      %358 = arith.addf %354, %357 : vector<104x128xf32>
      %c549 = arith.constant 549 : index
      %c0_170 = arith.constant 0 : index
      %359 = vector.load %arg5[%c549, %c0_170] : memref<800x128xf32, #tpu.memory_space<vmem>>, vector<104x128xf32>
      %360 = vector.broadcast %4 : vector<1x128xf32> to vector<104x128xf32>
      %361 = arith.mulf %359, %360 : vector<104x128xf32>
      %362 = arith.addf %358, %361 : vector<104x128xf32>
      %c550 = arith.constant 550 : index
      %c0_171 = arith.constant 0 : index
      %363 = vector.load %arg5[%c550, %c0_171] : memref<800x128xf32, #tpu.memory_space<vmem>>, vector<104x128xf32>
      %364 = vector.broadcast %5 : vector<1x128xf32> to vector<104x128xf32>
      %365 = arith.mulf %363, %364 : vector<104x128xf32>
      %366 = arith.addf %362, %365 : vector<104x128xf32>
      %c576 = arith.constant 576 : index
      %c0_172 = arith.constant 0 : index
      %367 = vector.load %arg5[%c576, %c0_172] : memref<800x128xf32, #tpu.memory_space<vmem>>, vector<104x128xf32>
      %368 = vector.broadcast %6 : vector<1x128xf32> to vector<104x128xf32>
      %369 = arith.mulf %367, %368 : vector<104x128xf32>
      %370 = arith.addf %366, %369 : vector<104x128xf32>
      %c577 = arith.constant 577 : index
      %c0_173 = arith.constant 0 : index
      %371 = vector.load %arg5[%c577, %c0_173] : memref<800x128xf32, #tpu.memory_space<vmem>>, vector<104x128xf32>
      %372 = vector.broadcast %7 : vector<1x128xf32> to vector<104x128xf32>
      %373 = arith.mulf %371, %372 : vector<104x128xf32>
      %374 = arith.addf %370, %373 : vector<104x128xf32>
      %c578 = arith.constant 578 : index
      %c0_174 = arith.constant 0 : index
      %375 = vector.load %arg5[%c578, %c0_174] : memref<800x128xf32, #tpu.memory_space<vmem>>, vector<104x128xf32>
      %376 = vector.broadcast %8 : vector<1x128xf32> to vector<104x128xf32>
      %377 = arith.mulf %375, %376 : vector<104x128xf32>
      %378 = arith.addf %374, %377 : vector<104x128xf32>
      %cst_175 = arith.constant 0.000000e+00 : f32
      %379 = vector.broadcast %cst_175 : f32 to vector<104x128xf32>
      %380 = arith.maximumf %378, %379 : vector<104x128xf32>
      %c520_176 = arith.constant 520 : index
      %c0_177 = arith.constant 0 : index
      %381 = vector.load %arg6[%c520_176, %c0_177] : memref<728x128xf32, #tpu.memory_space<vmem>>, vector<104x128xf32>
      tpu.vector_store %arg6[%c520_176, %c0_177], %380 {strides = array<i32>} : memref<728x128xf32, #tpu.memory_space<vmem>>, vector<104x128xf32>,
      %cst_178 = arith.constant 0.000000e+00 : f32
      %382 = vector.broadcast %cst_178 : f32 to vector<104x128xf32>
      %c624 = arith.constant 624 : index
      %c0_179 = arith.constant 0 : index
      %383 = vector.load %arg5[%c624, %c0_179] : memref<800x128xf32, #tpu.memory_space<vmem>>, vector<104x128xf32>
      %384 = vector.broadcast %0 : vector<1x128xf32> to vector<104x128xf32>
      %385 = arith.mulf %383, %384 : vector<104x128xf32>
      %386 = arith.addf %382, %385 : vector<104x128xf32>
      %c625 = arith.constant 625 : index
      %c0_180 = arith.constant 0 : index
      %387 = vector.load %arg5[%c625, %c0_180] : memref<800x128xf32, #tpu.memory_space<vmem>>, vector<104x128xf32>
      %388 = vector.broadcast %1 : vector<1x128xf32> to vector<104x128xf32>
      %389 = arith.mulf %387, %388 : vector<104x128xf32>
      %390 = arith.addf %386, %389 : vector<104x128xf32>
      %c626 = arith.constant 626 : index
      %c0_181 = arith.constant 0 : index
      %391 = vector.load %arg5[%c626, %c0_181] : memref<800x128xf32, #tpu.memory_space<vmem>>, vector<104x128xf32>
      %392 = vector.broadcast %2 : vector<1x128xf32> to vector<104x128xf32>
      %393 = arith.mulf %391, %392 : vector<104x128xf32>
      %394 = arith.addf %390, %393 : vector<104x128xf32>
      %c652 = arith.constant 652 : index
      %c0_182 = arith.constant 0 : index
      %395 = vector.load %arg5[%c652, %c0_182] : memref<800x128xf32, #tpu.memory_space<vmem>>, vector<104x128xf32>
      %396 = vector.broadcast %3 : vector<1x128xf32> to vector<104x128xf32>
      %397 = arith.mulf %395, %396 : vector<104x128xf32>
      %398 = arith.addf %394, %397 : vector<104x128xf32>
      %c653 = arith.constant 653 : index
      %c0_183 = arith.constant 0 : index
      %399 = vector.load %arg5[%c653, %c0_183] : memref<800x128xf32, #tpu.memory_space<vmem>>, vector<104x128xf32>
      %400 = vector.broadcast %4 : vector<1x128xf32> to vector<104x128xf32>
      %401 = arith.mulf %399, %400 : vector<104x128xf32>
      %402 = arith.addf %398, %401 : vector<104x128xf32>
      %c654 = arith.constant 654 : index
      %c0_184 = arith.constant 0 : index
      %403 = vector.load %arg5[%c654, %c0_184] : memref<800x128xf32, #tpu.memory_space<vmem>>, vector<104x128xf32>
      %404 = vector.broadcast %5 : vector<1x128xf32> to vector<104x128xf32>
      %405 = arith.mulf %403, %404 : vector<104x128xf32>
      %406 = arith.addf %402, %405 : vector<104x128xf32>
      %c680 = arith.constant 680 : index
      %c0_185 = arith.constant 0 : index
      %407 = vector.load %arg5[%c680, %c0_185] : memref<800x128xf32, #tpu.memory_space<vmem>>, vector<104x128xf32>
      %408 = vector.broadcast %6 : vector<1x128xf32> to vector<104x128xf32>
      %409 = arith.mulf %407, %408 : vector<104x128xf32>
      %410 = arith.addf %406, %409 : vector<104x128xf32>
      %c681 = arith.constant 681 : index
      %c0_186 = arith.constant 0 : index
      %411 = vector.load %arg5[%c681, %c0_186] : memref<800x128xf32, #tpu.memory_space<vmem>>, vector<104x128xf32>
      %412 = vector.broadcast %7 : vector<1x128xf32> to vector<104x128xf32>
      %413 = arith.mulf %411, %412 : vector<104x128xf32>
      %414 = arith.addf %410, %413 : vector<104x128xf32>
      %c682 = arith.constant 682 : index
      %c0_187 = arith.constant 0 : index
      %415 = vector.load %arg5[%c682, %c0_187] : memref<800x128xf32, #tpu.memory_space<vmem>>, vector<104x128xf32>
      %416 = vector.broadcast %8 : vector<1x128xf32> to vector<104x128xf32>
      %417 = arith.mulf %415, %416 : vector<104x128xf32>
      %418 = arith.addf %414, %417 : vector<104x128xf32>
      %cst_188 = arith.constant 0.000000e+00 : f32
      %419 = vector.broadcast %cst_188 : f32 to vector<104x128xf32>
      %420 = arith.maximumf %418, %419 : vector<104x128xf32>
      %c624_189 = arith.constant 624 : index
      %c0_190 = arith.constant 0 : index
      %421 = vector.load %arg6[%c624_189, %c0_190] : memref<728x128xf32, #tpu.memory_space<vmem>>, vector<104x128xf32>
      tpu.vector_store %arg6[%c624_189, %c0_190], %420 {strides = array<i32>} : memref<728x128xf32, #tpu.memory_space<vmem>>, vector<104x128xf32>,
      %c0_191 = arith.constant 0 : index
      %c0_192 = arith.constant 0 : index
      %422 = tpu.strided_load %arg6[%c0_191, %c0_192] {strides = array<i32: 2, 1>} : memref<728x128xf32, #tpu.memory_space<vmem>>, vector<364x128xf32>
      %c1_193 = arith.constant 1 : index
      %c0_194 = arith.constant 0 : index
      %423 = tpu.strided_load %arg6[%c1_193, %c0_194] {strides = array<i32: 2, 1>} : memref<728x128xf32, #tpu.memory_space<vmem>>, vector<364x128xf32>
      %424 = arith.maximumf %422, %423 : vector<364x128xf32>
      %c0_195 = arith.constant 0 : index
      %c0_196 = arith.constant 0 : index
      %425 = vector.load %arg7[%c0_195, %c0_196] : memref<368x128xf32, #tpu.memory_space<vmem>>, vector<364x128xf32>
      tpu.vector_store %arg7[%c0_195, %c0_196], %424 {strides = array<i32>} : memref<368x128xf32, #tpu.memory_space<vmem>>, vector<364x128xf32>,
      %c0_197 = arith.constant 0 : index
      %c0_198 = arith.constant 0 : index
      %426 = vector.load %arg7[%c0_197, %c0_198] : memref<368x128xf32, #tpu.memory_space<vmem>>, vector<13x128xf32>
      %c14_199 = arith.constant 14 : index
      %c0_200 = arith.constant 0 : index
      %427 = vector.load %arg7[%c14_199, %c0_200] : memref<368x128xf32, #tpu.memory_space<vmem>>, vector<13x128xf32>
      %428 = arith.maximumf %426, %427 : vector<13x128xf32>
      %c0_201 = arith.constant 0 : index
      %c0_202 = arith.constant 0 : index
      %429 = vector.load %arg8[%c0_201, %c0_202] : memref<176x128xf32, #tpu.memory_space<vmem>>, vector<13x128xf32>
      tpu.vector_store %arg8[%c0_201, %c0_202], %428 {strides = array<i32>} : memref<176x128xf32, #tpu.memory_space<vmem>>, vector<13x128xf32>,
      %c28_203 = arith.constant 28 : index
      %c0_204 = arith.constant 0 : index
      %430 = vector.load %arg7[%c28_203, %c0_204] : memref<368x128xf32, #tpu.memory_space<vmem>>, vector<13x128xf32>
      %c42 = arith.constant 42 : index
      %c0_205 = arith.constant 0 : index
      %431 = vector.load %arg7[%c42, %c0_205] : memref<368x128xf32, #tpu.memory_space<vmem>>, vector<13x128xf32>
      %432 = arith.maximumf %430, %431 : vector<13x128xf32>
      %c13_206 = arith.constant 13 : index
      %c0_207 = arith.constant 0 : index
      %433 = vector.load %arg8[%c13_206, %c0_207] : memref<176x128xf32, #tpu.memory_space<vmem>>, vector<13x128xf32>
      tpu.vector_store %arg8[%c13_206, %c0_207], %432 {strides = array<i32>} : memref<176x128xf32, #tpu.memory_space<vmem>>, vector<13x128xf32>,
      %c56_208 = arith.constant 56 : index
      %c0_209 = arith.constant 0 : index
      %434 = vector.load %arg7[%c56_208, %c0_209] : memref<368x128xf32, #tpu.memory_space<vmem>>, vector<13x128xf32>
      %c70 = arith.constant 70 : index
      %c0_210 = arith.constant 0 : index
      %435 = vector.load %arg7[%c70, %c0_210] : memref<368x128xf32, #tpu.memory_space<vmem>>, vector<13x128xf32>
      %436 = arith.maximumf %434, %435 : vector<13x128xf32>
      %c26_211 = arith.constant 26 : index
      %c0_212 = arith.constant 0 : index
      %437 = vector.load %arg8[%c26_211, %c0_212] : memref<176x128xf32, #tpu.memory_space<vmem>>, vector<13x128xf32>
      tpu.vector_store %arg8[%c26_211, %c0_212], %436 {strides = array<i32>} : memref<176x128xf32, #tpu.memory_space<vmem>>, vector<13x128xf32>,
      %c84 = arith.constant 84 : index
      %c0_213 = arith.constant 0 : index
      %438 = vector.load %arg7[%c84, %c0_213] : memref<368x128xf32, #tpu.memory_space<vmem>>, vector<13x128xf32>
      %c98 = arith.constant 98 : index
      %c0_214 = arith.constant 0 : index
      %439 = vector.load %arg7[%c98, %c0_214] : memref<368x128xf32, #tpu.memory_space<vmem>>, vector<13x128xf32>
      %440 = arith.maximumf %438, %439 : vector<13x128xf32>
      %c39_215 = arith.constant 39 : index
      %c0_216 = arith.constant 0 : index
      %441 = vector.load %arg8[%c39_215, %c0_216] : memref<176x128xf32, #tpu.memory_space<vmem>>, vector<13x128xf32>
      tpu.vector_store %arg8[%c39_215, %c0_216], %440 {strides = array<i32>} : memref<176x128xf32, #tpu.memory_space<vmem>>, vector<13x128xf32>,
      %c112 = arith.constant 112 : index
      %c0_217 = arith.constant 0 : index
      %442 = vector.load %arg7[%c112, %c0_217] : memref<368x128xf32, #tpu.memory_space<vmem>>, vector<13x128xf32>
      %c126 = arith.constant 126 : index
      %c0_218 = arith.constant 0 : index
      %443 = vector.load %arg7[%c126, %c0_218] : memref<368x128xf32, #tpu.memory_space<vmem>>, vector<13x128xf32>
      %444 = arith.maximumf %442, %443 : vector<13x128xf32>
      %c52_219 = arith.constant 52 : index
      %c0_220 = arith.constant 0 : index
      %445 = vector.load %arg8[%c52_219, %c0_220] : memref<176x128xf32, #tpu.memory_space<vmem>>, vector<13x128xf32>
      tpu.vector_store %arg8[%c52_219, %c0_220], %444 {strides = array<i32>} : memref<176x128xf32, #tpu.memory_space<vmem>>, vector<13x128xf32>,
      %c140 = arith.constant 140 : index
      %c0_221 = arith.constant 0 : index
      %446 = vector.load %arg7[%c140, %c0_221] : memref<368x128xf32, #tpu.memory_space<vmem>>, vector<13x128xf32>
      %c154_222 = arith.constant 154 : index
      %c0_223 = arith.constant 0 : index
      %447 = vector.load %arg7[%c154_222, %c0_223] : memref<368x128xf32, #tpu.memory_space<vmem>>, vector<13x128xf32>
      %448 = arith.maximumf %446, %447 : vector<13x128xf32>
      %c65_224 = arith.constant 65 : index
      %c0_225 = arith.constant 0 : index
      %449 = vector.load %arg8[%c65_224, %c0_225] : memref<176x128xf32, #tpu.memory_space<vmem>>, vector<13x128xf32>
      tpu.vector_store %arg8[%c65_224, %c0_225], %448 {strides = array<i32>} : memref<176x128xf32, #tpu.memory_space<vmem>>, vector<13x128xf32>,
      %c168_226 = arith.constant 168 : index
      %c0_227 = arith.constant 0 : index
      %450 = vector.load %arg7[%c168_226, %c0_227] : memref<368x128xf32, #tpu.memory_space<vmem>>, vector<13x128xf32>
      %c182 = arith.constant 182 : index
      %c0_228 = arith.constant 0 : index
      %451 = vector.load %arg7[%c182, %c0_228] : memref<368x128xf32, #tpu.memory_space<vmem>>, vector<13x128xf32>
      %452 = arith.maximumf %450, %451 : vector<13x128xf32>
      %c78_229 = arith.constant 78 : index
      %c0_230 = arith.constant 0 : index
      %453 = vector.load %arg8[%c78_229, %c0_230] : memref<176x128xf32, #tpu.memory_space<vmem>>, vector<13x128xf32>
      tpu.vector_store %arg8[%c78_229, %c0_230], %452 {strides = array<i32>} : memref<176x128xf32, #tpu.memory_space<vmem>>, vector<13x128xf32>,
      %c196 = arith.constant 196 : index
      %c0_231 = arith.constant 0 : index
      %454 = vector.load %arg7[%c196, %c0_231] : memref<368x128xf32, #tpu.memory_space<vmem>>, vector<13x128xf32>
      %c210_232 = arith.constant 210 : index
      %c0_233 = arith.constant 0 : index
      %455 = vector.load %arg7[%c210_232, %c0_233] : memref<368x128xf32, #tpu.memory_space<vmem>>, vector<13x128xf32>
      %456 = arith.maximumf %454, %455 : vector<13x128xf32>
      %c91_234 = arith.constant 91 : index
      %c0_235 = arith.constant 0 : index
      %457 = vector.load %arg8[%c91_234, %c0_235] : memref<176x128xf32, #tpu.memory_space<vmem>>, vector<13x128xf32>
      tpu.vector_store %arg8[%c91_234, %c0_235], %456 {strides = array<i32>} : memref<176x128xf32, #tpu.memory_space<vmem>>, vector<13x128xf32>,
      %c224 = arith.constant 224 : index
      %c0_236 = arith.constant 0 : index
      %458 = vector.load %arg7[%c224, %c0_236] : memref<368x128xf32, #tpu.memory_space<vmem>>, vector<13x128xf32>
      %c238_237 = arith.constant 238 : index
      %c0_238 = arith.constant 0 : index
      %459 = vector.load %arg7[%c238_237, %c0_238] : memref<368x128xf32, #tpu.memory_space<vmem>>, vector<13x128xf32>
      %460 = arith.maximumf %458, %459 : vector<13x128xf32>
      %c104_239 = arith.constant 104 : index
      %c0_240 = arith.constant 0 : index
      %461 = vector.load %arg8[%c104_239, %c0_240] : memref<176x128xf32, #tpu.memory_space<vmem>>, vector<13x128xf32>
      tpu.vector_store %arg8[%c104_239, %c0_240], %460 {strides = array<i32>} : memref<176x128xf32, #tpu.memory_space<vmem>>, vector<13x128xf32>,
      %c252 = arith.constant 252 : index
      %c0_241 = arith.constant 0 : index
      %462 = vector.load %arg7[%c252, %c0_241] : memref<368x128xf32, #tpu.memory_space<vmem>>, vector<13x128xf32>
      %c266_242 = arith.constant 266 : index
      %c0_243 = arith.constant 0 : index
      %463 = vector.load %arg7[%c266_242, %c0_243] : memref<368x128xf32, #tpu.memory_space<vmem>>, vector<13x128xf32>
      %464 = arith.maximumf %462, %463 : vector<13x128xf32>
      %c117_244 = arith.constant 117 : index
      %c0_245 = arith.constant 0 : index
      %465 = vector.load %arg8[%c117_244, %c0_245] : memref<176x128xf32, #tpu.memory_space<vmem>>, vector<13x128xf32>
      tpu.vector_store %arg8[%c117_244, %c0_245], %464 {strides = array<i32>} : memref<176x128xf32, #tpu.memory_space<vmem>>, vector<13x128xf32>,
      %c280 = arith.constant 280 : index
      %c0_246 = arith.constant 0 : index
      %466 = vector.load %arg7[%c280, %c0_246] : memref<368x128xf32, #tpu.memory_space<vmem>>, vector<13x128xf32>
      %c294 = arith.constant 294 : index
      %c0_247 = arith.constant 0 : index
      %467 = vector.load %arg7[%c294, %c0_247] : memref<368x128xf32, #tpu.memory_space<vmem>>, vector<13x128xf32>
      %468 = arith.maximumf %466, %467 : vector<13x128xf32>
      %c130 = arith.constant 130 : index
      %c0_248 = arith.constant 0 : index
      %469 = vector.load %arg8[%c130, %c0_248] : memref<176x128xf32, #tpu.memory_space<vmem>>, vector<13x128xf32>
      tpu.vector_store %arg8[%c130, %c0_248], %468 {strides = array<i32>} : memref<176x128xf32, #tpu.memory_space<vmem>>, vector<13x128xf32>,
      %c308 = arith.constant 308 : index
      %c0_249 = arith.constant 0 : index
      %470 = vector.load %arg7[%c308, %c0_249] : memref<368x128xf32, #tpu.memory_space<vmem>>, vector<13x128xf32>
      %c322 = arith.constant 322 : index
      %c0_250 = arith.constant 0 : index
      %471 = vector.load %arg7[%c322, %c0_250] : memref<368x128xf32, #tpu.memory_space<vmem>>, vector<13x128xf32>
      %472 = arith.maximumf %470, %471 : vector<13x128xf32>
      %c143 = arith.constant 143 : index
      %c0_251 = arith.constant 0 : index
      %473 = vector.load %arg8[%c143, %c0_251] : memref<176x128xf32, #tpu.memory_space<vmem>>, vector<13x128xf32>
      tpu.vector_store %arg8[%c143, %c0_251], %472 {strides = array<i32>} : memref<176x128xf32, #tpu.memory_space<vmem>>, vector<13x128xf32>,
      %c336 = arith.constant 336 : index
      %c0_252 = arith.constant 0 : index
      %474 = vector.load %arg7[%c336, %c0_252] : memref<368x128xf32, #tpu.memory_space<vmem>>, vector<13x128xf32>
      %c350 = arith.constant 350 : index
      %c0_253 = arith.constant 0 : index
      %475 = vector.load %arg7[%c350, %c0_253] : memref<368x128xf32, #tpu.memory_space<vmem>>, vector<13x128xf32>
      %476 = arith.maximumf %474, %475 : vector<13x128xf32>
      %c156 = arith.constant 156 : index
      %c0_254 = arith.constant 0 : index
      %477 = vector.load %arg8[%c156, %c0_254] : memref<176x128xf32, #tpu.memory_space<vmem>>, vector<13x128xf32>
      tpu.vector_store %arg8[%c156, %c0_254], %476 {strides = array<i32>} : memref<176x128xf32, #tpu.memory_space<vmem>>, vector<13x128xf32>,
      %c128_i32 = arith.constant 128 : i32
      %478 = arith.muli %arg11, %c128_i32 : i32
      %479 = tpu.assume_multiple %478, 128 : i32
      %c0_255 = arith.constant 0 : index
      %c0_256 = arith.constant 0 : index
      %480 = vector.load %arg8[%c0_255, %c0_256] : memref<176x128xf32, #tpu.memory_space<vmem>>, vector<128x128xf32>
      %481 = arith.truncf %480 : vector<128x128xf32> to vector<128x128xbf16>
      %482 = arith.index_cast %479 : i32 to index
      %c0_257 = arith.constant 0 : index
      %483 = vector.load %arg9[%482, %c0_257] : memref<256x1152xbf16, #tpu.memory_space<vmem>>, vector<128x128xbf16>
      tpu.vector_store %arg9[%482, %c0_257], %481 {strides = array<i32>} : memref<256x1152xbf16, #tpu.memory_space<vmem>>, vector<128x128xbf16>,
      %c1_258 = arith.constant 1 : index
      %c0_259 = arith.constant 0 : index
      %484 = vector.load %arg8[%c1_258, %c0_259] : memref<176x128xf32, #tpu.memory_space<vmem>>, vector<128x128xf32>
      %485 = arith.truncf %484 : vector<128x128xf32> to vector<128x128xbf16>
      %486 = arith.index_cast %479 : i32 to index
      %c128_260 = arith.constant 128 : index
      %487 = vector.load %arg9[%486, %c128_260] : memref<256x1152xbf16, #tpu.memory_space<vmem>>, vector<128x128xbf16>
      tpu.vector_store %arg9[%486, %c128_260], %485 {strides = array<i32>} : memref<256x1152xbf16, #tpu.memory_space<vmem>>, vector<128x128xbf16>,
      %c2_261 = arith.constant 2 : index
      %c0_262 = arith.constant 0 : index
      %488 = vector.load %arg8[%c2_261, %c0_262] : memref<176x128xf32, #tpu.memory_space<vmem>>, vector<128x128xf32>
      %489 = arith.truncf %488 : vector<128x128xf32> to vector<128x128xbf16>
      %490 = arith.index_cast %479 : i32 to index
      %c256 = arith.constant 256 : index
      %491 = vector.load %arg9[%490, %c256] : memref<256x1152xbf16, #tpu.memory_space<vmem>>, vector<128x128xbf16>
      tpu.vector_store %arg9[%490, %c256], %489 {strides = array<i32>} : memref<256x1152xbf16, #tpu.memory_space<vmem>>, vector<128x128xbf16>,
      %c13_263 = arith.constant 13 : index
      %c0_264 = arith.constant 0 : index
      %492 = vector.load %arg8[%c13_263, %c0_264] : memref<176x128xf32, #tpu.memory_space<vmem>>, vector<128x128xf32>
      %493 = arith.truncf %492 : vector<128x128xf32> to vector<128x128xbf16>
      %494 = arith.index_cast %479 : i32 to index
      %c384 = arith.constant 384 : index
      %495 = vector.load %arg9[%494, %c384] : memref<256x1152xbf16, #tpu.memory_space<vmem>>, vector<128x128xbf16>
      tpu.vector_store %arg9[%494, %c384], %493 {strides = array<i32>} : memref<256x1152xbf16, #tpu.memory_space<vmem>>, vector<128x128xbf16>,
      %c14_265 = arith.constant 14 : index
      %c0_266 = arith.constant 0 : index
      %496 = vector.load %arg8[%c14_265, %c0_266] : memref<176x128xf32, #tpu.memory_space<vmem>>, vector<128x128xf32>
      %497 = arith.truncf %496 : vector<128x128xf32> to vector<128x128xbf16>
      %498 = arith.index_cast %479 : i32 to index
      %c512 = arith.constant 512 : index
      %499 = vector.load %arg9[%498, %c512] : memref<256x1152xbf16, #tpu.memory_space<vmem>>, vector<128x128xbf16>
      tpu.vector_store %arg9[%498, %c512], %497 {strides = array<i32>} : memref<256x1152xbf16, #tpu.memory_space<vmem>>, vector<128x128xbf16>,
      %c15_267 = arith.constant 15 : index
      %c0_268 = arith.constant 0 : index
      %500 = vector.load %arg8[%c15_267, %c0_268] : memref<176x128xf32, #tpu.memory_space<vmem>>, vector<128x128xf32>
      %501 = arith.truncf %500 : vector<128x128xf32> to vector<128x128xbf16>
      %502 = arith.index_cast %479 : i32 to index
      %c640 = arith.constant 640 : index
      %503 = vector.load %arg9[%502, %c640] : memref<256x1152xbf16, #tpu.memory_space<vmem>>, vector<128x128xbf16>
      tpu.vector_store %arg9[%502, %c640], %501 {strides = array<i32>} : memref<256x1152xbf16, #tpu.memory_space<vmem>>, vector<128x128xbf16>,
      %c26_269 = arith.constant 26 : index
      %c0_270 = arith.constant 0 : index
      %504 = vector.load %arg8[%c26_269, %c0_270] : memref<176x128xf32, #tpu.memory_space<vmem>>, vector<128x128xf32>
      %505 = arith.truncf %504 : vector<128x128xf32> to vector<128x128xbf16>
      %506 = arith.index_cast %479 : i32 to index
      %c768 = arith.constant 768 : index
      %507 = vector.load %arg9[%506, %c768] : memref<256x1152xbf16, #tpu.memory_space<vmem>>, vector<128x128xbf16>
      tpu.vector_store %arg9[%506, %c768], %505 {strides = array<i32>} : memref<256x1152xbf16, #tpu.memory_space<vmem>>, vector<128x128xbf16>,
      %c27_271 = arith.constant 27 : index
      %c0_272 = arith.constant 0 : index
      %508 = vector.load %arg8[%c27_271, %c0_272] : memref<176x128xf32, #tpu.memory_space<vmem>>, vector<128x128xf32>
      %509 = arith.truncf %508 : vector<128x128xf32> to vector<128x128xbf16>
      %510 = arith.index_cast %479 : i32 to index
      %c896 = arith.constant 896 : index
      %511 = vector.load %arg9[%510, %c896] : memref<256x1152xbf16, #tpu.memory_space<vmem>>, vector<128x128xbf16>
      tpu.vector_store %arg9[%510, %c896], %509 {strides = array<i32>} : memref<256x1152xbf16, #tpu.memory_space<vmem>>, vector<128x128xbf16>,
      %c28_273 = arith.constant 28 : index
      %c0_274 = arith.constant 0 : index
      %512 = vector.load %arg8[%c28_273, %c0_274] : memref<176x128xf32, #tpu.memory_space<vmem>>, vector<128x128xf32>
      %513 = arith.truncf %512 : vector<128x128xf32> to vector<128x128xbf16>
      %514 = arith.index_cast %479 : i32 to index
      %c1024 = arith.constant 1024 : index
      %515 = vector.load %arg9[%514, %c1024] : memref<256x1152xbf16, #tpu.memory_space<vmem>>, vector<128x128xbf16>
      tpu.vector_store %arg9[%514, %c1024], %513 {strides = array<i32>} : memref<256x1152xbf16, #tpu.memory_space<vmem>>, vector<128x128xbf16>,
    }
    %c2_i32_10 = arith.constant 2 : i32
    %c0_11 = arith.constant 0 : index
    %c0_12 = arith.constant 0 : index
    %12 = vector.load %arg9[%c0_11, %c0_12] : memref<256x1152xbf16, #tpu.memory_space<vmem>>, vector<256x1152xbf16>
    %c0_13 = arith.constant 0 : index
    %c0_14 = arith.constant 0 : index
    %13 = vector.load %arg3[%c0_13, %c0_14] : memref<1152x64xbf16, #tpu.memory_space<vmem>>, vector<1152x64xbf16>
    %cst_15 = arith.constant dense<0.000000e+00> : vector<256x64xf32>
    %14 = tpu.matmul %12, %13, %cst_15 {dimension_numbers = #tpu.dot_dimension_numbers<[1], [0], [0], [1], [0, 0, 1, 1], [], []>} : vector<256x1152xbf16>, vector<1152x64xbf16>, vector<256x64xf32> -> vector<256x64xf32>
    %cst_16 = arith.constant 0.000000e+00 : f32
    %15 = vector.broadcast %cst_16 : f32 to vector<256x64xf32>
    %16 = arith.maximumf %14, %15 : vector<256x64xf32>
    %c0_17 = arith.constant 0 : index
    %c0_18 = arith.constant 0 : index
    %17 = vector.load %arg10[%c0_17, %c0_18] : memref<256x64xf32, #tpu.memory_space<vmem>>, vector<256x64xf32>
    tpu.vector_store %arg10[%c0_17, %c0_18], %16 {strides = array<i32>} : memref<256x64xf32, #tpu.memory_space<vmem>>, vector<256x64xf32>,
    %c0_19 = arith.constant 0 : index
    %c0_20 = arith.constant 0 : index
    %18 = tpu.strided_load %arg10[%c0_19, %c0_20] {strides = array<i32: 2, 1>} : memref<256x64xf32, #tpu.memory_space<vmem>>, vector<5x64xf32>
    %c1_21 = arith.constant 1 : index
    %c0_22 = arith.constant 0 : index
    %19 = tpu.strided_load %arg10[%c1_21, %c0_22] {strides = array<i32: 2, 1>} : memref<256x64xf32, #tpu.memory_space<vmem>>, vector<5x64xf32>
    %c13 = arith.constant 13 : index
    %c0_23 = arith.constant 0 : index
    %20 = tpu.strided_load %arg10[%c13, %c0_23] {strides = array<i32: 2, 1>} : memref<256x64xf32, #tpu.memory_space<vmem>>, vector<5x64xf32>
    %c14 = arith.constant 14 : index
    %c0_24 = arith.constant 0 : index
    %21 = tpu.strided_load %arg10[%c14, %c0_24] {strides = array<i32: 2, 1>} : memref<256x64xf32, #tpu.memory_space<vmem>>, vector<5x64xf32>
    %22 = arith.maximumf %18, %19 : vector<5x64xf32>
    %23 = arith.maximumf %20, %21 : vector<5x64xf32>
    %24 = arith.maximumf %22, %23 : vector<5x64xf32>
    %25 = arith.truncf %24 : vector<5x64xf32> to vector<5x64xbf16>
    %c0_25 = arith.constant 0 : index
    %c0_26 = arith.constant 0 : index
    %c0_27 = arith.constant 0 : index
    %26 = vector.load %arg4[%c0_25, %c0_26, %c0_27] : memref<2x25x64xbf16, #tpu.memory_space<vmem>>, vector<1x5x64xbf16>
    %27 = vector.shape_cast %26 : vector<1x5x64xbf16> to vector<5x64xbf16>
    %28 = vector.shape_cast %25 : vector<5x64xbf16> to vector<1x5x64xbf16>
    tpu.vector_store %arg4[%c0_25, %c0_26, %c0_27], %28 {strides = array<i32>} : memref<2x25x64xbf16, #tpu.memory_space<vmem>>, vector<1x5x64xbf16>,
    %c26 = arith.constant 26 : index
    %c0_28 = arith.constant 0 : index
    %29 = tpu.strided_load %arg10[%c26, %c0_28] {strides = array<i32: 2, 1>} : memref<256x64xf32, #tpu.memory_space<vmem>>, vector<5x64xf32>
    %c27 = arith.constant 27 : index
    %c0_29 = arith.constant 0 : index
    %30 = tpu.strided_load %arg10[%c27, %c0_29] {strides = array<i32: 2, 1>} : memref<256x64xf32, #tpu.memory_space<vmem>>, vector<5x64xf32>
    %c39 = arith.constant 39 : index
    %c0_30 = arith.constant 0 : index
    %31 = tpu.strided_load %arg10[%c39, %c0_30] {strides = array<i32: 2, 1>} : memref<256x64xf32, #tpu.memory_space<vmem>>, vector<5x64xf32>
    %c40 = arith.constant 40 : index
    %c0_31 = arith.constant 0 : index
    %32 = tpu.strided_load %arg10[%c40, %c0_31] {strides = array<i32: 2, 1>} : memref<256x64xf32, #tpu.memory_space<vmem>>, vector<5x64xf32>
    %33 = arith.maximumf %29, %30 : vector<5x64xf32>
    %34 = arith.maximumf %31, %32 : vector<5x64xf32>
    %35 = arith.maximumf %33, %34 : vector<5x64xf32>
    %36 = arith.truncf %35 : vector<5x64xf32> to vector<5x64xbf16>
    %c0_32 = arith.constant 0 : index
    %c5_33 = arith.constant 5 : index
    %c0_34 = arith.constant 0 : index
    %37 = vector.load %arg4[%c0_32, %c5_33, %c0_34] : memref<2x25x64xbf16, #tpu.memory_space<vmem>>, vector<1x5x64xbf16>
    %38 = vector.shape_cast %37 : vector<1x5x64xbf16> to vector<5x64xbf16>
    %39 = vector.shape_cast %36 : vector<5x64xbf16> to vector<1x5x64xbf16>
    tpu.vector_store %arg4[%c0_32, %c5_33, %c0_34], %39 {strides = array<i32>} : memref<2x25x64xbf16, #tpu.memory_space<vmem>>, vector<1x5x64xbf16>,
    %c52 = arith.constant 52 : index
    %c0_35 = arith.constant 0 : index
    %40 = tpu.strided_load %arg10[%c52, %c0_35] {strides = array<i32: 2, 1>} : memref<256x64xf32, #tpu.memory_space<vmem>>, vector<5x64xf32>
    %c53 = arith.constant 53 : index
    %c0_36 = arith.constant 0 : index
    %41 = tpu.strided_load %arg10[%c53, %c0_36] {strides = array<i32: 2, 1>} : memref<256x64xf32, #tpu.memory_space<vmem>>, vector<5x64xf32>
    %c65 = arith.constant 65 : index
    %c0_37 = arith.constant 0 : index
    %42 = tpu.strided_load %arg10[%c65, %c0_37] {strides = array<i32: 2, 1>} : memref<256x64xf32, #tpu.memory_space<vmem>>, vector<5x64xf32>
    %c66 = arith.constant 66 : index
    %c0_38 = arith.constant 0 : index
    %43 = tpu.strided_load %arg10[%c66, %c0_38] {strides = array<i32: 2, 1>} : memref<256x64xf32, #tpu.memory_space<vmem>>, vector<5x64xf32>
    %44 = arith.maximumf %40, %41 : vector<5x64xf32>
    %45 = arith.maximumf %42, %43 : vector<5x64xf32>
    %46 = arith.maximumf %44, %45 : vector<5x64xf32>
    %47 = arith.truncf %46 : vector<5x64xf32> to vector<5x64xbf16>
    %c0_39 = arith.constant 0 : index
    %c10 = arith.constant 10 : index
    %c0_40 = arith.constant 0 : index
    %48 = vector.load %arg4[%c0_39, %c10, %c0_40] : memref<2x25x64xbf16, #tpu.memory_space<vmem>>, vector<1x5x64xbf16>
    %49 = vector.shape_cast %48 : vector<1x5x64xbf16> to vector<5x64xbf16>
    %50 = vector.shape_cast %47 : vector<5x64xbf16> to vector<1x5x64xbf16>
    tpu.vector_store %arg4[%c0_39, %c10, %c0_40], %50 {strides = array<i32>} : memref<2x25x64xbf16, #tpu.memory_space<vmem>>, vector<1x5x64xbf16>,
    %c78 = arith.constant 78 : index
    %c0_41 = arith.constant 0 : index
    %51 = tpu.strided_load %arg10[%c78, %c0_41] {strides = array<i32: 2, 1>} : memref<256x64xf32, #tpu.memory_space<vmem>>, vector<5x64xf32>
    %c79 = arith.constant 79 : index
    %c0_42 = arith.constant 0 : index
    %52 = tpu.strided_load %arg10[%c79, %c0_42] {strides = array<i32: 2, 1>} : memref<256x64xf32, #tpu.memory_space<vmem>>, vector<5x64xf32>
    %c91 = arith.constant 91 : index
    %c0_43 = arith.constant 0 : index
    %53 = tpu.strided_load %arg10[%c91, %c0_43] {strides = array<i32: 2, 1>} : memref<256x64xf32, #tpu.memory_space<vmem>>, vector<5x64xf32>
    %c92 = arith.constant 92 : index
    %c0_44 = arith.constant 0 : index
    %54 = tpu.strided_load %arg10[%c92, %c0_44] {strides = array<i32: 2, 1>} : memref<256x64xf32, #tpu.memory_space<vmem>>, vector<5x64xf32>
    %55 = arith.maximumf %51, %52 : vector<5x64xf32>
    %56 = arith.maximumf %53, %54 : vector<5x64xf32>
    %57 = arith.maximumf %55, %56 : vector<5x64xf32>
    %58 = arith.truncf %57 : vector<5x64xf32> to vector<5x64xbf16>
    %c0_45 = arith.constant 0 : index
    %c15 = arith.constant 15 : index
    %c0_46 = arith.constant 0 : index
    %59 = vector.load %arg4[%c0_45, %c15, %c0_46] : memref<2x25x64xbf16, #tpu.memory_space<vmem>>, vector<1x5x64xbf16>
    %60 = vector.shape_cast %59 : vector<1x5x64xbf16> to vector<5x64xbf16>
    %61 = vector.shape_cast %58 : vector<5x64xbf16> to vector<1x5x64xbf16>
    tpu.vector_store %arg4[%c0_45, %c15, %c0_46], %61 {strides = array<i32>} : memref<2x25x64xbf16, #tpu.memory_space<vmem>>, vector<1x5x64xbf16>,
    %c104 = arith.constant 104 : index
    %c0_47 = arith.constant 0 : index
    %62 = tpu.strided_load %arg10[%c104, %c0_47] {strides = array<i32: 2, 1>} : memref<256x64xf32, #tpu.memory_space<vmem>>, vector<5x64xf32>
    %c105 = arith.constant 105 : index
    %c0_48 = arith.constant 0 : index
    %63 = tpu.strided_load %arg10[%c105, %c0_48] {strides = array<i32: 2, 1>} : memref<256x64xf32, #tpu.memory_space<vmem>>, vector<5x64xf32>
    %c117 = arith.constant 117 : index
    %c0_49 = arith.constant 0 : index
    %64 = tpu.strided_load %arg10[%c117, %c0_49] {strides = array<i32: 2, 1>} : memref<256x64xf32, #tpu.memory_space<vmem>>, vector<5x64xf32>
    %c118 = arith.constant 118 : index
    %c0_50 = arith.constant 0 : index
    %65 = tpu.strided_load %arg10[%c118, %c0_50] {strides = array<i32: 2, 1>} : memref<256x64xf32, #tpu.memory_space<vmem>>, vector<5x64xf32>
    %66 = arith.maximumf %62, %63 : vector<5x64xf32>
    %67 = arith.maximumf %64, %65 : vector<5x64xf32>
    %68 = arith.maximumf %66, %67 : vector<5x64xf32>
    %69 = arith.truncf %68 : vector<5x64xf32> to vector<5x64xbf16>
    %c0_51 = arith.constant 0 : index
    %c20 = arith.constant 20 : index
    %c0_52 = arith.constant 0 : index
    %70 = vector.load %arg4[%c0_51, %c20, %c0_52] : memref<2x25x64xbf16, #tpu.memory_space<vmem>>, vector<1x5x64xbf16>
    %71 = vector.shape_cast %70 : vector<1x5x64xbf16> to vector<5x64xbf16>
    %72 = vector.shape_cast %69 : vector<5x64xbf16> to vector<1x5x64xbf16>
    tpu.vector_store %arg4[%c0_51, %c20, %c0_52], %72 {strides = array<i32>} : memref<2x25x64xbf16, #tpu.memory_space<vmem>>, vector<1x5x64xbf16>,
    %c128 = arith.constant 128 : index
    %c0_53 = arith.constant 0 : index
    %73 = tpu.strided_load %arg10[%c128, %c0_53] {strides = array<i32: 2, 1>} : memref<256x64xf32, #tpu.memory_space<vmem>>, vector<5x64xf32>
    %c129 = arith.constant 129 : index
    %c0_54 = arith.constant 0 : index
    %74 = tpu.strided_load %arg10[%c129, %c0_54] {strides = array<i32: 2, 1>} : memref<256x64xf32, #tpu.memory_space<vmem>>, vector<5x64xf32>
    %c141 = arith.constant 141 : index
    %c0_55 = arith.constant 0 : index
    %75 = tpu.strided_load %arg10[%c141, %c0_55] {strides = array<i32: 2, 1>} : memref<256x64xf32, #tpu.memory_space<vmem>>, vector<5x64xf32>
    %c142 = arith.constant 142 : index
    %c0_56 = arith.constant 0 : index
    %76 = tpu.strided_load %arg10[%c142, %c0_56] {strides = array<i32: 2, 1>} : memref<256x64xf32, #tpu.memory_space<vmem>>, vector<5x64xf32>
    %77 = arith.maximumf %73, %74 : vector<5x64xf32>
    %78 = arith.maximumf %75, %76 : vector<5x64xf32>
    %79 = arith.maximumf %77, %78 : vector<5x64xf32>
    %80 = arith.truncf %79 : vector<5x64xf32> to vector<5x64xbf16>
    %c1_57 = arith.constant 1 : index
    %c0_58 = arith.constant 0 : index
    %c0_59 = arith.constant 0 : index
    %81 = vector.load %arg4[%c1_57, %c0_58, %c0_59] : memref<2x25x64xbf16, #tpu.memory_space<vmem>>, vector<1x5x64xbf16>
    %82 = vector.shape_cast %81 : vector<1x5x64xbf16> to vector<5x64xbf16>
    %83 = vector.shape_cast %80 : vector<5x64xbf16> to vector<1x5x64xbf16>
    tpu.vector_store %arg4[%c1_57, %c0_58, %c0_59], %83 {strides = array<i32>} : memref<2x25x64xbf16, #tpu.memory_space<vmem>>, vector<1x5x64xbf16>,
    %c154 = arith.constant 154 : index
    %c0_60 = arith.constant 0 : index
    %84 = tpu.strided_load %arg10[%c154, %c0_60] {strides = array<i32: 2, 1>} : memref<256x64xf32, #tpu.memory_space<vmem>>, vector<5x64xf32>
    %c155 = arith.constant 155 : index
    %c0_61 = arith.constant 0 : index
    %85 = tpu.strided_load %arg10[%c155, %c0_61] {strides = array<i32: 2, 1>} : memref<256x64xf32, #tpu.memory_space<vmem>>, vector<5x64xf32>
    %c167 = arith.constant 167 : index
    %c0_62 = arith.constant 0 : index
    %86 = tpu.strided_load %arg10[%c167, %c0_62] {strides = array<i32: 2, 1>} : memref<256x64xf32, #tpu.memory_space<vmem>>, vector<5x64xf32>
    %c168 = arith.constant 168 : index
    %c0_63 = arith.constant 0 : index
    %87 = tpu.strided_load %arg10[%c168, %c0_63] {strides = array<i32: 2, 1>} : memref<256x64xf32, #tpu.memory_space<vmem>>, vector<5x64xf32>
    %88 = arith.maximumf %84, %85 : vector<5x64xf32>
    %89 = arith.maximumf %86, %87 : vector<5x64xf32>
    %90 = arith.maximumf %88, %89 : vector<5x64xf32>
    %91 = arith.truncf %90 : vector<5x64xf32> to vector<5x64xbf16>
    %c1_64 = arith.constant 1 : index
    %c5_65 = arith.constant 5 : index
    %c0_66 = arith.constant 0 : index
    %92 = vector.load %arg4[%c1_64, %c5_65, %c0_66] : memref<2x25x64xbf16, #tpu.memory_space<vmem>>, vector<1x5x64xbf16>
    %93 = vector.shape_cast %92 : vector<1x5x64xbf16> to vector<5x64xbf16>
    %94 = vector.shape_cast %91 : vector<5x64xbf16> to vector<1x5x64xbf16>
    tpu.vector_store %arg4[%c1_64, %c5_65, %c0_66], %94 {strides = array<i32>} : memref<2x25x64xbf16, #tpu.memory_space<vmem>>, vector<1x5x64xbf16>,
    %c180 = arith.constant 180 : index
    %c0_67 = arith.constant 0 : index
    %95 = tpu.strided_load %arg10[%c180, %c0_67] {strides = array<i32: 2, 1>} : memref<256x64xf32, #tpu.memory_space<vmem>>, vector<5x64xf32>
    %c181 = arith.constant 181 : index
    %c0_68 = arith.constant 0 : index
    %96 = tpu.strided_load %arg10[%c181, %c0_68] {strides = array<i32: 2, 1>} : memref<256x64xf32, #tpu.memory_space<vmem>>, vector<5x64xf32>
    %c193 = arith.constant 193 : index
    %c0_69 = arith.constant 0 : index
    %97 = tpu.strided_load %arg10[%c193, %c0_69] {strides = array<i32: 2, 1>} : memref<256x64xf32, #tpu.memory_space<vmem>>, vector<5x64xf32>
    %c194 = arith.constant 194 : index
    %c0_70 = arith.constant 0 : index
    %98 = tpu.strided_load %arg10[%c194, %c0_70] {strides = array<i32: 2, 1>} : memref<256x64xf32, #tpu.memory_space<vmem>>, vector<5x64xf32>
    %99 = arith.maximumf %95, %96 : vector<5x64xf32>
    %100 = arith.maximumf %97, %98 : vector<5x64xf32>
    %101 = arith.maximumf %99, %100 : vector<5x64xf32>
    %102 = arith.truncf %101 : vector<5x64xf32> to vector<5x64xbf16>
    %c1_71 = arith.constant 1 : index
    %c10_72 = arith.constant 10 : index
    %c0_73 = arith.constant 0 : index
    %103 = vector.load %arg4[%c1_71, %c10_72, %c0_73] : memref<2x25x64xbf16, #tpu.memory_space<vmem>>, vector<1x5x64xbf16>
    %104 = vector.shape_cast %103 : vector<1x5x64xbf16> to vector<5x64xbf16>
    %105 = vector.shape_cast %102 : vector<5x64xbf16> to vector<1x5x64xbf16>
    tpu.vector_store %arg4[%c1_71, %c10_72, %c0_73], %105 {strides = array<i32>} : memref<2x25x64xbf16, #tpu.memory_space<vmem>>, vector<1x5x64xbf16>,
    %c206 = arith.constant 206 : index
    %c0_74 = arith.constant 0 : index
    %106 = tpu.strided_load %arg10[%c206, %c0_74] {strides = array<i32: 2, 1>} : memref<256x64xf32, #tpu.memory_space<vmem>>, vector<5x64xf32>
    %c207 = arith.constant 207 : index
    %c0_75 = arith.constant 0 : index
    %107 = tpu.strided_load %arg10[%c207, %c0_75] {strides = array<i32: 2, 1>} : memref<256x64xf32, #tpu.memory_space<vmem>>, vector<5x64xf32>
    %c219 = arith.constant 219 : index
    %c0_76 = arith.constant 0 : index
    %108 = tpu.strided_load %arg10[%c219, %c0_76] {strides = array<i32: 2, 1>} : memref<256x64xf32, #tpu.memory_space<vmem>>, vector<5x64xf32>
    %c220 = arith.constant 220 : index
    %c0_77 = arith.constant 0 : index
    %109 = tpu.strided_load %arg10[%c220, %c0_77] {strides = array<i32: 2, 1>} : memref<256x64xf32, #tpu.memory_space<vmem>>, vector<5x64xf32>
    %110 = arith.maximumf %106, %107 : vector<5x64xf32>
    %111 = arith.maximumf %108, %109 : vector<5x64xf32>
    %112 = arith.maximumf %110, %111 : vector<5x64xf32>
    %113 = arith.truncf %112 : vector<5x64xf32> to vector<5x64xbf16>
    %c1_78 = arith.constant 1 : index
    %c15_79 = arith.constant 15 : index
    %c0_80 = arith.constant 0 : index
    %114 = vector.load %arg4[%c1_78, %c15_79, %c0_80] : memref<2x25x64xbf16, #tpu.memory_space<vmem>>, vector<1x5x64xbf16>
    %115 = vector.shape_cast %114 : vector<1x5x64xbf16> to vector<5x64xbf16>
    %116 = vector.shape_cast %113 : vector<5x64xbf16> to vector<1x5x64xbf16>
    tpu.vector_store %arg4[%c1_78, %c15_79, %c0_80], %116 {strides = array<i32>} : memref<2x25x64xbf16, #tpu.memory_space<vmem>>, vector<1x5x64xbf16>,
    %c232 = arith.constant 232 : index
    %c0_81 = arith.constant 0 : index
    %117 = tpu.strided_load %arg10[%c232, %c0_81] {strides = array<i32: 2, 1>} : memref<256x64xf32, #tpu.memory_space<vmem>>, vector<5x64xf32>
    %c233 = arith.constant 233 : index
    %c0_82 = arith.constant 0 : index
    %118 = tpu.strided_load %arg10[%c233, %c0_82] {strides = array<i32: 2, 1>} : memref<256x64xf32, #tpu.memory_space<vmem>>, vector<5x64xf32>
    %c245 = arith.constant 245 : index
    %c0_83 = arith.constant 0 : index
    %119 = tpu.strided_load %arg10[%c245, %c0_83] {strides = array<i32: 2, 1>} : memref<256x64xf32, #tpu.memory_space<vmem>>, vector<5x64xf32>
    %c246 = arith.constant 246 : index
    %c0_84 = arith.constant 0 : index
    %120 = tpu.strided_load %arg10[%c246, %c0_84] {strides = array<i32: 2, 1>} : memref<256x64xf32, #tpu.memory_space<vmem>>, vector<5x64xf32>
    %121 = arith.maximumf %117, %118 : vector<5x64xf32>
    %122 = arith.maximumf %119, %120 : vector<5x64xf32>
    %123 = arith.maximumf %121, %122 : vector<5x64xf32>
    %124 = arith.truncf %123 : vector<5x64xf32> to vector<5x64xbf16>
    %c1_85 = arith.constant 1 : index
    %c20_86 = arith.constant 20 : index
    %c0_87 = arith.constant 0 : index
    %125 = vector.load %arg4[%c1_85, %c20_86, %c0_87] : memref<2x25x64xbf16, #tpu.memory_space<vmem>>, vector<1x5x64xbf16>
    %126 = vector.shape_cast %125 : vector<1x5x64xbf16> to vector<5x64xbf16>
    %127 = vector.shape_cast %124 : vector<5x64xbf16> to vector<1x5x64xbf16>
    tpu.vector_store %arg4[%c1_85, %c20_86, %c0_87], %127 {strides = array<i32>} : memref<2x25x64xbf16, #tpu.memory_space<vmem>>, vector<1x5x64xbf16>,
    return
  }
  func.func @transform_0(%arg0: i32) -> (i32, i32, i32) {
    %c0_i32 = arith.constant 0 : i32
    %c0_i32_0 = arith.constant 0 : i32
    %c0_i32_1 = arith.constant 0 : i32
    return %arg0, %c0_i32, %c0_i32_0 : i32, i32, i32
  }
  func.func @transform_1(%arg0: i32) -> (i32, i32) {
    %c0_i32 = arith.constant 0 : i32
    %c0_i32_0 = arith.constant 0 : i32
    %c0_i32_1 = arith.constant 0 : i32
    return %c0_i32, %c0_i32_0 : i32, i32
  }
  func.func @transform_2(%arg0: i32) -> (i32, i32) {
    %c0_i32 = arith.constant 0 : i32
    %c0_i32_0 = arith.constant 0 : i32
    %c0_i32_1 = arith.constant 0 : i32
    return %c0_i32, %c0_i32_0 : i32, i32
  }
  func.func @transform_3(%arg0: i32) -> (i32, i32, i32) {
    %c0_i32 = arith.constant 0 : i32
    %c0_i32_0 = arith.constant 0 : i32
    %c0_i32_1 = arith.constant 0 : i32
    return %arg0, %c0_i32, %c0_i32_0 : i32, i32, i32
  }
}

module attributes {stable_mosaic.version = 11 : i64} {
  func.func @fc_head_kernel(%arg0: i32, %arg1: memref<2x1600xbf16, #tpu.memory_space<vmem>>, %arg2: memref<1600x512xbf16, #tpu.memory_space<vmem>>, %arg3: memref<1x512xf32, #tpu.memory_space<vmem>>, %arg4: memref<512x128xbf16, #tpu.memory_space<vmem>>, %arg5: memref<1x128xf32, #tpu.memory_space<vmem>>, %arg6: memref<2x128xf32, #tpu.memory_space<vmem>>) attributes {dimension_semantics = [#tpu.dimension_semantics<parallel>], iteration_bounds = array<i64: 1>, scalar_prefetch = 0 : i64, scratch_operands = 0 : i64, tpu.core_type = #tpu.core_type<tc>, window_params = [{transform_indices = @transform_0, window_bounds = array<i64: 2, 1600>}, {pipeline_mode = #tpu.pipeline_mode<synchronous>, transform_indices = @transform_1, window_bounds = array<i64: 1600, 512>}, {pipeline_mode = #tpu.pipeline_mode<synchronous>, transform_indices = @transform_2, window_bounds = array<i64: 1, 512>}, {pipeline_mode = #tpu.pipeline_mode<synchronous>, transform_indices = @transform_3, window_bounds = array<i64: 512, 128>}, {pipeline_mode = #tpu.pipeline_mode<synchronous>, transform_indices = @transform_4, window_bounds = array<i64: 1, 128>}, {transform_indices = @transform_5, window_bounds = array<i64: 2, 128>}]} {
    %c0 = arith.constant 0 : index
    %c0_0 = arith.constant 0 : index
    %0 = vector.load %arg1[%c0, %c0_0] : memref<2x1600xbf16, #tpu.memory_space<vmem>>, vector<2x1600xbf16>
    %c0_1 = arith.constant 0 : index
    %c0_2 = arith.constant 0 : index
    %1 = vector.load %arg2[%c0_1, %c0_2] : memref<1600x512xbf16, #tpu.memory_space<vmem>>, vector<1600x512xbf16>
    %cst = arith.constant dense<0.000000e+00> : vector<2x512xf32>
    %2 = tpu.matmul %0, %1, %cst {dimension_numbers = #tpu.dot_dimension_numbers<[1], [0], [0], [1], [0, 0, 1, 1], [], []>} : vector<2x1600xbf16>, vector<1600x512xbf16>, vector<2x512xf32> -> vector<2x512xf32>
    %c0_3 = arith.constant 0 : index
    %c0_4 = arith.constant 0 : index
    %3 = vector.load %arg3[%c0_3, %c0_4] : memref<1x512xf32, #tpu.memory_space<vmem>>, vector<1x512xf32>
    %4 = vector.broadcast %3 : vector<1x512xf32> to vector<2x512xf32>
    %5 = arith.addf %2, %4 : vector<2x512xf32>
    %cst_5 = arith.constant 0.000000e+00 : f32
    %6 = vector.broadcast %cst_5 : f32 to vector<2x512xf32>
    %7 = arith.maximumf %5, %6 : vector<2x512xf32>
    %8 = arith.truncf %7 : vector<2x512xf32> to vector<2x512xbf16>
    %c0_6 = arith.constant 0 : index
    %c0_7 = arith.constant 0 : index
    %9 = vector.load %arg4[%c0_6, %c0_7] : memref<512x128xbf16, #tpu.memory_space<vmem>>, vector<512x128xbf16>
    %cst_8 = arith.constant dense<0.000000e+00> : vector<2x128xf32>
    %10 = tpu.matmul %8, %9, %cst_8 {dimension_numbers = #tpu.dot_dimension_numbers<[1], [0], [0], [1], [0, 0, 1, 1], [], []>} : vector<2x512xbf16>, vector<512x128xbf16>, vector<2x128xf32> -> vector<2x128xf32>
    %c0_9 = arith.constant 0 : index
    %c0_10 = arith.constant 0 : index
    %11 = vector.load %arg5[%c0_9, %c0_10] : memref<1x128xf32, #tpu.memory_space<vmem>>, vector<1x128xf32>
    %12 = vector.broadcast %11 : vector<1x128xf32> to vector<2x128xf32>
    %13 = arith.addf %10, %12 : vector<2x128xf32>
    %cst_11 = arith.constant dense<0xFF800000> : vector<2xf32>
    %14 = vector.multi_reduction <maximumf>, %13, %cst_11 [1] : vector<2x128xf32> to vector<2xf32>
    %15 = vector.shape_cast %14 : vector<2xf32> to vector<2x1xf32>
    %16 = vector.broadcast %15 : vector<2x1xf32> to vector<2x128xf32>
    %17 = arith.subf %13, %16 : vector<2x128xf32>
    %18 = math.exp %17 : vector<2x128xf32>
    %cst_12 = arith.constant dense<0.000000e+00> : vector<2xf32>
    %19 = vector.multi_reduction <add>, %18, %cst_12 [1] : vector<2x128xf32> to vector<2xf32>
    %20 = vector.shape_cast %19 : vector<2xf32> to vector<2x1xf32>
    %21 = math.log %20 : vector<2x1xf32>
    %22 = vector.broadcast %21 : vector<2x1xf32> to vector<2x128xf32>
    %23 = arith.subf %17, %22 : vector<2x128xf32>
    %c0_13 = arith.constant 0 : index
    %c0_14 = arith.constant 0 : index
    %24 = vector.load %arg6[%c0_13, %c0_14] : memref<2x128xf32, #tpu.memory_space<vmem>>, vector<2x128xf32>
    tpu.vector_store %arg6[%c0_13, %c0_14], %23 {strides = array<i32>} : memref<2x128xf32, #tpu.memory_space<vmem>>, vector<2x128xf32>,
    return
  }
  func.func @transform_0(%arg0: i32) -> (i32, i32) {
    %c0_i32 = arith.constant 0 : i32
    %c0_i32_0 = arith.constant 0 : i32
    return %arg0, %c0_i32 : i32, i32
  }
  func.func @transform_1(%arg0: i32) -> (i32, i32) {
    %c0_i32 = arith.constant 0 : i32
    %c0_i32_0 = arith.constant 0 : i32
    %c0_i32_1 = arith.constant 0 : i32
    return %c0_i32, %c0_i32_0 : i32, i32
  }
  func.func @transform_2(%arg0: i32) -> (i32, i32) {
    %c0_i32 = arith.constant 0 : i32
    %c0_i32_0 = arith.constant 0 : i32
    %c0_i32_1 = arith.constant 0 : i32
    return %c0_i32, %c0_i32_0 : i32, i32
  }
  func.func @transform_3(%arg0: i32) -> (i32, i32) {
    %c0_i32 = arith.constant 0 : i32
    %c0_i32_0 = arith.constant 0 : i32
    %c0_i32_1 = arith.constant 0 : i32
    return %c0_i32, %c0_i32_0 : i32, i32
  }
  func.func @transform_4(%arg0: i32) -> (i32, i32) {
    %c0_i32 = arith.constant 0 : i32
    %c0_i32_0 = arith.constant 0 : i32
    %c0_i32_1 = arith.constant 0 : i32
    return %c0_i32, %c0_i32_0 : i32, i32
  }
  func.func @transform_5(%arg0: i32) -> (i32, i32) {
    %c0_i32 = arith.constant 0 : i32
    %c0_i32_0 = arith.constant 0 : i32
    return %arg0, %c0_i32 : i32, i32
  }
}

</mosaic_0001>

<bundles_post_ra>
// kernel: net_forward.3
= control target key start
LH: loop header
LB: loop body
LE: loop exit
PB: predicated region body
PF: predicated region fallthrough
CT: control target
= control target key end

     0   :  { %10 = vsyncpa [#allocation3], 0  ;;  %s6085_s0 = inlined_call_operand.vmem [shape: bf16[2,1600], index: 0, kind: input, shape index: {}]   ;;  %s6086_s1 = inlined_call_operand.vmem [shape: bf16[1600,512], index: 1, kind: input, shape index: {}]   ;;  %s6087_s2 = inlined_call_operand.vmem [shape: f32[1,512], index: 2, kind: input, shape index: {}]   ;;  %s6088_s3 = inlined_call_operand.hbm [shape: bf16[512,128], index: 3, kind: input, shape index: {}]   ;;  %s6089_s4 = inlined_call_operand.vmem [shape: f32[1,128], index: 4, kind: input, shape index: {}]   ;;  %s6090_s5 = inlined_call_operand.hbm [shape: f32[2,128], index: 5, kind: output, shape index: {}]  }
   0x1   :  { %11 = vsyncpa [#allocation4], 0  ;;  %s4743_s18 = smov [#allocation2]   ;;  %s4695_s22 = scalar_lea.hbm %s6088_s3, 4096 }
   0x2   :  { %s23_s19 = sshll.u32 %s4743_s18, 4  ;;  %p4696_p0 = scmp.ne.s32.totalorder %s6088_s3, %s4695_s22  ;;  %s24_s19 = int_to_ptr.vmem [resolvable:$true] %s23_s19 }
   0x3   :  { %p4699_p1 = scmp.lt.u32.totalorder %s4695_s22, %s6088_s3 }
   0x5   :  { %p4701_p2 = pnand %p4699_p1, %p4696_p0 }
   0x7   :  { %4704 = shalt.err (!%p4701_p2)
}
   0x8   :  { %s4705_s27 = scalar_lea.vmem %s24_s19, 4096  ;;  %p4710_p4 = scmp.lt.s32.totalorder %s24_s19, %s24_s19 }
   0x9   :  { %p4706_p3 = scmp.ne.s32.totalorder %s24_s19, %s4705_s27  ;;  %p4711_p5 = scmp.lt.s32.totalorder %s4705_s27, %s4705_s27 }
   0xb   :  { %p4712_p6 = por %p4711_p5, %p4710_p4 }
   0xd   :  { %p4713_p7 = pnand %p4712_p6, %p4706_p3 }
   0xf   :  { %4716 = shalt.err (!%p4713_p7)
}
  0x10   :  { %s4744_s28 = smov 64   ;;  %s4745_s29 = smov 4  }
  0x11   :  { %29 = dma.hbm_to_vmem [thread:$0]  %s6088_s3, 4096, %s24_s19, [#allocation3], %s4744_s28, %s4744_s28, %s4745_s29  }
  0x12   :  { %4739 = dma.done.wait [#allocation3], 4096  }
  0x13   :  { %4740 = vsyncadd [#allocation3], 4294963200  ;;  %v4057_v0 = vld [vmem:[%s6086_s1 + $0x4] ss:$16 sps:$4 sm:$0xff]   ;;  %v4059_v1 = vld [vmem:[%s6086_s1 + $0xc] ss:$16 sps:$4 sm:$0xff]   ;;  %v440_v36 = vlaneseq }
  0x14   :  { %2566 = vmatprep.subr.bf16.mxu0 %v4057_v0  ;;  %v4061_v2 = vld [vmem:[%s6086_s1] ss:$16 sps:$4 sm:$0xff]   ;;  %v4062_v3 = vld [vmem:[%s6086_s1 + $0x8] ss:$16 sps:$4 sm:$0xff]   ;;  %2853 = vmatprep.subr.bf16.mxu1 %v4059_v1  ;;  %v4063_v4 = vld [vmem:[%s6086_s1 + $0x24] ss:$16 sps:$4 sm:$0xff]  }
  0x15   :  { %2567 = vmatpush1.bf16.msra.mxu0 %v4061_v2  ;;  %2854 = vmatpush1.bf16.msra.mxu1 %v4062_v3  ;;  %v4065_v5 = vld [vmem:[%s6086_s1 + $0x2c] ss:$16 sps:$4 sm:$0xff]   ;;  %v4067_v6 = vld [vmem:[%s6086_s1 + $0x20] ss:$16 sps:$4 sm:$0xff]   ;;  %v4068_v7 = vld [vmem:[%s6086_s1 + $0x28] ss:$16 sps:$4 sm:$0xff]  }
  0x16   :  { %2568 = vmatprep.subr.bf16.mxu0 %v4063_v4  ;;  %2855 = vmatprep.subr.bf16.mxu1 %v4065_v5  ;;  %v4069_v8 = vld [vmem:[%s6086_s1 + $0x44] ss:$16 sps:$4 sm:$0xff]   ;;  %v4071_v9 = vld [vmem:[%s6086_s1 + $0x4c] ss:$16 sps:$4 sm:$0xff]   ;;  %v4073_v10 = vld [vmem:[%s6086_s1 + $0x40] ss:$16 sps:$4 sm:$0xff]  }
  0x17   :  { %v4074_v11 = vld [vmem:[%s6086_s1 + $0x48] ss:$16 sps:$4 sm:$0xff]   ;;  %v4075_v12 = vld [vmem:[%s6086_s1 + $0x64] ss:$16 sps:$4 sm:$0xff]   ;;  %v4077_v13 = vld [vmem:[%s6086_s1 + $0x6c] ss:$16 sps:$4 sm:$0xff]  }
  0x18   :  { %v4079_v14 = vld [vmem:[%s6086_s1 + $0x60] ss:$16 sps:$4 sm:$0xff]   ;;  %v4080_v15 = vld [vmem:[%s6086_s1 + $0x68] ss:$16 sps:$4 sm:$0xff]   ;;  %v4081_v16 = vld [vmem:[%s6086_s1 + $0x84] ss:$16 sps:$4 sm:$0xff]  }
  0x19   :  { %2569 = vmatpush1.bf16.msra.mxu0 %v4067_v6  ;;  %2856 = vmatpush1.bf16.msra.mxu1 %v4068_v7  ;;  %v4083_v17 = vld [vmem:[%s6086_s1 + $0x8c] ss:$16 sps:$4 sm:$0xff]   ;;  %v4085_v18 = vld [vmem:[%s6086_s1 + $0x80] ss:$16 sps:$4 sm:$0xff]   ;;  %v4086_v19 = vld [vmem:[%s6086_s1 + $0x88] ss:$16 sps:$4 sm:$0xff]  }
  0x1a   :  { %2570 = vmatprep.subr.bf16.mxu0 %v4069_v8  ;;  %2857 = vmatprep.subr.bf16.mxu1 %v4071_v9  ;;  %v4087_v20 = vld [vmem:[%s6086_s1 + $0xa4] ss:$16 sps:$4 sm:$0xff]   ;;  %v4089_v21 = vld [vmem:[%s6086_s1 + $0xac] ss:$16 sps:$4 sm:$0xff]   ;;  %v4091_v22 = vld [vmem:[%s6086_s1 + $0xa0] ss:$16 sps:$4 sm:$0xff]  }
  0x1b   :  { %v4092_v23 = vld [vmem:[%s6086_s1 + $0xa8] ss:$16 sps:$4 sm:$0xff]   ;;  %v4093_v24 = vld [vmem:[%s6086_s1 + $0xc4] ss:$16 sps:$4 sm:$0xff]   ;;  %v4095_v25 = vld [vmem:[%s6086_s1 + $0xcc] ss:$16 sps:$4 sm:$0xff]  }
  0x1c   :  { %v4097_v26 = vld [vmem:[%s6086_s1 + $0xc0] ss:$16 sps:$4 sm:$0xff]   ;;  %v4098_v27 = vld [vmem:[%s6086_s1 + $0xc8] ss:$16 sps:$4 sm:$0xff]   ;;  %v4099_v28 = vld [vmem:[%s6086_s1 + $0xe4] ss:$16 sps:$4 sm:$0xff]  }
  0x1d   :  { %2571 = vmatpush1.bf16.msra.mxu0 %v4073_v10  ;;  %2858 = vmatpush1.bf16.msra.mxu1 %v4074_v11  ;;  %v4101_v29 = vld [vmem:[%s6086_s1 + $0xec] ss:$16 sps:$4 sm:$0xff]   ;;  %v4103_v30 = vld [vmem:[%s6086_s1 + $0xe0] ss:$16 sps:$4 sm:$0xff]   ;;  %v4104_v31 = vld [vmem:[%s6086_s1 + $0xe8] ss:$16 sps:$4 sm:$0xff]  }
  0x1e   :  { %2572 = vmatprep.subr.bf16.mxu0 %v4075_v12  ;;  %2859 = vmatprep.subr.bf16.mxu1 %v4077_v13  ;;  %v4105_v32 = vld [vmem:[%s6086_s1 + $0x104] ss:$16 sps:$4 sm:$0xff]   ;;  %v4107_v33 = vld [vmem:[%s6086_s1 + $0x10c] ss:$16 sps:$4 sm:$0xff]   ;;  %v4109_v34 = vld [vmem:[%s6086_s1 + $0x100] ss:$16 sps:$4 sm:$0xff]  }
  0x1f   :  { %v4110_v35 = vld [vmem:[%s6086_s1 + $0x108] ss:$16 sps:$4 sm:$0xff]   ;;  %v4746_v37 = vmov 1966171168   ;;  %v4111_v39 = vld [vmem:[%s6086_s1 + $0x124] ss:$16 sps:$4 sm:$0xff]  }
  0x20   :  { %v464_v38 = vunpack.c.l.s4 %v4746_v37  ;;  %v4113_v40 = vld [vmem:[%s6086_s1 + $0x12c] ss:$16 sps:$4 sm:$0xff]   ;;  %v4115_v41 = vld [vmem:[%s6086_s1 + $0x120] ss:$16 sps:$4 sm:$0xff]   ;;  %v4908_v42 = vshrl.u32 %v440_v36, 7  ;;  %vm2562_vm0 = vcmask 523264  }
  0x21   :  { %2573 = vmatpush1.bf16.msra.mxu0 %v4079_v14  ;;  %2860 = vmatpush1.bf16.msra.mxu1 %v4080_v15  ;;  %v4116_v44 = vld [vmem:[%s6086_s1 + $0x128] ss:$16 sps:$4 sm:$0xff]   ;;  %v4117_v45 = vld [vmem:[%s6086_s1 + $0x144] ss:$16 sps:$4 sm:$0xff]   ;;  %v4119_v46 = vld [vmem:[%s6086_s1 + $0x14c] ss:$16 sps:$4 sm:$0xff]  }
  0x22   :  { %2574 = vmatprep.subr.bf16.mxu0 %v4081_v16  ;;  %2861 = vmatprep.subr.bf16.mxu1 %v4083_v17  ;;  %v465_v43 = vunpack.c.0.s8 %v464_v38  ;;  %v4121_v47 = vld [vmem:[%s6086_s1 + $0x140] ss:$16 sps:$4 sm:$0xff]   ;;  %v4122_v48 = vld [vmem:[%s6086_s1 + $0x148] ss:$16 sps:$4 sm:$0xff]   ;;  %v4123_v50 = vld [vmem:[%s6086_s1 + $0x164] ss:$16 sps:$4 sm:$0xff]  }
  0x23   :  { %v4125_v51 = vld [vmem:[%s6086_s1 + $0x16c] ss:$16 sps:$4 sm:$0xff]   ;;  %v4937_v52 = vld [vmem:[%s6085_s0] sm:$0xff]  ;;  %v4128_v55 = vld [vmem:[%s6086_s1 + $0x168] ss:$16 sps:$4 sm:$0xff]   ;;  %vm3491_vm1 = vcmask 1041408  }
  0x24   :  { %v4926_v49 = vsub.s32 %v465_v43, %v4908_v42  ;;  %v4127_v53 = vld [vmem:[%s6086_s1 + $0x160] ss:$16 sps:$4 sm:$0xff]   ;;  %v4129_v56 = vld [vmem:[%s6086_s1 + $0x184] ss:$16 sps:$4 sm:$0xff]   ;;  %v4131_v57 = vld [vmem:[%s6086_s1 + $0x18c] ss:$16 sps:$4 sm:$0xff]  }
  0x25   :  { %2575 = vmatpush1.bf16.msra.mxu0 %v4085_v18  ;;  %2862 = vmatpush1.bf16.msra.mxu1 %v4086_v19  ;;  %v4133_v59 = vld [vmem:[%s6086_s1 + $0x180] ss:$16 sps:$4 sm:$0xff]   ;;  %v4134_v61 = vld [vmem:[%s6086_s1 + $0x188] ss:$16 sps:$4 sm:$0xff]   ;;  %v4135_v62 = vld [vmem:[%s6086_s1 + $0x1a4] ss:$16 sps:$4 sm:$0xff]  }
  0x26   :  { %2576 = vmatprep.subr.bf16.mxu0 %v4087_v20  ;;  %2863 = vmatprep.subr.bf16.mxu1 %v4089_v21  ;;  %v469_v54 = vrot.slane %v4937_v52, %v4926_v49  ;;  %v4137_v63 = vld [vmem:[%s6086_s1 + $0x1ac] ss:$16 sps:$4 sm:$0xff]   ;;  %v4139_v0 = vld [vmem:[%s6086_s1 + $0x1a0] ss:$16 sps:$4 sm:$0xff]   ;;  %v4140_v1 = vld [vmem:[%s6086_s1 + $0x1a8] ss:$16 sps:$4 sm:$0xff]  }
  0x27   :  { %v4141_v2 = vld [vmem:[%s6086_s1 + $0x1c4] ss:$16 sps:$4 sm:$0xff]   ;;  %v4143_v3 = vld [vmem:[%s6086_s1 + $0x1cc] ss:$16 sps:$4 sm:$0xff]   ;;  %v4145_v4 = vld [vmem:[%s6086_s1 + $0x1c0] ss:$16 sps:$4 sm:$0xff]  }
  0x28   :  { %v477_v58 = vcombine.high %v469_v54, %v469_v54  ;;  %v4146_v5 = vld [vmem:[%s6086_s1 + $0x1c8] ss:$16 sps:$4 sm:$0xff]   ;;  %v4147_v6 = vld [vmem:[%s6086_s1 + $0x1e4] ss:$16 sps:$4 sm:$0xff]   ;;  %v4149_v7 = vld [vmem:[%s6086_s1 + $0x1ec] ss:$16 sps:$4 sm:$0xff]   ;;  %v5006_v13 = vrot.slane %v469_v54, %v4926_v49 }
  0x29   :  { %2577 = vmatpush1.bf16.msra.mxu0 %v4091_v22  ;;  %2864 = vmatpush1.bf16.msra.mxu1 %v4092_v23  ;;  %v4151_v8 = vld [vmem:[%s6086_s1 + $0x1e0] ss:$16 sps:$4 sm:$0xff]   ;;  %v4152_v9 = vld [vmem:[%s6086_s1 + $0x1e8] ss:$16 sps:$4 sm:$0xff]   ;;  %v4155_v10 = vld [vmem:[%s6086_s1 + $0x204] ss:$16 sps:$4 sm:$0xff]  }
  0x2a   :  { %2578 = vmatprep.subr.bf16.mxu0 %v4093_v24  ;;  %2865 = vmatprep.subr.bf16.mxu1 %v4095_v25  ;;  %v499_v60 = vrot.slane %v477_v58, %v4926_v49  ;;  %v4158_v11 = vld [vmem:[%s6086_s1 + $0x20c] ss:$16 sps:$4 sm:$0xff]   ;;  %v4153_v12 = vld [vmem:[%s6086_s1 + $0x200] ss:$16 sps:$4 sm:$0xff]   ;;  %v4156_v14 = vld [vmem:[%s6086_s1 + $0x208] ss:$16 sps:$4 sm:$0xff]  }
  0x2b   :  { %v4161_v15 = vld [vmem:[%s6086_s1 + $0x224] ss:$16 sps:$4 sm:$0xff]   ;;  %v4164_v16 = vld [vmem:[%s6086_s1 + $0x22c] ss:$16 sps:$4 sm:$0xff]   ;;  %v4159_v18 = vld [vmem:[%s6086_s1 + $0x220] ss:$16 sps:$4 sm:$0xff]  }
  0x2c   :  { %2598 = vmatprep.mubr.bf16.mxu0 %v499_v60  ;;  %2885 = vmatprep.mubr.bf16.mxu1 %v499_v60  ;;  %v509_v17 = vcombine.high %v499_v60, %v499_v60  ;;  %v4162_v19 = vld [vmem:[%s6086_s1 + $0x228] ss:$16 sps:$4 sm:$0xff]   ;;  %v4167_v20 = vld [vmem:[%s6086_s1 + $0x244] ss:$16 sps:$4 sm:$0xff]   ;;  %v4170_v21 = vld [vmem:[%s6086_s1 + $0x24c] ss:$16 sps:$4 sm:$0xff]  }
  0x2d   :  { %2579 = vmatpush1.bf16.msra.mxu0 %v4097_v26  ;;  %2866 = vmatpush1.bf16.msra.mxu1 %v4098_v27  ;;  %v4165_v22 = vld [vmem:[%s6086_s1 + $0x240] ss:$16 sps:$4 sm:$0xff]   ;;  %v4168_v23 = vld [vmem:[%s6086_s1 + $0x248] ss:$16 sps:$4 sm:$0xff]   ;;  %v4173_v24 = vld [vmem:[%s6086_s1 + $0x264] ss:$16 sps:$4 sm:$0xff]  }
  0x2e   :  { %2580 = vmatprep.subr.bf16.mxu0 %v4099_v28  ;;  %2867 = vmatprep.subr.bf16.mxu1 %v4101_v29  ;;  %v4176_v25 = vld [vmem:[%s6086_s1 + $0x26c] ss:$16 sps:$4 sm:$0xff]   ;;  %v4171_v26 = vld [vmem:[%s6086_s1 + $0x260] ss:$16 sps:$4 sm:$0xff]   ;;  %v4174_v27 = vld [vmem:[%s6086_s1 + $0x268] ss:$16 sps:$4 sm:$0xff]  }
  0x2f   :  { %v4179_v28 = vld [vmem:[%s6086_s1 + $0x284] ss:$16 sps:$4 sm:$0xff]   ;;  %v4182_v29 = vld [vmem:[%s6086_s1 + $0x28c] ss:$16 sps:$4 sm:$0xff]   ;;  %v4189_v38 = vld [vmem:[%s6086_s1 + $0x2c0] ss:$16 sps:$4 sm:$0xff]  }
  0x30   :  { %v4191_v36 = vld [vmem:[%s6086_s1 + $0x2c4] ss:$16 sps:$4 sm:$0xff]   ;;  %v4194_v37 = vld [vmem:[%s6086_s1 + $0x2cc] ss:$16 sps:$4 sm:$0xff]   ;;  %v4195_v43 = vld [vmem:[%s6086_s1 + $0x2e0] ss:$16 sps:$4 sm:$0xff]  }
  0x31   :  { %2581 = vmatpush1.bf16.msra.mxu0 %v4103_v30  ;;  %2868 = vmatpush1.bf16.msra.mxu1 %v4104_v31  ;;  %v4177_v30 = vld [vmem:[%s6086_s1 + $0x280] ss:$16 sps:$4 sm:$0xff]   ;;  %v4180_v31 = vld [vmem:[%s6086_s1 + $0x288] ss:$16 sps:$4 sm:$0xff]   ;;  %v4224_v60 = vld [vmem:[%s6086_s1 + $0x36c] ss:$16 sps:$4 sm:$0xff]  }
  0x32   :  { %2582 = vmatprep.subr.bf16.mxu0 %v4105_v32  ;;  %2869 = vmatprep.subr.bf16.mxu1 %v4107_v33  ;;  %v4185_v32 = vld [vmem:[%s6086_s1 + $0x2a4] ss:$16 sps:$4 sm:$0xff]   ;;  %v4188_v33 = vld [vmem:[%s6086_s1 + $0x2ac] ss:$16 sps:$4 sm:$0xff]   ;;  %v4210_v54 = vld [vmem:[%s6086_s1 + $0x328] ss:$16 sps:$4 sm:$0xff]  }
  0x33   :  { %v4216_v58 = vld [vmem:[%s6086_s1 + $0x348] ss:$16 sps:$4 sm:$0xff]  }
  0x35   :  { %2583 = vmatpush1.bf16.msra.mxu0 %v4109_v34  ;;  %2870 = vmatpush1.bf16.msra.mxu1 %v4110_v35  ;;  %v4183_v34 = vld [vmem:[%s6086_s1 + $0x2a0] ss:$16 sps:$4 sm:$0xff]   ;;  %v4186_v35 = vld [vmem:[%s6086_s1 + $0x2a8] ss:$16 sps:$4 sm:$0xff]  }
  0x36   :  { %2584 = vmatprep.subr.bf16.mxu0 %v4111_v39  ;;  %2871 = vmatprep.subr.bf16.mxu1 %v4113_v40  ;;  %v4192_v39 = vld [vmem:[%s6086_s1 + $0x2c8] ss:$16 sps:$4 sm:$0xff]   ;;  %v4197_v40 = vld [vmem:[%s6086_s1 + $0x2e4] ss:$16 sps:$4 sm:$0xff]  }
  0x39   :  { %2585 = vmatpush1.bf16.msra.mxu0 %v4115_v41  ;;  %2872 = vmatpush1.bf16.msra.mxu1 %v4116_v44  ;;  %v4200_v41 = vld [vmem:[%s6086_s1 + $0x2ec] ss:$16 sps:$4 sm:$0xff]   ;;  %v4198_v44 = vld [vmem:[%s6086_s1 + $0x2e8] ss:$16 sps:$4 sm:$0xff]  }
  0x3a   :  { %2586 = vmatprep.subr.bf16.mxu0 %v4117_v45  ;;  %2873 = vmatprep.subr.bf16.mxu1 %v4119_v46  ;;  %v4203_v45 = vld [vmem:[%s6086_s1 + $0x304] ss:$16 sps:$4 sm:$0xff]   ;;  %v4206_v46 = vld [vmem:[%s6086_s1 + $0x30c] ss:$16 sps:$4 sm:$0xff]  }
  0x3d   :  { %2587 = vmatpush1.bf16.msra.mxu0 %v4121_v47  ;;  %2874 = vmatpush1.bf16.msra.mxu1 %v4122_v48  ;;  %v4201_v47 = vld [vmem:[%s6086_s1 + $0x300] ss:$16 sps:$4 sm:$0xff]   ;;  %v4204_v48 = vld [vmem:[%s6086_s1 + $0x308] ss:$16 sps:$4 sm:$0xff]  }
  0x3e   :  { %2588 = vmatprep.subr.bf16.mxu0 %v4123_v50  ;;  %2875 = vmatprep.subr.bf16.mxu1 %v4125_v51  ;;  %v4209_v50 = vld [vmem:[%s6086_s1 + $0x324] ss:$16 sps:$4 sm:$0xff]   ;;  %v4212_v51 = vld [vmem:[%s6086_s1 + $0x32c] ss:$16 sps:$4 sm:$0xff]  }
  0x41   :  { %2589 = vmatpush1.bf16.msra.mxu0 %v4127_v53  ;;  %2876 = vmatpush1.bf16.msra.mxu1 %v4128_v55  ;;  %v4207_v53 = vld [vmem:[%s6086_s1 + $0x320] ss:$16 sps:$4 sm:$0xff]   ;;  %v4215_v55 = vld [vmem:[%s6086_s1 + $0x344] ss:$16 sps:$4 sm:$0xff]  }
  0x42   :  { %2590 = vmatprep.subr.bf16.mxu0 %v4129_v56  ;;  %2877 = vmatprep.subr.bf16.mxu1 %v4131_v57  ;;  %v4218_v56 = vld [vmem:[%s6086_s1 + $0x34c] ss:$16 sps:$4 sm:$0xff]   ;;  %v4213_v57 = vld [vmem:[%s6086_s1 + $0x340] ss:$16 sps:$4 sm:$0xff]  }
  0x45   :  { %2591 = vmatpush1.bf16.msra.mxu0 %v4133_v59  ;;  %2878 = vmatpush1.bf16.msra.mxu1 %v4134_v61  ;;  %v4221_v59 = vld [vmem:[%s6086_s1 + $0x364] ss:$16 sps:$4 sm:$0xff]   ;;  %v4219_v61 = vld [vmem:[%s6086_s1 + $0x360] ss:$16 sps:$4 sm:$0xff]  }
  0x46   :  { %2592 = vmatprep.subr.bf16.mxu0 %v4135_v62  ;;  %2879 = vmatprep.subr.bf16.mxu1 %v4137_v63  ;;  %v4222_v62 = vld [vmem:[%s6086_s1 + $0x368] ss:$16 sps:$4 sm:$0xff]   ;;  %v4227_v63 = vld [vmem:[%s6086_s1 + $0x384] ss:$16 sps:$4 sm:$0xff]  }
  0x49   :  { %2593 = vmatpush1.bf16.msra.mxu0 %v4139_v0  ;;  %2880 = vmatpush1.bf16.msra.mxu1 %v4140_v1  ;;  %v4230_v0 = vld [vmem:[%s6086_s1 + $0x38c] ss:$16 sps:$4 sm:$0xff]   ;;  %v4225_v1 = vld [vmem:[%s6086_s1 + $0x380] ss:$16 sps:$4 sm:$0xff]  }
  0x4a   :  { %2594 = vmatprep.subr.bf16.mxu0 %v4141_v2  ;;  %2881 = vmatprep.subr.bf16.mxu1 %v4143_v3  ;;  %v4228_v2 = vld [vmem:[%s6086_s1 + $0x388] ss:$16 sps:$4 sm:$0xff]   ;;  %v4233_v3 = vld [vmem:[%s6086_s1 + $0x3a4] ss:$16 sps:$4 sm:$0xff]  }
  0x4d   :  { %2595 = vmatpush1.bf16.msra.mxu0 %v4145_v4  ;;  %2882 = vmatpush1.bf16.msra.mxu1 %v4146_v5  ;;  %v4236_v4 = vld [vmem:[%s6086_s1 + $0x3ac] ss:$16 sps:$4 sm:$0xff]   ;;  %v4231_v5 = vld [vmem:[%s6086_s1 + $0x3a0] ss:$16 sps:$4 sm:$0xff]  }
  0x4e   :  { %2596 = vmatprep.subr.bf16.mxu0 %v4147_v6  ;;  %2883 = vmatprep.subr.bf16.mxu1 %v4149_v7  ;;  %v4234_v6 = vld [vmem:[%s6086_s1 + $0x3a8] ss:$16 sps:$4 sm:$0xff]   ;;  %v4239_v7 = vld [vmem:[%s6086_s1 + $0x3c4] ss:$16 sps:$4 sm:$0xff]  }
  0x51   :  { %2597 = vmatpush1.bf16.msra.mxu0 %v4151_v8  ;;  %2884 = vmatpush1.bf16.msra.mxu1 %v4152_v9  ;;  %v4242_v8 = vld [vmem:[%s6086_s1 + $0x3cc] ss:$16 sps:$4 sm:$0xff]   ;;  %v462_v9 = vcombine.high %v4937_v52, %v4937_v52 }
  0x52   :  { %2607 = vmatprep.subr.bf16.mxu0 %v4155_v10  ;;  %2894 = vmatprep.subr.bf16.mxu1 %v4158_v11  ;;  %v4237_v10 = vld [vmem:[%s6086_s1 + $0x3c0] ss:$16 sps:$4 sm:$0xff]   ;;  %v4240_v11 = vld [vmem:[%s6086_s1 + $0x3c8] ss:$16 sps:$4 sm:$0xff]   ;;  %v4248_v52 = vld [vmem:[%s6086_s1 + $0x3ec] ss:$16 sps:$4 sm:$0xff]  }
  0x54   :  { %2599 = vmatmul.mubr.bf16.vlgmr.msra.gmra.mrb[0].mxu0 %v5006_v13  ;;  %2886 = vmatmul.mubr.bf16.vlgmr.msra.gmra.mrb[0].mxu1 %v5006_v13 }
  0x55   :  { %2608 = vmatpush1.bf16.msra.mxu0 %v4153_v12  ;;  %2895 = vmatpush1.bf16.msra.mxu1 %v4156_v14  ;;  %v4245_v12 = vld [vmem:[%s6086_s1 + $0x3e4] ss:$16 sps:$4 sm:$0xff]   ;;  %v5190_v14 = vrot.slane %v462_v9, %v4926_v49  ;;  %v4324_v9 = vld [vmem:[%s6086_s1 + $0x588] ss:$16 sps:$4 sm:$0xff]  }
  0x56   :  { %2609 = vmatprep.subr.bf16.mxu0 %v4161_v15  ;;  %2896 = vmatprep.subr.bf16.mxu1 %v4164_v16  ;;  %v4243_v15 = vld [vmem:[%s6086_s1 + $0x3e0] ss:$16 sps:$4 sm:$0xff]   ;;  %v4246_v16 = vld [vmem:[%s6086_s1 + $0x3e8] ss:$16 sps:$4 sm:$0xff]  }
  0x57   :  { %2639 = vmatprep.mubr.bf16.mxu0 %v509_v17  ;;  %2926 = vmatprep.mubr.bf16.mxu1 %v509_v17  ;;  %v4251_v17 = vld [vmem:[%s6086_s1 + $0x404] ss:$16 sps:$4 sm:$0xff]  }
  0x59   :  { %2610 = vmatpush1.bf16.msra.mxu0 %v4159_v18  ;;  %2897 = vmatpush1.bf16.msra.mxu1 %v4162_v19  ;;  %v4254_v18 = vld [vmem:[%s6086_s1 + $0x40c] ss:$16 sps:$4 sm:$0xff]   ;;  %v478_v19 = vcombine.high %v5190_v14, %v5190_v14 }
  0x5a   :  { %2611 = vmatprep.subr.bf16.mxu0 %v4167_v20  ;;  %2898 = vmatprep.subr.bf16.mxu1 %v4170_v21  ;;  %v4249_v20 = vld [vmem:[%s6086_s1 + $0x400] ss:$16 sps:$4 sm:$0xff]   ;;  %v507_v21 = vcombine.high %v5006_v13, %v5006_v13 }
  0x5b   :  { %v4255_v13 = vld [vmem:[%s6086_s1 + $0x420] ss:$16 sps:$4 sm:$0xff]  }
  0x5d   :  { %2612 = vmatpush1.bf16.msra.mxu0 %v4165_v22  ;;  %2899 = vmatpush1.bf16.msra.mxu1 %v4168_v23  ;;  %v4252_v22 = vld [vmem:[%s6086_s1 + $0x408] ss:$16 sps:$4 sm:$0xff]   ;;  %v4257_v23 = vld [vmem:[%s6086_s1 + $0x424] ss:$16 sps:$4 sm:$0xff]  }
  0x5e   :  { %2613 = vmatprep.subr.bf16.mxu0 %v4173_v24  ;;  %2900 = vmatprep.subr.bf16.mxu1 %v4176_v25  ;;  %v4260_v24 = vld [vmem:[%s6086_s1 + $0x42c] ss:$16 sps:$4 sm:$0xff]   ;;  %v5221_v25 = vrot.slane %v478_v19, %v4926_v49  ;;  %v4341_v19 = vld [vmem:[%s6086_s1 + $0x5e4] ss:$16 sps:$4 sm:$0xff]  }
  0x61   :  { %2614 = vmatpush1.bf16.msra.mxu0 %v4171_v26  ;;  %2901 = vmatpush1.bf16.msra.mxu1 %v4174_v27  ;;  %v4258_v26 = vld [vmem:[%s6086_s1 + $0x428] ss:$16 sps:$4 sm:$0xff]   ;;  %v4263_v27 = vld [vmem:[%s6086_s1 + $0x444] ss:$16 sps:$4 sm:$0xff]  }
  0x62   :  { %2615 = vmatprep.subr.bf16.mxu0 %v4179_v28  ;;  %2902 = vmatprep.subr.bf16.mxu1 %v4182_v29  ;;  %v4266_v28 = vld [vmem:[%s6086_s1 + $0x44c] ss:$16 sps:$4 sm:$0xff]   ;;  %v4261_v29 = vld [vmem:[%s6086_s1 + $0x440] ss:$16 sps:$4 sm:$0xff]  }
  0x65   :  { %2616 = vmatpush1.bf16.msra.mxu0 %v4177_v30  ;;  %2903 = vmatpush1.bf16.msra.mxu1 %v4180_v31  ;;  %v4264_v30 = vld [vmem:[%s6086_s1 + $0x448] ss:$16 sps:$4 sm:$0xff]   ;;  %v4269_v31 = vld [vmem:[%s6086_s1 + $0x464] ss:$16 sps:$4 sm:$0xff]  }
  0x66   :  { %2617 = vmatprep.subr.bf16.mxu0 %v4185_v32  ;;  %2904 = vmatprep.subr.bf16.mxu1 %v4188_v33  ;;  %v4272_v32 = vld [vmem:[%s6086_s1 + $0x46c] ss:$16 sps:$4 sm:$0xff]   ;;  %v4267_v33 = vld [vmem:[%s6086_s1 + $0x460] ss:$16 sps:$4 sm:$0xff]  }
  0x69   :  { %2618 = vmatpush1.bf16.msra.mxu0 %v4183_v34  ;;  %2905 = vmatpush1.bf16.msra.mxu1 %v4186_v35  ;;  %v4270_v34 = vld [vmem:[%s6086_s1 + $0x468] ss:$16 sps:$4 sm:$0xff]   ;;  %v4275_v35 = vld [vmem:[%s6086_s1 + $0x484] ss:$16 sps:$4 sm:$0xff]  }
  0x6a   :  { %2619 = vmatprep.subr.bf16.mxu0 %v4191_v36  ;;  %2906 = vmatprep.subr.bf16.mxu1 %v4194_v37  ;;  %v4278_v36 = vld [vmem:[%s6086_s1 + $0x48c] ss:$16 sps:$4 sm:$0xff]   ;;  %v4273_v37 = vld [vmem:[%s6086_s1 + $0x480] ss:$16 sps:$4 sm:$0xff]  }
  0x6d   :  { %2620 = vmatpush1.bf16.msra.mxu0 %v4189_v38  ;;  %2907 = vmatpush1.bf16.msra.mxu1 %v4192_v39  ;;  %v4276_v38 = vld [vmem:[%s6086_s1 + $0x488] ss:$16 sps:$4 sm:$0xff]   ;;  %v4281_v39 = vld [vmem:[%s6086_s1 + $0x4a4] ss:$16 sps:$4 sm:$0xff]  }
  0x6e   :  { %2621 = vmatprep.subr.bf16.mxu0 %v4197_v40  ;;  %2908 = vmatprep.subr.bf16.mxu1 %v4200_v41  ;;  %v4284_v40 = vld [vmem:[%s6086_s1 + $0x4ac] ss:$16 sps:$4 sm:$0xff]   ;;  %v4279_v41 = vld [vmem:[%s6086_s1 + $0x4a0] ss:$16 sps:$4 sm:$0xff]  }
  0x71   :  { %2622 = vmatpush1.bf16.msra.mxu0 %v4195_v43  ;;  %2909 = vmatpush1.bf16.msra.mxu1 %v4198_v44  ;;  %v4282_v43 = vld [vmem:[%s6086_s1 + $0x4a8] ss:$16 sps:$4 sm:$0xff]   ;;  %v4287_v44 = vld [vmem:[%s6086_s1 + $0x4c4] ss:$16 sps:$4 sm:$0xff]  }
  0x72   :  { %2623 = vmatprep.subr.bf16.mxu0 %v4203_v45  ;;  %2910 = vmatprep.subr.bf16.mxu1 %v4206_v46  ;;  %v4290_v45 = vld [vmem:[%s6086_s1 + $0x4cc] ss:$16 sps:$4 sm:$0xff]   ;;  %v4285_v46 = vld [vmem:[%s6086_s1 + $0x4c0] ss:$16 sps:$4 sm:$0xff]  }
  0x75   :  { %2624 = vmatpush1.bf16.msra.mxu0 %v4201_v47  ;;  %2911 = vmatpush1.bf16.msra.mxu1 %v4204_v48  ;;  %v4288_v47 = vld [vmem:[%s6086_s1 + $0x4c8] ss:$16 sps:$4 sm:$0xff]   ;;  %v4293_v48 = vld [vmem:[%s6086_s1 + $0x4e4] ss:$16 sps:$4 sm:$0xff]  }
  0x76   :  { %2625 = vmatprep.subr.bf16.mxu0 %v4209_v50  ;;  %2912 = vmatprep.subr.bf16.mxu1 %v4212_v51  ;;  %v4296_v50 = vld [vmem:[%s6086_s1 + $0x4ec] ss:$16 sps:$4 sm:$0xff]   ;;  %v4291_v51 = vld [vmem:[%s6086_s1 + $0x4e0] ss:$16 sps:$4 sm:$0xff]  }
  0x79   :  { %2626 = vmatpush1.bf16.msra.mxu0 %v4207_v53  ;;  %2913 = vmatpush1.bf16.msra.mxu1 %v4210_v54  ;;  %v4294_v53 = vld [vmem:[%s6086_s1 + $0x4e8] ss:$16 sps:$4 sm:$0xff]   ;;  %v4299_v54 = vld [vmem:[%s6086_s1 + $0x504] ss:$16 sps:$4 sm:$0xff]  }
  0x7a   :  { %2627 = vmatprep.subr.bf16.mxu0 %v4215_v55  ;;  %2914 = vmatprep.subr.bf16.mxu1 %v4218_v56  ;;  %v4302_v55 = vld [vmem:[%s6086_s1 + $0x50c] ss:$16 sps:$4 sm:$0xff]   ;;  %v4297_v56 = vld [vmem:[%s6086_s1 + $0x500] ss:$16 sps:$4 sm:$0xff]  }
  0x7d   :  { %2628 = vmatpush1.bf16.msra.mxu0 %v4213_v57  ;;  %2915 = vmatpush1.bf16.msra.mxu1 %v4216_v58  ;;  %v4300_v57 = vld [vmem:[%s6086_s1 + $0x508] ss:$16 sps:$4 sm:$0xff]   ;;  %v4305_v58 = vld [vmem:[%s6086_s1 + $0x524] ss:$16 sps:$4 sm:$0xff]  }
  0x7e   :  { %2629 = vmatprep.subr.bf16.mxu0 %v4221_v59  ;;  %2916 = vmatprep.subr.bf16.mxu1 %v4224_v60  ;;  %v4308_v59 = vld [vmem:[%s6086_s1 + $0x52c] ss:$16 sps:$4 sm:$0xff]   ;;  %v4303_v60 = vld [vmem:[%s6086_s1 + $0x520] ss:$16 sps:$4 sm:$0xff]  }
  0x81   :  { %2630 = vmatpush1.bf16.msra.mxu0 %v4219_v61  ;;  %2917 = vmatpush1.bf16.msra.mxu1 %v4222_v62  ;;  %v4306_v61 = vld [vmem:[%s6086_s1 + $0x528] ss:$16 sps:$4 sm:$0xff]   ;;  %v4311_v62 = vld [vmem:[%s6086_s1 + $0x544] ss:$16 sps:$4 sm:$0xff]  }
  0x82   :  { %2631 = vmatprep.subr.bf16.mxu0 %v4227_v63  ;;  %2918 = vmatprep.subr.bf16.mxu1 %v4230_v0  ;;  %v4314_v63 = vld [vmem:[%s6086_s1 + $0x54c] ss:$16 sps:$4 sm:$0xff]   ;;  %v4309_v0 = vld [vmem:[%s6086_s1 + $0x540] ss:$16 sps:$4 sm:$0xff]  }
  0x85   :  { %2632 = vmatpush1.bf16.msra.mxu0 %v4225_v1  ;;  %2919 = vmatpush1.bf16.msra.mxu1 %v4228_v2  ;;  %v4312_v1 = vld [vmem:[%s6086_s1 + $0x548] ss:$16 sps:$4 sm:$0xff]   ;;  %v4317_v2 = vld [vmem:[%s6086_s1 + $0x564] ss:$16 sps:$4 sm:$0xff]  }
  0x86   :  { %2633 = vmatprep.subr.bf16.mxu0 %v4233_v3  ;;  %2920 = vmatprep.subr.bf16.mxu1 %v4236_v4  ;;  %v4320_v3 = vld [vmem:[%s6086_s1 + $0x56c] ss:$16 sps:$4 sm:$0xff]   ;;  %v4315_v4 = vld [vmem:[%s6086_s1 + $0x560] ss:$16 sps:$4 sm:$0xff]  }
  0x89   :  { %2634 = vmatpush1.bf16.msra.mxu0 %v4231_v5  ;;  %2921 = vmatpush1.bf16.msra.mxu1 %v4234_v6  ;;  %v4318_v5 = vld [vmem:[%s6086_s1 + $0x568] ss:$16 sps:$4 sm:$0xff]   ;;  %v4323_v6 = vld [vmem:[%s6086_s1 + $0x584] ss:$16 sps:$4 sm:$0xff]  }
  0x8a   :  { %2635 = vmatprep.subr.bf16.mxu0 %v4239_v7  ;;  %2922 = vmatprep.subr.bf16.mxu1 %v4242_v8  ;;  %v4326_v7 = vld [vmem:[%s6086_s1 + $0x58c] ss:$16 sps:$4 sm:$0xff]   ;;  %v4321_v8 = vld [vmem:[%s6086_s1 + $0x580] ss:$16 sps:$4 sm:$0xff]  }
  0x8d   :  { %2636 = vmatpush1.bf16.msra.mxu0 %v4237_v10  ;;  %2923 = vmatpush1.bf16.msra.mxu1 %v4240_v11  ;;  %v4329_v10 = vld [vmem:[%s6086_s1 + $0x5a4] ss:$16 sps:$4 sm:$0xff]   ;;  %v4332_v11 = vld [vmem:[%s6086_s1 + $0x5ac] ss:$16 sps:$4 sm:$0xff]  }
  0x8e   :  { %2637 = vmatprep.subr.bf16.mxu0 %v4245_v12  ;;  %2924 = vmatprep.subr.bf16.mxu1 %v4248_v52  ;;  %v4327_v12 = vld [vmem:[%s6086_s1 + $0x5a0] ss:$16 sps:$4 sm:$0xff]   ;;  %v4330_v52 = vld [vmem:[%s6086_s1 + $0x5a8] ss:$16 sps:$4 sm:$0xff]  }
  0x91   :  { %2638 = vmatpush1.bf16.msra.mxu0 %v4243_v15  ;;  %2925 = vmatpush1.bf16.msra.mxu1 %v4246_v16  ;;  %v4335_v15 = vld [vmem:[%s6086_s1 + $0x5c4] ss:$16 sps:$4 sm:$0xff]   ;;  %v4338_v16 = vld [vmem:[%s6086_s1 + $0x5cc] ss:$16 sps:$4 sm:$0xff]  }
  0x92   :  { %2648 = vmatprep.subr.bf16.mxu0 %v4251_v17  ;;  %2935 = vmatprep.subr.bf16.mxu1 %v4254_v18  ;;  %v4333_v17 = vld [vmem:[%s6086_s1 + $0x5c0] ss:$16 sps:$4 sm:$0xff]   ;;  %v4336_v18 = vld [vmem:[%s6086_s1 + $0x5c8] ss:$16 sps:$4 sm:$0xff]  }
  0x94   :  { %2640 = vmatmul.mubr.bf16.vlgmr.msra.gmra.mrb[0].mxu0 %v507_v21  ;;  %2927 = vmatmul.mubr.bf16.vlgmr.msra.gmra.mrb[0].mxu1 %v507_v21  ;;  %v4339_v21 = vld [vmem:[%s6086_s1 + $0x5e0] ss:$16 sps:$4 sm:$0xff]  }
  0x95   :  { %2649 = vmatpush1.bf16.msra.mxu0 %v4249_v20  ;;  %2936 = vmatpush1.bf16.msra.mxu1 %v4252_v22  ;;  %v4344_v20 = vld [vmem:[%s6086_s1 + $0x5ec] ss:$16 sps:$4 sm:$0xff]   ;;  %v4342_v22 = vld [vmem:[%s6086_s1 + $0x5e8] ss:$16 sps:$4 sm:$0xff]  }
  0x96   :  { %2650 = vmatprep.subr.bf16.mxu0 %v4257_v23  ;;  %2937 = vmatprep.subr.bf16.mxu1 %v4260_v24  ;;  %v4348_v23 = vld [vmem:[%s6086_s1 + $0x604] ss:$16 sps:$4 sm:$0xff]   ;;  %v4351_v24 = vld [vmem:[%s6086_s1 + $0x60c] ss:$16 sps:$4 sm:$0xff]  }
  0x97   :  { %2680 = vmatprep.mubr.bf16.mxu0 %v5221_v25  ;;  %2967 = vmatprep.mubr.bf16.mxu1 %v5221_v25 }
  0x99   :  { %2651 = vmatpush1.bf16.msra.mxu0 %v4255_v13  ;;  %2938 = vmatpush1.bf16.msra.mxu1 %v4258_v26  ;;  %v4346_v13 = vld [vmem:[%s6086_s1 + $0x600] ss:$16 sps:$4 sm:$0xff]   ;;  %v5410_v26 = vrot.slane %v5190_v14, %v4926_v49  ;;  %v510_v14 = vcombine.high %v5221_v25, %v5221_v25  ;;  %v4360_v25 = vld [vmem:[%s6086_s1 + $0x644] ss:$16 sps:$4 sm:$0xff]  }
  0x9a   :  { %2652 = vmatprep.subr.bf16.mxu0 %v4263_v27  ;;  %2939 = vmatprep.subr.bf16.mxu1 %v4266_v28  ;;  %v4349_v27 = vld [vmem:[%s6086_s1 + $0x608] ss:$16 sps:$4 sm:$0xff]   ;;  %v4354_v28 = vld [vmem:[%s6086_s1 + $0x624] ss:$16 sps:$4 sm:$0xff]  }
  0x9d   :  { %2653 = vmatpush1.bf16.msra.mxu0 %v4261_v29  ;;  %2940 = vmatpush1.bf16.msra.mxu1 %v4264_v30  ;;  %v4357_v29 = vld [vmem:[%s6086_s1 + $0x62c] ss:$16 sps:$4 sm:$0xff]   ;;  %v4352_v30 = vld [vmem:[%s6086_s1 + $0x620] ss:$16 sps:$4 sm:$0xff]  }
  0x9e   :  { %2654 = vmatprep.subr.bf16.mxu0 %v4269_v31  ;;  %2941 = vmatprep.subr.bf16.mxu1 %v4272_v32  ;;  %v4355_v31 = vld [vmem:[%s6086_s1 + $0x628] ss:$16 sps:$4 sm:$0xff]   ;;  %v4363_v32 = vld [vmem:[%s6086_s1 + $0x64c] ss:$16 sps:$4 sm:$0xff]  }
  0xa1   :  { %2655 = vmatpush1.bf16.msra.mxu0 %v4267_v33  ;;  %2942 = vmatpush1.bf16.msra.mxu1 %v4270_v34  ;;  %v4358_v33 = vld [vmem:[%s6086_s1 + $0x640] ss:$16 sps:$4 sm:$0xff]   ;;  %v4361_v34 = vld [vmem:[%s6086_s1 + $0x648] ss:$16 sps:$4 sm:$0xff]  }
  0xa2   :  { %2656 = vmatprep.subr.bf16.mxu0 %v4275_v35  ;;  %2943 = vmatprep.subr.bf16.mxu1 %v4278_v36  ;;  %v4366_v35 = vld [vmem:[%s6086_s1 + $0x664] ss:$16 sps:$4 sm:$0xff]   ;;  %v4369_v36 = vld [vmem:[%s6086_s1 + $0x66c] ss:$16 sps:$4 sm:$0xff]  }
  0xa5   :  { %2657 = vmatpush1.bf16.msra.mxu0 %v4273_v37  ;;  %2944 = vmatpush1.bf16.msra.mxu1 %v4276_v38  ;;  %v4364_v37 = vld [vmem:[%s6086_s1 + $0x660] ss:$16 sps:$4 sm:$0xff]   ;;  %v4367_v38 = vld [vmem:[%s6086_s1 + $0x668] ss:$16 sps:$4 sm:$0xff]  }
  0xa6   :  { %2658 = vmatprep.subr.bf16.mxu0 %v4281_v39  ;;  %2945 = vmatprep.subr.bf16.mxu1 %v4284_v40  ;;  %v4372_v39 = vld [vmem:[%s6086_s1 + $0x684] ss:$16 sps:$4 sm:$0xff]   ;;  %v4375_v40 = vld [vmem:[%s6086_s1 + $0x68c] ss:$16 sps:$4 sm:$0xff]  }
  0xa9   :  { %2659 = vmatpush1.bf16.msra.mxu0 %v4279_v41  ;;  %2946 = vmatpush1.bf16.msra.mxu1 %v4282_v43  ;;  %v4370_v41 = vld [vmem:[%s6086_s1 + $0x680] ss:$16 sps:$4 sm:$0xff]   ;;  %v4373_v43 = vld [vmem:[%s6086_s1 + $0x688] ss:$16 sps:$4 sm:$0xff]  }
  0xaa   :  { %2660 = vmatprep.subr.bf16.mxu0 %v4287_v44  ;;  %2947 = vmatprep.subr.bf16.mxu1 %v4290_v45  ;;  %v4378_v44 = vld [vmem:[%s6086_s1 + $0x6a4] ss:$16 sps:$4 sm:$0xff]   ;;  %v4381_v45 = vld [vmem:[%s6086_s1 + $0x6ac] ss:$16 sps:$4 sm:$0xff]  }
  0xad   :  { %2661 = vmatpush1.bf16.msra.mxu0 %v4285_v46  ;;  %2948 = vmatpush1.bf16.msra.mxu1 %v4288_v47  ;;  %v4376_v46 = vld [vmem:[%s6086_s1 + $0x6a0] ss:$16 sps:$4 sm:$0xff]   ;;  %v4379_v47 = vld [vmem:[%s6086_s1 + $0x6a8] ss:$16 sps:$4 sm:$0xff]  }
  0xae   :  { %2662 = vmatprep.subr.bf16.mxu0 %v4293_v48  ;;  %2949 = vmatprep.subr.bf16.mxu1 %v4296_v50  ;;  %v4384_v48 = vld [vmem:[%s6086_s1 + $0x6c4] ss:$16 sps:$4 sm:$0xff]   ;;  %v4387_v50 = vld [vmem:[%s6086_s1 + $0x6cc] ss:$16 sps:$4 sm:$0xff]  }
  0xb1   :  { %2663 = vmatpush1.bf16.msra.mxu0 %v4291_v51  ;;  %2950 = vmatpush1.bf16.msra.mxu1 %v4294_v53  ;;  %v4382_v51 = vld [vmem:[%s6086_s1 + $0x6c0] ss:$16 sps:$4 sm:$0xff]   ;;  %v4385_v53 = vld [vmem:[%s6086_s1 + $0x6c8] ss:$16 sps:$4 sm:$0xff]  }
  0xb2   :  { %2664 = vmatprep.subr.bf16.mxu0 %v4299_v54  ;;  %2951 = vmatprep.subr.bf16.mxu1 %v4302_v55  ;;  %v4390_v54 = vld [vmem:[%s6086_s1 + $0x6e4] ss:$16 sps:$4 sm:$0xff]   ;;  %v4393_v55 = vld [vmem:[%s6086_s1 + $0x6ec] ss:$16 sps:$4 sm:$0xff]  }
  0xb5   :  { %2665 = vmatpush1.bf16.msra.mxu0 %v4297_v56  ;;  %2952 = vmatpush1.bf16.msra.mxu1 %v4300_v57  ;;  %v4388_v56 = vld [vmem:[%s6086_s1 + $0x6e0] ss:$16 sps:$4 sm:$0xff]   ;;  %v4391_v57 = vld [vmem:[%s6086_s1 + $0x6e8] ss:$16 sps:$4 sm:$0xff]  }
  0xb6   :  { %2666 = vmatprep.subr.bf16.mxu0 %v4305_v58  ;;  %2953 = vmatprep.subr.bf16.mxu1 %v4308_v59  ;;  %v4396_v58 = vld [vmem:[%s6086_s1 + $0x704] ss:$16 sps:$4 sm:$0xff]   ;;  %v4399_v59 = vld [vmem:[%s6086_s1 + $0x70c] ss:$16 sps:$4 sm:$0xff]  }
  0xb9   :  { %2667 = vmatpush1.bf16.msra.mxu0 %v4303_v60  ;;  %2954 = vmatpush1.bf16.msra.mxu1 %v4306_v61  ;;  %v4394_v60 = vld [vmem:[%s6086_s1 + $0x700] ss:$16 sps:$4 sm:$0xff]   ;;  %v4397_v61 = vld [vmem:[%s6086_s1 + $0x708] ss:$16 sps:$4 sm:$0xff]  }
  0xba   :  { %2668 = vmatprep.subr.bf16.mxu0 %v4311_v62  ;;  %2955 = vmatprep.subr.bf16.mxu1 %v4314_v63  ;;  %v4402_v62 = vld [vmem:[%s6086_s1 + $0x724] ss:$16 sps:$4 sm:$0xff]   ;;  %v4405_v63 = vld [vmem:[%s6086_s1 + $0x72c] ss:$16 sps:$4 sm:$0xff]  }
  0xbd   :  { %2669 = vmatpush1.bf16.msra.mxu0 %v4309_v0  ;;  %2956 = vmatpush1.bf16.msra.mxu1 %v4312_v1  ;;  %v4400_v0 = vld [vmem:[%s6086_s1 + $0x720] ss:$16 sps:$4 sm:$0xff]   ;;  %v4403_v1 = vld [vmem:[%s6086_s1 + $0x728] ss:$16 sps:$4 sm:$0xff]  }
  0xbe   :  { %2670 = vmatprep.subr.bf16.mxu0 %v4317_v2  ;;  %2957 = vmatprep.subr.bf16.mxu1 %v4320_v3  ;;  %v4408_v2 = vld [vmem:[%s6086_s1 + $0x744] ss:$16 sps:$4 sm:$0xff]   ;;  %v4411_v3 = vld [vmem:[%s6086_s1 + $0x74c] ss:$16 sps:$4 sm:$0xff]  }
  0xc1   :  { %2671 = vmatpush1.bf16.msra.mxu0 %v4315_v4  ;;  %2958 = vmatpush1.bf16.msra.mxu1 %v4318_v5  ;;  %v4406_v4 = vld [vmem:[%s6086_s1 + $0x740] ss:$16 sps:$4 sm:$0xff]   ;;  %v4409_v5 = vld [vmem:[%s6086_s1 + $0x748] ss:$16 sps:$4 sm:$0xff]  }
  0xc2   :  { %2672 = vmatprep.subr.bf16.mxu0 %v4323_v6  ;;  %2959 = vmatprep.subr.bf16.mxu1 %v4326_v7  ;;  %v4414_v6 = vld [vmem:[%s6086_s1 + $0x764] ss:$16 sps:$4 sm:$0xff]   ;;  %v4417_v7 = vld [vmem:[%s6086_s1 + $0x76c] ss:$16 sps:$4 sm:$0xff]  }
  0xc5   :  { %2673 = vmatpush1.bf16.msra.mxu0 %v4321_v8  ;;  %2960 = vmatpush1.bf16.msra.mxu1 %v4324_v9  ;;  %v4412_v8 = vld [vmem:[%s6086_s1 + $0x760] ss:$16 sps:$4 sm:$0xff]   ;;  %v4415_v9 = vld [vmem:[%s6086_s1 + $0x768] ss:$16 sps:$4 sm:$0xff]  }
  0xc6   :  { %2674 = vmatprep.subr.bf16.mxu0 %v4329_v10  ;;  %2961 = vmatprep.subr.bf16.mxu1 %v4332_v11  ;;  %v4420_v10 = vld [vmem:[%s6086_s1 + $0x784] ss:$16 sps:$4 sm:$0xff]   ;;  %v4423_v11 = vld [vmem:[%s6086_s1 + $0x78c] ss:$16 sps:$4 sm:$0xff]  }
  0xc9   :  { %2675 = vmatpush1.bf16.msra.mxu0 %v4327_v12  ;;  %2962 = vmatpush1.bf16.msra.mxu1 %v4330_v52  ;;  %v4418_v12 = vld [vmem:[%s6086_s1 + $0x780] ss:$16 sps:$4 sm:$0xff]   ;;  %v4421_v52 = vld [vmem:[%s6086_s1 + $0x788] ss:$16 sps:$4 sm:$0xff]  }
  0xca   :  { %2676 = vmatprep.subr.bf16.mxu0 %v4335_v15  ;;  %2963 = vmatprep.subr.bf16.mxu1 %v4338_v16  ;;  %v4426_v15 = vld [vmem:[%s6086_s1 + $0x7a4] ss:$16 sps:$4 sm:$0xff]   ;;  %v4429_v16 = vld [vmem:[%s6086_s1 + $0x7ac] ss:$16 sps:$4 sm:$0xff]  }
  0xcd   :  { %2677 = vmatpush1.bf16.msra.mxu0 %v4333_v17  ;;  %2964 = vmatpush1.bf16.msra.mxu1 %v4336_v18  ;;  %v4424_v17 = vld [vmem:[%s6086_s1 + $0x7a0] ss:$16 sps:$4 sm:$0xff]   ;;  %v4427_v18 = vld [vmem:[%s6086_s1 + $0x7a8] ss:$16 sps:$4 sm:$0xff]  }
  0xce   :  { %2678 = vmatprep.subr.bf16.mxu0 %v4341_v19  ;;  %2965 = vmatprep.subr.bf16.mxu1 %v4344_v20  ;;  %v4432_v19 = vld [vmem:[%s6086_s1 + $0x7c4] ss:$16 sps:$4 sm:$0xff]   ;;  %v4435_v20 = vld [vmem:[%s6086_s1 + $0x7cc] ss:$16 sps:$4 sm:$0xff]  }
  0xd1   :  { %2679 = vmatpush1.bf16.msra.mxu0 %v4339_v21  ;;  %2966 = vmatpush1.bf16.msra.mxu1 %v4342_v22  ;;  %v5584_v21 = vld [vmem:[%s6085_s0 + $0x8] sm:$0x1f]  ;;  %v4430_v22 = vld [vmem:[%s6086_s1 + $0x7c0] ss:$16 sps:$4 sm:$0xff]  }
  0xd2   :  { %2689 = vmatprep.subr.bf16.mxu0 %v4348_v23  ;;  %2976 = vmatprep.subr.bf16.mxu1 %v4351_v24  ;;  %v4433_v23 = vld [vmem:[%s6086_s1 + $0x7c8] ss:$16 sps:$4 sm:$0xff]   ;;  %v4438_v24 = vld [vmem:[%s6086_s1 + $0x7e4] ss:$16 sps:$4 sm:$0xff]  }
  0xd4   :  { %2681 = vmatmul.mubr.bf16.vlgmr.msra.gmra.mrb[0].mxu0 %v5410_v26  ;;  %2968 = vmatmul.mubr.bf16.vlgmr.msra.gmra.mrb[0].mxu1 %v5410_v26 }
  0xd5   :  { %2690 = vmatpush1.bf16.msra.mxu0 %v4346_v13  ;;  %2977 = vmatpush1.bf16.msra.mxu1 %v4349_v27  ;;  %v4441_v13 = vld [vmem:[%s6086_s1 + $0x7ec] ss:$16 sps:$4 sm:$0xff]   ;;  %v5600_v27 = vrot.slane %v5584_v21, %v4926_v49 }
  0xd6   :  { %2691 = vmatprep.subr.bf16.mxu0 %v4354_v28  ;;  %2978 = vmatprep.subr.bf16.mxu1 %v4357_v29  ;;  %v4436_v28 = vld [vmem:[%s6086_s1 + $0x7e0] ss:$16 sps:$4 sm:$0xff]   ;;  %v4439_v29 = vld [vmem:[%s6086_s1 + $0x7e8] ss:$16 sps:$4 sm:$0xff]  }
  0xd7   :  { %2721 = vmatprep.mubr.bf16.mxu0 %v510_v14  ;;  %3008 = vmatprep.mubr.bf16.mxu1 %v510_v14  ;;  %v4444_v14 = vld [vmem:[%s6086_s1 + $0x804] ss:$16 sps:$4 sm:$0xff]  }
  0xd9   :  { %2692 = vmatpush1.bf16.msra.mxu0 %v4352_v30  ;;  %2979 = vmatpush1.bf16.msra.mxu1 %v4355_v31  ;;  %v4447_v30 = vld [vmem:[%s6086_s1 + $0x80c] ss:$16 sps:$4 sm:$0xff]   ;;  %v526_v31 = vcombine.high %v5600_v27, %v5600_v27 }
  0xda   :  { %2693 = vmatprep.subr.bf16.mxu0 %v4360_v25  ;;  %2980 = vmatprep.subr.bf16.mxu1 %v4363_v32  ;;  %v508_v25 = vcombine.high %v5410_v26, %v5410_v26  ;;  %v4442_v32 = vld [vmem:[%s6086_s1 + $0x800] ss:$16 sps:$4 sm:$0xff]   ;;  %v4453_v26 = vld [vmem:[%s6086_s1 + $0x82c] ss:$16 sps:$4 sm:$0xff]  }
  0xdd   :  { %2694 = vmatpush1.bf16.msra.mxu0 %v4358_v33  ;;  %2981 = vmatpush1.bf16.msra.mxu1 %v4361_v34  ;;  %v4445_v33 = vld [vmem:[%s6086_s1 + $0x808] ss:$16 sps:$4 sm:$0xff]   ;;  %v4450_v34 = vld [vmem:[%s6086_s1 + $0x824] ss:$16 sps:$4 sm:$0xff]  }
  0xde   :  { %2695 = vmatprep.subr.bf16.mxu0 %v4366_v35  ;;  %2982 = vmatprep.subr.bf16.mxu1 %v4369_v36  ;;  %v5631_v35 = vrot.slane %v526_v31, %v4926_v49  ;;  %v4448_v36 = vld [vmem:[%s6086_s1 + $0x820] ss:$16 sps:$4 sm:$0xff]   ;;  %v4529_v31 = vld [vmem:[%s6086_s1 + $0x9c8] ss:$16 sps:$4 sm:$0xff]  }
  0xe1   :  { %2696 = vmatpush1.bf16.msra.mxu0 %v4364_v37  ;;  %2983 = vmatpush1.bf16.msra.mxu1 %v4367_v38  ;;  %v4451_v37 = vld [vmem:[%s6086_s1 + $0x828] ss:$16 sps:$4 sm:$0xff]   ;;  %v4456_v38 = vld [vmem:[%s6086_s1 + $0x844] ss:$16 sps:$4 sm:$0xff]  }
  0xe2   :  { %2697 = vmatprep.subr.bf16.mxu0 %v4372_v39  ;;  %2984 = vmatprep.subr.bf16.mxu1 %v4375_v40  ;;  %v4459_v39 = vld [vmem:[%s6086_s1 + $0x84c] ss:$16 sps:$4 sm:$0xff]   ;;  %v4454_v40 = vld [vmem:[%s6086_s1 + $0x840] ss:$16 sps:$4 sm:$0xff]  }
  0xe5   :  { %2698 = vmatpush1.bf16.msra.mxu0 %v4370_v41  ;;  %2985 = vmatpush1.bf16.msra.mxu1 %v4373_v43  ;;  %v4457_v41 = vld [vmem:[%s6086_s1 + $0x848] ss:$16 sps:$4 sm:$0xff]   ;;  %v4462_v43 = vld [vmem:[%s6086_s1 + $0x864] ss:$16 sps:$4 sm:$0xff]  }
  0xe6   :  { %2699 = vmatprep.subr.bf16.mxu0 %v4378_v44  ;;  %2986 = vmatprep.subr.bf16.mxu1 %v4381_v45  ;;  %v4465_v44 = vld [vmem:[%s6086_s1 + $0x86c] ss:$16 sps:$4 sm:$0xff]   ;;  %v4460_v45 = vld [vmem:[%s6086_s1 + $0x860] ss:$16 sps:$4 sm:$0xff]  }
  0xe9   :  { %2700 = vmatpush1.bf16.msra.mxu0 %v4376_v46  ;;  %2987 = vmatpush1.bf16.msra.mxu1 %v4379_v47  ;;  %v4463_v46 = vld [vmem:[%s6086_s1 + $0x868] ss:$16 sps:$4 sm:$0xff]   ;;  %v4468_v47 = vld [vmem:[%s6086_s1 + $0x884] ss:$16 sps:$4 sm:$0xff]  }
  0xea   :  { %2701 = vmatprep.subr.bf16.mxu0 %v4384_v48  ;;  %2988 = vmatprep.subr.bf16.mxu1 %v4387_v50  ;;  %v4471_v48 = vld [vmem:[%s6086_s1 + $0x88c] ss:$16 sps:$4 sm:$0xff]   ;;  %v4466_v50 = vld [vmem:[%s6086_s1 + $0x880] ss:$16 sps:$4 sm:$0xff]  }
  0xed   :  { %2702 = vmatpush1.bf16.msra.mxu0 %v4382_v51  ;;  %2989 = vmatpush1.bf16.msra.mxu1 %v4385_v53  ;;  %v4469_v51 = vld [vmem:[%s6086_s1 + $0x888] ss:$16 sps:$4 sm:$0xff]   ;;  %v4474_v53 = vld [vmem:[%s6086_s1 + $0x8a4] ss:$16 sps:$4 sm:$0xff]  }
  0xee   :  { %2703 = vmatprep.subr.bf16.mxu0 %v4390_v54  ;;  %2990 = vmatprep.subr.bf16.mxu1 %v4393_v55  ;;  %v4477_v54 = vld [vmem:[%s6086_s1 + $0x8ac] ss:$16 sps:$4 sm:$0xff]   ;;  %v4472_v55 = vld [vmem:[%s6086_s1 + $0x8a0] ss:$16 sps:$4 sm:$0xff]  }
  0xf1   :  { %2704 = vmatpush1.bf16.msra.mxu0 %v4388_v56  ;;  %2991 = vmatpush1.bf16.msra.mxu1 %v4391_v57  ;;  %v4475_v56 = vld [vmem:[%s6086_s1 + $0x8a8] ss:$16 sps:$4 sm:$0xff]   ;;  %v4480_v57 = vld [vmem:[%s6086_s1 + $0x8c4] ss:$16 sps:$4 sm:$0xff]  }
  0xf2   :  { %2705 = vmatprep.subr.bf16.mxu0 %v4396_v58  ;;  %2992 = vmatprep.subr.bf16.mxu1 %v4399_v59  ;;  %v4483_v58 = vld [vmem:[%s6086_s1 + $0x8cc] ss:$16 sps:$4 sm:$0xff]   ;;  %v4478_v59 = vld [vmem:[%s6086_s1 + $0x8c0] ss:$16 sps:$4 sm:$0xff]  }
  0xf5   :  { %2706 = vmatpush1.bf16.msra.mxu0 %v4394_v60  ;;  %2993 = vmatpush1.bf16.msra.mxu1 %v4397_v61  ;;  %v4481_v60 = vld [vmem:[%s6086_s1 + $0x8c8] ss:$16 sps:$4 sm:$0xff]   ;;  %v4486_v61 = vld [vmem:[%s6086_s1 + $0x8e4] ss:$16 sps:$4 sm:$0xff]  }
  0xf6   :  { %2707 = vmatprep.subr.bf16.mxu0 %v4402_v62  ;;  %2994 = vmatprep.subr.bf16.mxu1 %v4405_v63  ;;  %v4489_v62 = vld [vmem:[%s6086_s1 + $0x8ec] ss:$16 sps:$4 sm:$0xff]   ;;  %v4484_v63 = vld [vmem:[%s6086_s1 + $0x8e0] ss:$16 sps:$4 sm:$0xff]  }
  0xf9   :  { %2708 = vmatpush1.bf16.msra.mxu0 %v4400_v0  ;;  %2995 = vmatpush1.bf16.msra.mxu1 %v4403_v1  ;;  %v4487_v0 = vld [vmem:[%s6086_s1 + $0x8e8] ss:$16 sps:$4 sm:$0xff]   ;;  %v4492_v1 = vld [vmem:[%s6086_s1 + $0x904] ss:$16 sps:$4 sm:$0xff]  }
  0xfa   :  { %2709 = vmatprep.subr.bf16.mxu0 %v4408_v2  ;;  %2996 = vmatprep.subr.bf16.mxu1 %v4411_v3  ;;  %v4495_v2 = vld [vmem:[%s6086_s1 + $0x90c] ss:$16 sps:$4 sm:$0xff]   ;;  %v4490_v3 = vld [vmem:[%s6086_s1 + $0x900] ss:$16 sps:$4 sm:$0xff]  }
  0xfd   :  { %2710 = vmatpush1.bf16.msra.mxu0 %v4406_v4  ;;  %2997 = vmatpush1.bf16.msra.mxu1 %v4409_v5  ;;  %v4493_v4 = vld [vmem:[%s6086_s1 + $0x908] ss:$16 sps:$4 sm:$0xff]   ;;  %v4498_v5 = vld [vmem:[%s6086_s1 + $0x924] ss:$16 sps:$4 sm:$0xff]  }
  0xfe   :  { %2711 = vmatprep.subr.bf16.mxu0 %v4414_v6  ;;  %2998 = vmatprep.subr.bf16.mxu1 %v4417_v7  ;;  %v4501_v6 = vld [vmem:[%s6086_s1 + $0x92c] ss:$16 sps:$4 sm:$0xff]   ;;  %v4496_v7 = vld [vmem:[%s6086_s1 + $0x920] ss:$16 sps:$4 sm:$0xff]  }
 0x101   :  { %2712 = vmatpush1.bf16.msra.mxu0 %v4412_v8  ;;  %2999 = vmatpush1.bf16.msra.mxu1 %v4415_v9  ;;  %v4499_v8 = vld [vmem:[%s6086_s1 + $0x928] ss:$16 sps:$4 sm:$0xff]   ;;  %v4504_v9 = vld [vmem:[%s6086_s1 + $0x944] ss:$16 sps:$4 sm:$0xff]  }
 0x102   :  { %2713 = vmatprep.subr.bf16.mxu0 %v4420_v10  ;;  %3000 = vmatprep.subr.bf16.mxu1 %v4423_v11  ;;  %v4507_v10 = vld [vmem:[%s6086_s1 + $0x94c] ss:$16 sps:$4 sm:$0xff]   ;;  %v4502_v11 = vld [vmem:[%s6086_s1 + $0x940] ss:$16 sps:$4 sm:$0xff]  }
 0x105   :  { %2714 = vmatpush1.bf16.msra.mxu0 %v4418_v12  ;;  %3001 = vmatpush1.bf16.msra.mxu1 %v4421_v52  ;;  %v4505_v12 = vld [vmem:[%s6086_s1 + $0x948] ss:$16 sps:$4 sm:$0xff]   ;;  %v4510_v52 = vld [vmem:[%s6086_s1 + $0x964] ss:$16 sps:$4 sm:$0xff]  }
 0x106   :  { %2715 = vmatprep.subr.bf16.mxu0 %v4426_v15  ;;  %3002 = vmatprep.subr.bf16.mxu1 %v4429_v16  ;;  %v4513_v15 = vld [vmem:[%s6086_s1 + $0x96c] ss:$16 sps:$4 sm:$0xff]   ;;  %v4508_v16 = vld [vmem:[%s6086_s1 + $0x960] ss:$16 sps:$4 sm:$0xff]  }
 0x109   :  { %2716 = vmatpush1.bf16.msra.mxu0 %v4424_v17  ;;  %3003 = vmatpush1.bf16.msra.mxu1 %v4427_v18  ;;  %v4511_v17 = vld [vmem:[%s6086_s1 + $0x968] ss:$16 sps:$4 sm:$0xff]   ;;  %v4516_v18 = vld [vmem:[%s6086_s1 + $0x984] ss:$16 sps:$4 sm:$0xff]  }
 0x10a   :  { %2717 = vmatprep.subr.bf16.mxu0 %v4432_v19  ;;  %3004 = vmatprep.subr.bf16.mxu1 %v4435_v20  ;;  %v4519_v19 = vld [vmem:[%s6086_s1 + $0x98c] ss:$16 sps:$4 sm:$0xff]   ;;  %v4514_v20 = vld [vmem:[%s6086_s1 + $0x980] ss:$16 sps:$4 sm:$0xff]  }
 0x10d   :  { %2718 = vmatpush1.bf16.msra.mxu0 %v4430_v22  ;;  %3005 = vmatpush1.bf16.msra.mxu1 %v4433_v23  ;;  %v4517_v22 = vld [vmem:[%s6086_s1 + $0x988] ss:$16 sps:$4 sm:$0xff]   ;;  %v4522_v23 = vld [vmem:[%s6086_s1 + $0x9a4] ss:$16 sps:$4 sm:$0xff]  }
 0x10e   :  { %2719 = vmatprep.subr.bf16.mxu0 %v4438_v24  ;;  %3006 = vmatprep.subr.bf16.mxu1 %v4441_v13  ;;  %v4525_v24 = vld [vmem:[%s6086_s1 + $0x9ac] ss:$16 sps:$4 sm:$0xff]   ;;  %v4520_v13 = vld [vmem:[%s6086_s1 + $0x9a0] ss:$16 sps:$4 sm:$0xff]  }
 0x111   :  { %2720 = vmatpush1.bf16.msra.mxu0 %v4436_v28  ;;  %3007 = vmatpush1.bf16.msra.mxu1 %v4439_v29  ;;  %v4523_v28 = vld [vmem:[%s6086_s1 + $0x9a8] ss:$16 sps:$4 sm:$0xff]   ;;  %v4528_v29 = vld [vmem:[%s6086_s1 + $0x9c4] ss:$16 sps:$4 sm:$0xff]  }
 0x112   :  { %2730 = vmatprep.subr.bf16.mxu0 %v4444_v14  ;;  %3017 = vmatprep.subr.bf16.mxu1 %v4447_v30  ;;  %v4531_v14 = vld [vmem:[%s6086_s1 + $0x9cc] ss:$16 sps:$4 sm:$0xff]   ;;  %v4526_v30 = vld [vmem:[%s6086_s1 + $0x9c0] ss:$16 sps:$4 sm:$0xff]  }
 0x114   :  { %2722 = vmatmul.mubr.bf16.vlgmr.msra.gmra.mrb[0].mxu0 %v508_v25  ;;  %3009 = vmatmul.mubr.bf16.vlgmr.msra.gmra.mrb[0].mxu1 %v508_v25  ;;  %v4534_v25 = vld [vmem:[%s6086_s1 + $0x9e4] ss:$16 sps:$4 sm:$0xff]  }
 0x115   :  { %2731 = vmatpush1.bf16.msra.mxu0 %v4442_v32  ;;  %3018 = vmatpush1.bf16.msra.mxu1 %v4445_v33  ;;  %v4537_v32 = vld [vmem:[%s6086_s1 + $0x9ec] ss:$16 sps:$4 sm:$0xff]   ;;  %v4532_v33 = vld [vmem:[%s6086_s1 + $0x9e0] ss:$16 sps:$4 sm:$0xff]  }
 0x116   :  { %2732 = vmatprep.subr.bf16.mxu0 %v4450_v34  ;;  %3019 = vmatprep.subr.bf16.mxu1 %v4453_v26  ;;  %v4535_v34 = vld [vmem:[%s6086_s1 + $0x9e8] ss:$16 sps:$4 sm:$0xff]   ;;  %v4541_v26 = vld [vmem:[%s6086_s1 + $0xa04] ss:$16 sps:$4 sm:$0xff]  }
 0x117   :  { %2762 = vmatprep.mubr.bf16.mxu0 %v5631_v35  ;;  %3049 = vmatprep.mubr.bf16.mxu1 %v5631_v35 }
 0x119   :  { %2733 = vmatpush1.bf16.msra.mxu0 %v4448_v36  ;;  %3020 = vmatpush1.bf16.msra.mxu1 %v4451_v37  ;;  %v4544_v36 = vld [vmem:[%s6086_s1 + $0xa0c] ss:$16 sps:$4 sm:$0xff]   ;;  %v5817_v37 = vrot.slane %v5600_v27, %v4926_v49 }
 0x11a   :  { %2734 = vmatprep.subr.bf16.mxu0 %v4456_v38  ;;  %3021 = vmatprep.subr.bf16.mxu1 %v4459_v39  ;;  %v4539_v38 = vld [vmem:[%s6086_s1 + $0xa00] ss:$16 sps:$4 sm:$0xff]   ;;  %v4542_v39 = vld [vmem:[%s6086_s1 + $0xa08] ss:$16 sps:$4 sm:$0xff]   ;;  %v4550_v27 = vld [vmem:[%s6086_s1 + $0xa2c] ss:$16 sps:$4 sm:$0xff]  }
 0x11d   :  { %2735 = vmatpush1.bf16.msra.mxu0 %v4454_v40  ;;  %3022 = vmatpush1.bf16.msra.mxu1 %v4457_v41  ;;  %v4547_v40 = vld [vmem:[%s6086_s1 + $0xa24] ss:$16 sps:$4 sm:$0xff]   ;;  %v549_v41 = vcombine.high %v5631_v35, %v5631_v35 }
 0x11e   :  { %2736 = vmatprep.subr.bf16.mxu0 %v4462_v43  ;;  %3023 = vmatprep.subr.bf16.mxu1 %v4465_v44  ;;  %v4545_v43 = vld [vmem:[%s6086_s1 + $0xa20] ss:$16 sps:$4 sm:$0xff]   ;;  %v4548_v44 = vld [vmem:[%s6086_s1 + $0xa28] ss:$16 sps:$4 sm:$0xff]   ;;  %v4553_v35 = vld [vmem:[%s6086_s1 + $0xa44] ss:$16 sps:$4 sm:$0xff]  }
 0x121   :  { %2737 = vmatpush1.bf16.msra.mxu0 %v4460_v45  ;;  %3024 = vmatpush1.bf16.msra.mxu1 %v4463_v46  ;;  %v4556_v45 = vld [vmem:[%s6086_s1 + $0xa4c] ss:$16 sps:$4 sm:$0xff]   ;;  %v4551_v46 = vld [vmem:[%s6086_s1 + $0xa40] ss:$16 sps:$4 sm:$0xff]  }
 0x122   :  { %2738 = vmatprep.subr.bf16.mxu0 %v4468_v47  ;;  %3025 = vmatprep.subr.bf16.mxu1 %v4471_v48  ;;  %v4554_v47 = vld [vmem:[%s6086_s1 + $0xa48] ss:$16 sps:$4 sm:$0xff]   ;;  %v4559_v48 = vld [vmem:[%s6086_s1 + $0xa64] ss:$16 sps:$4 sm:$0xff]  }
 0x125   :  { %2739 = vmatpush1.bf16.msra.mxu0 %v4466_v50  ;;  %3026 = vmatpush1.bf16.msra.mxu1 %v4469_v51  ;;  %v4562_v50 = vld [vmem:[%s6086_s1 + $0xa6c] ss:$16 sps:$4 sm:$0xff]   ;;  %v4557_v51 = vld [vmem:[%s6086_s1 + $0xa60] ss:$16 sps:$4 sm:$0xff]  }
 0x126   :  { %2740 = vmatprep.subr.bf16.mxu0 %v4474_v53  ;;  %3027 = vmatprep.subr.bf16.mxu1 %v4477_v54  ;;  %v4560_v53 = vld [vmem:[%s6086_s1 + $0xa68] ss:$16 sps:$4 sm:$0xff]   ;;  %v4565_v54 = vld [vmem:[%s6086_s1 + $0xa84] ss:$16 sps:$4 sm:$0xff]  }
 0x129   :  { %2741 = vmatpush1.bf16.msra.mxu0 %v4472_v55  ;;  %3028 = vmatpush1.bf16.msra.mxu1 %v4475_v56  ;;  %v4568_v55 = vld [vmem:[%s6086_s1 + $0xa8c] ss:$16 sps:$4 sm:$0xff]   ;;  %v4563_v56 = vld [vmem:[%s6086_s1 + $0xa80] ss:$16 sps:$4 sm:$0xff]  }
 0x12a   :  { %2742 = vmatprep.subr.bf16.mxu0 %v4480_v57  ;;  %3029 = vmatprep.subr.bf16.mxu1 %v4483_v58  ;;  %v4566_v57 = vld [vmem:[%s6086_s1 + $0xa88] ss:$16 sps:$4 sm:$0xff]   ;;  %v4571_v58 = vld [vmem:[%s6086_s1 + $0xaa4] ss:$16 sps:$4 sm:$0xff]  }
 0x12d   :  { %2743 = vmatpush1.bf16.msra.mxu0 %v4478_v59  ;;  %3030 = vmatpush1.bf16.msra.mxu1 %v4481_v60  ;;  %v4574_v59 = vld [vmem:[%s6086_s1 + $0xaac] ss:$16 sps:$4 sm:$0xff]   ;;  %v4569_v60 = vld [vmem:[%s6086_s1 + $0xaa0] ss:$16 sps:$4 sm:$0xff]  }
 0x12e   :  { %2744 = vmatprep.subr.bf16.mxu0 %v4486_v61  ;;  %3031 = vmatprep.subr.bf16.mxu1 %v4489_v62  ;;  %v4572_v61 = vld [vmem:[%s6086_s1 + $0xaa8] ss:$16 sps:$4 sm:$0xff]   ;;  %v4577_v62 = vld [vmem:[%s6086_s1 + $0xac4] ss:$16 sps:$4 sm:$0xff]  }
 0x131   :  { %2745 = vmatpush1.bf16.msra.mxu0 %v4484_v63  ;;  %3032 = vmatpush1.bf16.msra.mxu1 %v4487_v0  ;;  %v4580_v63 = vld [vmem:[%s6086_s1 + $0xacc] ss:$16 sps:$4 sm:$0xff]   ;;  %v4575_v0 = vld [vmem:[%s6086_s1 + $0xac0] ss:$16 sps:$4 sm:$0xff]  }
 0x132   :  { %2746 = vmatprep.subr.bf16.mxu0 %v4492_v1  ;;  %3033 = vmatprep.subr.bf16.mxu1 %v4495_v2  ;;  %v4578_v1 = vld [vmem:[%s6086_s1 + $0xac8] ss:$16 sps:$4 sm:$0xff]   ;;  %v4583_v2 = vld [vmem:[%s6086_s1 + $0xae4] ss:$16 sps:$4 sm:$0xff]  }
 0x135   :  { %2747 = vmatpush1.bf16.msra.mxu0 %v4490_v3  ;;  %3034 = vmatpush1.bf16.msra.mxu1 %v4493_v4  ;;  %v4586_v3 = vld [vmem:[%s6086_s1 + $0xaec] ss:$16 sps:$4 sm:$0xff]   ;;  %v4581_v4 = vld [vmem:[%s6086_s1 + $0xae0] ss:$16 sps:$4 sm:$0xff]  }
 0x136   :  { %2748 = vmatprep.subr.bf16.mxu0 %v4498_v5  ;;  %3035 = vmatprep.subr.bf16.mxu1 %v4501_v6  ;;  %v4584_v5 = vld [vmem:[%s6086_s1 + $0xae8] ss:$16 sps:$4 sm:$0xff]   ;;  %v4589_v6 = vld [vmem:[%s6086_s1 + $0xb04] ss:$16 sps:$4 sm:$0xff]  }
 0x139   :  { %2749 = vmatpush1.bf16.msra.mxu0 %v4496_v7  ;;  %3036 = vmatpush1.bf16.msra.mxu1 %v4499_v8  ;;  %v4592_v7 = vld [vmem:[%s6086_s1 + $0xb0c] ss:$16 sps:$4 sm:$0xff]   ;;  %v4587_v8 = vld [vmem:[%s6086_s1 + $0xb00] ss:$16 sps:$4 sm:$0xff]  }
 0x13a   :  { %2750 = vmatprep.subr.bf16.mxu0 %v4504_v9  ;;  %3037 = vmatprep.subr.bf16.mxu1 %v4507_v10  ;;  %v4590_v9 = vld [vmem:[%s6086_s1 + $0xb08] ss:$16 sps:$4 sm:$0xff]   ;;  %v4595_v10 = vld [vmem:[%s6086_s1 + $0xb24] ss:$16 sps:$4 sm:$0xff]  }
 0x13d   :  { %2751 = vmatpush1.bf16.msra.mxu0 %v4502_v11  ;;  %3038 = vmatpush1.bf16.msra.mxu1 %v4505_v12  ;;  %v4598_v11 = vld [vmem:[%s6086_s1 + $0xb2c] ss:$16 sps:$4 sm:$0xff]   ;;  %v4593_v12 = vld [vmem:[%s6086_s1 + $0xb20] ss:$16 sps:$4 sm:$0xff]  }
 0x13e   :  { %2752 = vmatprep.subr.bf16.mxu0 %v4510_v52  ;;  %3039 = vmatprep.subr.bf16.mxu1 %v4513_v15  ;;  %v4596_v52 = vld [vmem:[%s6086_s1 + $0xb28] ss:$16 sps:$4 sm:$0xff]   ;;  %v4601_v15 = vld [vmem:[%s6086_s1 + $0xb44] ss:$16 sps:$4 sm:$0xff]  }
 0x141   :  { %2753 = vmatpush1.bf16.msra.mxu0 %v4508_v16  ;;  %3040 = vmatpush1.bf16.msra.mxu1 %v4511_v17  ;;  %v4604_v16 = vld [vmem:[%s6086_s1 + $0xb4c] ss:$16 sps:$4 sm:$0xff]   ;;  %v4599_v17 = vld [vmem:[%s6086_s1 + $0xb40] ss:$16 sps:$4 sm:$0xff]  }
 0x142   :  { %2754 = vmatprep.subr.bf16.mxu0 %v4516_v18  ;;  %3041 = vmatprep.subr.bf16.mxu1 %v4519_v19  ;;  %v4602_v18 = vld [vmem:[%s6086_s1 + $0xb48] ss:$16 sps:$4 sm:$0xff]   ;;  %v4607_v19 = vld [vmem:[%s6086_s1 + $0xb64] ss:$16 sps:$4 sm:$0xff]  }
 0x145   :  { %2755 = vmatpush1.bf16.msra.mxu0 %v4514_v20  ;;  %3042 = vmatpush1.bf16.msra.mxu1 %v4517_v22  ;;  %v4610_v20 = vld [vmem:[%s6086_s1 + $0xb6c] ss:$16 sps:$4 sm:$0xff]   ;;  %v4605_v22 = vld [vmem:[%s6086_s1 + $0xb60] ss:$16 sps:$4 sm:$0xff]  }
 0x146   :  { %2756 = vmatprep.subr.bf16.mxu0 %v4522_v23  ;;  %3043 = vmatprep.subr.bf16.mxu1 %v4525_v24  ;;  %v4608_v23 = vld [vmem:[%s6086_s1 + $0xb68] ss:$16 sps:$4 sm:$0xff]   ;;  %v4613_v24 = vld [vmem:[%s6086_s1 + $0xb84] ss:$16 sps:$4 sm:$0xff]  }
 0x149   :  { %2757 = vmatpush1.bf16.msra.mxu0 %v4520_v13  ;;  %3044 = vmatpush1.bf16.msra.mxu1 %v4523_v28  ;;  %v4616_v13 = vld [vmem:[%s6086_s1 + $0xb8c] ss:$16 sps:$4 sm:$0xff]   ;;  %v4611_v28 = vld [vmem:[%s6086_s1 + $0xb80] ss:$16 sps:$4 sm:$0xff]  }
 0x14a   :  { %2758 = vmatprep.subr.bf16.mxu0 %v4528_v29  ;;  %3045 = vmatprep.subr.bf16.mxu1 %v4531_v14  ;;  %v4614_v29 = vld [vmem:[%s6086_s1 + $0xb88] ss:$16 sps:$4 sm:$0xff]   ;;  %v4619_v14 = vld [vmem:[%s6086_s1 + $0xba4] ss:$16 sps:$4 sm:$0xff]  }
 0x14d   :  { %2759 = vmatpush1.bf16.msra.mxu0 %v4526_v30  ;;  %3046 = vmatpush1.bf16.msra.mxu1 %v4529_v31  ;;  %v4622_v30 = vld [vmem:[%s6086_s1 + $0xbac] ss:$16 sps:$4 sm:$0xff]   ;;  %v4617_v31 = vld [vmem:[%s6086_s1 + $0xba0] ss:$16 sps:$4 sm:$0xff]  }
 0x14e   :  { %2760 = vmatprep.subr.bf16.mxu0 %v4534_v25  ;;  %3047 = vmatprep.subr.bf16.mxu1 %v4537_v32  ;;  %v4620_v25 = vld [vmem:[%s6086_s1 + $0xba8] ss:$16 sps:$4 sm:$0xff]   ;;  %v4625_v32 = vld [vmem:[%s6086_s1 + $0xbc4] ss:$16 sps:$4 sm:$0xff]  }
 0x151   :  { %2761 = vmatpush1.bf16.msra.mxu0 %v4532_v33  ;;  %3048 = vmatpush1.bf16.msra.mxu1 %v4535_v34  ;;  %v4628_v33 = vld [vmem:[%s6086_s1 + $0xbcc] ss:$16 sps:$4 sm:$0xff]   ;;  %v4623_v34 = vld [vmem:[%s6086_s1 + $0xbc0] ss:$16 sps:$4 sm:$0xff]  }
 0x152   :  { %2771 = vmatprep.subr.bf16.mxu0 %v4541_v26  ;;  %3058 = vmatprep.subr.bf16.mxu1 %v4544_v36  ;;  %v4626_v26 = vld [vmem:[%s6086_s1 + $0xbc8] ss:$16 sps:$4 sm:$0xff]   ;;  %v4631_v36 = vld [vmem:[%s6086_s1 + $0xbe4] ss:$16 sps:$4 sm:$0xff]  }
 0x154   :  { %2763 = vmatmul.mubr.bf16.vlgmr.msra.gmra.mrb[0].mxu0 %v5817_v37  ;;  %3050 = vmatmul.mubr.bf16.vlgmr.msra.gmra.mrb[0].mxu1 %v5817_v37 }
 0x155   :  { %2772 = vmatpush1.bf16.msra.mxu0 %v4539_v38  ;;  %3059 = vmatpush1.bf16.msra.mxu1 %v4542_v39  ;;  %v4634_v38 = vld [vmem:[%s6086_s1 + $0xbec] ss:$16 sps:$4 sm:$0xff]   ;;  %v4629_v39 = vld [vmem:[%s6086_s1 + $0xbe0] ss:$16 sps:$4 sm:$0xff]  }
 0x156   :  { %2773 = vmatprep.subr.bf16.mxu0 %v4547_v40  ;;  %3060 = vmatprep.subr.bf16.mxu1 %v4550_v27  ;;  %v4632_v40 = vld [vmem:[%s6086_s1 + $0xbe8] ss:$16 sps:$4 sm:$0xff]   ;;  %v4637_v27 = vld [vmem:[%s6086_s1 + $0xc04] ss:$16 sps:$4 sm:$0xff]  }
 0x157   :  { %2803 = vmatprep.mubr.bf16.mxu0 %v549_v41  ;;  %3090 = vmatprep.mubr.bf16.mxu1 %v549_v41  ;;  %v4640_v41 = vld [vmem:[%s6086_s1 + $0xc0c] ss:$16 sps:$4 sm:$0xff]  }
 0x159   :  { %2774 = vmatpush1.bf16.msra.mxu0 %v4545_v43  ;;  %3061 = vmatpush1.bf16.msra.mxu1 %v4548_v44  ;;  %v548_v43 = vcombine.high %v5817_v37, %v5817_v37  ;;  %v4635_v44 = vld [vmem:[%s6086_s1 + $0xc00] ss:$16 sps:$4 sm:$0xff]   ;;  %v4646_v37 = vld [vmem:[%s6086_s1 + $0xc2c] ss:$16 sps:$4 sm:$0xff]  }
 0x15a   :  { %2775 = vmatprep.subr.bf16.mxu0 %v4553_v35  ;;  %3062 = vmatprep.subr.bf16.mxu1 %v4556_v45  ;;  %v4638_v35 = vld [vmem:[%s6086_s1 + $0xc08] ss:$16 sps:$4 sm:$0xff]   ;;  %v4643_v45 = vld [vmem:[%s6086_s1 + $0xc24] ss:$16 sps:$4 sm:$0xff]  }
 0x15d   :  { %2776 = vmatpush1.bf16.msra.mxu0 %v4551_v46  ;;  %3063 = vmatpush1.bf16.msra.mxu1 %v4554_v47  ;;  %v4641_v46 = vld [vmem:[%s6086_s1 + $0xc20] ss:$16 sps:$4 sm:$0xff]   ;;  %v4644_v47 = vld [vmem:[%s6086_s1 + $0xc28] ss:$16 sps:$4 sm:$0xff]  }
 0x15e   :  { %2777 = vmatprep.subr.bf16.mxu0 %v4559_v48  ;;  %3064 = vmatprep.subr.bf16.mxu1 %v4562_v50  ;;  %v4649_v48 = vld [vmem:[%s6086_s1 + $0xc44] ss:$16 sps:$4 sm:$0xff]   ;;  %v4652_v50 = vld [vmem:[%s6086_s1 + $0xc4c] ss:$16 sps:$4 sm:$0xff]  }
 0x161   :  { %2778 = vmatpush1.bf16.msra.mxu0 %v4557_v51  ;;  %3065 = vmatpush1.bf16.msra.mxu1 %v4560_v53  ;;  %v4747_v51 = vmov 0   ;;  %v511_v53 = vcombine.high %v5584_v21, %v5584_v21  ;;  %v4658_v21 = vld [vmem:[%s6086_s1 + $0xc6c] ss:$16 sps:$4 sm:$0xff]  }
 0x162   :  { %2779 = vmatprep.subr.bf16.mxu0 %v4565_v54  ;;  %3066 = vmatprep.subr.bf16.mxu1 %v4568_v55  ;;  %v4647_v54 = vld [vmem:[%s6086_s1 + $0xc40] ss:$16 sps:$4 sm:$0xff]   ;;  %v4650_v55 = vld [vmem:[%s6086_s1 + $0xc48] ss:$16 sps:$4 sm:$0xff]  }
 0x165   :  { %2780 = vmatpush1.bf16.msra.mxu0 %v4563_v56  ;;  %3067 = vmatpush1.bf16.msra.mxu1 %v4566_v57  ;;  %v4655_v56 = vld [vmem:[%s6086_s1 + $0xc64] ss:$16 sps:$4 sm:$0xff]   ;;  %v525_v57 = vrot.slane %v511_v53, %v4926_v49 }
 0x166   :  { %2781 = vmatprep.subr.bf16.mxu0 %v4571_v58  ;;  %3068 = vmatprep.subr.bf16.mxu1 %v4574_v59  ;;  %v4653_v58 = vld [vmem:[%s6086_s1 + $0xc60] ss:$16 sps:$4 sm:$0xff]   ;;  %v4656_v59 = vld [vmem:[%s6086_s1 + $0xc68] ss:$16 sps:$4 sm:$0xff]  }
 0x169   :  { %2782 = vmatpush1.bf16.msra.mxu0 %v4569_v60  ;;  %3069 = vmatpush1.bf16.msra.mxu1 %v4572_v61  ;;  %v4659_v60 = vld [vmem:[#allocation2 + $0x40] sm:$0xff]  }
 0x16a   :  { %2783 = vmatprep.subr.bf16.mxu0 %v4577_v62  ;;  %3070 = vmatprep.subr.bf16.mxu1 %v4580_v63  ;;  %v4660_v61 = vld [vmem:[#allocation2 + $0xc0] sm:$0xff]   ;;  %v540_v62 = vrot.slane %v525_v57, %v4926_v49  ;;  %v4669_v49 = vld [vmem:[#allocation2 + $0x10] sm:$0xff]  }
 0x16b   :  { %v4661_v63 = vld [vmem:[#allocation2] sm:$0xff]  }
 0x16d   :  { %2784 = vmatpush1.bf16.msra.mxu0 %v4575_v0  ;;  %3071 = vmatpush1.bf16.msra.mxu1 %v4578_v1  ;;  %v4662_v0 = vld [vmem:[#allocation2 + $0x80] sm:$0xff]   ;;  %v4663_v1 = vld [vmem:[#allocation2 + $0x48] sm:$0xff]  }
 0x16e   :  { %2785 = vmatprep.subr.bf16.mxu0 %v4583_v2  ;;  %3072 = vmatprep.subr.bf16.mxu1 %v4586_v3  ;;  %v4664_v2 = vld [vmem:[#allocation2 + $0xc8] sm:$0xff]  }
 0x16f   :  { %v4665_v3 = vld [vmem:[#allocation2 + $0x8] sm:$0xff]  }
 0x171   :  { %2786 = vmatpush1.bf16.msra.mxu0 %v4581_v4  ;;  %3073 = vmatpush1.bf16.msra.mxu1 %v4584_v5  ;;  %v4666_v4 = vld [vmem:[#allocation2 + $0x88] sm:$0xff]   ;;  %v4667_v5 = vld [vmem:[#allocation2 + $0x50] sm:$0xff]  }
 0x172   :  { %2787 = vmatprep.subr.bf16.mxu0 %v4589_v6  ;;  %3074 = vmatprep.subr.bf16.mxu1 %v4592_v7  ;;  %v4668_v6 = vld [vmem:[#allocation2 + $0xd0] sm:$0xff]  }
 0x173   :  { %v4670_v7 = vld [vmem:[#allocation2 + $0x90] sm:$0xff]  }
 0x175   :  { %2788 = vmatpush1.bf16.msra.mxu0 %v4587_v8  ;;  %3075 = vmatpush1.bf16.msra.mxu1 %v4590_v9  ;;  %v4671_v8 = vld [vmem:[#allocation2 + $0x58] sm:$0xff]  }
 0x176   :  { %2789 = vmatprep.subr.bf16.mxu0 %v4595_v10  ;;  %3076 = vmatprep.subr.bf16.mxu1 %v4598_v11  ;;  %v4672_v9 = vld [vmem:[#allocation2 + $0xd8] sm:$0xff]  }
 0x177   :  { %v4673_v10 = vld [vmem:[#allocation2 + $0x18] sm:$0xff]  }
 0x178   :  { %v4674_v11 = vld [vmem:[#allocation2 + $0x98] sm:$0xff]  }
 0x179   :  { %2790 = vmatpush1.bf16.msra.mxu0 %v4593_v12  ;;  %3077 = vmatpush1.bf16.msra.mxu1 %v4596_v52  ;;  %v4675_v12 = vld [vmem:[#allocation2 + $0x60] sm:$0xff]  }
 0x17a   :  { %2791 = vmatprep.subr.bf16.mxu0 %v4601_v15  ;;  %3078 = vmatprep.subr.bf16.mxu1 %v4604_v16  ;;  %v4676_v52 = vld [vmem:[#allocation2 + $0xe0] sm:$0xff]  }
 0x17b   :  { %v4677_v15 = vld [vmem:[#allocation2 + $0x20] sm:$0xff]  }
 0x17c   :  { %v4678_v16 = vld [vmem:[#allocation2 + $0xa0] sm:$0xff]  }
 0x17d   :  { %2792 = vmatpush1.bf16.msra.mxu0 %v4599_v17  ;;  %3079 = vmatpush1.bf16.msra.mxu1 %v4602_v18  ;;  %v4679_v17 = vld [vmem:[#allocation2 + $0x68] sm:$0xff]  }
 0x17e   :  { %2793 = vmatprep.subr.bf16.mxu0 %v4607_v19  ;;  %3080 = vmatprep.subr.bf16.mxu1 %v4610_v20  ;;  %v4680_v18 = vld [vmem:[#allocation2 + $0xe8] sm:$0xff]  }
 0x17f   :  { %v4681_v19 = vld [vmem:[#allocation2 + $0x28] sm:$0xff]  }
 0x180   :  { %v4682_v20 = vld [vmem:[#allocation2 + $0xa8] sm:$0xff]  }
 0x181   :  { %2794 = vmatpush1.bf16.msra.mxu0 %v4605_v22  ;;  %3081 = vmatpush1.bf16.msra.mxu1 %v4608_v23  ;;  %v4683_v22 = vld [vmem:[#allocation2 + $0x70] sm:$0xff]  }
 0x182   :  { %2795 = vmatprep.subr.bf16.mxu0 %v4613_v24  ;;  %3082 = vmatprep.subr.bf16.mxu1 %v4616_v13  ;;  %v4684_v23 = vld [vmem:[#allocation2 + $0xf0] sm:$0xff]  }
 0x183   :  { %v4685_v24 = vld [vmem:[#allocation2 + $0x30] sm:$0xff]  }
 0x184   :  { %v4686_v13 = vld [vmem:[#allocation2 + $0xb0] sm:$0xff]  }
 0x185   :  { %2796 = vmatpush1.bf16.msra.mxu0 %v4611_v28  ;;  %3083 = vmatpush1.bf16.msra.mxu1 %v4614_v29  ;;  %v4687_v28 = vld [vmem:[#allocation2 + $0x78] sm:$0xff]  }
 0x186   :  { %2797 = vmatprep.subr.bf16.mxu0 %v4619_v14  ;;  %3084 = vmatprep.subr.bf16.mxu1 %v4622_v30  ;;  %v4688_v29 = vld [vmem:[#allocation2 + $0xf8] sm:$0xff]  }
 0x187   :  { %v4689_v14 = vld [vmem:[#allocation2 + $0x38] sm:$0xff]  }
 0x188   :  { %v4690_v30 = vld [vmem:[#allocation2 + $0xb8] sm:$0xff]  }
 0x189   :  { %2798 = vmatpush1.bf16.msra.mxu0 %v4617_v31  ;;  %3085 = vmatpush1.bf16.msra.mxu1 %v4620_v25  ;;  %v442_v31 = vsub.s32 0, %v4908_v42  ;;  %v450_v25 = vsub.s32 2, %v4908_v42 }
 0x18a   :  { %2799 = vmatprep.subr.bf16.mxu0 %v4625_v32  ;;  %3086 = vmatprep.subr.bf16.mxu1 %v4628_v33  ;;  %v438_v32 = vld [vmem:[%s6087_s2] sm:$0xf]  ;;  %v446_v33 = vsub.s32 1, %v4908_v42 }
 0x18d   :  { %2800 = vmatpush1.bf16.msra.mxu0 %v4623_v34  ;;  %3087 = vmatpush1.bf16.msra.mxu1 %v4626_v26  ;;  %v454_v34 = vsub.s32 3, %v4908_v42  ;;  %v443_v26 = vrot.slane %v438_v32, %v442_v31 }
 0x18e   :  { %2801 = vmatprep.subr.bf16.mxu0 %v4631_v36  ;;  %3088 = vmatprep.subr.bf16.mxu1 %v4634_v38  ;;  %v451_v36 = vrot.slane %v438_v32, %v450_v25  ;;  %v447_v38 = vrot.slane %v438_v32, %v446_v33 }
 0x191   :  { %2802 = vmatpush1.bf16.msra.mxu0 %v4629_v39  ;;  %3089 = vmatpush1.bf16.msra.mxu1 %v4632_v40  ;;  %v455_v39 = vrot.slane %v438_v32, %v454_v34 }
 0x192   :  { %2812 = vmatprep.subr.bf16.mxu0 %v4637_v27  ;;  %3099 = vmatprep.subr.bf16.mxu1 %v4640_v41 }
 0x194   :  { %2804 = vmatmul.mubr.bf16.vlgmr.msra.gmra.mrb[0].mxu0 %v548_v43  ;;  %3091 = vmatmul.mubr.bf16.vlgmr.msra.gmra.mrb[0].mxu1 %v548_v43 }
 0x195   :  { %2813 = vmatpush1.bf16.msra.mxu0 %v4635_v44  ;;  %3100 = vmatpush1.bf16.msra.mxu1 %v4638_v35 }
 0x196   :  { %2814 = vmatprep.subr.bf16.mxu0 %v4643_v45  ;;  %3101 = vmatprep.subr.bf16.mxu1 %v4646_v37 }
 0x197   :  { %2844 = vmatprep.mubr.bf16.mxu0 %v4747_v51  ;;  %3131 = vmatprep.mubr.bf16.mxu1 %v4747_v51 }
 0x199   :  { %2815 = vmatpush1.bf16.msra.mxu0 %v4641_v46  ;;  %3102 = vmatpush1.bf16.msra.mxu1 %v4644_v47 }
 0x19a   :  { %2816 = vmatprep.subr.bf16.mxu0 %v4649_v48  ;;  %3103 = vmatprep.subr.bf16.mxu1 %v4652_v50 }
 0x19d   :  { %2817 = vmatpush1.bf16.msra.mxu0 %v4647_v54  ;;  %3104 = vmatpush1.bf16.msra.mxu1 %v4650_v55 }
 0x19e   :  { %2818 = vmatprep.subr.bf16.mxu0 %v4655_v56  ;;  %3105 = vmatprep.subr.bf16.mxu1 %v4658_v21 }
 0x1a1   :  { %2819 = vmatpush1.bf16.msra.mxu0 %v4653_v58  ;;  %3106 = vmatpush1.bf16.msra.mxu1 %v4656_v59 }
 0x1a2   :  { %3955 = vmatprep.subr.bf16.mxu0 %v4659_v60  ;;  %3977 = vmatprep.subr.bf16.mxu1 %v4660_v61  ;;  %v3922_v60 = vld [vmem:[%s6089_s4] ss:$0 sm:$0xff]  ;;  %s4748_s4 = smov [#allocation5]  }
 0x1a3   :  { %s3511_s21 = sshll.u32 %s4748_s4, 4  ;;  %s3512_s21 = int_to_ptr.vmem [resolvable:$true] %s3511_s21 }
 0x1a4   :  { %3920 = vmatmul.mubr.msk.bf16.vlgmr.msra.gmra.mrb[0].mxu0 %vm2562_vm0, %v540_v62  ;;  %3921 = vmatmul.mubr.msk.bf16.vlgmr.msra.gmra.mrb[0].mxu1 %vm2562_vm0, %v540_v62  ;;  %s4717_s22 = scalar_lea.vmem %s3512_s21, 32  ;;  %p4722_p9 = scmp.lt.s32.totalorder %s3512_s21, %s3512_s21 }
 0x1a5   :  { %3956 = vmatpush3.bf16.msra.mxu0 %v4661_v63  ;;  %3978 = vmatpush3.bf16.msra.mxu1 %v4662_v0  ;;  %p4718_p8 = scmp.ne.s32.totalorder %s3512_s21, %s4717_s22  ;;  %p4723_p10 = scmp.lt.s32.totalorder %s4717_s22, %s4717_s22 }
 0x1a6   :  { %3957 = vmatprep.subr.bf16.mxu0 %v4663_v1  ;;  %3979 = vmatprep.subr.bf16.mxu1 %v4664_v2 }
 0x1a7   :  { %p4724_p11 = por %p4723_p10, %p4722_p9 }
 0x1a9   :  { %3958 = vmatpush3.bf16.msra.mxu0 %v4665_v3  ;;  %3980 = vmatpush3.bf16.msra.mxu1 %v4666_v4  ;;  %p4725_p12 = pnand %p4724_p11, %p4718_p8 }
 0x1aa   :  { %3959 = vmatprep.subr.bf16.mxu0 %v4667_v5  ;;  %3981 = vmatprep.subr.bf16.mxu1 %v4668_v6 }
 0x1ad   :  { %3960 = vmatpush3.bf16.msra.mxu0 %v4669_v49  ;;  %3982 = vmatpush3.bf16.msra.mxu1 %v4670_v7 }
 0x1ae   :  { %3961 = vmatprep.subr.bf16.mxu0 %v4671_v8  ;;  %3983 = vmatprep.subr.bf16.mxu1 %v4672_v9 }
 0x1b1   :  { %3962 = vmatpush3.bf16.msra.mxu0 %v4673_v10  ;;  %3984 = vmatpush3.bf16.msra.mxu1 %v4674_v11 }
 0x1b2   :  { %3963 = vmatprep.subr.bf16.mxu0 %v4675_v12  ;;  %3985 = vmatprep.subr.bf16.mxu1 %v4676_v52 }
 0x1b5   :  { %3964 = vmatpush3.bf16.msra.mxu0 %v4677_v15  ;;  %3986 = vmatpush3.bf16.msra.mxu1 %v4678_v16 }
 0x1b6   :  { %3965 = vmatprep.subr.bf16.mxu0 %v4679_v17  ;;  %3987 = vmatprep.subr.bf16.mxu1 %v4680_v18 }
 0x1b9   :  { %3966 = vmatpush3.bf16.msra.mxu0 %v4681_v19  ;;  %3988 = vmatpush3.bf16.msra.mxu1 %v4682_v20 }
 0x1ba   :  { %3967 = vmatprep.subr.bf16.mxu0 %v4683_v22  ;;  %3989 = vmatprep.subr.bf16.mxu1 %v4684_v23 }
 0x1bd   :  { %3968 = vmatpush3.bf16.msra.mxu0 %v4685_v24  ;;  %3990 = vmatpush3.bf16.msra.mxu1 %v4686_v13 }
 0x1be   :  { %3969 = vmatprep.subr.bf16.mxu0 %v4687_v28  ;;  %3991 = vmatprep.subr.bf16.mxu1 %v4688_v29 }
 0x1c1   :  { %3970 = vmatpush3.bf16.msra.mxu0 %v4689_v14  ;;  %3992 = vmatpush3.bf16.msra.mxu1 %v4690_v30 }
 0x277   :  { %v2846_v40 = vpop.f32.mrb[0].mxu0  ;;  %v3133_v27 = vpop.f32.mrb[0].mxu1 }
 0x278   :  { %v3999_v41 = vadd.f32 %v2846_v40, %v443_v26  ;;  %v4001_v43 = vadd.f32 %v3133_v27, %v451_v36  ;;  %v2848_v44 = vpop.f32.mrb[1].mxu0  ;;  %v3135_v35 = vpop.f32.mrb[1].mxu1 }
 0x279   :  { %v4000_v45 = vadd.f32 %v2848_v44, %v447_v38  ;;  %v4002_v37 = vadd.f32 %v3135_v35, %v455_v39  ;;  %v2850_v46 = vpop.f32.mrb[2].mxu0  ;;  %v3137_v47 = vpop.f32.mrb[2].mxu1 }
 0x27a   :  { %v3140_v48 = vmax.f32 %v3999_v41, 0.0  ;;  %v3142_v50 = vmax.f32 %v4001_v43, 0.0  ;;  %v2851_v51 = vpop.f32.mrb[3].mxu0  ;;  %v3138_v53 = vpop.f32.mrb[3].mxu1 }
 0x27b   :  { %v3141_v54 = vmax.f32 %v4000_v45, 0.0  ;;  %v3143_v42 = vmax.f32 %v4002_v37, 0.0 }
 0x27c   :  { %v3144_v21 = vpack.c.bf16 %v3140_v48, %v3140_v48  ;;  %v3146_v57 = vpack.c.bf16 %v3142_v50, %v3142_v50 }
 0x27d   :  { %v3145_v55 = vpack.c.bf16 %v3141_v54, %v3141_v54  ;;  %v3147_v56 = vpack.c.bf16 %v3143_v42, %v3143_v42 }
 0x27f   :  { %3443 = vmatprep.mubr.bf16.mxu0 %v3145_v55  ;;  %3483 = vmatprep.mubr.bf16.mxu1 %v3147_v56 }
 0x280   :  { %3444 = vmatmul.mubr.bf16.vlgmr.msra.gmra.mrb[4].mxu0 %v3144_v21  ;;  %3484 = vmatmul.mubr.bf16.vlgmr.msra.gmra.mrb[4].mxu1 %v3146_v57 }
 0x353   :  { %v3971_v58 = vpop.f32.mrb[4].mxu0  ;;  %v3993_v59 = vpop.f32.mrb[4].mxu1 }
 0x354   :  { %v3972_v61 = vpop.f32.mrb[5].mxu0  ;;  %v3994_v62 = vpop.f32.mrb[5].mxu1 }
 0x355   :  { %v3973_v63 = vadd.f32 %v3972_v61, %v3971_v58  ;;  %v3995_v0 = vadd.f32 %v3994_v62, %v3993_v59  ;;  %v3974_v1 = vpop.f32.mrb[6].mxu0  ;;  %v3996_v2 = vpop.f32.mrb[6].mxu1 }
 0x356   :  { %v3975_v3 = vpop.f32.mrb[7].mxu0  ;;  %v3997_v4 = vpop.f32.mrb[7].mxu1 }
 0x357   :  { %v3446_v5 = vadd.f32 %v3973_v63, %v3922_v60 }
 0x359   :  { %v3486_v6 = vadd.f32 %v3995_v0, %v3446_v5 }
 0x35b   :  { %v3492_v49 = vsel %vm3491_vm1, %v3486_v6, -inf }
 0x35c   :  { %3493 = vmax.xlane.f32.xlu0 %v3492_v49 }
 0x3e9   :  { %v3494_v7 = vpop.xlane.xlu0 %3493 }
 0x3ea   :  { %v3495_v8 = vsub.f32 %v3486_v6, %v3494_v7 }
 0x3ec   :  { %v3496_v9 = vmul.f32 1.442695, %v3495_v8 }
 0x3ee   :  { %4691 = vpow2.f32 %v3496_v9 }
 0x3f8   :  { %v4692_v10 = vpop.eup %4691 }
 0x3f9   :  { %v3498_v11 = vsel %vm3491_vm1, %v4692_v10, 0.0 }
 0x3fa   :  { %3499 = vadd.xlane.f32.xlu0 %v3498_v11 }
 0x487   :  { %v3500_v12 = vpop.xlane.xlu0 %3499 }
 0x488   :  { %4693 = vlog2.f32 %v3500_v12 }
 0x492   :  { %v4694_v52 = vpop.eup %4693 }
 0x493   :  { %v3502_v15 = vmul.f32 0.6931472, %v4694_v52 }
 0x495   :  { %v3503_v16 = vsub.f32 %v3495_v8, %v3502_v15 }
 0x497   :  { %3504 = vst [vmem:[#allocation5] sm:$0x3] %v3503_v16 }
 0x498   :  { %4728 = shalt.err (!%p4725_p12)
}
 0x499   :  { %s4729_s24 = scalar_lea.hbm %s6090_s5, 32 }
 0x49a   :  { %p4730_p13 = scmp.ne.s32.totalorder %s6090_s5, %s4729_s24  ;;  %p4733_p0 = scmp.lt.u32.totalorder %s4729_s24, %s6090_s5 }
 0x49c   :  { %p4735_p1 = pnand %p4733_p0, %p4730_p13 }
 0x49e   :  { %4738 = shalt.err (!%p4735_p1)
}
 0x49f   :  { %3514 = dma.vmem_to_hbm [thread:$0]  %s3512_s21, 32, %s6090_s5, [#allocation4]  }
 0x4a0   :  { %4741 = dma.done.wait [#allocation4], 32  }
 0x4a1   :  { %4742 = vsyncadd [#allocation4], 4294967264 }
 0x4a2   :  { %3518 = vsyncpa [#allocation3], 1 }
 0x4a3   :  { %3519 = vsyncpa [#allocation4], 1 }

// kernel: net_forward.2
= control target key start
LH: loop header
LB: loop body
LE: loop exit
PB: predicated region body
PF: predicated region fallthrough
CT: control target
= control target key end

     0   :  { %8 = vsyncpa [#allocation9], 0  ;;  %s6548_s12 = smov [#allocation8]   ;;  %s9830_s0 = inlined_call_operand.vmem [shape: f32[1,784,2], index: 0, kind: input, shape index: {}]   ;;  %s9831_s1 = inlined_call_operand.hbm [shape: f32[16,128], index: 1, kind: input, shape index: {}]   ;;  %s9832_s2 = inlined_call_operand.vmem [shape: bf16[1152,64], index: 2, kind: input, shape index: {}]   ;;  %s9833_s3 = inlined_call_operand.vmem [shape: bf16[2,25,64], index: 3, kind: output, shape index: {}]  }
   0x1   :  { %s16_s13 = sshll.u32 %s6548_s12, 4  ;;  %s6516_s16 = scalar_lea.hbm %s9831_s1, 256  ;;  %s17_s13 = int_to_ptr.vmem [resolvable:$true] %s16_s13 }
   0x2   :  { %p6517_p0 = scmp.ne.s32.totalorder %s9831_s1, %s6516_s16  ;;  %p6520_p1 = scmp.lt.u32.totalorder %s6516_s16, %s9831_s1 }
   0x4   :  { %p6522_p2 = pnand %p6520_p1, %p6517_p0 }
   0x6   :  { %6525 = shalt.err (!%p6522_p2)
}
   0x7   :  { %s6526_s21 = scalar_lea.vmem %s17_s13, 256  ;;  %p6531_p4 = scmp.lt.s32.totalorder %s17_s13, %s17_s13 }
   0x8   :  { %p6527_p3 = scmp.ne.s32.totalorder %s17_s13, %s6526_s21  ;;  %p6532_p5 = scmp.lt.s32.totalorder %s6526_s21, %s6526_s21 }
   0xa   :  { %p6533_p6 = por %p6532_p5, %p6531_p4 }
   0xc   :  { %p6534_p7 = pnand %p6533_p6, %p6527_p3 }
   0xe   :  { %6537 = shalt.err (!%p6534_p7)
}
   0xf   :  { %s6549_s22 = smov 128   ;;  %s6550_s23 = smov 8  }
  0x10   :  { %22 = dma.hbm_to_vmem [thread:$0]  %s9831_s1, 256, %s17_s13, [#allocation9], %s6549_s22, %s6549_s22, %s6550_s23  }
  0x11   :  { %6542 = dma.done.wait [#allocation9], 256  }
  0x12   :  { %6543 = vsyncadd [#allocation9], 4294967040  ;;  %v6551_v0 = vmov 0.0   ;;  %v6584_v1 = vld [vmem:[#allocation8] ss:$0 sm:$0xff]  ;;  %s6602_s1 = smov 0  }
  0x13   :  { %38 = vst [vmem:[#allocation2 + $0x310] sm:$0xff] %v6551_v0  ;;  %v6586_v2 = vld [vmem:[#allocation8 + $0x1] ss:$0 sm:$0xff]  ;;  %v6588_v3 = vld [vmem:[#allocation8 + $0x2] ss:$0 sm:$0xff] }
  0x14   :  { %v6590_v4 = vld [vmem:[#allocation8 + $0x3] ss:$0 sm:$0xff]  ;;  %v6592_v5 = vld [vmem:[#allocation8 + $0x4] ss:$0 sm:$0xff]  ;;  %v6594_v6 = vld [vmem:[#allocation8 + $0x5] ss:$0 sm:$0xff] }
  0x15   :  { %v6596_v7 = vld [vmem:[#allocation8 + $0x6] ss:$0 sm:$0xff]  ;;  %v6598_v8 = vld [vmem:[#allocation8 + $0x7] ss:$0 sm:$0xff]  ;;  %v6600_v9 = vld [vmem:[#allocation8 + $0x8] ss:$0 sm:$0xff] }
  0x16 LB: > { %v144_v10 = vlaneseq  ;;  %v48_v11 = vld [vmem:[%s9830_s0 + $0x10] sm:$0xff]  ;;  %v146_v13 = vstv %s6546_s1  ;;  %v46_v14 = vld [vmem:[%s9830_s0] sm:$0xff]  ;;  %v49_v15 = vld [vmem:[%s9830_s0 + $0x18] sm:$0xff]  ;;  %vm248_vm0 = vcmask 15360   ;;  %s5728_s6 = sshll.u32 %s6546_s1, 7  ;;  %s45_s1 = sadd.s32 1, %s6546_s1   ;;  %s6546_s1 = sphi %s6602_s1, %s45_s1  }
  0x17   : > { %v47_v16 = vld [vmem:[%s9830_s0 + $0x8] sm:$0xff]  ;;  %v50_v25 = vld [vmem:[%s9830_s0 + $0x20] sm:$0xff]  ;;  %v53_v30 = vld [vmem:[%s9830_s0 + $0x38] sm:$0xff]  ;;  %s7780_s7 = sshra.s32 %s5728_s6, 4  ;;  %p42_p8 = scmp.ge.s32.totalorder %s45_s1, 2  }
  0x18   : > { %v145_v12 = vand.u32 127, %v144_v10  ;;  %v51_v24 = vld [vmem:[%s9830_s0 + $0x28] sm:$0xff]  ;;  %v52_v31 = vld [vmem:[%s9830_s0 + $0x30] sm:$0xff]  ;;  %v54_v37 = vld [vmem:[%s9830_s0 + $0x40] sm:$0xff]  ;;  %s5823_s8 = smul.u32 72, %s7780_s7  ;;  %vm5420_vm2 = vcmask (%p42_p8), 523264  }
  0x19   : > { %v55_v36 = vld [vmem:[%s9830_s0 + $0x48] sm:$0xff]  ;;  %v57_v42 = vld [vmem:[%s9830_s0 + $0x58] sm:$0xff]  ;;  %v56_v43 = vld [vmem:[%s9830_s0 + $0x50] sm:$0xff]  ;;  %vm5464_vm3 = vcmask (%p42_p8), 518144   ;;  %vm5465_vm4 = vsmask.f32 (%p42_p8), 2304 }
  0x1a   : > { %vm6620_vm1 = vcmp.eq.s32.totalorder %v145_v12, %v146_v13  ;;  %v59_v48 = vld [vmem:[%s9830_s0 + $0x68] sm:$0xff]  ;;  %v58_v49 = vld [vmem:[%s9830_s0 + $0x60] sm:$0xff]  ;;  %v61_v54 = vld [vmem:[%s9830_s0 + $0x78] sm:$0xff]  ;;  %s7819_s9 = scalar_lea.vmem [#allocation6], %s5823_s8  ;;  %vm5502_vm6 = vcmask (%p42_p8), 516096   ;;  %vm5496_vm7 = vcmask (%p42_p8), 519170  }
  0x1b   : > { %v152_v18 = vsel %vm6620_vm1, %v48_v11, 0.0  ;;  %v150_v19 = vsel %vm6620_vm1, %v46_v14, 0.0  ;;  %v153_v20 = vsel %vm6620_vm1, %v49_v15, 0.0  ;;  %v151_v21 = vsel %vm6620_vm1, %v47_v16, 0.0  ;;  %v60_v55 = vld [vmem:[%s9830_s0 + $0x70] sm:$0xff]  ;;  %v63_v60 = vld [vmem:[%s9830_s0 + $0x88] sm:$0xff]  ;;  %vm9637_vm5 = vmand (%p42_p8), %vm5464_vm3, %vm5465_vm4 }
  0x1c   : > { %v255_v22 = vsel %vm248_vm0, %v152_v18, 0.0  ;;  %v249_v23 = vsel %vm248_vm0, %v150_v19, 0.0  ;;  %v258_v26 = vsel %vm248_vm0, %v153_v20, 0.0  ;;  %v252_v27 = vsel %vm248_vm0, %v151_v21, 0.0  ;;  %v62_v61 = vld [vmem:[%s9830_s0 + $0x80] sm:$0xff]  ;;  %v65_v11 = vld [vmem:[%s9830_s0 + $0x98] sm:$0xff] }
  0x1d   : > { %256 = vadd.xlane.f32.xlu1 %v255_v22  ;;  %250 = vadd.xlane.f32.xlu0 %v249_v23  ;;  %v155_v28 = vsel %vm6620_vm1, %v51_v24, 0.0  ;;  %v154_v29 = vsel %vm6620_vm1, %v50_v25, 0.0  ;;  %v157_v34 = vsel %vm6620_vm1, %v53_v30, 0.0  ;;  %v156_v35 = vsel %vm6620_vm1, %v52_v31, 0.0  ;;  %v64_v12 = vld [vmem:[%s9830_s0 + $0x90] sm:$0xff]  ;;  %v67_v18 = vld [vmem:[%s9830_s0 + $0xa8] sm:$0xff] }
  0x1e   : > { %v264_v32 = vsel %vm248_vm0, %v155_v28, 0.0  ;;  %v261_v33 = vsel %vm248_vm0, %v154_v29, 0.0  ;;  %v270_v38 = vsel %vm248_vm0, %v157_v34, 0.0  ;;  %v267_v39 = vsel %vm248_vm0, %v156_v35, 0.0  ;;  %v66_v19 = vld [vmem:[%s9830_s0 + $0xa0] sm:$0xff]  ;;  %v69_v24 = vld [vmem:[%s9830_s0 + $0xb8] sm:$0xff] }
  0x1f   : > { %v159_v40 = vsel %vm6620_vm1, %v55_v36, 0.0  ;;  %v158_v41 = vsel %vm6620_vm1, %v54_v37, 0.0  ;;  %v161_v46 = vsel %vm6620_vm1, %v57_v42, 0.0  ;;  %v160_v47 = vsel %vm6620_vm1, %v56_v43, 0.0  ;;  %v68_v25 = vld [vmem:[%s9830_s0 + $0xb0] sm:$0xff]  ;;  %v71_v30 = vld [vmem:[%s9830_s0 + $0xc8] sm:$0xff] }
  0x20   : > { %v276_v44 = vsel %vm248_vm0, %v159_v40, 0.0  ;;  %v273_v45 = vsel %vm248_vm0, %v158_v41, 0.0  ;;  %v282_v50 = vsel %vm248_vm0, %v161_v46, 0.0  ;;  %v279_v51 = vsel %vm248_vm0, %v160_v47, 0.0  ;;  %v70_v31 = vld [vmem:[%s9830_s0 + $0xc0] sm:$0xff]  ;;  %v73_v36 = vld [vmem:[%s9830_s0 + $0xd8] sm:$0xff] }
  0x21   : > { %259 = vadd.xlane.f32.xlu1 %v258_v26  ;;  %253 = vadd.xlane.f32.xlu0 %v252_v27  ;;  %v163_v52 = vsel %vm6620_vm1, %v59_v48, 0.0  ;;  %v162_v53 = vsel %vm6620_vm1, %v58_v49, 0.0  ;;  %v165_v58 = vsel %vm6620_vm1, %v61_v54, 0.0  ;;  %v164_v59 = vsel %vm6620_vm1, %v60_v55, 0.0  ;;  %v72_v37 = vld [vmem:[%s9830_s0 + $0xd0] sm:$0xff]  ;;  %v75_v42 = vld [vmem:[%s9830_s0 + $0xe8] sm:$0xff] }
  0x22   : > { %v288_v56 = vsel %vm248_vm0, %v163_v52, 0.0  ;;  %v285_v57 = vsel %vm248_vm0, %v162_v53, 0.0  ;;  %v294_v62 = vsel %vm248_vm0, %v165_v58, 0.0  ;;  %v291_v63 = vsel %vm248_vm0, %v164_v59, 0.0  ;;  %v74_v43 = vld [vmem:[%s9830_s0 + $0xe0] sm:$0xff]  ;;  %v77_v48 = vld [vmem:[%s9830_s0 + $0xf8] sm:$0xff] }
  0x23   : > { %v167_v0 = vsel %vm6620_vm1, %v63_v60, 0.0  ;;  %v166_v10 = vsel %vm6620_vm1, %v62_v61, 0.0  ;;  %v169_v15 = vsel %vm6620_vm1, %v65_v11, 0.0  ;;  %v168_v16 = vsel %vm6620_vm1, %v64_v12, 0.0  ;;  %v76_v49 = vld [vmem:[%s9830_s0 + $0xf0] sm:$0xff]  ;;  %v79_v54 = vld [vmem:[%s9830_s0 + $0x108] sm:$0xff] }
  0x24   : > { %v300_v13 = vsel %vm248_vm0, %v167_v0, 0.0  ;;  %v297_v14 = vsel %vm248_vm0, %v166_v10, 0.0  ;;  %v306_v20 = vsel %vm248_vm0, %v169_v15, 0.0  ;;  %v303_v21 = vsel %vm248_vm0, %v168_v16, 0.0  ;;  %v78_v55 = vld [vmem:[%s9830_s0 + $0x100] sm:$0xff]  ;;  %v81_v60 = vld [vmem:[%s9830_s0 + $0x118] sm:$0xff] }
  0x25   : > { %265 = vadd.xlane.f32.xlu1 %v264_v32  ;;  %262 = vadd.xlane.f32.xlu0 %v261_v33  ;;  %v171_v22 = vsel %vm6620_vm1, %v67_v18, 0.0  ;;  %v170_v23 = vsel %vm6620_vm1, %v66_v19, 0.0  ;;  %v173_v28 = vsel %vm6620_vm1, %v69_v24, 0.0  ;;  %v172_v29 = vsel %vm6620_vm1, %v68_v25, 0.0  ;;  %v80_v61 = vld [vmem:[%s9830_s0 + $0x110] sm:$0xff]  ;;  %v83_v11 = vld [vmem:[%s9830_s0 + $0x128] sm:$0xff] }
  0x26   : > { %v312_v26 = vsel %vm248_vm0, %v171_v22, 0.0  ;;  %v309_v27 = vsel %vm248_vm0, %v170_v23, 0.0  ;;  %v318_v32 = vsel %vm248_vm0, %v173_v28, 0.0  ;;  %v315_v33 = vsel %vm248_vm0, %v172_v29, 0.0  ;;  %v82_v12 = vld [vmem:[%s9830_s0 + $0x120] sm:$0xff]  ;;  %v85_v18 = vld [vmem:[%s9830_s0 + $0x138] sm:$0xff] }
  0x27   : > { %v175_v34 = vsel %vm6620_vm1, %v71_v30, 0.0  ;;  %v174_v35 = vsel %vm6620_vm1, %v70_v31, 0.0  ;;  %v177_v40 = vsel %vm6620_vm1, %v73_v36, 0.0  ;;  %v176_v41 = vsel %vm6620_vm1, %v72_v37, 0.0  ;;  %v84_v19 = vld [vmem:[%s9830_s0 + $0x130] sm:$0xff]  ;;  %v87_v24 = vld [vmem:[%s9830_s0 + $0x148] sm:$0xff] }
  0x28   : > { %v179_v46 = vsel %vm6620_vm1, %v75_v42, 0.0  ;;  %v178_v47 = vsel %vm6620_vm1, %v74_v43, 0.0  ;;  %v181_v52 = vsel %vm6620_vm1, %v77_v48, 0.0  ;;  %v180_v53 = vsel %vm6620_vm1, %v76_v49, 0.0  ;;  %v86_v25 = vld [vmem:[%s9830_s0 + $0x140] sm:$0xff]  ;;  %v89_v30 = vld [vmem:[%s9830_s0 + $0x158] sm:$0xff] }
  0x29   : > { %271 = vadd.xlane.f32.xlu1 %v270_v38  ;;  %268 = vadd.xlane.f32.xlu0 %v267_v39  ;;  %v324_v38 = vsel %vm248_vm0, %v175_v34, 0.0  ;;  %v321_v39 = vsel %vm248_vm0, %v174_v35, 0.0  ;;  %v183_v58 = vsel %vm6620_vm1, %v79_v54, 0.0  ;;  %v182_v59 = vsel %vm6620_vm1, %v78_v55, 0.0  ;;  %v88_v31 = vld [vmem:[%s9830_s0 + $0x150] sm:$0xff]  ;;  %v91_v36 = vld [vmem:[%s9830_s0 + $0x168] sm:$0xff] }
  0x2a   : > { %v185_v0 = vsel %vm6620_vm1, %v81_v60, 0.0  ;;  %v184_v10 = vsel %vm6620_vm1, %v80_v61, 0.0  ;;  %v187_v15 = vsel %vm6620_vm1, %v83_v11, 0.0  ;;  %v186_v16 = vsel %vm6620_vm1, %v82_v12, 0.0  ;;  %v90_v37 = vld [vmem:[%s9830_s0 + $0x160] sm:$0xff]  ;;  %v93_v42 = vld [vmem:[%s9830_s0 + $0x178] sm:$0xff] }
  0x2b   : > { %v189_v22 = vsel %vm6620_vm1, %v85_v18, 0.0  ;;  %v188_v23 = vsel %vm6620_vm1, %v84_v19, 0.0  ;;  %v191_v28 = vsel %vm6620_vm1, %v87_v24, 0.0  ;;  %v190_v29 = vsel %vm6620_vm1, %v86_v25, 0.0  ;;  %v92_v43 = vld [vmem:[%s9830_s0 + $0x170] sm:$0xff]  ;;  %v95_v48 = vld [vmem:[%s9830_s0 + $0x188] sm:$0xff] }
  0x2c   : > { %v193_v34 = vsel %vm6620_vm1, %v89_v30, 0.0  ;;  %v192_v35 = vsel %vm6620_vm1, %v88_v31, 0.0  ;;  %v94_v49 = vld [vmem:[%s9830_s0 + $0x180] sm:$0xff]  ;;  %v97_v54 = vld [vmem:[%s9830_s0 + $0x198] sm:$0xff]  ;;  %v96_v55 = vld [vmem:[%s9830_s0 + $0x190] sm:$0xff]  ;;  %vm5521_vm11 = vcmask (%p42_p8), 519169  }
  0x2d   : > { %277 = vadd.xlane.f32.xlu1 %v276_v44  ;;  %274 = vadd.xlane.f32.xlu0 %v273_v45  ;;  %v330_v44 = vsel %vm248_vm0, %v177_v40, 0.0  ;;  %v327_v45 = vsel %vm248_vm0, %v176_v41, 0.0  ;;  %v195_v40 = vsel %vm6620_vm1, %v91_v36, 0.0  ;;  %v194_v41 = vsel %vm6620_vm1, %v90_v37, 0.0  ;;  %v99_v60 = vld [vmem:[%s9830_s0 + $0x1a8] sm:$0xff]  ;;  %v98_v61 = vld [vmem:[%s9830_s0 + $0x1a0] sm:$0xff] }
  0x2e   : > { %v101_v11 = vld [vmem:[%s9830_s0 + $0x1b8] sm:$0xff]  ;;  %v100_v12 = vld [vmem:[%s9830_s0 + $0x1b0] sm:$0xff]  ;;  %v103_v18 = vld [vmem:[%s9830_s0 + $0x1c8] sm:$0xff]  ;;  %vm5497_vm8 = vsmask.f32 (%p42_p8), 7946  ;;  %vm5553_vm12 = vcmask (%p42_p8), 519171  }
  0x2f   : > { %v102_v19 = vld [vmem:[%s9830_s0 + $0x1c0] sm:$0xff]  ;;  %v105_v24 = vld [vmem:[%s9830_s0 + $0x1d8] sm:$0xff]  ;;  %v104_v25 = vld [vmem:[%s9830_s0 + $0x1d0] sm:$0xff]  ;;  %vm5522_vm9 = vsmask.f32 (%p42_p8), 3328  ;;  %vm5559_vm3 = vcmask (%p42_p8), 517120  }
  0x30   : > { %v107_v30 = vld [vmem:[%s9830_s0 + $0x1e8] sm:$0xff]  ;;  %v106_v31 = vld [vmem:[%s9830_s0 + $0x1e0] sm:$0xff]  ;;  %v109_v36 = vld [vmem:[%s9830_s0 + $0x1f8] sm:$0xff]  ;;  %vm5554_vm13 = vsmask.f32 (%p42_p8), 7950 }
  0x31   : > { %283 = vadd.xlane.f32.xlu1 %v282_v50  ;;  %280 = vadd.xlane.f32.xlu0 %v279_v51  ;;  %v336_v50 = vsel %vm248_vm0, %v179_v46, 0.0  ;;  %v333_v51 = vsel %vm248_vm0, %v178_v47, 0.0  ;;  %v197_v46 = vsel %vm6620_vm1, %v93_v42, 0.0  ;;  %v196_v47 = vsel %vm6620_vm1, %v92_v43, 0.0  ;;  %v108_v37 = vld [vmem:[%s9830_s0 + $0x1f0] sm:$0xff]  ;;  %v111_v42 = vld [vmem:[%s9830_s0 + $0x208] sm:$0xff]  ;;  %vm9677_vm10 = vmand (%p42_p8), %vm5496_vm7, %vm5497_vm8 }
  0x32   : > { %v110_v43 = vld [vmem:[%s9830_s0 + $0x200] sm:$0xff]  ;;  %vm9705_vm14 = vmand (%p42_p8), %vm5521_vm11, %vm5522_vm9  ;;  %vm5583_vm15 = vsmask.f32 (%p42_p8), 256 }
  0x35   : > { %289 = vadd.xlane.f32.xlu1 %v288_v56  ;;  %286 = vadd.xlane.f32.xlu0 %v285_v57  ;;  %v342_v56 = vsel %vm248_vm0, %v181_v52, 0.0  ;;  %v339_v57 = vsel %vm248_vm0, %v180_v53, 0.0  ;;  %v199_v52 = vsel %vm6620_vm1, %v95_v48, 0.0  ;;  %v198_v53 = vsel %vm6620_vm1, %v94_v49, 0.0  ;;  %v113_v48 = vld [vmem:[%s9830_s0 + $0x218] sm:$0xff]  ;;  %v112_v49 = vld [vmem:[%s9830_s0 + $0x210] sm:$0xff] }
  0x39   : > { %295 = vadd.xlane.f32.xlu1 %v294_v62  ;;  %292 = vadd.xlane.f32.xlu0 %v291_v63  ;;  %v348_v62 = vsel %vm248_vm0, %v183_v58, 0.0  ;;  %v345_v63 = vsel %vm248_vm0, %v182_v59, 0.0  ;;  %v201_v58 = vsel %vm6620_vm1, %v97_v54, 0.0  ;;  %v200_v59 = vsel %vm6620_vm1, %v96_v55, 0.0  ;;  %v115_v54 = vld [vmem:[%s9830_s0 + $0x228] sm:$0xff]  ;;  %v114_v55 = vld [vmem:[%s9830_s0 + $0x220] sm:$0xff] }
  0x3d   : > { %301 = vadd.xlane.f32.xlu1 %v300_v13  ;;  %298 = vadd.xlane.f32.xlu0 %v297_v14  ;;  %v354_v13 = vsel %vm248_vm0, %v185_v0, 0.0  ;;  %v351_v14 = vsel %vm248_vm0, %v184_v10, 0.0  ;;  %v203_v0 = vsel %vm6620_vm1, %v99_v60, 0.0  ;;  %v202_v10 = vsel %vm6620_vm1, %v98_v61, 0.0  ;;  %v117_v60 = vld [vmem:[%s9830_s0 + $0x238] sm:$0xff]  ;;  %v116_v61 = vld [vmem:[%s9830_s0 + $0x230] sm:$0xff] }
  0x41   : > { %307 = vadd.xlane.f32.xlu1 %v306_v20  ;;  %304 = vadd.xlane.f32.xlu0 %v303_v21  ;;  %v360_v20 = vsel %vm248_vm0, %v187_v15, 0.0  ;;  %v357_v21 = vsel %vm248_vm0, %v186_v16, 0.0  ;;  %v205_v15 = vsel %vm6620_vm1, %v101_v11, 0.0  ;;  %v204_v16 = vsel %vm6620_vm1, %v100_v12, 0.0  ;;  %v119_v11 = vld [vmem:[%s9830_s0 + $0x248] sm:$0xff]  ;;  %v118_v12 = vld [vmem:[%s9830_s0 + $0x240] sm:$0xff] }
  0x45   : > { %313 = vadd.xlane.f32.xlu1 %v312_v26  ;;  %310 = vadd.xlane.f32.xlu0 %v309_v27  ;;  %v366_v26 = vsel %vm248_vm0, %v189_v22, 0.0  ;;  %v363_v27 = vsel %vm248_vm0, %v188_v23, 0.0  ;;  %v207_v22 = vsel %vm6620_vm1, %v103_v18, 0.0  ;;  %v206_v23 = vsel %vm6620_vm1, %v102_v19, 0.0  ;;  %v123_v19 = vld [vmem:[%s9830_s0 + $0x268] sm:$0xff] }
  0x46   : > { %v223_v18 = vsel %vm6620_vm1, %v119_v11, 0.0  ;;  %v141_v11 = vld [vmem:[%s9830_s0 + $0x2f8] sm:$0xff] }
  0x49   : > { %319 = vadd.xlane.f32.xlu1 %v318_v32  ;;  %316 = vadd.xlane.f32.xlu0 %v315_v33  ;;  %v372_v32 = vsel %vm248_vm0, %v191_v28, 0.0  ;;  %v369_v33 = vsel %vm248_vm0, %v190_v29, 0.0  ;;  %v209_v28 = vsel %vm6620_vm1, %v105_v24, 0.0  ;;  %v208_v29 = vsel %vm6620_vm1, %v104_v25, 0.0  ;;  %v124_v25 = vld [vmem:[%s9830_s0 + $0x270] sm:$0xff] }
  0x4d   : > { %325 = vadd.xlane.f32.xlu1 %v324_v38  ;;  %322 = vadd.xlane.f32.xlu0 %v321_v39  ;;  %v378_v38 = vsel %vm248_vm0, %v193_v34, 0.0  ;;  %v375_v39 = vsel %vm248_vm0, %v192_v35, 0.0  ;;  %v211_v34 = vsel %vm6620_vm1, %v107_v30, 0.0  ;;  %v210_v35 = vsel %vm6620_vm1, %v106_v31, 0.0  ;;  %v129_v30 = vld [vmem:[%s9830_s0 + $0x298] sm:$0xff]  ;;  %v128_v31 = vld [vmem:[%s9830_s0 + $0x290] sm:$0xff] }
  0x51   : > { %331 = vadd.xlane.f32.xlu1 %v330_v44  ;;  %328 = vadd.xlane.f32.xlu0 %v327_v45  ;;  %v384_v44 = vsel %vm248_vm0, %v195_v40, 0.0  ;;  %v381_v45 = vsel %vm248_vm0, %v194_v41, 0.0  ;;  %v213_v40 = vsel %vm6620_vm1, %v109_v36, 0.0  ;;  %v212_v41 = vsel %vm6620_vm1, %v108_v37, 0.0 }
  0x55   : > { %337 = vadd.xlane.f32.xlu1 %v336_v50  ;;  %334 = vadd.xlane.f32.xlu0 %v333_v51  ;;  %v390_v50 = vsel %vm248_vm0, %v197_v46, 0.0  ;;  %v387_v51 = vsel %vm248_vm0, %v196_v47, 0.0  ;;  %v215_v46 = vsel %vm6620_vm1, %v111_v42, 0.0  ;;  %v214_v47 = vsel %vm6620_vm1, %v110_v43, 0.0 }
  0x59   : > { %343 = vadd.xlane.f32.xlu1 %v342_v56  ;;  %340 = vadd.xlane.f32.xlu0 %v339_v57  ;;  %v396_v56 = vsel %vm248_vm0, %v199_v52, 0.0  ;;  %v393_v57 = vsel %vm248_vm0, %v198_v53, 0.0  ;;  %v217_v52 = vsel %vm6620_vm1, %v113_v48, 0.0  ;;  %v216_v53 = vsel %vm6620_vm1, %v112_v49, 0.0  ;;  %v132_v48 = vld [vmem:[%s9830_s0 + $0x2b0] sm:$0xff] }
  0x5d   : > { %349 = vadd.xlane.f32.xlu1 %v348_v62  ;;  %346 = vadd.xlane.f32.xlu0 %v345_v63  ;;  %v402_v62 = vsel %vm248_vm0, %v201_v58, 0.0  ;;  %v399_v63 = vsel %vm248_vm0, %v200_v59, 0.0  ;;  %v219_v58 = vsel %vm6620_vm1, %v115_v54, 0.0  ;;  %v218_v59 = vsel %vm6620_vm1, %v114_v55, 0.0  ;;  %v137_v54 = vld [vmem:[%s9830_s0 + $0x2d8] sm:$0xff] }
  0x61   : > { %355 = vadd.xlane.f32.xlu1 %v354_v13  ;;  %352 = vadd.xlane.f32.xlu0 %v351_v14  ;;  %v408_v13 = vsel %vm248_vm0, %v203_v0, 0.0  ;;  %v405_v14 = vsel %vm248_vm0, %v202_v10, 0.0  ;;  %v221_v0 = vsel %vm6620_vm1, %v117_v60, 0.0  ;;  %v220_v10 = vsel %vm6620_vm1, %v116_v61, 0.0  ;;  %v136_v60 = vld [vmem:[%s9830_s0 + $0x2d0] sm:$0xff]  ;;  %v139_v61 = vld [vmem:[%s9830_s0 + $0x2e8] sm:$0xff] }
  0x65   : > { %361 = vadd.xlane.f32.xlu1 %v360_v20  ;;  %358 = vadd.xlane.f32.xlu0 %v357_v21  ;;  %v414_v20 = vsel %vm248_vm0, %v205_v15, 0.0  ;;  %v411_v21 = vsel %vm248_vm0, %v204_v16, 0.0  ;;  %v462_v15 = vsel %vm248_vm0, %v221_v0, 0.0  ;;  %v459_v16 = vsel %vm248_vm0, %v220_v10, 0.0 }
  0x69   : > { %367 = vadd.xlane.f32.xlu1 %v366_v26  ;;  %364 = vadd.xlane.f32.xlu0 %v363_v27  ;;  %v420_v26 = vsel %vm248_vm0, %v207_v22, 0.0  ;;  %v417_v27 = vsel %vm248_vm0, %v206_v23, 0.0  ;;  %v122_v22 = vld [vmem:[%s9830_s0 + $0x260] sm:$0xff]  ;;  %v125_v23 = vld [vmem:[%s9830_s0 + $0x278] sm:$0xff] }
  0x6a   : > { %v226_v36 = vsel %vm6620_vm1, %v122_v22, 0.0  ;;  %v229_v37 = vsel %vm6620_vm1, %v125_v23, 0.0  ;;  %v243_v22 = vsel %vm6620_vm1, %v139_v61, 0.0 }
  0x6b   : > { %v477_v49 = vsel %vm248_vm0, %v226_v36, 0.0 }
  0x6d   : > { %373 = vadd.xlane.f32.xlu1 %v372_v32  ;;  %370 = vadd.xlane.f32.xlu0 %v369_v33  ;;  %v426_v32 = vsel %vm248_vm0, %v209_v28, 0.0  ;;  %v423_v33 = vsel %vm248_vm0, %v208_v29, 0.0  ;;  %v468_v28 = vsel %vm248_vm0, %v223_v18, 0.0  ;;  %v227_v29 = vsel %vm6620_vm1, %v123_v19, 0.0 }
  0x6e   : > { %v480_v43 = vsel %vm248_vm0, %v227_v29, 0.0 }
  0x71   : > { %379 = vadd.xlane.f32.xlu1 %v378_v38  ;;  %376 = vadd.xlane.f32.xlu0 %v375_v39  ;;  %v432_v38 = vsel %vm248_vm0, %v211_v34, 0.0  ;;  %v429_v39 = vsel %vm248_vm0, %v210_v35, 0.0 }
  0x75   : > { %385 = vadd.xlane.f32.xlu1 %v384_v44  ;;  %382 = vadd.xlane.f32.xlu0 %v381_v45  ;;  %v438_v44 = vsel %vm248_vm0, %v213_v40, 0.0  ;;  %v435_v45 = vsel %vm248_vm0, %v212_v41, 0.0  ;;  %v228_v40 = vsel %vm6620_vm1, %v124_v25, 0.0 }
  0x79   : > { %391 = vadd.xlane.f32.xlu1 %v390_v50  ;;  %388 = vadd.xlane.f32.xlu0 %v387_v51  ;;  %v444_v50 = vsel %vm248_vm0, %v215_v46, 0.0  ;;  %v441_v51 = vsel %vm248_vm0, %v214_v47, 0.0  ;;  %v130_v46 = vld [vmem:[%s9830_s0 + $0x2a0] sm:$0xff]  ;;  %v133_v47 = vld [vmem:[%s9830_s0 + $0x2b8] sm:$0xff] }
  0x7a   : > { %v234_v10 = vsel %vm6620_vm1, %v130_v46, 0.0 }
  0x7b   : > { %v7203_v29 = vsel %vm248_vm0, %v234_v10, 0.0 }
  0x7d   : > { %397 = vadd.xlane.f32.xlu1 %v396_v56  ;;  %394 = vadd.xlane.f32.xlu0 %v393_v57  ;;  %v450_v56 = vsel %vm248_vm0, %v217_v52, 0.0  ;;  %v447_v57 = vsel %vm248_vm0, %v216_v53, 0.0  ;;  %v135_v52 = vld [vmem:[%s9830_s0 + $0x2c8] sm:$0xff]  ;;  %v134_v53 = vld [vmem:[%s9830_s0 + $0x2c0] sm:$0xff] }
  0x7e   : > { %v239_v18 = vsel %vm6620_vm1, %v135_v52, 0.0  ;;  %v238_v19 = vsel %vm6620_vm1, %v134_v53, 0.0 }
  0x7f   : > { %v7218_v36 = vsel %vm248_vm0, %v238_v19, 0.0 }
  0x81   : > { %403 = vadd.xlane.f32.xlu1 %v402_v62  ;;  %400 = vadd.xlane.f32.xlu0 %v399_v63  ;;  %v456_v62 = vsel %vm248_vm0, %v219_v58, 0.0  ;;  %v453_v63 = vsel %vm248_vm0, %v218_v59, 0.0 }
  0x85   : > { %409 = vadd.xlane.f32.xlu1 %v408_v13  ;;  %406 = vadd.xlane.f32.xlu0 %v405_v14  ;;  %v121_v13 = vld [vmem:[%s9830_s0 + $0x258] sm:$0xff]  ;;  %v120_v14 = vld [vmem:[%s9830_s0 + $0x250] sm:$0xff] }
  0x86   : > { %v224_v24 = vsel %vm6620_vm1, %v120_v14, 0.0 }
  0x89   : > { %415 = vadd.xlane.f32.xlu1 %v414_v20  ;;  %412 = vadd.xlane.f32.xlu0 %v411_v21  ;;  %v222_v20 = vsel %vm6620_vm1, %v118_v12, 0.0  ;;  %v225_v21 = vsel %vm6620_vm1, %v121_v13, 0.0  ;;  %v140_v12 = vld [vmem:[%s9830_s0 + $0x2f0] sm:$0xff]  ;;  %v142_v13 = vld [vmem:[%s9830_s0 + $0x300] sm:$0xff] }
  0x8a   : > { %v465_v34 = vsel %vm248_vm0, %v222_v20, 0.0  ;;  %v474_v35 = vsel %vm248_vm0, %v225_v21, 0.0  ;;  %v241_v20 = vsel %vm6620_vm1, %v137_v54, 0.0  ;;  %v240_v21 = vsel %vm6620_vm1, %v136_v60, 0.0 }
  0x8d   : > { %421 = vadd.xlane.f32.xlu1 %v420_v26  ;;  %418 = vadd.xlane.f32.xlu0 %v417_v27  ;;  %v127_v26 = vld [vmem:[%s9830_s0 + $0x288] sm:$0xff]  ;;  %v126_v27 = vld [vmem:[%s9830_s0 + $0x280] sm:$0xff] }
  0x8e   : > { %v231_v41 = vsel %vm6620_vm1, %v127_v26, 0.0  ;;  %v230_v42 = vsel %vm6620_vm1, %v126_v27, 0.0  ;;  %v245_v26 = vsel %vm6620_vm1, %v141_v11, 0.0  ;;  %v244_v27 = vsel %vm6620_vm1, %v140_v12, 0.0 }
  0x8f   : > { %v7146_v58 = vsel %vm248_vm0, %v231_v41, 0.0  ;;  %v7149_v59 = vsel %vm248_vm0, %v230_v42, 0.0  ;;  %v7233_v41 = vsel %vm248_vm0, %v245_v26, 0.0  ;;  %v7236_v42 = vsel %vm248_vm0, %v244_v27, 0.0 }
  0x91   : > { %427 = vadd.xlane.f32.xlu1 %v426_v32  ;;  %424 = vadd.xlane.f32.xlu0 %v423_v33 }
  0x95   : > { %433 = vadd.xlane.f32.xlu1 %v432_v38  ;;  %430 = vadd.xlane.f32.xlu0 %v429_v39  ;;  %v131_v38 = vld [vmem:[%s9830_s0 + $0x2a8] sm:$0xff]  ;;  %v471_v39 = vsel %vm248_vm0, %v224_v24, 0.0 }
  0x99   : > { %439 = vadd.xlane.f32.xlu1 %v438_v44  ;;  %436 = vadd.xlane.f32.xlu0 %v435_v45  ;;  %v233_v44 = vsel %vm6620_vm1, %v129_v30, 0.0  ;;  %v232_v45 = vsel %vm6620_vm1, %v128_v31, 0.0 }
  0x9a   : > { %v7164_v0 = vsel %vm248_vm0, %v232_v45, 0.0 }
  0x9d   : > { %445 = vadd.xlane.f32.xlu1 %v444_v50  ;;  %442 = vadd.xlane.f32.xlu0 %v441_v51  ;;  %v7129_v50 = vsel %vm248_vm0, %v229_v37, 0.0  ;;  %v235_v51 = vsel %vm6620_vm1, %v131_v38, 0.0  ;;  %v7221_v37 = vsel %vm248_vm0, %v241_v20, 0.0  ;;  %v7224_v38 = vsel %vm248_vm0, %v240_v21, 0.0 }
  0x9e   : > { %v7178_v14 = vsel %vm248_vm0, %v235_v51, 0.0 }
  0xa1   : > { %451 = vadd.xlane.f32.xlu1 %v450_v56  ;;  %448 = vadd.xlane.f32.xlu0 %v447_v57  ;;  %v7143_v57 = vsel %vm248_vm0, %v228_v40, 0.0 }
  0xa5   : > { %457 = vadd.xlane.f32.xlu1 %v456_v62  ;;  %454 = vadd.xlane.f32.xlu0 %v453_v63  ;;  %v138_v62 = vld [vmem:[%s9830_s0 + $0x2e0] sm:$0xff]  ;;  %v7161_v63 = vsel %vm248_vm0, %v233_v44, 0.0 }
  0xa6   : > { %v242_v25 = vsel %vm6620_vm1, %v138_v62, 0.0 }
  0xa7   : > { %v7230_v40 = vsel %vm248_vm0, %v242_v25, 0.0 }
  0xa9   : > { %463 = vadd.xlane.f32.xlu1 %v462_v15  ;;  %460 = vadd.xlane.f32.xlu0 %v459_v16  ;;  %v237_v15 = vsel %vm6620_vm1, %v133_v47, 0.0  ;;  %v236_v16 = vsel %vm6620_vm1, %v132_v48, 0.0 }
  0xaa   : > { %v7091_v32 = vpop.xlane.xlu1 %256  ;;  %v7093_v33 = vpop.xlane.xlu0 %250  ;;  %v7206_v30 = vsel %vm248_vm0, %v237_v15, 0.0  ;;  %v7209_v31 = vsel %vm248_vm0, %v236_v16, 0.0 }
  0xab   : > { %545 = vst [vmem:[#allocation2 + $0x10] sm:$0xff] %v7091_v32  ;;  %543 = vst [vmem:[#allocation2] sm:$0xff] %v7093_v33  ;;  %v660_v45 = vmul.f32 %v6584_v1, %v7091_v32  ;;  %v658_v46 = vmul.f32 %v6584_v1, %v7093_v33 }
  0xad   : > { %469 = vadd.xlane.f32.xlu1 %v468_v28  ;;  %466 = vadd.xlane.f32.xlu0 %v465_v34  ;;  %v246_v28 = vsel %vm6620_vm1, %v142_v13, 0.0  ;;  %v7212_v34 = vsel %vm248_vm0, %v239_v18, 0.0 }
  0xae   : > { %v260_v55 = vpop.xlane.xlu1 %259  ;;  %v254_v56 = vpop.xlane.xlu0 %253  ;;  %v7239_v44 = vsel %vm248_vm0, %v246_v28, 0.0 }
  0xaf   : > { %546 = vst [vmem:[#allocation2 + $0x18] sm:$0xff] %v260_v55  ;;  %544 = vst [vmem:[#allocation2 + $0x8] sm:$0xff] %v254_v56  ;;  %v659_v60 = vmul.f32 %v6584_v1, %v254_v56 }
  0xb1   : > { %475 = vadd.xlane.f32.xlu1 %v474_v35  ;;  %472 = vadd.xlane.f32.xlu0 %v471_v39  ;;  %v143_v35 = vld [vmem:[%s9830_s0 + $0x308] sm:$0xff]  ;;  %v7227_v39 = vsel %vm248_vm0, %v243_v22, 0.0 }
  0xb2   : > { %v266_v23 = vpop.xlane.xlu1 %265  ;;  %v263_v24 = vpop.xlane.xlu0 %262  ;;  %v247_v53 = vsel %vm6620_vm1, %v143_v35, 0.0  ;;  %vm9738_vm1 = vmand (%p42_p8), %vm5553_vm12, %vm5554_vm13 }
  0xb3   : > { %548 = vst [vmem:[#allocation2 + $0x28] sm:$0xff] %v266_v23  ;;  %547 = vst [vmem:[#allocation2 + $0x20] sm:$0xff] %v263_v24  ;;  %v7252_v33 = vmul.f32 %v6584_v1, %v266_v23  ;;  %v662_v17 = vmul.f32 %v6584_v1, %v263_v24  ;;  %v7264_v16 = vsel %vm248_vm0, %v247_v53, 0.0 }
  0xb4   :  { %vm9727_vm0 = vmand (%p42_p8), %vm5502_vm6, %vm5583_vm15 }
  0xb5   : > { %481 = vadd.xlane.f32.xlu1 %v480_v43  ;;  %478 = vadd.xlane.f32.xlu0 %v477_v49  ;;  %v661_v43 = vmul.f32 %v6584_v1, %v260_v55 }
  0xb6   : > { %v686_v47 = vld [vmem:[#allocation2 + $0x11] sm:$0xff]  ;;  %v684_v49 = vld [vmem:[#allocation2 + $0x1] sm:$0xff]  ;;  %v272_v51 = vpop.xlane.xlu1 %271  ;;  %v269_v52 = vpop.xlane.xlu0 %268  ;;  %v685_v61 = vld [vmem:[#allocation2 + $0x9] sm:$0xff] }
  0xb7   : > { %v729_v48 = vld [vmem:[#allocation2 + $0x12] sm:$0xff]  ;;  %v703_v54 = vmul.f32 %v6586_v2, %v686_v47  ;;  %v701_v32 = vmul.f32 %v6586_v2, %v684_v49  ;;  %v727_v62 = vld [vmem:[#allocation2 + $0x2] sm:$0xff]  ;;  %v728_v10 = vld [vmem:[#allocation2 + $0xa] sm:$0xff]  ;;  %550 = vst [vmem:[#allocation2 + $0x38] sm:$0xff] %v272_v51  ;;  %v702_v11 = vmul.f32 %v6586_v2, %v685_v61  ;;  %v7258_v12 = vmul.f32 %v6584_v1, %v272_v51 }
  0xb8   : > { %549 = vst [vmem:[#allocation2 + $0x30] sm:$0xff] %v269_v52  ;;  %v746_v55 = vmul.f32 %v6588_v3, %v729_v48  ;;  %v744_v15 = vmul.f32 %v6588_v3, %v727_v62  ;;  %v745_v19 = vmul.f32 %v6588_v3, %v728_v10  ;;  %v7268_v23 = vmul.f32 %v6596_v7, %v272_v51 }
  0xb9   : > { %v716_v56 = vadd.f32 %v703_v54, %v660_v45  ;;  %v714_v13 = vadd.f32 %v701_v32, %v658_v46  ;;  %487 = vadd.xlane.f32.xlu1 %v7129_v50  ;;  %484 = vadd.xlane.f32.xlu0 %v7143_v57  ;;  %v715_v18 = vadd.f32 %v702_v11, %v659_v60 }
  0xba   : > { %v687_v20 = vld [vmem:[#allocation2 + $0x19] sm:$0xff]  ;;  %v688_v21 = vld [vmem:[#allocation2 + $0x21] sm:$0xff]  ;;  %v664_v24 = vmul.f32 %v6584_v1, %v269_v52  ;;  %v7271_v25 = vpop.xlane.xlu1 %277  ;;  %v7273_v26 = vpop.xlane.xlu0 %274 }
  0xbb   : > { %v730_v22 = vld [vmem:[#allocation2 + $0x1a] sm:$0xff]  ;;  %v7275_v50 = vadd.f32 %v746_v55, %v716_v56  ;;  %v757_v57 = vadd.f32 %v744_v15, %v714_v13  ;;  %v704_v27 = vmul.f32 %v6586_v2, %v687_v20  ;;  %v705_v28 = vmul.f32 %v6586_v2, %v688_v21  ;;  %v731_v35 = vld [vmem:[#allocation2 + $0x22] sm:$0xff]  ;;  %552 = vst [vmem:[#allocation2 + $0x48] sm:$0xff] %v7271_v25 }
  0xbc   : > { %v770_v45 = vld [vmem:[#allocation2 + $0x1c] sm:$0xff]  ;;  %v771_v46 = vld [vmem:[#allocation2 + $0x24] sm:$0xff]  ;;  %551 = vst [vmem:[#allocation2 + $0x40] sm:$0xff] %v7273_v26  ;;  %v758_v47 = vadd.f32 %v745_v19, %v715_v18  ;;  %v747_v48 = vmul.f32 %v6588_v3, %v730_v22  ;;  %v748_v49 = vmul.f32 %v6588_v3, %v731_v35 }
  0xbd   : > { %v787_v51 = vmul.f32 %v6590_v4, %v770_v45  ;;  %v813_v52 = vld [vmem:[#allocation2 + $0x1d] sm:$0xff]  ;;  %v814_v53 = vld [vmem:[#allocation2 + $0x25] sm:$0xff]  ;;  %v717_v60 = vadd.f32 %v704_v27, %v661_v43  ;;  %v718_v61 = vadd.f32 %v705_v28, %v662_v17  ;;  %v788_v32 = vmul.f32 %v6590_v4, %v771_v46  ;;  %493 = vadd.xlane.f32.xlu1 %v7146_v58 }
  0xbe   : > { %v856_v54 = vld [vmem:[#allocation2 + $0x1e] sm:$0xff]  ;;  %v830_v62 = vmul.f32 %v6592_v5, %v813_v52  ;;  %v857_v10 = vld [vmem:[#allocation2 + $0x26] sm:$0xff]  ;;  %v831_v11 = vmul.f32 %v6592_v5, %v814_v53  ;;  %490 = vadd.xlane.f32.xlu0 %v7149_v59  ;;  %v7291_v43 = vpop.xlane.xlu1 %283  ;;  %v7293_v17 = vpop.xlane.xlu0 %280 }
  0xbf   : > { %v800_v55 = vadd.f32 %v787_v51, %v757_v57  ;;  %v873_v56 = vmul.f32 %v6594_v6, %v856_v54  ;;  %v874_v13 = vmul.f32 %v6594_v6, %v857_v10  ;;  %v689_v15 = vld [vmem:[#allocation2 + $0x29] sm:$0xff]  ;;  %v690_v18 = vld [vmem:[#allocation2 + $0x31] sm:$0xff]  ;;  %v760_v20 = vadd.f32 %v747_v48, %v717_v60  ;;  %554 = vst [vmem:[#allocation2 + $0x58] sm:$0xff] %v7291_v43 }
  0xc0   : > { %v732_v19 = vld [vmem:[#allocation2 + $0x2a] sm:$0xff]  ;;  %v7295_v21 = vadd.f32 %v748_v49, %v718_v61  ;;  %v801_v58 = vadd.f32 %v788_v32, %v758_v47  ;;  %v706_v22 = vmul.f32 %v6586_v2, %v689_v15  ;;  %v733_v57 = vld [vmem:[#allocation2 + $0x32] sm:$0xff]  ;;  %553 = vst [vmem:[#allocation2 + $0x50] sm:$0xff] %v7293_v17  ;;  %v707_v59 = vmul.f32 %v6586_v2, %v690_v18 }
  0xc1   : > { %v772_v27 = vld [vmem:[#allocation2 + $0x2c] sm:$0xff]  ;;  %v773_v28 = vld [vmem:[#allocation2 + $0x34] sm:$0xff]  ;;  %v843_v35 = vadd.f32 %v830_v62, %v800_v55  ;;  %v749_v45 = vmul.f32 %v6588_v3, %v732_v19  ;;  %v750_v46 = vmul.f32 %v6588_v3, %v733_v57  ;;  %499 = vadd.xlane.f32.xlu1 %v7161_v63 }
  0xc2   : > { %v815_v48 = vld [vmem:[#allocation2 + $0x2d] sm:$0xff]  ;;  %v816_v49 = vld [vmem:[#allocation2 + $0x35] sm:$0xff]  ;;  %v844_v51 = vadd.f32 %v831_v11, %v801_v58  ;;  %v719_v47 = vadd.f32 %v706_v22, %v7252_v33  ;;  %v789_v52 = vmul.f32 %v6590_v4, %v772_v27  ;;  %v790_v53 = vmul.f32 %v6590_v4, %v773_v28  ;;  %496 = vadd.xlane.f32.xlu0 %v7164_v0  ;;  %v7310_v55 = vpop.xlane.xlu1 %289  ;;  %v7312_v11 = vpop.xlane.xlu0 %286 }
  0xc3   : > { %v858_v54 = vld [vmem:[#allocation2 + $0x2e] sm:$0xff]  ;;  %v859_v60 = vld [vmem:[#allocation2 + $0x36] sm:$0xff]  ;;  %v886_v61 = vadd.f32 %v873_v56, %v843_v35  ;;  %v720_v32 = vadd.f32 %v707_v59, %v664_v24  ;;  %v832_v62 = vmul.f32 %v6592_v5, %v815_v48  ;;  %v833_v10 = vmul.f32 %v6592_v5, %v816_v49  ;;  %v692_v63 = vld [vmem:[#allocation2 + $0x41] sm:$0xff]  ;;  %556 = vst [vmem:[#allocation2 + $0x68] sm:$0xff] %v7310_v55 }
  0xc4   : > { %v7314_v33 = vadd.f32 %v874_v13, %v844_v51  ;;  %v762_v15 = vadd.f32 %v749_v45, %v719_v47  ;;  %v802_v18 = vadd.f32 %v789_v52, %v7275_v50  ;;  %v803_v19 = vadd.f32 %v790_v53, %v760_v20  ;;  %v691_v58 = vld [vmem:[#allocation2 + $0x39] sm:$0xff]  ;;  %555 = vst [vmem:[#allocation2 + $0x60] sm:$0xff] %v7312_v11  ;;  %v735_v57 = vld [vmem:[#allocation2 + $0x42] sm:$0xff] }
  0xc5   : > { %v734_v56 = vld [vmem:[#allocation2 + $0x3a] sm:$0xff]  ;;  %v923_v24 = vadd.f32 %v7268_v23, %v886_v61  ;;  %v7320_v0 = vadd.f32 %v750_v46, %v720_v32  ;;  %v875_v22 = vmul.f32 %v6594_v6, %v858_v54  ;;  %v876_v13 = vmul.f32 %v6594_v6, %v859_v60  ;;  %v775_v59 = vld [vmem:[#allocation2 + $0x44] sm:$0xff]  ;;  %505 = vadd.xlane.f32.xlu1 %v7178_v14 }
  0xc6   : > { %v774_v27 = vld [vmem:[#allocation2 + $0x3c] sm:$0xff]  ;;  %v845_v28 = vadd.f32 %v832_v62, %v802_v18  ;;  %v846_v50 = vadd.f32 %v833_v10, %v803_v19  ;;  %v7326_v20 = vmul.f32 %v6584_v1, %v7271_v25  ;;  %v912_v35 = vmul.f32 %v6596_v7, %v7271_v25  ;;  %v818_v51 = vld [vmem:[#allocation2 + $0x45] sm:$0xff]  ;;  %502 = vadd.xlane.f32.xlu0 %v7203_v29  ;;  %v7337_v52 = vpop.xlane.xlu1 %295  ;;  %v7339_v25 = vpop.xlane.xlu0 %292 }
  0xc7   : > { %v817_v45 = vld [vmem:[#allocation2 + $0x3d] sm:$0xff]  ;;  %v666_v23 = vmul.f32 %v6584_v1, %v7273_v26  ;;  %v708_v46 = vmul.f32 %v6586_v2, %v691_v58  ;;  %v709_v48 = vmul.f32 %v6586_v2, %v692_v63  ;;  %v751_v49 = vmul.f32 %v6588_v3, %v734_v56  ;;  %v861_v61 = vld [vmem:[#allocation2 + $0x46] sm:$0xff]  ;;  %558 = vst [vmem:[#allocation2 + $0x78] sm:$0xff] %v7337_v52 }
  0xc8   : > { %v860_v47 = vld [vmem:[#allocation2 + $0x3e] sm:$0xff]  ;;  %v888_v53 = vadd.f32 %v875_v22, %v845_v28  ;;  %v7341_v54 = vadd.f32 %v876_v13, %v846_v50  ;;  %v752_v14 = vmul.f32 %v6588_v3, %v735_v57  ;;  %v791_v60 = vmul.f32 %v6590_v4, %v774_v27  ;;  %557 = vst [vmem:[#allocation2 + $0x70] sm:$0xff] %v7339_v25 }
  0xc9   : > { %v721_v32 = vadd.f32 %v708_v46, %v7258_v12  ;;  %v722_v62 = vadd.f32 %v709_v48, %v666_v23  ;;  %v792_v29 = vmul.f32 %v6590_v4, %v775_v59  ;;  %v834_v10 = vmul.f32 %v6592_v5, %v817_v45  ;;  %511 = vadd.xlane.f32.xlu1 %v7206_v30  ;;  %v693_v46 = vld [vmem:[#allocation2 + $0x49] sm:$0xff]  ;;  %v694_v48 = vld [vmem:[#allocation2 + $0x51] sm:$0xff] }
  0xca   : > { %v7350_v18 = vadd.f32 %v912_v35, %v888_v53  ;;  %v804_v19 = vadd.f32 %v791_v60, %v7295_v21  ;;  %v835_v22 = vmul.f32 %v6592_v5, %v818_v51  ;;  %v877_v13 = vmul.f32 %v6594_v6, %v860_v47  ;;  %508 = vadd.xlane.f32.xlu0 %v7209_v31  ;;  %v7362_v59 = vpop.xlane.xlu1 %301  ;;  %v7364_v35 = vpop.xlane.xlu0 %298  ;;  %v776_v60 = vld [vmem:[#allocation2 + $0x4c] sm:$0xff] }
  0xcb   : > { %v7356_v27 = vadd.f32 %v751_v49, %v721_v32  ;;  %v7358_v28 = vadd.f32 %v752_v14, %v722_v62  ;;  %v805_v12 = vadd.f32 %v792_v29, %v762_v15  ;;  %v878_v50 = vmul.f32 %v6594_v6, %v861_v61  ;;  %560 = vst [vmem:[#allocation2 + $0x88] sm:$0xff] %v7362_v59  ;;  %v737_v14 = vld [vmem:[#allocation2 + $0x52] sm:$0xff] }
  0xcc   : > { %v847_v21 = vadd.f32 %v834_v10, %v804_v19  ;;  %v911_v45 = vmul.f32 %v6596_v7, %v7273_v26  ;;  %v947_v23 = vmul.f32 %v6598_v8, %v691_v58  ;;  %v948_v30 = vmul.f32 %v6598_v8, %v692_v63  ;;  %559 = vst [vmem:[#allocation2 + $0x80] sm:$0xff] %v7364_v35  ;;  %v736_v26 = vld [vmem:[#allocation2 + $0x4a] sm:$0xff]  ;;  %v777_v62 = vld [vmem:[#allocation2 + $0x54] sm:$0xff] }
  0xcd   : > { %v848_v15 = vadd.f32 %v835_v22, %v805_v12  ;;  %v984_v31 = vmul.f32 %v6600_v9, %v734_v56  ;;  %v985_v49 = vmul.f32 %v6600_v9, %v735_v57  ;;  %v7376_v51 = vmul.f32 %v6584_v1, %v7291_v43  ;;  %517 = vadd.xlane.f32.xlu1 %v7212_v34  ;;  %v819_v29 = vld [vmem:[#allocation2 + $0x4d] sm:$0xff]  ;;  %v820_v22 = vld [vmem:[#allocation2 + $0x55] sm:$0xff] }
  0xce   : > { %v890_v47 = vadd.f32 %v877_v13, %v847_v21  ;;  %v924_v58 = vadd.f32 %v911_v45, %v7314_v33  ;;  %v960_v63 = vadd.f32 %v947_v23, %v923_v24  ;;  %v914_v53 = vmul.f32 %v6596_v7, %v7291_v43  ;;  %514 = vadd.xlane.f32.xlu0 %v7218_v36  ;;  %v7389_v33 = vpop.xlane.xlu1 %307  ;;  %v7391_v43 = vpop.xlane.xlu0 %304  ;;  %v862_v21 = vld [vmem:[#allocation2 + $0x4e] sm:$0xff]  ;;  %v863_v45 = vld [vmem:[#allocation2 + $0x56] sm:$0xff] }
  0xcf   : > { %v7382_v61 = vadd.f32 %v878_v50, %v848_v15  ;;  %v668_v56 = vmul.f32 %v6584_v1, %v7293_v17  ;;  %v710_v57 = vmul.f32 %v6586_v2, %v693_v46  ;;  %v711_v32 = vmul.f32 %v6586_v2, %v694_v48  ;;  %562 = vst [vmem:[#allocation2 + $0x98] sm:$0xff] %v7389_v33 }
  0xd0   : > { %v961_v24 = vadd.f32 %v948_v30, %v924_v58  ;;  %v997_v10 = vadd.f32 %v984_v31, %v960_v63  ;;  %v7393_v34 = vadd.f32 %v914_v53, %v890_v47  ;;  %v753_v19 = vmul.f32 %v6588_v3, %v736_v26  ;;  %561 = vst [vmem:[#allocation2 + $0x90] sm:$0xff] %v7391_v43 }
  0xd1   : > { %v723_v13 = vadd.f32 %v710_v57, %v7326_v20  ;;  %v724_v12 = vadd.f32 %v711_v32, %v668_v56  ;;  %v754_v36 = vmul.f32 %v6588_v3, %v737_v14  ;;  %v793_v50 = vmul.f32 %v6590_v4, %v776_v60  ;;  %523 = vadd.xlane.f32.xlu1 %v7221_v37 }
  0xd2   : > { %v998_v23 = vadd.f32 %v985_v49, %v961_v24  ;;  %v1010_v30 = vmax.f32 %v997_v10, 0.0  ;;  %v794_v15 = vmul.f32 %v6590_v4, %v777_v62  ;;  %v836_v31 = vmul.f32 %v6592_v5, %v819_v29  ;;  %520 = vadd.xlane.f32.xlu0 %v7224_v38  ;;  %v7411_v53 = vpop.xlane.xlu1 %313  ;;  %v7413_v49 = vpop.xlane.xlu0 %310  ;;  %v695_v29 = vld [vmem:[#allocation2 + $0x59] sm:$0xff]  ;;  %v7424_v24 = vld [vmem:[#allocation2 + $0x61] sm:$0xff] }
  0xd3   : > { %v7404_v47 = vadd.f32 %v753_v19, %v723_v13  ;;  %v7406_v58 = vadd.f32 %v754_v36, %v724_v12  ;;  %v806_v20 = vadd.f32 %v793_v50, %v7320_v0  ;;  %v837_v63 = vmul.f32 %v6592_v5, %v820_v22  ;;  %564 = vst [vmem:[#allocation2 + $0xa8] sm:$0xff] %v7411_v53  ;;  %v738_v13 = vld [vmem:[#allocation2 + $0x5a] sm:$0xff]  ;;  %v739_v36 = vld [vmem:[#allocation2 + $0x62] sm:$0xff] }
  0xd4   : > { %v1011_v60 = vmax.f32 %v998_v23, 0.0  ;;  %1023 = vst [vmem:[#allocation3] sm:$0xff] %v1010_v30  ;;  %v807_v56 = vadd.f32 %v794_v15, %v7356_v27  ;;  %v879_v37 = vmul.f32 %v6594_v6, %v862_v21  ;;  %v880_v57 = vmul.f32 %v6594_v6, %v863_v45  ;;  %563 = vst [vmem:[#allocation2 + $0xa0] sm:$0xff] %v7413_v49  ;;  %v778_v50 = vld [vmem:[#allocation2 + $0x5c] sm:$0xff] }
  0xd5   : > { %v849_v0 = vadd.f32 %v836_v31, %v806_v20  ;;  %v913_v38 = vmul.f32 %v6596_v7, %v7293_v17  ;;  %v949_v32 = vmul.f32 %v6598_v8, %v693_v46  ;;  %v950_v62 = vmul.f32 %v6598_v8, %v694_v48  ;;  %529 = vadd.xlane.f32.xlu1 %v7227_v39  ;;  %v821_v45 = vld [vmem:[#allocation2 + $0x5d] sm:$0xff]  ;;  %v822_v31 = vld [vmem:[#allocation2 + $0x65] sm:$0xff] }
  0xd6   : > { %1024 = vst [vmem:[#allocation3 + $0x8] sm:$0xff] %v1011_v60  ;;  %v850_v27 = vadd.f32 %v837_v63, %v807_v56  ;;  %v986_v10 = vmul.f32 %v6600_v9, %v736_v26  ;;  %v987_v19 = vmul.f32 %v6600_v9, %v737_v14  ;;  %v916_v22 = vmul.f32 %v6596_v7, %v7310_v55  ;;  %v7438_v26 = vpop.xlane.xlu1 %319  ;;  %v7440_v14 = vpop.xlane.xlu0 %316 }
  0xd7   : > { %v892_v17 = vadd.f32 %v879_v37, %v849_v0  ;;  %v926_v46 = vadd.f32 %v913_v38, %v7341_v54  ;;  %v962_v48 = vadd.f32 %v949_v32, %v7350_v18  ;;  %v7435_v12 = vmul.f32 %v6584_v1, %v7310_v55  ;;  %526 = vadd.xlane.f32.xlu0 %v7230_v40  ;;  %v779_v55 = vld [vmem:[#allocation2 + $0x64] sm:$0xff] }
  0xd8   : > { %v7442_v21 = vadd.f32 %v880_v57, %v850_v27  ;;  %v670_v39 = vmul.f32 %v6584_v1, %v7312_v11  ;;  %v712_v54 = vmul.f32 %v6586_v2, %v695_v29  ;;  %v713_v18 = vmul.f32 %v6586_v2, %v7424_v24  ;;  %566 = vst [vmem:[#allocation2 + $0xb8] sm:$0xff] %v7438_v26  ;;  %v864_v37 = vld [vmem:[#allocation2 + $0x5e] sm:$0xff]  ;;  %v865_v57 = vld [vmem:[#allocation2 + $0x66] sm:$0xff] }
  0xd9   : > { %565 = vst [vmem:[#allocation2 + $0xb0] sm:$0xff] %v7440_v14  ;;  %v963_v40 = vadd.f32 %v950_v62, %v926_v46  ;;  %v999_v23 = vadd.f32 %v986_v10, %v962_v48  ;;  %v7451_v30 = vadd.f32 %v916_v22, %v892_v17  ;;  %v755_v15 = vmul.f32 %v6588_v3, %v738_v13 }
  0xda   : > { %v725_v20 = vadd.f32 %v712_v54, %v7376_v51  ;;  %v726_v63 = vadd.f32 %v713_v18, %v670_v39  ;;  %v756_v60 = vmul.f32 %v6588_v3, %v739_v36  ;;  %v795_v56 = vmul.f32 %v6590_v4, %v778_v50  ;;  %535 = vadd.xlane.f32.xlu1 %v7233_v41  ;;  %v7461_v27 = vpop.xlane.xlu1 %325  ;;  %v7463_v51 = vpop.xlane.xlu0 %322 }
  0xdb   : > { %v1000_v0 = vadd.f32 %v987_v19, %v963_v40  ;;  %v1012_v38 = vmax.f32 %v999_v23, 0.0  ;;  %v796_v32 = vmul.f32 %v6590_v4, %v779_v55  ;;  %v838_v62 = vmul.f32 %v6592_v5, %v821_v45  ;;  %532 = vadd.xlane.f32.xlu0 %v7236_v42  ;;  %568 = vst [vmem:[#allocation2 + $0xc8] sm:$0xff] %v7461_v27  ;;  %v780_v45 = vld [vmem:[#allocation2 + $0x6c] sm:$0xff]  ;;  %v781_v40 = vld [vmem:[#allocation2 + $0x74] sm:$0xff] }
  0xdc   : > { %v768_v10 = vadd.f32 %v755_v15, %v725_v20  ;;  %v7465_v22 = vadd.f32 %v756_v60, %v726_v63  ;;  %v808_v17 = vadd.f32 %v795_v56, %v7358_v28  ;;  %v839_v46 = vmul.f32 %v6592_v5, %v822_v31  ;;  %567 = vst [vmem:[#allocation2 + $0xc0] sm:$0xff] %v7463_v51  ;;  %v823_v20 = vld [vmem:[#allocation2 + $0x6d] sm:$0xff] }
  0xdd   : > { %v7471_v41 = vld [vmem:[#allocation3] ss:$2 sm:$0xff]  ;;  %v7473_v19 = vld [vmem:[#allocation3 + $0x1] ss:$2 sm:$0xff]  ;;  %v1013_v42 = vmax.f32 %v1000_v0, 0.0  ;;  %1025 = vst [vmem:[#allocation3 + $0x10] sm:$0xff] %v1012_v38  ;;  %v809_v48 = vadd.f32 %v796_v32, %v7404_v47  ;;  %v881_v50 = vmul.f32 %v6594_v6, %v864_v37  ;;  %v882_v39 = vmul.f32 %v6594_v6, %v865_v57 }
  0xde   : > { %v851_v54 = vadd.f32 %v838_v62, %v808_v17  ;;  %v915_v18 = vmul.f32 %v6596_v7, %v7312_v11  ;;  %v951_v55 = vmul.f32 %v6598_v8, %v695_v29  ;;  %541 = vadd.xlane.f32.xlu1 %v7264_v16  ;;  %v952_v47 = vmul.f32 %v6598_v8, %v7424_v24  ;;  %v7489_v63 = vpop.xlane.xlu1 %331  ;;  %v7491_v11 = vpop.xlane.xlu0 %328  ;;  %v824_v24 = vld [vmem:[#allocation2 + $0x75] sm:$0xff]  ;;  %v936_v62 = vld [vmem:[#allocation2 + $0x69] sm:$0xff] }
  0xdf   : > { %1026 = vst [vmem:[#allocation3 + $0x18] sm:$0xff] %v1013_v42  ;;  %v852_v23 = vadd.f32 %v839_v46, %v809_v48  ;;  %v988_v15 = vmul.f32 %v6600_v9, %v738_v13  ;;  %v989_v31 = vmul.f32 %v6600_v9, %v739_v36  ;;  %538 = vadd.xlane.f32.xlu0 %v7239_v44  ;;  %v866_v37 = vld [vmem:[#allocation2 + $0x6e] sm:$0xff]  ;;  %570 = vst [vmem:[#allocation2 + $0xd8] sm:$0xff] %v7489_v63 }
  0xe0   : > { %v894_v29 = vadd.f32 %v881_v50, %v851_v54  ;;  %v928_v60 = vadd.f32 %v915_v18, %v7382_v61  ;;  %v964_v16 = vadd.f32 %v951_v55, %v7393_v34  ;;  %v918_v56 = vmul.f32 %v6596_v7, %v7337_v52  ;;  %569 = vst [vmem:[#allocation2 + $0xd0] sm:$0xff] %v7491_v11  ;;  %v867_v34 = vld [vmem:[#allocation2 + $0x76] sm:$0xff]  ;;  %v973_v50 = vld [vmem:[#allocation2 + $0x6a] sm:$0xff] }
  0xe1   : > { %v7499_v13 = vadd.f32 %v882_v39, %v852_v23  ;;  %v7503_v44 = vmul.f32 %v6584_v1, %v7337_v52  ;;  %v797_v36 = vmul.f32 %v6590_v4, %v780_v45  ;;  %v798_v61 = vmul.f32 %v6590_v4, %v781_v40  ;;  %v937_v17 = vld [vmem:[#allocation2 + $0x71] sm:$0xff] }
  0xe2   : > { %v965_v57 = vadd.f32 %v952_v47, %v928_v60  ;;  %v1001_v0 = vadd.f32 %v988_v15, %v964_v16  ;;  %v7507_v38 = vadd.f32 %v918_v56, %v894_v29  ;;  %v840_v32 = vmul.f32 %v6592_v5, %v823_v20  ;;  %v974_v39 = vld [vmem:[#allocation2 + $0x72] sm:$0xff]  ;;  %v7513_v54 = vpop.xlane.xlu1 %337  ;;  %v7515_v18 = vpop.xlane.xlu0 %334 }
  0xe3   : > { %v810_v46 = vadd.f32 %v797_v36, %v7406_v58  ;;  %v811_v42 = vadd.f32 %v798_v61, %v768_v10  ;;  %v841_v48 = vmul.f32 %v6592_v5, %v824_v24  ;;  %v883_v52 = vmul.f32 %v6594_v6, %v866_v37  ;;  %572 = vst [vmem:[#allocation2 + $0xe8] sm:$0xff] %v7513_v54 }
  0xe4   : > { %v1002_v55 = vadd.f32 %v989_v31, %v965_v57  ;;  %v1014_v45 = vmax.f32 %v1001_v0, 0.0  ;;  %v884_v40 = vmul.f32 %v6594_v6, %v867_v34  ;;  %v917_v23 = vmul.f32 %v6596_v7, %v7339_v25  ;;  %571 = vst [vmem:[#allocation2 + $0xe0] sm:$0xff] %v7515_v18 }
  0xe5   : > { %v853_v58 = vadd.f32 %v840_v32, %v810_v46  ;;  %v854_v10 = vadd.f32 %v841_v48, %v811_v42  ;;  %v953_v47 = vmul.f32 %v6598_v8, %v936_v62  ;;  %v954_v15 = vmul.f32 %v6598_v8, %v937_v17  ;;  %v782_v42 = vld [vmem:[#allocation2 + $0x7c] sm:$0xff] }
  0xe6   : > { %v3192_v20 = vld [vmem:[#allocation3 + $0x10] ss:$2 sm:$0xff]  ;;  %v3284_v29 = vld [vmem:[#allocation3 + $0x11] ss:$2 sm:$0xff]  ;;  %v1015_v60 = vmax.f32 %v1002_v55, 0.0  ;;  %1027 = vst [vmem:[#allocation3 + $0x20] sm:$0xff] %v1014_v45  ;;  %v930_v31 = vadd.f32 %v917_v23, %v7442_v21  ;;  %v990_v16 = vmul.f32 %v6600_v9, %v973_v50  ;;  %v991_v56 = vmul.f32 %v6600_v9, %v974_v39  ;;  %v7530_v34 = vpop.xlane.xlu1 %343  ;;  %v7532_v57 = vpop.xlane.xlu0 %340 }
  0xe7   : > { %v3374_v24 = vmax.f32 %v3192_v20, %v3284_v29  ;;  %v896_v37 = vadd.f32 %v883_v52, %v853_v58  ;;  %v7527_v36 = vadd.f32 %v884_v40, %v854_v10  ;;  %v966_v61 = vadd.f32 %v953_v47, %v7451_v30  ;;  %v825_v48 = vld [vmem:[#allocation2 + $0x7d] sm:$0xff]  ;;  %574 = vst [vmem:[#allocation2 + $0xf8] sm:$0xff] %v7530_v34 }
  0xe8   : > { %1028 = vst [vmem:[#allocation3 + $0x28] sm:$0xff] %v1015_v60  ;;  %v967_v0 = vadd.f32 %v954_v15, %v930_v31  ;;  %v1050_v32 = vmul.f32 %v6584_v1, %v7339_v25  ;;  %v1088_v21 = vmul.f32 %v6586_v2, %v936_v62  ;;  %v1089_v46 = vmul.f32 %v6586_v2, %v937_v17  ;;  %v868_v25 = vld [vmem:[#allocation2 + $0x7e] sm:$0xff] }
  0xe9   : > { %573 = vst [vmem:[#allocation2 + $0xf0] sm:$0xff] %v7532_v57  ;;  %3420 = vst [vmem:[#allocation4 + $0x8] sm:$0xff] %v3374_v24  ;;  %v1003_v30 = vadd.f32 %v990_v16, %v966_v61  ;;  %v1127_v52 = vmul.f32 %v6588_v3, %v973_v50  ;;  %v1128_v55 = vmul.f32 %v6588_v3, %v974_v39  ;;  %v938_v58 = vld [vmem:[#allocation2 + $0x79] sm:$0xff]  ;;  %v939_v10 = vld [vmem:[#allocation2 + $0x81] sm:$0xff] }
  0xea   : > { %v920_v45 = vmul.f32 %v6596_v7, %v7362_v59  ;;  %v1004_v40 = vadd.f32 %v991_v56, %v967_v0  ;;  %v1101_v62 = vadd.f32 %v1088_v21, %v7435_v12  ;;  %v1102_v17 = vadd.f32 %v1089_v46, %v1050_v32  ;;  %v975_v20 = vld [vmem:[#allocation2 + $0x7a] sm:$0xff]  ;;  %v976_v29 = vld [vmem:[#allocation2 + $0x82] sm:$0xff]  ;;  %v7553_v60 = vpop.xlane.xlu1 %349  ;;  %v7555_v31 = vpop.xlane.xlu0 %346 }
  0xeb   : > { %v7547_v23 = vmul.f32 %v6584_v1, %v7362_v59  ;;  %v1016_v47 = vmax.f32 %v1003_v30, 0.0  ;;  %v799_v50 = vmul.f32 %v6590_v4, %v782_v42  ;;  %v842_v39 = vmul.f32 %v6592_v5, %v825_v48  ;;  %576 = vst [vmem:[#allocation2 + $0x108] sm:$0xff] %v7553_v60  ;;  %575 = vst [vmem:[#allocation2 + $0x100] sm:$0xff] %v7555_v31  ;;  %v1153_v48 = vld [vmem:[#allocation2 + $0x84] sm:$0xff] }
  0xec   : > { %v7549_v15 = vadd.f32 %v920_v45, %v896_v37  ;;  %v1017_v12 = vmax.f32 %v1004_v40, 0.0  ;;  %v1140_v16 = vadd.f32 %v1127_v52, %v1101_v62  ;;  %v7557_v56 = vadd.f32 %v1128_v55, %v1102_v17  ;;  %v1192_v30 = vld [vmem:[#allocation2 + $0x85] sm:$0xff] }
  0xed   : > { %v885_v59 = vmul.f32 %v6594_v6, %v868_v25  ;;  %1029 = vst [vmem:[#allocation3 + $0x30] sm:$0xff] %v1016_v47  ;;  %v812_v24 = vadd.f32 %v799_v50, %v7465_v22  ;;  %v919_v37 = vmul.f32 %v6596_v7, %v7364_v35  ;;  %v955_v61 = vmul.f32 %v6598_v8, %v938_v58  ;;  %v1231_v62 = vld [vmem:[#allocation2 + $0x86] sm:$0xff] }
  0xee   : > { %v956_v0 = vmul.f32 %v6598_v8, %v939_v10  ;;  %1030 = vst [vmem:[#allocation3 + $0x38] sm:$0xff] %v1017_v12  ;;  %v992_v32 = vmul.f32 %v6600_v9, %v975_v20  ;;  %v993_v21 = vmul.f32 %v6600_v9, %v976_v29  ;;  %v1052_v46 = vmul.f32 %v6584_v1, %v7364_v35  ;;  %v356_v17 = vpop.xlane.xlu1 %355  ;;  %v353_v47 = vpop.xlane.xlu0 %352 }
  0xef   : > { %v1090_v42 = vmul.f32 %v6586_v2, %v938_v58  ;;  %v3194_v22 = vld [vmem:[#allocation3 + $0x20] ss:$2 sm:$0xff]  ;;  %v3286_v52 = vld [vmem:[#allocation3 + $0x21] ss:$2 sm:$0xff]  ;;  %v855_v55 = vadd.f32 %v842_v39, %v812_v24  ;;  %v932_v45 = vadd.f32 %v919_v37, %v7499_v13  ;;  %v968_v25 = vadd.f32 %v955_v61, %v7507_v38  ;;  %578 = vst [vmem:[#allocation2 + $0x118] sm:$0xff] %v356_v17 }
  0xf0   : > { %v1091_v40 = vmul.f32 %v6586_v2, %v939_v10  ;;  %v3375_v50 = vmax.f32 %v3194_v22, %v3286_v52  ;;  %v1129_v35 = vmul.f32 %v6588_v3, %v975_v20  ;;  %v1130_v58 = vmul.f32 %v6588_v3, %v976_v29  ;;  %577 = vst [vmem:[#allocation2 + $0x110] sm:$0xff] %v353_v47  ;;  %v940_v37 = vld [vmem:[#allocation2 + $0x89] sm:$0xff] }
  0xf1   : > { %v1103_v12 = vadd.f32 %v1090_v42, %v7503_v44  ;;  %v898_v28 = vadd.f32 %v885_v59, %v855_v55  ;;  %v969_v39 = vadd.f32 %v956_v0, %v932_v45  ;;  %v1005_v24 = vadd.f32 %v992_v32, %v968_v25  ;;  %v941_v42 = vld [vmem:[#allocation2 + $0x91] sm:$0xff] }
  0xf2   : > { %v1104_v13 = vadd.f32 %v1091_v40, %v1052_v46  ;;  %3421 = vst [vmem:[#allocation4 + $0x10] sm:$0xff] %v3375_v50  ;;  %v1166_v10 = vmul.f32 %v6590_v4, %v1153_v48  ;;  %v1205_v61 = vmul.f32 %v6592_v5, %v1192_v30  ;;  %v1244_v44 = vmul.f32 %v6594_v6, %v1231_v62  ;;  %v977_v20 = vld [vmem:[#allocation2 + $0x8a] sm:$0xff]  ;;  %v362_v0 = vpop.xlane.xlu1 %361  ;;  %v359_v32 = vpop.xlane.xlu0 %358  ;;  %v978_v45 = vld [vmem:[#allocation2 + $0x92] sm:$0xff] }
  0xf3   : > { %v7578_v38 = vadd.f32 %v1129_v35, %v1103_v12  ;;  %v1006_v22 = vadd.f32 %v993_v21, %v969_v39  ;;  %v1018_v29 = vmax.f32 %v1005_v24, 0.0  ;;  %v922_v59 = vmul.f32 %v6596_v7, %v7389_v33  ;;  %580 = vst [vmem:[#allocation2 + $0x128] sm:$0xff] %v362_v0  ;;  %579 = vst [vmem:[#allocation2 + $0x120] sm:$0xff] %v359_v32  ;;  %v1154_v35 = vld [vmem:[#allocation2 + $0x8c] sm:$0xff] }
  0xf4   : > { %v7583_v52 = vadd.f32 %v1130_v58, %v1104_v13  ;;  %v1179_v46 = vadd.f32 %v1166_v10, %v1140_v16  ;;  %v7589_v55 = vmul.f32 %v6584_v1, %v7389_v33  ;;  %v921_v48 = vmul.f32 %v6596_v7, %v7391_v43  ;;  %v1155_v13 = vld [vmem:[#allocation2 + $0x94] sm:$0xff] }
  0xf5   : > { %v957_v30 = vmul.f32 %v6598_v8, %v940_v37  ;;  %v3196_v21 = vld [vmem:[#allocation3 + $0x30] ss:$2 sm:$0xff]  ;;  %v3288_v25 = vld [vmem:[#allocation3 + $0x31] ss:$2 sm:$0xff]  ;;  %v1019_v40 = vmax.f32 %v1006_v22, 0.0  ;;  %1031 = vst [vmem:[#allocation3 + $0x40] sm:$0xff] %v1018_v29  ;;  %v7594_v62 = vadd.f32 %v922_v59, %v898_v28  ;;  %v958_v16 = vmul.f32 %v6598_v8, %v941_v42 }
  0xf6   : > { %v994_v17 = vmul.f32 %v6600_v9, %v977_v20  ;;  %v3376_v33 = vmax.f32 %v3196_v21, %v3288_v25  ;;  %v1218_v47 = vadd.f32 %v1205_v61, %v1179_v46  ;;  %v934_v50 = vadd.f32 %v921_v48, %v7527_v36  ;;  %v368_v10 = vpop.xlane.xlu1 %367  ;;  %v365_v22 = vpop.xlane.xlu0 %364  ;;  %v1193_v59 = vld [vmem:[#allocation2 + $0x8d] sm:$0xff]  ;;  %v1194_v46 = vld [vmem:[#allocation2 + $0x95] sm:$0xff] }
  0xf7   : > { %v970_v12 = vadd.f32 %v957_v30, %v7549_v15  ;;  %1032 = vst [vmem:[#allocation3 + $0x48] sm:$0xff] %v1019_v40  ;;  %v995_v58 = vmul.f32 %v6600_v9, %v978_v45  ;;  %v1054_v39 = vmul.f32 %v6584_v1, %v7391_v43  ;;  %v1092_v28 = vmul.f32 %v6586_v2, %v940_v37  ;;  %v1232_v48 = vld [vmem:[#allocation2 + $0x8e] sm:$0xff]  ;;  %v1233_v40 = vld [vmem:[#allocation2 + $0x96] sm:$0xff] }
  0xf8   : > { %v1093_v24 = vmul.f32 %v6586_v2, %v941_v42  ;;  %3422 = vst [vmem:[#allocation4 + $0x18] sm:$0xff] %v3376_v33  ;;  %v7605_v61 = vadd.f32 %v1244_v44, %v1218_v47  ;;  %v971_v36 = vadd.f32 %v958_v16, %v934_v50  ;;  %v1131_v15 = vmul.f32 %v6588_v3, %v977_v20  ;;  %v942_v33 = vld [vmem:[#allocation2 + $0x99] sm:$0xff] }
  0xf9   : > { %v1007_v29 = vadd.f32 %v994_v17, %v970_v12  ;;  %582 = vst [vmem:[#allocation2 + $0x138] sm:$0xff] %v368_v10  ;;  %581 = vst [vmem:[#allocation2 + $0x130] sm:$0xff] %v365_v22  ;;  %v3467_v0 = vld [vmem:[#allocation4 + $0xe] sm:$0xff]  ;;  %v1105_v43 = vadd.f32 %v1092_v28, %v7547_v23  ;;  %v1132_v37 = vmul.f32 %v6588_v3, %v978_v45  ;;  %v979_v47 = vld [vmem:[#allocation2 + $0x9a] sm:$0xff] }
  0xfa   : > { %v1106_v32 = vadd.f32 %v1093_v24, %v1054_v39  ;;  %v1167_v42 = vmul.f32 %v6590_v4, %v1154_v35  ;;  %v9836_v44 = vmax.f32 %v7471_v41, %v7473_v19  ;;  %v1008_v21 = vadd.f32 %v995_v58, %v971_v36  ;;  %v374_v50 = vpop.xlane.xlu1 %373  ;;  %v371_v12 = vpop.xlane.xlu0 %370  ;;  %v7627_v39 = vld [vmem:[#allocation2 + $0xa1] sm:$0xff] }
  0xfb   : > { %v1020_v20 = vmax.f32 %v1007_v29, 0.0  ;;  %v1168_v25 = vmul.f32 %v6590_v4, %v1155_v13  ;;  %v7617_v16 = vadd.f32 %v1131_v15, %v1105_v43  ;;  %v1206_v17 = vmul.f32 %v6592_v5, %v1193_v59  ;;  %584 = vst [vmem:[#allocation2 + $0x148] sm:$0xff] %v374_v50  ;;  %583 = vst [vmem:[#allocation2 + $0x140] sm:$0xff] %v371_v12  ;;  %v1121_v10 = vld [vmem:[#allocation2 + $0xa2] sm:$0xff] }
  0xfc   : > { %v7614_v30 = vmax.f32 %v9836_v44, %v3467_v0  ;;  %v7619_v23 = vadd.f32 %v1132_v37, %v1106_v32  ;;  %v1180_v45 = vadd.f32 %v1167_v42, %v7557_v56  ;;  %v1021_v41 = vmax.f32 %v1008_v21, 0.0  ;;  %v1157_v43 = vld [vmem:[#allocation2 + $0xa4] sm:$0xff] }
  0xfd   : > { %1033 = vst [vmem:[#allocation3 + $0x50] sm:$0xff] %v1020_v20  ;;  %v1181_v19 = vadd.f32 %v1168_v25, %v7578_v38  ;;  %v1207_v35 = vmul.f32 %v6592_v5, %v1194_v46  ;;  %v1245_v58 = vmul.f32 %v6594_v6, %v1232_v48  ;;  %v1246_v28 = vmul.f32 %v6594_v6, %v1233_v40  ;;  %v1156_v38 = vld [vmem:[#allocation2 + $0x9c] sm:$0xff]  ;;  %v1196_v50 = vld [vmem:[#allocation2 + $0xa5] sm:$0xff] }
  0xfe   : > { %3471 = vst [vmem:[#allocation5] sm:$0xff] %v7614_v30  ;;  %v1219_v56 = vadd.f32 %v1206_v17, %v1180_v45  ;;  %v7632_v24 = vmul.f32 %v6584_v1, %v7411_v53  ;;  %v1278_v13 = vmul.f32 %v6596_v7, %v7411_v53  ;;  %v3198_v22 = vld [vmem:[#allocation3 + $0x40] ss:$2 sm:$0xff]  ;;  %v3290_v36 = vld [vmem:[#allocation3 + $0x41] ss:$2 sm:$0xff]  ;;  %1034 = vst [vmem:[#allocation3 + $0x58] sm:$0xff] %v1021_v41  ;;  %v380_v21 = vpop.xlane.xlu1 %379  ;;  %v377_v20 = vpop.xlane.xlu0 %376 }
  0xff   : > { %v1220_v29 = vadd.f32 %v1207_v35, %v1181_v19  ;;  %v959_v15 = vmul.f32 %v6598_v8, %v942_v33  ;;  %v996_v59 = vmul.f32 %v6600_v9, %v979_v47  ;;  %v1056_v0 = vmul.f32 %v6584_v1, %v7413_v49  ;;  %v3466_v32 = vld [vmem:[#allocation4 + $0x8] sm:$0x1f]  ;;  %v3468_v37 = vld [vmem:[#allocation4 + $0x16] sm:$0x1f]  ;;  %586 = vst [vmem:[#allocation2 + $0x158] sm:$0xff] %v380_v21 }
 0x100   : > { %v3377_v42 = vmax.f32 %v3198_v22, %v3290_v36  ;;  %v1258_v46 = vadd.f32 %v1245_v58, %v1219_v56  ;;  %v1094_v53 = vmul.f32 %v6586_v2, %v942_v33  ;;  %v1095_v48 = vmul.f32 %v6586_v2, %v7627_v39  ;;  %v1195_v44 = vld [vmem:[#allocation2 + $0x9d] sm:$0xff]  ;;  %585 = vst [vmem:[#allocation2 + $0x150] sm:$0xff] %v377_v20  ;;  %v1235_v58 = vld [vmem:[#allocation2 + $0xa6] sm:$0xff] }
 0x101   : > { %v3470_v25 = vmax.f32 %v3466_v32, %v3468_v37  ;;  %v7643_v40 = vadd.f32 %v1246_v28, %v1220_v29  ;;  %v972_v45 = vadd.f32 %v959_v15, %v7594_v62  ;;  %v1133_v17 = vmul.f32 %v6588_v3, %v979_v47  ;;  %v1234_v12 = vld [vmem:[#allocation2 + $0x9e] sm:$0xff]  ;;  %v1083_v37 = vld [vmem:[#allocation2 + $0xa9] sm:$0xff] }
 0x102   : > { %3423 = vst [vmem:[#allocation4 + $0x20] sm:$0xff] %v3377_v42  ;;  %v7647_v41 = vadd.f32 %v1278_v13, %v1258_v46  ;;  %v1107_v33 = vadd.f32 %v1094_v53, %v7589_v55  ;;  %v1108_v19 = vadd.f32 %v1095_v48, %v1056_v0  ;;  %v1134_v35 = vmul.f32 %v6588_v3, %v1121_v10  ;;  %v386_v55 = vpop.xlane.xlu1 %385  ;;  %v383_v15 = vpop.xlane.xlu0 %382  ;;  %v1122_v42 = vld [vmem:[#allocation2 + $0xaa] sm:$0xff] }
 0x103   : > { %3472 = vst [vmem:[#allocation5 + $0x8] sm:$0x1f] %v3470_v25  ;;  %v1009_v56 = vadd.f32 %v996_v59, %v972_v45  ;;  %v1169_v28 = vmul.f32 %v6590_v4, %v1156_v38  ;;  %v1170_v62 = vmul.f32 %v6590_v4, %v1157_v43  ;;  %v1208_v47 = vmul.f32 %v6592_v5, %v1195_v44  ;;  %v1084_v43 = vld [vmem:[#allocation2 + $0xb1] sm:$0xff] }
 0x104   : > { %v1146_v22 = vadd.f32 %v1133_v17, %v1107_v33  ;;  %v7654_v36 = vadd.f32 %v1134_v35, %v1108_v19  ;;  %v1209_v13 = vmul.f32 %v6592_v5, %v1196_v50  ;;  %v1247_v29 = vmul.f32 %v6594_v6, %v1234_v12  ;;  %588 = vst [vmem:[#allocation2 + $0x168] sm:$0xff] %v386_v55  ;;  %v1158_v50 = vld [vmem:[#allocation2 + $0xac] sm:$0xff]  ;;  %v1159_v33 = vld [vmem:[#allocation2 + $0xb4] sm:$0xff] }
 0x105   : > { %v1022_v0 = vmax.f32 %v1009_v56, 0.0  ;;  %v1182_v32 = vadd.f32 %v1169_v28, %v7583_v52  ;;  %v1183_v59 = vadd.f32 %v1170_v62, %v7617_v16  ;;  %v1248_v38 = vmul.f32 %v6594_v6, %v1235_v58  ;;  %587 = vst [vmem:[#allocation2 + $0x160] sm:$0xff] %v383_v15  ;;  %v3200_v46 = vld [vmem:[#allocation3 + $0x50] ss:$2 sm:$0xff]  ;;  %v3292_v53 = vld [vmem:[#allocation3 + $0x51] ss:$2 sm:$0xff] }
 0x106   : > { %v1277_v48 = vmul.f32 %v6596_v7, %v7413_v49  ;;  %v1310_v44 = vmul.f32 %v6598_v8, %v7627_v39  ;;  %v1343_v21 = vmul.f32 %v6600_v9, %v1121_v10  ;;  %v7668_v52 = vmul.f32 %v6584_v1, %v7438_v26  ;;  %v1123_v16 = vld [vmem:[#allocation2 + $0xb2] sm:$0xff]  ;;  %v392_v58 = vpop.xlane.xlu1 %391  ;;  %v389_v56 = vpop.xlane.xlu0 %388 }
 0x107   : > { %v3378_v20 = vmax.f32 %v3200_v46, %v3292_v53  ;;  %1035 = vst [vmem:[#allocation3 + $0x60] sm:$0xff] %v1022_v0  ;;  %v1221_v25 = vadd.f32 %v1208_v47, %v1182_v32  ;;  %v1222_v45 = vadd.f32 %v1209_v13, %v1183_v59  ;;  %v1280_v17 = vmul.f32 %v6596_v7, %v7438_v26  ;;  %v1197_v19 = vld [vmem:[#allocation2 + $0xad] sm:$0xff]  ;;  %v1198_v35 = vld [vmem:[#allocation2 + $0xb5] sm:$0xff] }
 0x108   : > { %v1290_v49 = vadd.f32 %v1277_v48, %v7605_v61  ;;  %v1058_v39 = vmul.f32 %v6584_v1, %v7440_v14  ;;  %v1096_v10 = vmul.f32 %v6586_v2, %v1083_v37  ;;  %v1097_v12 = vmul.f32 %v6586_v2, %v1084_v43  ;;  %590 = vst [vmem:[#allocation2 + $0x178] sm:$0xff] %v392_v58  ;;  %v1236_v0 = vld [vmem:[#allocation2 + $0xae] sm:$0xff]  ;;  %v1237_v32 = vld [vmem:[#allocation2 + $0xb6] sm:$0xff]  ;;  %v1086_v58 = vld [vmem:[#allocation2 + $0xc1] sm:$0xff] }
 0x109   : > { %3424 = vst [vmem:[#allocation4 + $0x28] sm:$0xff] %v3378_v20  ;;  %v1260_v28 = vadd.f32 %v1247_v29, %v1221_v25  ;;  %v7677_v62 = vadd.f32 %v1248_v38, %v1222_v45  ;;  %v1135_v26 = vmul.f32 %v6588_v3, %v1122_v42  ;;  %v1136_v61 = vmul.f32 %v6588_v3, %v1123_v16 }
 0x10a   : > { %589 = vst [vmem:[#allocation2 + $0x170] sm:$0xff] %v389_v56  ;;  %v1323_v47 = vadd.f32 %v1310_v44, %v1290_v49  ;;  %v1109_v13 = vadd.f32 %v1096_v10, %v7632_v24  ;;  %v1110_v55 = vadd.f32 %v1097_v12, %v1058_v39  ;;  %v1171_v15 = vmul.f32 %v6590_v4, %v1158_v50  ;;  %v398_v24 = vpop.xlane.xlu1 %397  ;;  %v395_v25 = vpop.xlane.xlu0 %394  ;;  %v1124_v56 = vld [vmem:[#allocation2 + $0xba] sm:$0xff] }
 0x10b   : > { %v7683_v59 = vadd.f32 %v1280_v17, %v1260_v28  ;;  %v1172_v29 = vmul.f32 %v6590_v4, %v1159_v33  ;;  %v1210_v38 = vmul.f32 %v6592_v5, %v1197_v19  ;;  %v1211_v46 = vmul.f32 %v6592_v5, %v1198_v35  ;;  %592 = vst [vmem:[#allocation2 + $0x188] sm:$0xff] %v398_v24  ;;  %v1085_v33 = vld [vmem:[#allocation2 + $0xb9] sm:$0xff] }
 0x10c   : > { %v1356_v53 = vadd.f32 %v1343_v21, %v1323_v47  ;;  %v1148_v48 = vadd.f32 %v1135_v26, %v1109_v13  ;;  %v7688_v20 = vadd.f32 %v1136_v61, %v1110_v55  ;;  %v1184_v44 = vadd.f32 %v1171_v15, %v7619_v23  ;;  %591 = vst [vmem:[#allocation2 + $0x180] sm:$0xff] %v395_v25  ;;  %v1160_v61 = vld [vmem:[#allocation2 + $0xbc] sm:$0xff] }
 0x10d   : > { %v1185_v45 = vadd.f32 %v1172_v29, %v1146_v22  ;;  %v1249_v50 = vmul.f32 %v6594_v6, %v1236_v0  ;;  %v1250_v17 = vmul.f32 %v6594_v6, %v1237_v32  ;;  %v1279_v49 = vmul.f32 %v6596_v7, %v7440_v14  ;;  %v1199_v15 = vld [vmem:[#allocation2 + $0xbd] sm:$0xff] }
 0x10e   : > { %v1369_v39 = vmax.f32 %v1356_v53, 0.0  ;;  %v1223_v10 = vadd.f32 %v1210_v38, %v1184_v44  ;;  %v1311_v21 = vmul.f32 %v6598_v8, %v1083_v37  ;;  %v1312_v12 = vmul.f32 %v6598_v8, %v1084_v43  ;;  %v1125_v43 = vld [vmem:[#allocation2 + $0xc2] sm:$0xff]  ;;  %v401_v47 = vpop.xlane.xlu0 %400 }
 0x10f   : > { %v1224_v23 = vadd.f32 %v1211_v46, %v1185_v45  ;;  %v1292_v19 = vadd.f32 %v1279_v49, %v7643_v40  ;;  %v1344_v22 = vmul.f32 %v6600_v9, %v1122_v42  ;;  %v1345_v35 = vmul.f32 %v6600_v9, %v1123_v16  ;;  %v404_v40 = vpop.xlane.xlu1 %403  ;;  %593 = vst [vmem:[#allocation2 + $0x190] sm:$0xff] %v401_v47  ;;  %v1200_v38 = vld [vmem:[#allocation2 + $0xc5] sm:$0xff] }
 0x110   : > { %1382 = vst [vmem:[#allocation3 + $0x68] sm:$0xff] %v1369_v39  ;;  %v1262_v14 = vadd.f32 %v1249_v50, %v1223_v10  ;;  %v1324_v28 = vadd.f32 %v1311_v21, %v7647_v41  ;;  %v7703_v26 = vmul.f32 %v6584_v1, %v7461_v27  ;;  %v1282_v37 = vmul.f32 %v6596_v7, %v7461_v27  ;;  %v1161_v41 = vld [vmem:[#allocation2 + $0xc4] sm:$0xff] }
 0x111   : > { %v7707_v42 = vadd.f32 %v1250_v17, %v1224_v23  ;;  %v1325_v16 = vadd.f32 %v1312_v12, %v1292_v19  ;;  %v1060_v13 = vmul.f32 %v6584_v1, %v7463_v51  ;;  %v1098_v55 = vmul.f32 %v6586_v2, %v1085_v33  ;;  %594 = vst [vmem:[#allocation2 + $0x198] sm:$0xff] %v404_v40  ;;  %v1238_v25 = vld [vmem:[#allocation2 + $0xbe] sm:$0xff]  ;;  %v1239_v45 = vld [vmem:[#allocation2 + $0xc6] sm:$0xff] }
 0x112   : > { %v1357_v0 = vadd.f32 %v1344_v22, %v1324_v28  ;;  %v7712_v32 = vadd.f32 %v1282_v37, %v1262_v14  ;;  %v1099_v27 = vmul.f32 %v6586_v2, %v1086_v58  ;;  %v1137_v29 = vmul.f32 %v6588_v3, %v1124_v56  ;;  %v1087_v14 = vld [vmem:[#allocation2 + $0xc9] sm:$0xff] }
 0x113   : > { %v1358_v46 = vadd.f32 %v1345_v35, %v1325_v16  ;;  %v1111_v53 = vadd.f32 %v1098_v55, %v7668_v52  ;;  %v1138_v44 = vmul.f32 %v6588_v3, %v1125_v43  ;;  %v1173_v24 = vmul.f32 %v6590_v4, %v1160_v61  ;;  %v1126_v16 = vld [vmem:[#allocation2 + $0xca] sm:$0xff] }
 0x114   : > { %v1370_v50 = vmax.f32 %v1357_v0, 0.0  ;;  %v1112_v17 = vadd.f32 %v1099_v27, %v1060_v13  ;;  %v1174_v49 = vmul.f32 %v6590_v4, %v1161_v41  ;;  %v1212_v39 = vmul.f32 %v6592_v5, %v1199_v15  ;;  %v1162_v15 = vld [vmem:[#allocation2 + $0xcc] sm:$0xff] }
 0x115   : > { %v1371_v10 = vmax.f32 %v1358_v46, 0.0  ;;  %v1150_v21 = vadd.f32 %v1137_v29, %v1111_v53  ;;  %v1186_v12 = vadd.f32 %v1173_v24, %v7654_v36  ;;  %v1213_v23 = vmul.f32 %v6592_v5, %v1200_v38  ;;  %v1163_v38 = vld [vmem:[#allocation2 + $0xd4] sm:$0xff] }
 0x116   : > { %1383 = vst [vmem:[#allocation3 + $0x70] sm:$0xff] %v1370_v50  ;;  %v7723_v52 = vadd.f32 %v1138_v44, %v1112_v17  ;;  %v1187_v19 = vadd.f32 %v1174_v49, %v1148_v48  ;;  %v1251_v22 = vmul.f32 %v6594_v6, %v1238_v25  ;;  %v1252_v35 = vmul.f32 %v6594_v6, %v1239_v45  ;;  %v1202_v46 = vld [vmem:[#allocation2 + $0xd5] sm:$0xff]  ;;  %v410_v50 = vpop.xlane.xlu1 %409  ;;  %v407_v17 = vpop.xlane.xlu0 %406 }
 0x117   : > { %v3202_v28 = vld [vmem:[#allocation3 + $0x60] ss:$2 sm:$0xff]  ;;  %v3294_v37 = vld [vmem:[#allocation3 + $0x61] ss:$2 sm:$0xff]  ;;  %1384 = vst [vmem:[#allocation3 + $0x78] sm:$0xff] %v1371_v10  ;;  %v1225_v61 = vadd.f32 %v1212_v39, %v1186_v12  ;;  %v1281_v40 = vmul.f32 %v6596_v7, %v7463_v51  ;;  %v1313_v36 = vmul.f32 %v6598_v8, %v1085_v33  ;;  %v1314_v47 = vmul.f32 %v6598_v8, %v1086_v58  ;;  %v1241_v45 = vld [vmem:[#allocation2 + $0xd6] sm:$0xff] }
 0x118   : > { %v3379_v13 = vmax.f32 %v3202_v28, %v3294_v37  ;;  %v1226_v55 = vadd.f32 %v1213_v23, %v1187_v19  ;;  %v1346_v48 = vmul.f32 %v6600_v9, %v1124_v56  ;;  %v1347_v41 = vmul.f32 %v6600_v9, %v1125_v43  ;;  %v1201_v33 = vld [vmem:[#allocation2 + $0xcd] sm:$0xff]  ;;  %596 = vst [vmem:[#allocation2 + $0x1a8] sm:$0xff] %v410_v50 }
 0x119   : > { %v1264_v0 = vadd.f32 %v1251_v22, %v1225_v61  ;;  %v1294_v27 = vadd.f32 %v1281_v40, %v7677_v62  ;;  %v1326_v29 = vadd.f32 %v1313_v36, %v7683_v59  ;;  %v1284_v51 = vmul.f32 %v6596_v7, %v7489_v63  ;;  %v1240_v62 = vld [vmem:[#allocation2 + $0xce] sm:$0xff]  ;;  %595 = vst [vmem:[#allocation2 + $0x1a0] sm:$0xff] %v407_v17 }
 0x11a   : > { %3425 = vst [vmem:[#allocation4 + $0x30] sm:$0xff] %v3379_v13  ;;  %v7737_v58 = vadd.f32 %v1252_v35, %v1226_v55  ;;  %v7741_v56 = vmul.f32 %v6584_v1, %v7489_v63  ;;  %v1100_v43 = vmul.f32 %v6586_v2, %v1087_v14  ;;  %v1139_v53 = vmul.f32 %v6588_v3, %v1126_v16  ;;  %v1303_v35 = vld [vmem:[#allocation2 + $0xd1] sm:$0xff] }
 0x11b   : > { %v1327_v44 = vadd.f32 %v1314_v47, %v1294_v27  ;;  %v1359_v59 = vadd.f32 %v1346_v48, %v1326_v29  ;;  %v7745_v24 = vadd.f32 %v1284_v51, %v1264_v0  ;;  %v1175_v25 = vmul.f32 %v6590_v4, %v1162_v15  ;;  %v1336_v47 = vld [vmem:[#allocation2 + $0xd2] sm:$0xff]  ;;  %v1164_v29 = vld [vmem:[#allocation2 + $0xdc] sm:$0xff]  ;;  %v1165_v51 = vld [vmem:[#allocation2 + $0xe4] sm:$0xff] }
 0x11c   : > { %v1113_v49 = vadd.f32 %v1100_v43, %v7703_v26  ;;  %v1176_v39 = vmul.f32 %v6590_v4, %v1163_v38  ;;  %v1214_v63 = vmul.f32 %v6592_v5, %v1201_v33  ;;  %v1215_v10 = vmul.f32 %v6592_v5, %v1202_v46  ;;  %v3474_v38 = vld [vmem:[#allocation4 + $0x24] sm:$0x1f] }
 0x11d   : > { %v1360_v12 = vadd.f32 %v1347_v41, %v1327_v44  ;;  %v1372_v23 = vmax.f32 %v1359_v59, 0.0  ;;  %v1188_v19 = vadd.f32 %v1175_v25, %v7688_v20  ;;  %v1253_v22 = vmul.f32 %v6594_v6, %v1240_v62  ;;  %v3473_v41 = vld [vmem:[#allocation4 + $0x1c] sm:$0xff]  ;;  %v1203_v25 = vld [vmem:[#allocation2 + $0xdd] sm:$0xff] }
 0x11e   : > { %v7754_v28 = vld [vmem:[#allocation3 + $0x70] ss:$2 sm:$0xff]  ;;  %v7756_v37 = vld [vmem:[#allocation3 + $0x71] ss:$2 sm:$0xff]  ;;  %v1152_v26 = vadd.f32 %v1139_v53, %v1113_v49  ;;  %v1189_v61 = vadd.f32 %v1176_v39, %v1150_v21  ;;  %v1254_v40 = vmul.f32 %v6594_v6, %v1241_v45  ;;  %v1283_v36 = vmul.f32 %v6596_v7, %v7491_v11  ;;  %v1204_v49 = vld [vmem:[#allocation2 + $0xe5] sm:$0xff] }
 0x11f   : > { %v3380_v13 = vmax.f32 %v7754_v28, %v7756_v37  ;;  %v1373_v20 = vmax.f32 %v1360_v12, 0.0  ;;  %1385 = vst [vmem:[#allocation3 + $0x80] sm:$0xff] %v1372_v23  ;;  %v1227_v55 = vadd.f32 %v1214_v63, %v1188_v19  ;;  %v1315_v48 = vmul.f32 %v6598_v8, %v1087_v14  ;;  %v1242_v12 = vld [vmem:[#allocation2 + $0xde] sm:$0xff]  ;;  %v1243_v23 = vld [vmem:[#allocation2 + $0xe6] sm:$0xff] }
 0x120   : > { %v1228_v15 = vadd.f32 %v1215_v10, %v1189_v61  ;;  %v1296_v0 = vadd.f32 %v1283_v36, %v7707_v42  ;;  %v1316_v21 = vmul.f32 %v6598_v8, %v1303_v35  ;;  %v1348_v27 = vmul.f32 %v6600_v9, %v1126_v16  ;;  %v1305_v36 = vld [vmem:[#allocation2 + $0xe1] sm:$0xff] }
 0x121   : > { %v3475_v33 = vld [vmem:[#allocation4 + $0x2a] sm:$0xff]  ;;  %v3476_v46 = vld [vmem:[#allocation4 + $0x32] sm:$0x1f]  ;;  %1386 = vst [vmem:[#allocation3 + $0x88] sm:$0xff] %v1373_v20  ;;  %v1266_v43 = vadd.f32 %v1253_v22, %v1227_v55  ;;  %v1328_v53 = vadd.f32 %v1315_v48, %v7712_v32  ;;  %v1349_v14 = vmul.f32 %v6600_v9, %v1336_v47  ;;  %v1408_v62 = vmul.f32 %v6584_v1, %v7491_v11  ;;  %v413_v20 = vpop.xlane.xlu0 %412 }
 0x122   : > { %v7772_v42 = vmax.f32 %v3473_v41, %v3475_v33  ;;  %v3478_v44 = vmax.f32 %v3474_v38, %v3476_v46  ;;  %v7774_v59 = vadd.f32 %v1254_v40, %v1228_v15  ;;  %v1329_v16 = vadd.f32 %v1316_v21, %v1296_v0  ;;  %v1304_v40 = vld [vmem:[#allocation2 + $0xd9] sm:$0xff]  ;;  %v1338_v0 = vld [vmem:[#allocation2 + $0xe2] sm:$0xff]  ;;  %597 = vst [vmem:[#allocation2 + $0x1b0] sm:$0xff] %v413_v20 }
 0x123   : > { %v1361_v45 = vadd.f32 %v1348_v27, %v1328_v53  ;;  %v1447_v50 = vmul.f32 %v6586_v2, %v1303_v35  ;;  %v1486_v17 = vmul.f32 %v6588_v3, %v1336_v47  ;;  %v1286_v32 = vmul.f32 %v6596_v7, %v7513_v54  ;;  %v416_v47 = vpop.xlane.xlu1 %415  ;;  %v1337_v15 = vld [vmem:[#allocation2 + $0xda] sm:$0xff]  ;;  %v1515_v37 = vld [vmem:[#allocation2 + $0x104] sm:$0xff] }
 0x124   : > { %3479 = vst [vmem:[#allocation5 + $0xd] sm:$0xff] %v7772_v42  ;;  %3480 = vst [vmem:[#allocation5 + $0x15] sm:$0x1f] %v3478_v44  ;;  %v1362_v11 = vadd.f32 %v1349_v14, %v1329_v16  ;;  %v7785_v39 = vmul.f32 %v6584_v1, %v7513_v54  ;;  %v1177_v63 = vmul.f32 %v6590_v4, %v1164_v29 }
 0x125   : > { %v1178_v10 = vmul.f32 %v6590_v4, %v1165_v51  ;;  %v1374_v19 = vmax.f32 %v1361_v45, 0.0  ;;  %v1460_v22 = vadd.f32 %v1447_v50, %v1408_v62  ;;  %v7789_v35 = vadd.f32 %v1286_v32, %v1266_v43  ;;  %598 = vst [vmem:[#allocation2 + $0x1b8] sm:$0xff] %v416_v47 }
 0x126   : > { %v1216_v61 = vmul.f32 %v6592_v5, %v1203_v25  ;;  %v1375_v55 = vmax.f32 %v1362_v11, 0.0  ;;  %v1190_v54 = vadd.f32 %v1177_v63, %v7723_v52  ;;  %v1217_v41 = vmul.f32 %v6592_v5, %v1204_v49 }
 0x127   : > { %v1191_v48 = vadd.f32 %v1178_v10, %v1152_v26  ;;  %1387 = vst [vmem:[#allocation3 + $0x90] sm:$0xff] %v1374_v19  ;;  %v7795_v21 = vadd.f32 %v1486_v17, %v1460_v22  ;;  %v1255_v27 = vmul.f32 %v6594_v6, %v1242_v12  ;;  %v1256_v29 = vmul.f32 %v6594_v6, %v1243_v23  ;;  %v3607_v17 = vld [vmem:[#allocation5 + $0x1] sm:$0xff] }
 0x128   : > { %v1285_v51 = vmul.f32 %v6596_v7, %v7515_v18  ;;  %v3206_v38 = vld [vmem:[#allocation3 + $0x80] ss:$2 sm:$0xff]  ;;  %v3298_v52 = vld [vmem:[#allocation3 + $0x81] ss:$2 sm:$0xff]  ;;  %1388 = vst [vmem:[#allocation3 + $0x98] sm:$0xff] %v1375_v55  ;;  %v1229_v26 = vadd.f32 %v1216_v61, %v1190_v54  ;;  %v1317_v46 = vmul.f32 %v6598_v8, %v1304_v40  ;;  %v1318_v43 = vmul.f32 %v6598_v8, %v1305_v36 }
 0x129   : > { %v1230_v33 = vadd.f32 %v1217_v41, %v1191_v48  ;;  %v3381_v53 = vmax.f32 %v3206_v38, %v3298_v52  ;;  %v1350_v62 = vmul.f32 %v6600_v9, %v1337_v15  ;;  %v1351_v44 = vmul.f32 %v6600_v9, %v1338_v0  ;;  %v3639_v12 = vld [vmem:[#allocation5 + $0x2] sm:$0xff] }
 0x12a   : > { %v1298_v14 = vadd.f32 %v1285_v51, %v7737_v58  ;;  %v1268_v16 = vadd.f32 %v1255_v27, %v1229_v26  ;;  %v1330_v45 = vadd.f32 %v1317_v46, %v7745_v24  ;;  %v1410_v50 = vmul.f32 %v6584_v1, %v7515_v18  ;;  %v1306_v61 = vld [vmem:[#allocation2 + $0xe9] sm:$0xff]  ;;  %v1307_v48 = vld [vmem:[#allocation2 + $0xf1] sm:$0xff]  ;;  %v419_v27 = vpop.xlane.xlu0 %418 }
 0x12b   : > { %v7806_v25 = vadd.f32 %v1256_v29, %v1230_v33  ;;  %v3571_v32 = vld [vmem:[#allocation5 + $0x8] sm:$0xff]  ;;  %3427 = vst [vmem:[#allocation4 + $0x40] sm:$0xff] %v3381_v53  ;;  %v1448_v58 = vmul.f32 %v6586_v2, %v1304_v40  ;;  %v1449_v63 = vmul.f32 %v6586_v2, %v1305_v36  ;;  %v1487_v10 = vmul.f32 %v6588_v3, %v1337_v15 }
 0x12c   : > { %v3608_v49 = vld [vmem:[#allocation5 + $0x9] sm:$0xff]  ;;  %v1331_v11 = vadd.f32 %v1318_v43, %v1298_v14  ;;  %v3586_v23 = vpack.c.bf16 %v3571_v32, %v7614_v30  ;;  %v1363_v22 = vadd.f32 %v1350_v62, %v1330_v45  ;;  %v1488_v18 = vmul.f32 %v6588_v3, %v1338_v0  ;;  %v422_v0 = vpop.xlane.xlu1 %421  ;;  %599 = vst [vmem:[#allocation2 + $0x1c0] sm:$0xff] %v419_v27 }
 0x12d   : > { %v3623_v19 = vpack.c.bf16 %v3608_v49, %v3607_v17  ;;  %v3640_v24 = vld [vmem:[#allocation5 + $0xa] sm:$0xff]  ;;  %v1461_v55 = vadd.f32 %v1448_v58, %v7741_v56  ;;  %v1462_v54 = vadd.f32 %v1449_v63, %v1410_v50  ;;  %v1288_v40 = vmul.f32 %v6596_v7, %v7530_v34  ;;  %v1339_v41 = vld [vmem:[#allocation2 + $0xea] sm:$0xff]  ;;  %600 = vst [vmem:[#allocation2 + $0x1c8] sm:$0xff] %v422_v0  ;;  %v1341_v0 = vld [vmem:[#allocation2 + $0xfa] sm:$0xff] }
 0x12e   : > { %v3655_v47 = vpack.c.bf16 %v3640_v24, %v3639_v12  ;;  %v1364_v20 = vadd.f32 %v1351_v44, %v1331_v11  ;;  %3599 = vst [vmem:[%s7819_s9] sm:$0xff] %v3586_v23  ;;  %v1376_v30 = vmax.f32 %v1363_v22, 0.0  ;;  %v7827_v36 = vmul.f32 %v6584_v1, %v7530_v34  ;;  %v1340_v15 = vld [vmem:[#allocation2 + $0xf2] sm:$0xff] }
 0x12f   : > { %3631 = vst [vmem:[%s7819_s9 + $0x8] sm:$0xff] %v3623_v19  ;;  %v1287_v56 = vmul.f32 %v6596_v7, %v7532_v57  ;;  %v3208_v29 = vld [vmem:[#allocation3 + $0x90] ss:$2 sm:$0xff]  ;;  %v3300_v51 = vld [vmem:[#allocation3 + $0x91] ss:$2 sm:$0xff]  ;;  %v1500_v52 = vadd.f32 %v1487_v10, %v1461_v55  ;;  %v7832_v26 = vadd.f32 %v1488_v18, %v1462_v54  ;;  %v1319_v33 = vmul.f32 %v6598_v8, %v1306_v61 }
 0x130   : > { %3663 = vst [vmem:[%s7819_s9 + $0x10] sm:$0xff] %v3655_v47  ;;  %v1377_v38 = vmax.f32 %v1364_v20, 0.0  ;;  %v3382_v34 = vmax.f32 %v3208_v29, %v3300_v51  ;;  %1389 = vst [vmem:[#allocation3 + $0xa0] sm:$0xff] %v1376_v30  ;;  %v1301_v46 = vadd.f32 %v1288_v40, %v1268_v16  ;;  %v1320_v53 = vmul.f32 %v6598_v8, %v1307_v48  ;;  %v1512_v14 = vld [vmem:[#allocation2 + $0xec] sm:$0xff]  ;;  %v1513_v62 = vld [vmem:[#allocation2 + $0xf4] sm:$0xff]  ;;  %v425_v47 = vpop.xlane.xlu0 %424 }
 0x131   : > { %v1300_v43 = vadd.f32 %v1287_v56, %v7774_v59  ;;  %v1332_v44 = vadd.f32 %v1319_v33, %v7789_v35  ;;  %v1352_v45 = vmul.f32 %v6600_v9, %v1339_v41  ;;  %v1353_v50 = vmul.f32 %v6600_v9, %v1340_v15  ;;  %v1551_v32 = vld [vmem:[#allocation2 + $0xed] sm:$0xff]  ;;  %v1552_v58 = vld [vmem:[#allocation2 + $0xf5] sm:$0xff]  ;;  %v1309_v40 = vld [vmem:[#allocation2 + $0x101] sm:$0xff]  ;;  %601 = vst [vmem:[#allocation2 + $0x1d0] sm:$0xff] %v425_v47 }
 0x132   : > { %1390 = vst [vmem:[#allocation3 + $0xa8] sm:$0xff] %v1377_v38  ;;  %v1412_v17 = vmul.f32 %v6584_v1, %v7532_v57  ;;  %3428 = vst [vmem:[#allocation4 + $0x48] sm:$0xff] %v3382_v34  ;;  %v1450_v16 = vmul.f32 %v6586_v2, %v1306_v61  ;;  %v1451_v59 = vmul.f32 %v6586_v2, %v1307_v48  ;;  %v1590_v23 = vld [vmem:[#allocation2 + $0xee] sm:$0xff]  ;;  %v1591_v18 = vld [vmem:[#allocation2 + $0xf6] sm:$0xff]  ;;  %v428_v61 = vpop.xlane.xlu1 %427 }
 0x133   : > { %v1333_v49 = vadd.f32 %v1320_v53, %v1300_v43  ;;  %v1489_v11 = vmul.f32 %v6588_v3, %v1339_v41  ;;  %v1365_v63 = vadd.f32 %v1352_v45, %v1332_v44  ;;  %v1490_v35 = vmul.f32 %v6588_v3, %v1340_v15  ;;  %v1308_v30 = vld [vmem:[#allocation2 + $0xf9] sm:$0xff]  ;;  %602 = vst [vmem:[#allocation2 + $0x1d8] sm:$0xff] %v428_v61  ;;  %v1342_v38 = vld [vmem:[#allocation2 + $0x102] sm:$0xff] }
 0x134   : > { %v1525_v10 = vmul.f32 %v6590_v4, %v1512_v14  ;;  %v1526_v12 = vmul.f32 %v6590_v4, %v1513_v62  ;;  %v1463_v57 = vadd.f32 %v1450_v16, %v7785_v39  ;;  %v1464_v24 = vadd.f32 %v1451_v59, %v1412_v17  ;;  %v1514_v59 = vld [vmem:[#allocation2 + $0xfc] sm:$0xff] }
 0x135   : > { %v1366_v19 = vadd.f32 %v1353_v50, %v1333_v49  ;;  %v1564_v22 = vmul.f32 %v6592_v5, %v1551_v32  ;;  %v1378_v20 = vmax.f32 %v1365_v63, 0.0  ;;  %v1565_v48 = vmul.f32 %v6592_v5, %v1552_v58 }
 0x136   : > { %v1538_v55 = vadd.f32 %v1525_v10, %v7795_v21  ;;  %v1539_v54 = vadd.f32 %v1526_v12, %v1500_v52  ;;  %v7852_v41 = vadd.f32 %v1489_v11, %v1463_v57  ;;  %v7854_v39 = vadd.f32 %v1490_v35, %v1464_v24  ;;  %v3641_v11 = vld [vmem:[#allocation5 + $0x12] sm:$0xff] }
 0x137   : > { %v1379_v56 = vmax.f32 %v1366_v19, 0.0  ;;  %v1603_v15 = vmul.f32 %v6594_v6, %v1590_v23  ;;  %1391 = vst [vmem:[#allocation3 + $0xb0] sm:$0xff] %v1378_v20  ;;  %v1604_v21 = vmul.f32 %v6594_v6, %v1591_v18  ;;  %v7860_v51 = vmul.f32 %v6584_v1, %v7553_v60  ;;  %v1554_v23 = vld [vmem:[#allocation2 + $0x105] sm:$0xff] }
 0x138   : > { %v1577_v27 = vadd.f32 %v1564_v22, %v1538_v55  ;;  %v1578_v29 = vadd.f32 %v1565_v48, %v1539_v54  ;;  %v1636_v34 = vmul.f32 %v6596_v7, %v7553_v60  ;;  %v1289_v43 = vmul.f32 %v6596_v7, %v7555_v31  ;;  %v1592_v22 = vld [vmem:[#allocation2 + $0xfe] sm:$0xff]  ;;  %v1593_v55 = vld [vmem:[#allocation2 + $0x106] sm:$0xff]  ;;  %v434_v48 = vpop.xlane.xlu1 %433 }
 0x139   : > { %v3210_v52 = vld [vmem:[#allocation3 + $0xa0] ss:$2 sm:$0xff]  ;;  %v3302_v33 = vld [vmem:[#allocation3 + $0xa1] ss:$2 sm:$0xff]  ;;  %1392 = vst [vmem:[#allocation3 + $0xb8] sm:$0xff] %v1379_v56  ;;  %v1321_v53 = vmul.f32 %v6598_v8, %v1308_v30  ;;  %v1322_v14 = vmul.f32 %v6598_v8, %v1309_v40  ;;  %v1354_v17 = vmul.f32 %v6600_v9, %v1341_v0  ;;  %v1355_v16 = vmul.f32 %v6600_v9, %v1342_v38 }
 0x13a   : > { %v3483_v62 = vld [vmem:[#allocation4 + $0x46] sm:$0xff]  ;;  %v3383_v44 = vmax.f32 %v3210_v52, %v3302_v33  ;;  %v1616_v45 = vadd.f32 %v1603_v15, %v1577_v27  ;;  %v7868_v50 = vadd.f32 %v1604_v21, %v1578_v29  ;;  %v1302_v60 = vadd.f32 %v1289_v43, %v7806_v25  ;;  %v7893_v54 = vld [vmem:[#allocation2 + $0x109] sm:$0xff]  ;;  %v7901_v29 = vld [vmem:[#allocation2 + $0x111] sm:$0xff]  ;;  %604 = vst [vmem:[#allocation2 + $0x1e8] sm:$0xff] %v434_v48 }
 0x13b   : > { %v7874_v32 = vmax.f32 %v3380_v13, %v3483_v62  ;;  %v1334_v49 = vadd.f32 %v1321_v53, %v1301_v46  ;;  %v1414_v63 = vmul.f32 %v6584_v1, %v7555_v31  ;;  %v1452_v35 = vmul.f32 %v6586_v2, %v1308_v30  ;;  %v1553_v13 = vld [vmem:[#allocation2 + $0xfd] sm:$0xff]  ;;  %v431_v30 = vpop.xlane.xlu0 %430  ;;  %v7907_v43 = vld [vmem:[#allocation2 + $0x112] sm:$0xff] }
 0x13c   : > { %3429 = vst [vmem:[#allocation4 + $0x50] sm:$0xff] %v3383_v44  ;;  %v7878_v58 = vadd.f32 %v1636_v34, %v1616_v45  ;;  %v1453_v28 = vmul.f32 %v6586_v2, %v1309_v40  ;;  %v1335_v46 = vadd.f32 %v1322_v14, %v1302_v60  ;;  %v1491_v12 = vmul.f32 %v6588_v3, %v1341_v0  ;;  %v7905_v34 = vld [vmem:[#allocation2 + $0x10a] sm:$0xff]  ;;  %v3572_v53 = vld [vmem:[#allocation5 + $0x10] sm:$0xff] }
 0x13d   : > { %3487 = vst [vmem:[#allocation5 + $0x1a] sm:$0xff] %v7874_v32  ;;  %v3656_v25 = vpack.c.bf16 %v7874_v32, %v3641_v11  ;;  %v1367_v10 = vadd.f32 %v1354_v17, %v1334_v49  ;;  %v1465_v19 = vadd.f32 %v1452_v35, %v7827_v36  ;;  %v1492_v31 = vmul.f32 %v6588_v3, %v1342_v38  ;;  %v3609_v14 = vld [vmem:[#allocation5 + $0x11] sm:$0xff]  ;;  %v1516_v60 = vld [vmem:[#allocation2 + $0x10c] sm:$0xff] }
 0x13e   : > { %v1466_v57 = vadd.f32 %v1453_v28, %v1414_v63  ;;  %v1527_v24 = vmul.f32 %v6590_v4, %v1514_v59  ;;  %v1368_v18 = vadd.f32 %v1355_v16, %v1335_v46  ;;  %v1528_v47 = vmul.f32 %v6590_v4, %v1515_v37  ;;  %603 = vst [vmem:[#allocation2 + $0x1e0] sm:$0xff] %v431_v30  ;;  %v6380_v44 = vld [vmem:[#allocation2 + $0x118] sm:$0xff]  ;;  %v6381_v35 = vld [vmem:[#allocation2 + $0x110] sm:$0xff] }
 0x13f   : > { %3664 = vst [vmem:[%s7819_s9 + $0x58] sm:$0xff] %v3656_v25  ;;  %v1380_v61 = vmax.f32 %v1367_v10, 0.0  ;;  %v1566_v20 = vmul.f32 %v6592_v5, %v1553_v13  ;;  %v7895_v56 = vadd.f32 %v1491_v12, %v1465_v19  ;;  %v1567_v27 = vmul.f32 %v6592_v5, %v1554_v23  ;;  %v1517_v49 = vld [vmem:[#allocation2 + $0x114] sm:$0xff] }
 0x140   : > { %v3212_v40 = vld [vmem:[#allocation3 + $0xb0] ss:$2 sm:$0xff]  ;;  %v3304_v36 = vld [vmem:[#allocation3 + $0xb1] ss:$2 sm:$0xff]  ;;  %v7897_v15 = vadd.f32 %v1492_v31, %v1466_v57  ;;  %v1540_v0 = vadd.f32 %v1527_v24, %v7832_v26  ;;  %v1381_v38 = vmax.f32 %v1368_v18, 0.0  ;;  %v1541_v52 = vadd.f32 %v1528_v47, %v7852_v41 }
 0x141   : > { %v3384_v21 = vmax.f32 %v3212_v40, %v3304_v36  ;;  %1393 = vst [vmem:[#allocation3 + $0xc0] sm:$0xff] %v1380_v61  ;;  %v1605_v33 = vmul.f32 %v6594_v6, %v1592_v22  ;;  %v1606_v62 = vmul.f32 %v6594_v6, %v1593_v55  ;;  %v7911_v45 = vmul.f32 %v6380_v44, %v6584_v1  ;;  %v1555_v41 = vld [vmem:[#allocation2 + $0x10d] sm:$0xff]  ;;  %v3703_v16 = vld [vmem:[#allocation5 + $0xe] sm:$0xff] }
 0x142   : > { %v1579_v26 = vadd.f32 %v1566_v20, %v1540_v0  ;;  %v1638_v17 = vmul.f32 %v6380_v44, %v6596_v7  ;;  %v3482_v59 = vld [vmem:[#allocation4 + $0x40] sm:$0x1f]  ;;  %1394 = vst [vmem:[#allocation3 + $0xc8] sm:$0xff] %v1381_v38  ;;  %v1580_v63 = vadd.f32 %v1567_v27, %v1541_v52  ;;  %v1416_v28 = vmul.f32 %v6381_v35, %v6584_v1  ;;  %v1594_v46 = vld [vmem:[#allocation2 + $0x10e] sm:$0xff] }
 0x143   : > { %v3484_v11 = vld [vmem:[#allocation4 + $0x4e] sm:$0x1f]  ;;  %3430 = vst [vmem:[#allocation4 + $0x58] sm:$0xff] %v3384_v21  ;;  %v1454_v37 = vmul.f32 %v6586_v2, %v7893_v54  ;;  %v1455_v13 = vmul.f32 %v6586_v2, %v7901_v29  ;;  %v1556_v25 = vld [vmem:[#allocation2 + $0x115] sm:$0xff]  ;;  %v1493_v24 = vmul.f32 %v6588_v3, %v7905_v34  ;;  %v1494_v22 = vmul.f32 %v6588_v3, %v7907_v43 }
 0x144   : > { %v1595_v10 = vld [vmem:[#allocation2 + $0x116] sm:$0xff]  ;;  %v3573_v12 = vld [vmem:[#allocation5 + $0x18] sm:$0xff]  ;;  %v3486_v57 = vmax.f32 %v3482_v59, %v3484_v11  ;;  %v1618_v31 = vadd.f32 %v1605_v33, %v1579_v26  ;;  %v7924_v30 = vadd.f32 %v1606_v62, %v1580_v63  ;;  %v1529_v38 = vmul.f32 %v6590_v4, %v1516_v60 }
 0x145   : > { %v3610_v23 = vld [vmem:[#allocation5 + $0x19] sm:$0xff]  ;;  %v3735_v18 = vld [vmem:[#allocation5 + $0xf] sm:$0xff]  ;;  %v3587_v61 = vpack.c.bf16 %v3573_v12, %v3572_v53  ;;  %v1467_v27 = vadd.f32 %v1454_v37, %v7860_v51  ;;  %v1468_v21 = vadd.f32 %v1455_v13, %v1416_v28  ;;  %v1568_v52 = vmul.f32 %v6592_v5, %v1555_v41 }
 0x146   : > { %v3672_v19 = vld [vmem:[#allocation5 + $0x15] sm:$0xff]  ;;  %v3624_v47 = vpack.c.bf16 %v3610_v23, %v3609_v14  ;;  %3488 = vst [vmem:[#allocation5 + $0x22] sm:$0x1f] %v3486_v57  ;;  %v7926_v0 = vadd.f32 %v1638_v17, %v1618_v31  ;;  %v1569_v53 = vmul.f32 %v6592_v5, %v1556_v25  ;;  %v1607_v14 = vmul.f32 %v6594_v6, %v1594_v46  ;;  %v6382_v46 = vld [vmem:[#allocation2 + $0x128] sm:$0xff]  ;;  %v440_v23 = vpop.xlane.xlu1 %439 }
 0x147   : > { %v3687_v20 = vpack.c.bf16 %v3672_v19, %v7772_v42  ;;  %v3704_v55 = vld [vmem:[#allocation5 + $0x16] sm:$0xff]  ;;  %3600 = vst [vmem:[%s7819_s9 + $0x48] sm:$0xff] %v3587_v61  ;;  %v1530_v42 = vmul.f32 %v6590_v4, %v1517_v49  ;;  %v1506_v33 = vadd.f32 %v1493_v24, %v1467_v27  ;;  %v1608_v26 = vmul.f32 %v6594_v6, %v1595_v10  ;;  %v437_v19 = vpop.xlane.xlu0 %436 }
 0x148   : > { %v3736_v48 = vld [vmem:[#allocation5 + $0x17] sm:$0xff]  ;;  %v3719_v40 = vpack.c.bf16 %v3704_v55, %v3703_v16  ;;  %3632 = vst [vmem:[%s7819_s9 + $0x50] sm:$0xff] %v3624_v47  ;;  %v7940_v51 = vadd.f32 %v1494_v22, %v1468_v21  ;;  %v1542_v62 = vadd.f32 %v1529_v38, %v7854_v39  ;;  %v1637_v17 = vmul.f32 %v6381_v35, %v6596_v7 }
 0x149   : > { %v3751_v36 = vpack.c.bf16 %v3736_v48, %v3735_v18  ;;  %3695 = vst [vmem:[%s7819_s9 + $0x18] sm:$0xff] %v3687_v20  ;;  %v1543_v44 = vadd.f32 %v1530_v42, %v7895_v56  ;;  %v3214_v60 = vld [vmem:[#allocation3 + $0xc0] ss:$2 sm:$0xff]  ;;  %v3306_v49 = vld [vmem:[#allocation3 + $0xc1] ss:$2 sm:$0xff]  ;;  %v1669_v41 = vmul.f32 %v6598_v8, %v7893_v54  ;;  %v1670_v16 = vmul.f32 %v6598_v8, %v7901_v29 }
 0x14a   : > { %3727 = vst [vmem:[%s7819_s9 + $0x20] sm:$0xff] %v3719_v40  ;;  %v1702_v59 = vmul.f32 %v6600_v9, %v7905_v34  ;;  %v1703_v11 = vmul.f32 %v6600_v9, %v7907_v43  ;;  %v1443_v63 = vld [vmem:[#allocation2 + $0x119] sm:$0xff]  ;;  %v3385_v39 = vmax.f32 %v3214_v60, %v3306_v49  ;;  %v1581_v28 = vadd.f32 %v1568_v52, %v1542_v62  ;;  %v1444_v37 = vld [vmem:[#allocation2 + $0x121] sm:$0xff] }
 0x14b   : > { %3759 = vst [vmem:[%s7819_s9 + $0x28] sm:$0xff] %v3751_v36  ;;  %v1582_v56 = vadd.f32 %v1569_v53, %v1543_v44  ;;  %v1650_v35 = vadd.f32 %v1637_v17, %v7868_v50  ;;  %v1482_v13 = vld [vmem:[#allocation2 + $0x11a] sm:$0xff]  ;;  %v1483_v25 = vld [vmem:[#allocation2 + $0x122] sm:$0xff]  ;;  %v1682_v54 = vadd.f32 %v1669_v41, %v7878_v58  ;;  %v7956_v29 = vmul.f32 %v6382_v46, %v6584_v1 }
 0x14c   : > { %v1640_v34 = vmul.f32 %v6382_v46, %v6596_v7  ;;  %v6383_v10 = vld [vmem:[#allocation2 + $0x120] sm:$0xff]  ;;  %3431 = vst [vmem:[#allocation4 + $0x60] sm:$0xff] %v3385_v39  ;;  %v1620_v57 = vadd.f32 %v1607_v14, %v1581_v28  ;;  %v1456_v24 = vmul.f32 %v6586_v2, %v1443_v63  ;;  %606 = vst [vmem:[#allocation2 + $0x1f8] sm:$0xff] %v440_v23  ;;  %v1445_v28 = vld [vmem:[#allocation2 + $0x129] sm:$0xff] }
 0x14d   : > { %v1418_v43 = vmul.f32 %v6383_v10, %v6584_v1  ;;  %v1518_v12 = vld [vmem:[#allocation2 + $0x11c] sm:$0xff]  ;;  %v7960_v50 = vadd.f32 %v1608_v26, %v1582_v56  ;;  %v1683_v31 = vadd.f32 %v1670_v16, %v1650_v35  ;;  %v1519_v58 = vld [vmem:[#allocation2 + $0x124] sm:$0xff]  ;;  %605 = vst [vmem:[#allocation2 + $0x1f0] sm:$0xff] %v437_v19  ;;  %v1715_v18 = vadd.f32 %v1702_v59, %v1682_v54  ;;  %v1520_v23 = vld [vmem:[#allocation2 + $0x12c] sm:$0xff] }
 0x14e   : > { %v1557_v22 = vld [vmem:[#allocation2 + $0x11d] sm:$0xff]  ;;  %v1457_v61 = vmul.f32 %v6586_v2, %v1444_v37  ;;  %v1495_v47 = vmul.f32 %v6588_v3, %v1482_v13  ;;  %v1496_v20 = vmul.f32 %v6588_v3, %v1483_v25  ;;  %v1558_v55 = vld [vmem:[#allocation2 + $0x125] sm:$0xff]  ;;  %v7966_v40 = vadd.f32 %v1640_v34, %v1620_v57  ;;  %v6385_v57 = vld [vmem:[#allocation2 + $0x130] sm:$0xff] }
 0x14f   : > { %v1716_v48 = vadd.f32 %v1703_v11, %v1683_v31  ;;  %v1469_v36 = vadd.f32 %v1456_v24, %v7911_v45  ;;  %v1531_v27 = vmul.f32 %v6590_v4, %v1518_v12  ;;  %v1596_v21 = vld [vmem:[#allocation2 + $0x11e] sm:$0xff]  ;;  %v1597_v38 = vld [vmem:[#allocation2 + $0x126] sm:$0xff]  ;;  %v1728_v42 = vmax.f32 %v1715_v18, 0.0  ;;  %v1521_v24 = vld [vmem:[#allocation2 + $0x134] sm:$0xff] }
 0x150   : > { %v1470_v52 = vadd.f32 %v1457_v61, %v1418_v43  ;;  %v1532_v53 = vmul.f32 %v6590_v4, %v1519_v58  ;;  %v1570_v14 = vmul.f32 %v6592_v5, %v1557_v22  ;;  %v1571_v17 = vmul.f32 %v6592_v5, %v1558_v55  ;;  %v1484_v34 = vld [vmem:[#allocation2 + $0x12a] sm:$0xff]  ;;  %v1560_v61 = vld [vmem:[#allocation2 + $0x135] sm:$0xff] }
 0x151   : > { %v1729_v26 = vmax.f32 %v1716_v48, 0.0  ;;  %v1508_v62 = vadd.f32 %v1495_v47, %v1469_v36  ;;  %v1544_v44 = vadd.f32 %v1531_v27, %v7897_v15  ;;  %1741 = vst [vmem:[#allocation3 + $0xd0] sm:$0xff] %v1728_v42  ;;  %v1609_v49 = vmul.f32 %v6594_v6, %v1596_v21  ;;  %v1446_v15 = vld [vmem:[#allocation2 + $0x131] sm:$0xff]  ;;  %v446_v47 = vpop.xlane.xlu1 %445 }
 0x152   : > { %v7974_v60 = vadd.f32 %v1496_v20, %v1470_v52  ;;  %v1545_v45 = vadd.f32 %v1532_v53, %v1506_v33  ;;  %v1610_v41 = vmul.f32 %v6594_v6, %v1597_v38  ;;  %v1639_v59 = vmul.f32 %v6383_v10, %v6596_v7  ;;  %v6384_v33 = vld [vmem:[#allocation2 + $0x138] sm:$0xff]  ;;  %v1559_v58 = vld [vmem:[#allocation2 + $0x12d] sm:$0xff]  ;;  %v443_v20 = vpop.xlane.xlu0 %442  ;;  %608 = vst [vmem:[#allocation2 + $0x208] sm:$0xff] %v446_v47  ;;  %v1663_v47 = vld [vmem:[#allocation2 + $0x141] sm:$0xff] }
 0x153   : > { %1742 = vst [vmem:[#allocation3 + $0xd8] sm:$0xff] %v1729_v26  ;;  %v1583_v16 = vadd.f32 %v1570_v14, %v1544_v44  ;;  %v1671_v11 = vmul.f32 %v6598_v8, %v1443_v63  ;;  %v1672_v39 = vmul.f32 %v6598_v8, %v1444_v37  ;;  %v1704_v35 = vmul.f32 %v6600_v9, %v1482_v13  ;;  %v1485_v37 = vld [vmem:[#allocation2 + $0x132] sm:$0xff] }
 0x154   : > { %v1584_v56 = vadd.f32 %v1571_v17, %v1545_v45  ;;  %v1705_v54 = vmul.f32 %v6600_v9, %v1483_v25  ;;  %v1642_v46 = vmul.f32 %v6384_v33, %v6596_v7  ;;  %v1652_v12 = vadd.f32 %v1639_v59, %v7924_v30  ;;  %v1598_v21 = vld [vmem:[#allocation2 + $0x12e] sm:$0xff]  ;;  %607 = vst [vmem:[#allocation2 + $0x200] sm:$0xff] %v443_v20  ;;  %v1599_v14 = vld [vmem:[#allocation2 + $0x136] sm:$0xff] }
 0x155   : > { %v1622_v43 = vadd.f32 %v1609_v49, %v1583_v16  ;;  %v1684_v10 = vadd.f32 %v1671_v11, %v7926_v0  ;;  %v7987_v63 = vmul.f32 %v6384_v33, %v6584_v1  ;;  %v1420_v13 = vmul.f32 %v6385_v57, %v6584_v1  ;;  %v1522_v33 = vld [vmem:[#allocation2 + $0x13c] sm:$0xff] }
 0x156   : > { %v7989_v19 = vadd.f32 %v1610_v41, %v1584_v56  ;;  %v1458_v25 = vmul.f32 %v6586_v2, %v1445_v28  ;;  %v1459_v31 = vmul.f32 %v6586_v2, %v1446_v15  ;;  %v1685_v22 = vadd.f32 %v1672_v39, %v1652_v12 }
 0x157   : > { %v1717_v30 = vadd.f32 %v1704_v35, %v1684_v10  ;;  %v7994_v18 = vadd.f32 %v1642_v46, %v1622_v43  ;;  %v1497_v0 = vmul.f32 %v6588_v3, %v1484_v34  ;;  %v1498_v36 = vmul.f32 %v6588_v3, %v1485_v37  ;;  %v1523_v46 = vld [vmem:[#allocation2 + $0x144] sm:$0xff] }
 0x158   : > { %v1471_v55 = vadd.f32 %v1458_v25, %v7956_v29  ;;  %v1472_v48 = vadd.f32 %v1459_v31, %v1420_v13  ;;  %v1533_v27 = vmul.f32 %v6590_v4, %v1520_v23  ;;  %v1718_v38 = vadd.f32 %v1705_v54, %v1685_v22  ;;  %v1561_v10 = vld [vmem:[#allocation2 + $0x13d] sm:$0xff]  ;;  %v1562_v31 = vld [vmem:[#allocation2 + $0x145] sm:$0xff] }
 0x159   : > { %v1730_v42 = vmax.f32 %v1717_v30, 0.0  ;;  %v1534_v52 = vmul.f32 %v6590_v4, %v1521_v24  ;;  %v1572_v53 = vmul.f32 %v6592_v5, %v1559_v58  ;;  %v1573_v49 = vmul.f32 %v6592_v5, %v1560_v61  ;;  %v1600_v24 = vld [vmem:[#allocation2 + $0x13e] sm:$0xff] }
 0x15a   : > { %v3216_v26 = vld [vmem:[#allocation3 + $0xd0] ss:$2 sm:$0xff]  ;;  %v3308_v44 = vld [vmem:[#allocation3 + $0xd1] ss:$2 sm:$0xff]  ;;  %v1510_v17 = vadd.f32 %v1497_v0, %v1471_v55  ;;  %v8002_v45 = vadd.f32 %v1498_v36, %v1472_v48  ;;  %v1546_v29 = vadd.f32 %v1533_v27, %v7940_v51  ;;  %v1731_v16 = vmax.f32 %v1718_v38, 0.0  ;;  %v452_v38 = vpop.xlane.xlu1 %451 }
 0x15b   : > { %v3386_v41 = vmax.f32 %v3216_v26, %v3308_v44  ;;  %1743 = vst [vmem:[#allocation3 + $0xe0] sm:$0xff] %v1730_v42  ;;  %v1547_v59 = vadd.f32 %v1534_v52, %v1508_v62  ;;  %v1611_v11 = vmul.f32 %v6594_v6, %v1598_v21  ;;  %v1612_v56 = vmul.f32 %v6594_v6, %v1599_v14  ;;  %v1662_v61 = vld [vmem:[#allocation2 + $0x139] sm:$0xff]  ;;  %v1696_v21 = vld [vmem:[#allocation2 + $0x142] sm:$0xff]  ;;  %v449_v42 = vpop.xlane.xlu0 %448 }
 0x15c   : > { %v1585_v39 = vadd.f32 %v1572_v53, %v1546_v29  ;;  %v1641_v35 = vmul.f32 %v6385_v57, %v6596_v7  ;;  %v1673_v54 = vmul.f32 %v6598_v8, %v1445_v28  ;;  %1744 = vst [vmem:[#allocation3 + $0xe8] sm:$0xff] %v1731_v16  ;;  %v1674_v43 = vmul.f32 %v6598_v8, %v1446_v15  ;;  %v6386_v57 = vld [vmem:[#allocation2 + $0x148] sm:$0xff]  ;;  %v1695_v27 = vld [vmem:[#allocation2 + $0x13a] sm:$0xff] }
 0x15d   : > { %3432 = vst [vmem:[#allocation4 + $0x68] sm:$0xff] %v3386_v41  ;;  %v1586_v51 = vadd.f32 %v1573_v49, %v1547_v59  ;;  %v1706_v12 = vmul.f32 %v6600_v9, %v1484_v34  ;;  %v1707_v62 = vmul.f32 %v6600_v9, %v1485_v37  ;;  %v1644_v28 = vmul.f32 %v6386_v57, %v6596_v7  ;;  %v1601_v37 = vld [vmem:[#allocation2 + $0x146] sm:$0xff] }
 0x15e   : > { %v1624_v23 = vadd.f32 %v1611_v11, %v1585_v39  ;;  %v1654_v13 = vadd.f32 %v1641_v35, %v7960_v50  ;;  %v1686_v25 = vadd.f32 %v1673_v54, %v7966_v40  ;;  %v8019_v22 = vmul.f32 %v6386_v57, %v6584_v1  ;;  %v6387_v26 = vld [vmem:[#allocation2 + $0x140] sm:$0xff]  ;;  %610 = vst [vmem:[#allocation2 + $0x218] sm:$0xff] %v452_v38  ;;  %v3489_v29 = vld [vmem:[#allocation4 + $0x54] sm:$0xff] }
 0x15f   : > { %v8016_v58 = vadd.f32 %v1612_v56, %v1586_v51  ;;  %v1535_v15 = vmul.f32 %v6590_v4, %v1522_v33  ;;  %v1536_v34 = vmul.f32 %v6590_v4, %v1523_v46  ;;  %v1574_v40 = vmul.f32 %v6592_v5, %v1561_v10  ;;  %609 = vst [vmem:[#allocation2 + $0x210] sm:$0xff] %v449_v42  ;;  %v3737_v10 = vld [vmem:[#allocation5 + $0x1f] sm:$0xff] }
 0x160   : > { %v1687_v30 = vadd.f32 %v1674_v43, %v1654_v13  ;;  %v1719_v0 = vadd.f32 %v1706_v12, %v1686_v25  ;;  %v8023_v50 = vadd.f32 %v1644_v28, %v1624_v23  ;;  %v1575_v48 = vmul.f32 %v6592_v5, %v1562_v31  ;;  %v1524_v57 = vld [vmem:[#allocation2 + $0x14c] sm:$0xff] }
 0x161   : > { %v1548_v20 = vadd.f32 %v1535_v15, %v7974_v60  ;;  %v1549_v55 = vadd.f32 %v1536_v34, %v1510_v17  ;;  %v1613_v36 = vmul.f32 %v6594_v6, %v1600_v24  ;;  %v1614_v14 = vmul.f32 %v6594_v6, %v1601_v37  ;;  %v3490_v60 = vld [vmem:[#allocation4 + $0x5c] sm:$0x1f]  ;;  %v1697_v38 = vld [vmem:[#allocation2 + $0x14a] sm:$0xff] }
 0x162   : > { %v1720_v52 = vadd.f32 %v1707_v62, %v1687_v30  ;;  %v1732_v53 = vmax.f32 %v1719_v0, 0.0  ;;  %v1643_v44 = vmul.f32 %v6387_v26, %v6596_v7  ;;  %v1675_v41 = vmul.f32 %v6598_v8, %v1662_v61  ;;  %v1563_v34 = vld [vmem:[#allocation2 + $0x14d] sm:$0xff] }
 0x163   : > { %v1587_v17 = vadd.f32 %v1574_v40, %v1548_v20  ;;  %v1588_v49 = vadd.f32 %v1575_v48, %v1549_v55  ;;  %v1676_v16 = vmul.f32 %v6598_v8, %v1663_v47  ;;  %v8033_v39 = vld [vmem:[#allocation3 + $0xe0] ss:$2 sm:$0xff]  ;;  %v1708_v54 = vmul.f32 %v6600_v9, %v1695_v27  ;;  %v8038_v43 = vld [vmem:[#allocation3 + $0xe1] ss:$2 sm:$0xff] }
 0x164   : > { %v3491_v59 = vld [vmem:[#allocation4 + $0x62] sm:$0xff]  ;;  %v3492_v11 = vld [vmem:[#allocation4 + $0x6a] sm:$0x1f]  ;;  %v1733_v56 = vmax.f32 %v1720_v52, 0.0  ;;  %1745 = vst [vmem:[#allocation3 + $0xf0] sm:$0xff] %v1732_v53  ;;  %v1656_v35 = vadd.f32 %v1643_v44, %v7989_v19  ;;  %v1709_v33 = vmul.f32 %v6600_v9, %v1696_v21  ;;  %v3387_v23 = vmax.f32 %v8033_v39, %v8038_v43  ;;  %v1602_v20 = vld [vmem:[#allocation2 + $0x14e] sm:$0xff]  ;;  %v455_v44 = vpop.xlane.xlu0 %454 }
 0x165   : > { %v3493_v46 = vmax.f32 %v3489_v29, %v3491_v59  ;;  %v3494_v51 = vmax.f32 %v3490_v60, %v3492_v11  ;;  %v1626_v12 = vadd.f32 %v1613_v36, %v1587_v17  ;;  %v8040_v62 = vadd.f32 %v1614_v14, %v1588_v49  ;;  %v8060_v14 = vld [vmem:[#allocation2 + $0x152] sm:$0xff]  ;;  %611 = vst [vmem:[#allocation2 + $0x220] sm:$0xff] %v455_v44 }
 0x166   : > { %1746 = vst [vmem:[#allocation3 + $0xf8] sm:$0xff] %v1733_v56  ;;  %v1688_v13 = vadd.f32 %v1675_v41, %v7994_v18  ;;  %v1689_v25 = vadd.f32 %v1676_v16, %v1656_v35  ;;  %v1768_v19 = vmul.f32 %v6387_v26, %v6584_v1  ;;  %v1806_v31 = vmul.f32 %v6586_v2, %v1662_v61  ;;  %v6388_v18 = vld [vmem:[#allocation2 + $0x158] sm:$0xff]  ;;  %v458_v26 = vpop.xlane.xlu1 %457  ;;  %v6389_v49 = vld [vmem:[#allocation2 + $0x150] sm:$0xff] }
 0x167   : > { %3495 = vst [vmem:[#allocation5 + $0x27] sm:$0xff] %v3493_v46  ;;  %3496 = vst [vmem:[#allocation5 + $0x2f] sm:$0x1f] %v3494_v51  ;;  %v3752_v28 = vpack.c.bf16 %v3493_v46, %v3737_v10  ;;  %v1807_v24 = vmul.f32 %v6586_v2, %v1663_v47  ;;  %v1845_v15 = vmul.f32 %v6588_v3, %v1695_v27  ;;  %v1664_v47 = vld [vmem:[#allocation2 + $0x149] sm:$0xff]  ;;  %v1665_v27 = vld [vmem:[#allocation2 + $0x151] sm:$0xff] }
 0x168   : > { %v1721_v37 = vadd.f32 %v1708_v54, %v1688_v13  ;;  %v1722_v30 = vadd.f32 %v1709_v33, %v1689_v25  ;;  %v1846_v0 = vmul.f32 %v6588_v3, %v1696_v21  ;;  %v1646_v40 = vmul.f32 %v6388_v18, %v6596_v7  ;;  %612 = vst [vmem:[#allocation2 + $0x228] sm:$0xff] %v458_v26  ;;  %v3673_v51 = vld [vmem:[#allocation5 + $0x1d] sm:$0xff]  ;;  %v1875_v43 = vld [vmem:[#allocation2 + $0x174] sm:$0xff] }
 0x169   : > { %3760 = vst [vmem:[%s7819_s9 + $0x70] sm:$0xff] %v3752_v28  ;;  %v1819_v55 = vadd.f32 %v1806_v31, %v7987_v63  ;;  %v1820_v48 = vadd.f32 %v1807_v24, %v1768_v19  ;;  %v8054_v36 = vmul.f32 %v6388_v18, %v6584_v1  ;;  %v1537_v61 = vmul.f32 %v6590_v4, %v1524_v57  ;;  %v3799_v10 = vld [vmem:[#allocation5 + $0x1b] sm:$0xff]  ;;  %v1874_v39 = vld [vmem:[#allocation2 + $0x16c] sm:$0xff] }
 0x16a   : > { %v1734_v42 = vmax.f32 %v1721_v37, 0.0  ;;  %v1735_v52 = vmax.f32 %v1722_v30, 0.0  ;;  %v8057_v53 = vadd.f32 %v1646_v40, %v1626_v12  ;;  %v1576_v21 = vmul.f32 %v6592_v5, %v1563_v34  ;;  %v3705_v12 = vld [vmem:[#allocation5 + $0x1e] sm:$0xff]  ;;  %v1910_v34 = vld [vmem:[#allocation2 + $0x155] sm:$0xff] }
 0x16b   : > { %v8062_v63 = vadd.f32 %v1845_v15, %v1819_v55  ;;  %v8064_v29 = vadd.f32 %v1846_v0, %v1820_v48  ;;  %v1550_v60 = vadd.f32 %v1537_v61, %v8002_v45  ;;  %v1615_v17 = vmul.f32 %v6594_v6, %v1602_v20  ;;  %v1871_v15 = vld [vmem:[#allocation2 + $0x154] sm:$0xff] }
 0x16c   : > { %1747 = vst [vmem:[#allocation3 + $0x100] sm:$0xff] %v1734_v42  ;;  %1748 = vst [vmem:[#allocation3 + $0x108] sm:$0xff] %v1735_v52  ;;  %v1645_v41 = vmul.f32 %v6389_v49, %v6596_v7  ;;  %v1677_v16 = vmul.f32 %v6598_v8, %v1664_v47  ;;  %v1678_v59 = vmul.f32 %v6598_v8, %v1665_v27  ;;  %v3831_v52 = vld [vmem:[#allocation5 + $0x1c] sm:$0xff] }
 0x16d   : > { %v1710_v11 = vmul.f32 %v6600_v9, %v1697_v38  ;;  %v3220_v56 = vld [vmem:[#allocation3 + $0xf0] ss:$2 sm:$0xff]  ;;  %v3312_v35 = vld [vmem:[#allocation3 + $0xf1] ss:$2 sm:$0xff]  ;;  %v1589_v54 = vadd.f32 %v1576_v21, %v1550_v60  ;;  %v1711_v45 = vmul.f32 %v6600_v9, %v8060_v14  ;;  %v1770_v33 = vmul.f32 %v6389_v49, %v6584_v1  ;;  %v461_v49 = vpop.xlane.xlu0 %460 }
 0x16e   : > { %v1808_v46 = vmul.f32 %v6586_v2, %v1664_v47  ;;  %v3574_v13 = vld [vmem:[#allocation5 + $0x20] sm:$0xff]  ;;  %v3575_v25 = vld [vmem:[#allocation5 + $0x28] sm:$0xff]  ;;  %v3388_v57 = vmax.f32 %v3220_v56, %v3312_v35  ;;  %v1658_v28 = vadd.f32 %v1645_v41, %v8016_v58  ;;  %v1690_v31 = vadd.f32 %v1677_v16, %v8023_v50  ;;  %v1666_v56 = vld [vmem:[#allocation2 + $0x159] sm:$0xff]  ;;  %613 = vst [vmem:[#allocation2 + $0x230] sm:$0xff] %v461_v49 }
 0x16f   : > { %v3611_v19 = vld [vmem:[#allocation5 + $0x21] sm:$0xff]  ;;  %v1809_v24 = vmul.f32 %v6586_v2, %v1665_v27  ;;  %v3588_v37 = vpack.c.bf16 %v3575_v25, %v3574_v13  ;;  %v3612_v30 = vld [vmem:[#allocation5 + $0x29] sm:$0xff]  ;;  %v8081_v40 = vadd.f32 %v1615_v17, %v1589_v54  ;;  %v1847_v55 = vmul.f32 %v6588_v3, %v1697_v38  ;;  %v464_v17 = vpop.xlane.xlu1 %463  ;;  %v1667_v35 = vld [vmem:[#allocation2 + $0x161] sm:$0xff] }
 0x170   : > { %v3643_v0 = vld [vmem:[#allocation5 + $0x22] sm:$0xff]  ;;  %v8079_v18 = vld [vmem:[#allocation5 + $0x2a] sm:$0xff]  ;;  %v1821_v20 = vadd.f32 %v1808_v46, %v8019_v22  ;;  %v3625_v48 = vpack.c.bf16 %v3612_v30, %v3611_v19  ;;  %3434 = vst [vmem:[#allocation4 + $0x78] sm:$0xff] %v3388_v57  ;;  %v1691_v42 = vadd.f32 %v1678_v59, %v1658_v28  ;;  %v1723_v38 = vadd.f32 %v1710_v11, %v1690_v31  ;;  %v1699_v54 = vld [vmem:[#allocation2 + $0x15a] sm:$0xff] }
 0x171   : > { %v3657_v58 = vpack.c.bf16 %v8079_v18, %v3643_v0  ;;  %v3674_v50 = vld [vmem:[#allocation5 + $0x25] sm:$0xff]  ;;  %v3783_v47 = vpack.c.bf16 %v3643_v0, %v7874_v32  ;;  %3601 = vst [vmem:[%s7819_s9 + $0x90] sm:$0xff] %v3588_v37  ;;  %v1949_v60 = vld [vmem:[#allocation2 + $0x156] sm:$0xff]  ;;  %v1822_v16 = vadd.f32 %v1809_v24, %v1770_v33  ;;  %v1848_v59 = vmul.f32 %v6588_v3, %v8060_v14  ;;  %v1700_v33 = vld [vmem:[#allocation2 + $0x162] sm:$0xff] }
 0x172   : > { %v3706_v61 = vld [vmem:[#allocation5 + $0x26] sm:$0xff]  ;;  %v3688_v21 = vpack.c.bf16 %v3674_v50, %v3673_v51  ;;  %3633 = vst [vmem:[%s7819_s9 + $0x98] sm:$0xff] %v3625_v48  ;;  %v1724_v41 = vadd.f32 %v1711_v45, %v1691_v42  ;;  %614 = vst [vmem:[#allocation2 + $0x238] sm:$0xff] %v464_v17  ;;  %v1736_v51 = vmax.f32 %v1723_v38, 0.0  ;;  %v1923_v45 = vmul.f32 %v6592_v5, %v1910_v34  ;;  %v1950_v49 = vld [vmem:[#allocation2 + $0x15e] sm:$0xff] }
 0x173   : > { %v3800_v27 = vld [vmem:[#allocation5 + $0x23] sm:$0xff]  ;;  %v3720_v26 = vpack.c.bf16 %v3706_v61, %v3705_v12  ;;  %3665 = vst [vmem:[%s7819_s9 + $0xa0] sm:$0xff] %v3657_v58  ;;  %3791 = vst [vmem:[%s7819_s9 + $0x30] sm:$0xff] %v3783_v47  ;;  %v1860_v12 = vadd.f32 %v1847_v55, %v1821_v20  ;;  %v8099_v25 = vadd.f32 %v1848_v59, %v1822_v16  ;;  %v467_v16 = vpop.xlane.xlu0 %466 }
 0x174   : > { %v3815_v22 = vpack.c.bf16 %v3800_v27, %v3799_v10  ;;  %v3832_v44 = vld [vmem:[#allocation5 + $0x24] sm:$0xff]  ;;  %3696 = vst [vmem:[%s7819_s9 + $0x60] sm:$0xff] %v3688_v21  ;;  %v1884_v10 = vmul.f32 %v6590_v4, %v1871_v15  ;;  %v1737_v13 = vmax.f32 %v1724_v41, 0.0  ;;  %v1962_v19 = vmul.f32 %v6594_v6, %v1949_v60  ;;  %1749 = vst [vmem:[#allocation3 + $0x110] sm:$0xff] %v1736_v51  ;;  %v6391_v15 = vld [vmem:[#allocation2 + $0x160] sm:$0xff]  ;;  %v470_v41 = vpop.xlane.xlu1 %469 }
 0x175   : > { %v3847_v32 = vpack.c.bf16 %v3832_v44, %v3831_v52  ;;  %3728 = vst [vmem:[%s7819_s9 + $0x68] sm:$0xff] %v3720_v26  ;;  %v3222_v11 = vld [vmem:[#allocation3 + $0x100] ss:$2 sm:$0xff]  ;;  %v3314_v46 = vld [vmem:[#allocation3 + $0x101] ss:$2 sm:$0xff]  ;;  %v1647_v34 = vmul.f32 %v6391_v15, %v6596_v7  ;;  %v1679_v37 = vmul.f32 %v6598_v8, %v1666_v56  ;;  %v1680_v30 = vmul.f32 %v6598_v8, %v1667_v35 }
 0x176   : > { %3823 = vst [vmem:[%s7819_s9 + $0x38] sm:$0xff] %v3815_v22  ;;  %v3389_v14 = vmax.f32 %v3222_v11, %v3314_v46  ;;  %v1897_v57 = vadd.f32 %v1884_v10, %v8062_v63  ;;  %v6390_v28 = vld [vmem:[#allocation2 + $0x168] sm:$0xff]  ;;  %1750 = vst [vmem:[#allocation3 + $0x118] sm:$0xff] %v1737_v13  ;;  %v1712_v0 = vmul.f32 %v6600_v9, %v1699_v54  ;;  %v1872_v63 = vld [vmem:[#allocation2 + $0x15c] sm:$0xff] }
 0x177   : > { %3855 = vst [vmem:[%s7819_s9 + $0x40] sm:$0xff] %v3847_v32  ;;  %v1648_v31 = vmul.f32 %v6390_v28, %v6596_v7  ;;  %v8105_v24 = vmul.f32 %v6390_v28, %v6584_v1  ;;  %v1713_v20 = vmul.f32 %v6600_v9, %v1700_v33  ;;  %v1660_v58 = vadd.f32 %v1647_v34, %v8040_v62  ;;  %v1873_v61 = vld [vmem:[#allocation2 + $0x164] sm:$0xff] }
 0x178   : > { %3435 = vst [vmem:[#allocation4 + $0x80] sm:$0xff] %v3389_v14  ;;  %v1936_v55 = vadd.f32 %v1923_v45, %v1897_v57  ;;  %v1772_v50 = vmul.f32 %v6391_v15, %v6584_v1  ;;  %v1692_v47 = vadd.f32 %v1679_v37, %v8057_v53  ;;  %v1810_v27 = vmul.f32 %v6586_v2, %v1666_v56  ;;  %v1911_v21 = vld [vmem:[#allocation2 + $0x15d] sm:$0xff]  ;;  %v1912_v26 = vld [vmem:[#allocation2 + $0x165] sm:$0xff] }
 0x179   : > { %v8113_v48 = vadd.f32 %v1648_v31, %v8081_v40  ;;  %v1811_v42 = vmul.f32 %v6586_v2, %v1667_v35  ;;  %v1849_v52 = vmul.f32 %v6588_v3, %v1699_v54  ;;  %v1693_v44 = vadd.f32 %v1680_v30, %v1660_v58  ;;  %v1951_v32 = vld [vmem:[#allocation2 + $0x166] sm:$0xff]  ;;  %616 = vst [vmem:[#allocation2 + $0x248] sm:$0xff] %v470_v41  ;;  %v6392_v37 = vld [vmem:[#allocation2 + $0x178] sm:$0xff] }
 0x17a   : > { %v8121_v22 = vadd.f32 %v1962_v19, %v1936_v55  ;;  %v1850_v40 = vmul.f32 %v6588_v3, %v1700_v33  ;;  %v1885_v62 = vmul.f32 %v6590_v4, %v1872_v63  ;;  %v1725_v38 = vadd.f32 %v1712_v0, %v1692_v47  ;;  %615 = vst [vmem:[#allocation2 + $0x240] sm:$0xff] %v467_v16  ;;  %v1668_v10 = vld [vmem:[#allocation2 + $0x169] sm:$0xff]  ;;  %v1800_v30 = vld [vmem:[#allocation2 + $0x171] sm:$0xff] }
 0x17b   : > { %v1823_v60 = vadd.f32 %v1810_v27, %v8054_v36  ;;  %v1824_v17 = vadd.f32 %v1811_v42, %v1772_v50  ;;  %v1886_v53 = vmul.f32 %v6590_v4, %v1873_v61  ;;  %v1726_v59 = vadd.f32 %v1713_v20, %v1693_v44  ;;  %v1701_v45 = vld [vmem:[#allocation2 + $0x16a] sm:$0xff]  ;;  %v1839_v0 = vld [vmem:[#allocation2 + $0x172] sm:$0xff] }
 0x17c   : > { %v1898_v56 = vadd.f32 %v1885_v62, %v8064_v29  ;;  %v1924_v35 = vmul.f32 %v6592_v5, %v1911_v21  ;;  %v1925_v54 = vmul.f32 %v6592_v5, %v1912_v26  ;;  %v1738_v11 = vmax.f32 %v1725_v38, 0.0  ;;  %v3833_v20 = vld [vmem:[#allocation5 + $0x2c] sm:$0xff] }
 0x17d   : > { %v1862_v46 = vadd.f32 %v1849_v52, %v1823_v60  ;;  %v8130_v51 = vadd.f32 %v1850_v40, %v1824_v17  ;;  %v1899_v36 = vadd.f32 %v1886_v53, %v1860_v12  ;;  %v3224_v14 = vld [vmem:[#allocation3 + $0x110] ss:$2 sm:$0xff]  ;;  %v3316_v13 = vld [vmem:[#allocation3 + $0x111] ss:$2 sm:$0xff]  ;;  %v1739_v19 = vmax.f32 %v1726_v59, 0.0 }
 0x17e   : > { %v1937_v57 = vadd.f32 %v1924_v35, %v1898_v56  ;;  %v1963_v29 = vmul.f32 %v6594_v6, %v1950_v49  ;;  %v1964_v28 = vmul.f32 %v6594_v6, %v1951_v32  ;;  %v3390_v15 = vmax.f32 %v3224_v14, %v3316_v13  ;;  %1751 = vst [vmem:[#allocation3 + $0x120] sm:$0xff] %v1738_v11  ;;  %v6393_v47 = vld [vmem:[#allocation2 + $0x170] sm:$0xff]  ;;  %v8163_v11 = vld [vmem:[#allocation2 + $0x179] sm:$0xff]  ;;  %v8169_v14 = vld [vmem:[#allocation2 + $0x181] sm:$0xff] }
 0x17f   : > { %v3499_v33 = vld [vmem:[#allocation4 + $0x7e] sm:$0xff]  ;;  %v1938_v34 = vadd.f32 %v1925_v54, %v1899_v36  ;;  %v8138_v12 = vmul.f32 %v6392_v37, %v6584_v1  ;;  %1752 = vst [vmem:[#allocation3 + $0x128] sm:$0xff] %v1739_v19  ;;  %v1996_v55 = vmul.f32 %v6392_v37, %v6596_v7  ;;  %v1681_v58 = vmul.f32 %v6598_v8, %v1668_v10  ;;  %v1913_v52 = vld [vmem:[#allocation2 + $0x16d] sm:$0xff]  ;;  %v8173_v19 = vld [vmem:[#allocation2 + $0x182] sm:$0xff] }
 0x180   : > { %v3501_v31 = vmax.f32 %v3387_v23, %v3499_v33  ;;  %v1976_v63 = vadd.f32 %v1963_v29, %v1937_v57  ;;  %v1714_v50 = vmul.f32 %v6600_v9, %v1701_v45  ;;  %3436 = vst [vmem:[#allocation4 + $0x88] sm:$0xff] %v3390_v15  ;;  %v1774_v27 = vmul.f32 %v6393_v47, %v6584_v1  ;;  %v1914_v21 = vld [vmem:[#allocation2 + $0x175] sm:$0xff] }
 0x181   : > { %v8143_v61 = vadd.f32 %v1964_v28, %v1938_v34  ;;  %v1812_v42 = vmul.f32 %v6586_v2, %v1668_v10  ;;  %v1694_v44 = vadd.f32 %v1681_v58, %v8113_v48  ;;  %v1813_v40 = vmul.f32 %v6586_v2, %v1800_v30  ;;  %v1952_v38 = vld [vmem:[#allocation2 + $0x16e] sm:$0xff]  ;;  %v1953_v32 = vld [vmem:[#allocation2 + $0x176] sm:$0xff] }
 0x182   : > { %3503 = vst [vmem:[#allocation5 + $0x34] sm:$0xff] %v3501_v31  ;;  %v3848_v23 = vpack.c.bf16 %v3501_v31, %v3833_v20  ;;  %v8147_v26 = vadd.f32 %v1996_v55, %v1976_v63  ;;  %v1851_v62 = vmul.f32 %v6588_v3, %v1701_v45  ;;  %v1852_v17 = vmul.f32 %v6588_v3, %v1839_v0  ;;  %v8171_v13 = vld [vmem:[#allocation2 + $0x17a] sm:$0xff]  ;;  %v6394_v63 = vld [vmem:[#allocation2 + $0x188] sm:$0xff] }
 0x183   : > { %v1825_v60 = vadd.f32 %v1812_v42, %v8105_v24  ;;  %v1887_v53 = vmul.f32 %v6590_v4, %v1874_v39  ;;  %v1888_v49 = vmul.f32 %v6590_v4, %v1875_v43  ;;  %v1727_v41 = vadd.f32 %v1714_v50, %v1694_v44  ;;  %v1876_v15 = vld [vmem:[#allocation2 + $0x17c] sm:$0xff]  ;;  %v1877_v50 = vld [vmem:[#allocation2 + $0x184] sm:$0xff]  ;;  %v3801_v43 = vld [vmem:[#allocation5 + $0x2b] sm:$0xff] }
 0x184   : > { %3856 = vst [vmem:[%s7819_s9 + $0x88] sm:$0xff] %v3848_v23  ;;  %v1826_v16 = vadd.f32 %v1813_v40, %v1774_v27  ;;  %v1926_v59 = vmul.f32 %v6592_v5, %v1913_v52  ;;  %v1927_v48 = vmul.f32 %v6592_v5, %v1914_v21  ;;  %v1965_v24 = vmul.f32 %v6594_v6, %v1952_v38  ;;  %v1915_v39 = vld [vmem:[#allocation2 + $0x17d] sm:$0xff]  ;;  %v3498_v52 = vld [vmem:[#allocation4 + $0x78] sm:$0x1f] }
 0x185   : > { %v8159_v56 = vadd.f32 %v1851_v62, %v1825_v60  ;;  %v1900_v35 = vadd.f32 %v1887_v53, %v8099_v25  ;;  %v1901_v54 = vadd.f32 %v1888_v49, %v1862_v46  ;;  %v1740_v36 = vmax.f32 %v1727_v41, 0.0  ;;  %v1954_v42 = vld [vmem:[#allocation2 + $0x17e] sm:$0xff]  ;;  %v476_v60 = vpop.xlane.xlu1 %475 }
 0x186   : > { %v8165_v10 = vadd.f32 %v1852_v17, %v1826_v16  ;;  %v1966_v45 = vmul.f32 %v6594_v6, %v1953_v32  ;;  %v1995_v33 = vmul.f32 %v6393_v47, %v6596_v7  ;;  %v3226_v57 = vld [vmem:[#allocation3 + $0x120] ss:$2 sm:$0xff]  ;;  %v3318_v25 = vld [vmem:[#allocation3 + $0x121] ss:$2 sm:$0xff]  ;;  %v2028_v28 = vmul.f32 %v6598_v8, %v1800_v30  ;;  %v473_v17 = vpop.xlane.xlu0 %472  ;;  %618 = vst [vmem:[#allocation2 + $0x258] sm:$0xff] %v476_v60 }
 0x187   : > { %v1939_v46 = vadd.f32 %v1926_v59, %v1900_v35  ;;  %v1940_v29 = vadd.f32 %v1927_v48, %v1901_v54  ;;  %v2061_v31 = vmul.f32 %v6600_v9, %v1839_v0  ;;  %v3391_v37 = vmax.f32 %v3226_v57, %v3318_v25  ;;  %1753 = vst [vmem:[#allocation3 + $0x130] sm:$0xff] %v1740_v36  ;;  %v6395_v47 = vld [vmem:[#allocation2 + $0x180] sm:$0xff] }
 0x188   : > { %v2008_v20 = vadd.f32 %v1995_v33, %v8121_v22  ;;  %v8181_v55 = vmul.f32 %v6394_v63, %v6584_v1  ;;  %v1998_v58 = vmul.f32 %v6394_v63, %v6596_v7  ;;  %v1776_v27 = vmul.f32 %v6395_v47, %v6584_v1  ;;  %v1916_v22 = vld [vmem:[#allocation2 + $0x185] sm:$0xff]  ;;  %v3500_v44 = vld [vmem:[#allocation4 + $0x86] sm:$0x1f]  ;;  %617 = vst [vmem:[#allocation2 + $0x250] sm:$0xff] %v473_v17 }
 0x189   : > { %v8177_v34 = vld [vmem:[#allocation5 + $0x32] sm:$0xff]  ;;  %v1978_v0 = vadd.f32 %v1965_v24, %v1939_v46  ;;  %v8186_v23 = vadd.f32 %v1966_v45, %v1940_v29  ;;  %3437 = vst [vmem:[#allocation4 + $0x90] sm:$0xff] %v3391_v37  ;;  %v1814_v62 = vmul.f32 %v6586_v2, %v8163_v11  ;;  %v1853_v38 = vmul.f32 %v6588_v3, %v8171_v13  ;;  %v1955_v54 = vld [vmem:[#allocation2 + $0x186] sm:$0xff] }
 0x18a   : > { %v3784_v30 = vpack.c.bf16 %v8177_v34, %v8079_v18  ;;  %v3802_v21 = vld [vmem:[#allocation5 + $0x33] sm:$0xff]  ;;  %v2041_v40 = vadd.f32 %v2028_v28, %v2008_v20  ;;  %v1815_v18 = vmul.f32 %v6586_v2, %v8169_v14  ;;  %v3502_v49 = vmax.f32 %v3498_v52, %v3500_v44  ;;  %v8217_v37 = vld [vmem:[#allocation2 + $0x189] sm:$0xff]  ;;  %v482_v52 = vpop.xlane.xlu1 %481 }
 0x18b   : > { %v3816_v53 = vpack.c.bf16 %v3802_v21, %v3801_v43  ;;  %v8196_v32 = vadd.f32 %v1998_v58, %v1978_v0  ;;  %v1854_v41 = vmul.f32 %v6588_v3, %v8173_v19  ;;  %v1827_v59 = vadd.f32 %v1814_v62, %v8138_v12  ;;  %v6396_v43 = vld [vmem:[#allocation2 + $0x198] sm:$0xff]  ;;  %v8232_v0 = vld [vmem:[#allocation2 + $0x18a] sm:$0xff]  ;;  %v479_v21 = vpop.xlane.xlu0 %478  ;;  %620 = vst [vmem:[#allocation2 + $0x268] sm:$0xff] %v482_v52 }
 0x18c   : > { %3792 = vst [vmem:[%s7819_s9 + $0x78] sm:$0xff] %v3784_v30  ;;  %v2074_v16 = vadd.f32 %v2061_v31, %v2041_v40  ;;  %v1828_v48 = vadd.f32 %v1815_v18, %v1776_v27  ;;  %v1889_v35 = vmul.f32 %v6590_v4, %v1876_v15  ;;  %3504 = vst [vmem:[#allocation5 + $0x3c] sm:$0x1f] %v3502_v49  ;;  %v3613_v44 = vld [vmem:[#allocation5 + $0x31] sm:$0xff] }
 0x18d   : > { %3824 = vst [vmem:[%s7819_s9 + $0x80] sm:$0xff] %v3816_v53  ;;  %v1890_v24 = vmul.f32 %v6590_v4, %v1877_v50  ;;  %v1928_v36 = vmul.f32 %v6592_v5, %v1915_v39  ;;  %v1929_v45 = vmul.f32 %v6592_v5, %v1916_v22  ;;  %v1967_v33 = vmul.f32 %v6594_v6, %v1954_v42  ;;  %v1878_v42 = vld [vmem:[#allocation2 + $0x18c] sm:$0xff]  ;;  %v3675_v40 = vld [vmem:[#allocation5 + $0x2d] sm:$0xff] }
 0x18e   : > { %v2087_v57 = vmax.f32 %v2074_v16, 0.0  ;;  %v8207_v25 = vadd.f32 %v1853_v38, %v1827_v59  ;;  %v8209_v46 = vadd.f32 %v1854_v41, %v1828_v48  ;;  %v1902_v12 = vadd.f32 %v1889_v35, %v8130_v51  ;;  %v3707_v62 = vld [vmem:[#allocation5 + $0x2e] sm:$0xff]  ;;  %v1917_v53 = vld [vmem:[#allocation2 + $0x18d] sm:$0xff]  ;;  %619 = vst [vmem:[#allocation2 + $0x260] sm:$0xff] %v479_v21 }
 0x18f   : > { %v1903_v29 = vadd.f32 %v1890_v24, %v8159_v56  ;;  %v1968_v28 = vmul.f32 %v6594_v6, %v1955_v54  ;;  %v1997_v31 = vmul.f32 %v6395_v47, %v6596_v7  ;;  %v2029_v15 = vmul.f32 %v6598_v8, %v8163_v11  ;;  %v8225_v56 = vld [vmem:[#allocation2 + $0x191] sm:$0xff] }
 0x190   : > { %2100 = vst [vmem:[#allocation3 + $0x138] sm:$0xff] %v2087_v57  ;;  %v1941_v20 = vadd.f32 %v1928_v36, %v1902_v12  ;;  %v2030_v63 = vmul.f32 %v6598_v8, %v8169_v14  ;;  %v2062_v58 = vmul.f32 %v6600_v9, %v8171_v13  ;;  %v2063_v51 = vmul.f32 %v6600_v9, %v8173_v19  ;;  %v8234_v14 = vld [vmem:[#allocation2 + $0x192] sm:$0xff] }
 0x191   : > { %v1942_v50 = vadd.f32 %v1929_v45, %v1903_v29  ;;  %v2010_v39 = vadd.f32 %v1997_v31, %v8143_v61  ;;  %v2042_v11 = vadd.f32 %v2029_v15, %v8147_v26  ;;  %v8230_v30 = vmul.f32 %v6396_v43, %v6584_v1  ;;  %v3576_v47 = vld [vmem:[#allocation5 + $0x30] sm:$0xff]  ;;  %v6397_v19 = vld [vmem:[#allocation2 + $0x190] sm:$0xff] }
 0x192   : > { %v1980_v13 = vadd.f32 %v1967_v33, %v1941_v20  ;;  %v2000_v27 = vmul.f32 %v6396_v43, %v6596_v7  ;;  %v1778_v22 = vmul.f32 %v6397_v19, %v6584_v1  ;;  %v1816_v61 = vmul.f32 %v6586_v2, %v8217_v37  ;;  %v1879_v26 = vld [vmem:[#allocation2 + $0x194] sm:$0xff] }
 0x193   : > { %v8240_v18 = vadd.f32 %v1968_v28, %v1942_v50  ;;  %v2043_v38 = vadd.f32 %v2030_v63, %v2010_v39  ;;  %v2075_v60 = vadd.f32 %v2062_v58, %v2042_v11  ;;  %v1817_v17 = vmul.f32 %v6586_v2, %v8225_v56  ;;  %v1918_v49 = vld [vmem:[#allocation2 + $0x195] sm:$0xff]  ;;  %v3577_v41 = vld [vmem:[#allocation5 + $0x38] sm:$0xff] }
 0x194   : > { %v3614_v16 = vld [vmem:[#allocation5 + $0x39] sm:$0xff]  ;;  %v8244_v48 = vadd.f32 %v2000_v27, %v1980_v13  ;;  %v1829_v35 = vadd.f32 %v1816_v61, %v8181_v55  ;;  %v1855_v54 = vmul.f32 %v6588_v3, %v8232_v0  ;;  %v1856_v24 = vmul.f32 %v6588_v3, %v8234_v14  ;;  %v3739_v36 = vld [vmem:[#allocation5 + $0x2f] sm:$0xff]  ;;  %v1956_v63 = vld [vmem:[#allocation2 + $0x18e] sm:$0xff] }
 0x195   : > { %v3676_v59 = vld [vmem:[#allocation5 + $0x35] sm:$0xff]  ;;  %v3589_v45 = vpack.c.bf16 %v3577_v41, %v3576_v47  ;;  %v3626_v33 = vpack.c.bf16 %v3614_v16, %v3613_v44  ;;  %v2076_v28 = vadd.f32 %v2063_v51, %v2043_v38  ;;  %v2088_v15 = vmax.f32 %v2075_v60, 0.0  ;;  %v6398_v41 = vld [vmem:[#allocation2 + $0x1a8] sm:$0xff] }
 0x196   : > { %v3689_v57 = vpack.c.bf16 %v3676_v59, %v3675_v40  ;;  %v3708_v12 = vld [vmem:[#allocation5 + $0x36] sm:$0xff]  ;;  %v1830_v20 = vadd.f32 %v1817_v17, %v1778_v22  ;;  %v1957_v58 = vld [vmem:[#allocation2 + $0x196] sm:$0xff]  ;;  %v1868_v43 = vadd.f32 %v1855_v54, %v1829_v35  ;;  %v1891_v47 = vmul.f32 %v6590_v4, %v1878_v42 }
 0x197   : > { %v3740_v29 = vld [vmem:[#allocation5 + $0x37] sm:$0xff]  ;;  %v3721_v31 = vpack.c.bf16 %v3708_v12, %v3707_v62  ;;  %3602 = vst [vmem:[%s7819_s9 + $0xd8] sm:$0xff] %v3589_v45  ;;  %3634 = vst [vmem:[%s7819_s9 + $0xe0] sm:$0xff] %v3626_v33  ;;  %v3228_v50 = vld [vmem:[#allocation3 + $0x130] ss:$2 sm:$0xff]  ;;  %v2089_v11 = vmax.f32 %v2076_v28, 0.0  ;;  %v1892_v13 = vmul.f32 %v6590_v4, %v1879_v26  ;;  %v1930_v22 = vmul.f32 %v6592_v5, %v1917_v53  ;;  %v488_v33 = vpop.xlane.xlu1 %487 }
 0x198   : > { %v3753_v55 = vpack.c.bf16 %v3740_v29, %v3739_v36  ;;  %3697 = vst [vmem:[%s7819_s9 + $0xa8] sm:$0xff] %v3689_v57  ;;  %v3320_v39 = vld [vmem:[#allocation3 + $0x131] ss:$2 sm:$0xff]  ;;  %2101 = vst [vmem:[#allocation3 + $0x140] sm:$0xff] %v2088_v15  ;;  %v8258_v27 = vadd.f32 %v1856_v24, %v1830_v20  ;;  %v1931_v61 = vmul.f32 %v6592_v5, %v1918_v49  ;;  %v1920_v54 = vld [vmem:[#allocation2 + $0x1a5] sm:$0xff]  ;;  %v485_v57 = vpop.xlane.xlu0 %484 }
 0x199   : > { %3729 = vst [vmem:[%s7819_s9 + $0xb0] sm:$0xff] %v3721_v31  ;;  %v3392_v51 = vmax.f32 %v3228_v50, %v3320_v39  ;;  %2102 = vst [vmem:[#allocation3 + $0x148] sm:$0xff] %v2089_v11  ;;  %v1904_v52 = vadd.f32 %v1891_v47, %v8165_v10  ;;  %v1905_v21 = vadd.f32 %v1892_v13, %v8207_v25  ;;  %v1805_v26 = vld [vmem:[#allocation2 + $0x199] sm:$0xff]  ;;  %v1959_v31 = vld [vmem:[#allocation2 + $0x1a6] sm:$0xff] }
 0x19a   : > { %3761 = vst [vmem:[%s7819_s9 + $0xb8] sm:$0xff] %v3753_v55  ;;  %v1969_v44 = vmul.f32 %v6594_v6, %v1956_v63  ;;  %v1970_v42 = vmul.f32 %v6594_v6, %v1957_v58  ;;  %v1999_v40 = vmul.f32 %v6397_v19, %v6596_v7  ;;  %v2031_v62 = vmul.f32 %v6598_v8, %v8217_v37  ;;  %v1844_v10 = vld [vmem:[#allocation2 + $0x19a] sm:$0xff]  ;;  %v1881_v19 = vld [vmem:[#allocation2 + $0x1a4] sm:$0xff] }
 0x19b   : > { %3438 = vst [vmem:[#allocation4 + $0x98] sm:$0xff] %v3392_v51  ;;  %v2032_v38 = vmul.f32 %v6598_v8, %v8225_v56  ;;  %v2064_v60 = vmul.f32 %v6600_v9, %v8232_v0  ;;  %v1880_v17 = vld [vmem:[#allocation2 + $0x19c] sm:$0xff]  ;;  %v1943_v25 = vadd.f32 %v1930_v22, %v1904_v52  ;;  %v1944_v53 = vadd.f32 %v1931_v61, %v1905_v21 }
 0x19c   : > { %v2065_v49 = vmul.f32 %v6600_v9, %v8234_v14  ;;  %v2002_v16 = vmul.f32 %v6398_v41, %v6596_v7  ;;  %v2012_v59 = vadd.f32 %v1999_v40, %v8186_v23  ;;  %v2044_v37 = vadd.f32 %v2031_v62, %v8196_v32  ;;  %v1919_v35 = vld [vmem:[#allocation2 + $0x19d] sm:$0xff]  ;;  %622 = vst [vmem:[#allocation2 + $0x278] sm:$0xff] %v488_v33 }
 0x19d   : > { %v8279_v56 = vmul.f32 %v6398_v41, %v6584_v1  ;;  %v1818_v0 = vmul.f32 %v6586_v2, %v1805_v26  ;;  %v1982_v24 = vadd.f32 %v1969_v44, %v1943_v25  ;;  %v8282_v36 = vadd.f32 %v1970_v42, %v1944_v53  ;;  %v1958_v28 = vld [vmem:[#allocation2 + $0x19e] sm:$0xff]  ;;  %621 = vst [vmem:[#allocation2 + $0x270] sm:$0xff] %v485_v57  ;;  %v1882_v25 = vld [vmem:[#allocation2 + $0x1ac] sm:$0xff]  ;;  %v1883_v53 = vld [vmem:[#allocation2 + $0x1b4] sm:$0xff] }
 0x19e   : > { %v1857_v14 = vmul.f32 %v6588_v3, %v1844_v10  ;;  %v1893_v45 = vmul.f32 %v6590_v4, %v1880_v17  ;;  %v2045_v12 = vadd.f32 %v2032_v38, %v2012_v59  ;;  %v2077_v23 = vadd.f32 %v2064_v60, %v2044_v37  ;;  %v2021_v58 = vld [vmem:[#allocation2 + $0x1a1] sm:$0xff]  ;;  %v1922_v59 = vld [vmem:[#allocation2 + $0x1b5] sm:$0xff] }
 0x19f   : > { %v1831_v32 = vadd.f32 %v1818_v0, %v8230_v30  ;;  %v1894_v29 = vmul.f32 %v6590_v4, %v1881_v19  ;;  %v8288_v55 = vadd.f32 %v2002_v16, %v1982_v24  ;;  %v1932_v20 = vmul.f32 %v6592_v5, %v1919_v35  ;;  %v2054_v51 = vld [vmem:[#allocation2 + $0x1a2] sm:$0xff]  ;;  %v1961_v33 = vld [vmem:[#allocation2 + $0x1b6] sm:$0xff] }
 0x1a0   : > { %v1906_v15 = vadd.f32 %v1893_v45, %v8209_v46  ;;  %v1933_v63 = vmul.f32 %v6592_v5, %v1920_v54  ;;  %v3230_v50 = vld [vmem:[#allocation3 + $0x140] ss:$2 sm:$0xff]  ;;  %v3322_v39 = vld [vmem:[#allocation3 + $0x141] ss:$2 sm:$0xff]  ;;  %v2078_v11 = vadd.f32 %v2065_v49, %v2045_v12  ;;  %v2090_v47 = vmax.f32 %v2077_v23, 0.0 }
 0x1a1   : > { %v1870_v30 = vadd.f32 %v1857_v14, %v1831_v32  ;;  %v1907_v13 = vadd.f32 %v1894_v29, %v1868_v43  ;;  %v3393_v22 = vmax.f32 %v3230_v50, %v3322_v39  ;;  %v1971_v52 = vmul.f32 %v6594_v6, %v1958_v28  ;;  %v6399_v42 = vld [vmem:[#allocation2 + $0x1a0] sm:$0xff]  ;;  %v1960_v45 = vld [vmem:[#allocation2 + $0x1ae] sm:$0xff]  ;;  %v491_v50 = vpop.xlane.xlu0 %490 }
 0x1a2   : > { %v1945_v61 = vadd.f32 %v1932_v20, %v1906_v15  ;;  %v1972_v21 = vmul.f32 %v6594_v6, %v1959_v31  ;;  %v2091_v44 = vmax.f32 %v2078_v11, 0.0  ;;  %2103 = vst [vmem:[#allocation3 + $0x150] sm:$0xff] %v2090_v47  ;;  %v2001_v40 = vmul.f32 %v6399_v42, %v6596_v7  ;;  %v2022_v29 = vld [vmem:[#allocation2 + $0x1a9] sm:$0xff]  ;;  %623 = vst [vmem:[#allocation2 + $0x280] sm:$0xff] %v491_v50 }
 0x1a3   : > { %v1946_v46 = vadd.f32 %v1933_v63, %v1907_v13  ;;  %v2033_v62 = vmul.f32 %v6598_v8, %v1805_v26  ;;  %3439 = vst [vmem:[#allocation4 + $0xa0] sm:$0xff] %v3393_v22  ;;  %v2034_v60 = vmul.f32 %v6598_v8, %v2021_v58  ;;  %v2066_v43 = vmul.f32 %v6600_v9, %v1844_v10  ;;  %v1921_v26 = vld [vmem:[#allocation2 + $0x1ad] sm:$0xff]  ;;  %v6400_v10 = vld [vmem:[#allocation2 + $0x1b8] sm:$0xff]  ;;  %v3505_v39 = vld [vmem:[#allocation4 + $0x8c] sm:$0xff] }
 0x1a4   : > { %v1984_v38 = vadd.f32 %v1971_v52, %v1945_v61  ;;  %v2067_v17 = vmul.f32 %v6600_v9, %v2054_v51  ;;  %2104 = vst [vmem:[#allocation3 + $0x158] sm:$0xff] %v2091_v44  ;;  %v2014_v41 = vadd.f32 %v2001_v40, %v8240_v18  ;;  %v2126_v19 = vmul.f32 %v6399_v42, %v6584_v1  ;;  %v2023_v63 = vld [vmem:[#allocation2 + $0x1b1] sm:$0xff] }
 0x1a5   : > { %v8300_v49 = vadd.f32 %v1972_v21, %v1946_v46  ;;  %v2046_v16 = vadd.f32 %v2033_v62, %v8244_v48  ;;  %v2165_v37 = vmul.f32 %v6586_v2, %v2021_v58  ;;  %v2204_v0 = vmul.f32 %v6588_v3, %v2054_v51  ;;  %v494_v58 = vpop.xlane.xlu1 %493  ;;  %v6401_v51 = vld [vmem:[#allocation2 + $0x1b0] sm:$0xff] }
 0x1a6   : > { %v2004_v35 = vmul.f32 %v6400_v10, %v6596_v7  ;;  %v8309_v54 = vmul.f32 %v6400_v10, %v6584_v1  ;;  %v2047_v24 = vadd.f32 %v2034_v60, %v2014_v41  ;;  %v1895_v18 = vmul.f32 %v6590_v4, %v1882_v25  ;;  %v2055_v61 = vld [vmem:[#allocation2 + $0x1aa] sm:$0xff]  ;;  %v2056_v52 = vld [vmem:[#allocation2 + $0x1b2] sm:$0xff]  ;;  %624 = vst [vmem:[#allocation2 + $0x288] sm:$0xff] %v494_v58 }
 0x1a7   : > { %v2079_v14 = vadd.f32 %v2066_v43, %v2046_v16  ;;  %v1896_v48 = vmul.f32 %v6590_v4, %v1883_v53  ;;  %v2178_v57 = vadd.f32 %v2165_v37, %v2126_v19  ;;  %v1934_v23 = vmul.f32 %v6592_v5, %v1921_v26  ;;  %v3506_v21 = vld [vmem:[#allocation4 + $0x94] sm:$0x1f] }
 0x1a8   : > { %v8313_v12 = vadd.f32 %v2004_v35, %v1984_v38  ;;  %v1935_v32 = vmul.f32 %v6592_v5, %v1922_v59  ;;  %v2080_v28 = vadd.f32 %v2067_v17, %v2047_v24  ;;  %v1908_v15 = vadd.f32 %v1895_v18, %v8258_v27 }
 0x1a9   : > { %v2092_v31 = vmax.f32 %v2079_v14, 0.0  ;;  %v1909_v20 = vadd.f32 %v1896_v48, %v1870_v30  ;;  %v8318_v11 = vadd.f32 %v2204_v0, %v2178_v57  ;;  %v1973_v47 = vmul.f32 %v6594_v6, %v1960_v45  ;;  %v2024_v0 = vld [vmem:[#allocation2 + $0x1b9] sm:$0xff]  ;;  %v6402_v45 = vld [vmem:[#allocation2 + $0x1c8] sm:$0xff] }
 0x1aa   : > { %v1974_v13 = vmul.f32 %v6594_v6, %v1961_v33  ;;  %v2003_v22 = vmul.f32 %v6401_v51, %v6596_v7  ;;  %v3507_v27 = vld [vmem:[#allocation4 + $0x9a] sm:$0xff]  ;;  %v3508_v30 = vld [vmem:[#allocation4 + $0xa2] sm:$0x1f]  ;;  %v2093_v44 = vmax.f32 %v2080_v28, 0.0  ;;  %v1947_v46 = vadd.f32 %v1934_v23, %v1908_v15  ;;  %v6403_v28 = vld [vmem:[#allocation2 + $0x1c0] sm:$0xff] }
 0x1ab   : > { %2105 = vst [vmem:[#allocation3 + $0x160] sm:$0xff] %v2092_v31  ;;  %v1948_v42 = vadd.f32 %v1935_v32, %v1909_v20  ;;  %v2035_v40 = vmul.f32 %v6598_v8, %v2022_v29  ;;  %v8324_v62 = vmax.f32 %v3505_v39, %v3507_v27  ;;  %v3510_v38 = vmax.f32 %v3506_v21, %v3508_v30  ;;  %v8326_v60 = vld [vmem:[#allocation3 + $0x150] ss:$2 sm:$0xff]  ;;  %v8328_v43 = vld [vmem:[#allocation3 + $0x151] ss:$2 sm:$0xff]  ;;  %v2058_v20 = vld [vmem:[#allocation2 + $0x1c2] sm:$0xff] }
 0x1ac   : > { %v2016_v17 = vadd.f32 %v2003_v22, %v8282_v36  ;;  %v2036_v25 = vmul.f32 %v6598_v8, %v2023_v63  ;;  %v3394_v53 = vmax.f32 %v8326_v60, %v8328_v43  ;;  %2106 = vst [vmem:[#allocation3 + $0x168] sm:$0xff] %v2093_v44  ;;  %v1986_v41 = vadd.f32 %v1973_v47, %v1947_v46  ;;  %v2057_v15 = vld [vmem:[#allocation2 + $0x1ba] sm:$0xff]  ;;  %v500_v47 = vpop.xlane.xlu1 %499 }
 0x1ad   : > { %v8334_v16 = vadd.f32 %v1974_v13, %v1948_v42  ;;  %v2048_v19 = vadd.f32 %v2035_v40, %v8288_v55  ;;  %3511 = vst [vmem:[#allocation5 + $0x41] sm:$0xff] %v8324_v62  ;;  %3512 = vst [vmem:[#allocation5 + $0x49] sm:$0x1f] %v3510_v38  ;;  %v2068_v59 = vmul.f32 %v6600_v9, %v2055_v61  ;;  %v2025_v55 = vld [vmem:[#allocation2 + $0x1c1] sm:$0xff]  ;;  %v497_v13 = vpop.xlane.xlu0 %496 }
 0x1ae   : > { %v2049_v26 = vadd.f32 %v2036_v25, %v2016_v17  ;;  %v2069_v37 = vmul.f32 %v6600_v9, %v2056_v52  ;;  %v2128_v36 = vmul.f32 %v6401_v51, %v6584_v1  ;;  %v2166_v10 = vmul.f32 %v6586_v2, %v2022_v29  ;;  %626 = vst [vmem:[#allocation2 + $0x298] sm:$0xff] %v500_v47  ;;  %v2230_v42 = vld [vmem:[#allocation2 + $0x1bc] sm:$0xff] }
 0x1af   : > { %v2167_v35 = vmul.f32 %v6586_v2, %v2023_v63  ;;  %v2205_v24 = vmul.f32 %v6588_v3, %v2055_v61  ;;  %v2206_v14 = vmul.f32 %v6588_v3, %v2056_v52  ;;  %v2081_v18 = vadd.f32 %v2068_v59, %v2048_v19  ;;  %625 = vst [vmem:[#allocation2 + $0x290] sm:$0xff] %v497_v13  ;;  %v2269_v19 = vld [vmem:[#allocation2 + $0x1bd] sm:$0xff] }
 0x1b0   : > { %v2082_v48 = vadd.f32 %v2069_v37, %v2049_v26  ;;  %v2006_v33 = vmul.f32 %v6402_v45, %v6596_v7  ;;  %v8347_v57 = vmul.f32 %v6402_v45, %v6584_v1  ;;  %v2179_v23 = vadd.f32 %v2166_v10, %v8279_v56  ;;  %v2270_v26 = vld [vmem:[#allocation2 + $0x1c5] sm:$0xff] }
 0x1b1   : > { %v2180_v32 = vadd.f32 %v2167_v35, %v2128_v36  ;;  %v2005_v29 = vmul.f32 %v6403_v28, %v6596_v7  ;;  %v2037_v31 = vmul.f32 %v6598_v8, %v2024_v0  ;;  %v2094_v63 = vmax.f32 %v2081_v18, 0.0 }
 0x1b2   : > { %v2095_v58 = vmax.f32 %v2082_v48, 0.0  ;;  %v8352_v50 = vadd.f32 %v2006_v33, %v1986_v41  ;;  %v2038_v39 = vmul.f32 %v6598_v8, %v2025_v55  ;;  %v8355_v51 = vadd.f32 %v2205_v24, %v2179_v23  ;;  %v2231_v41 = vld [vmem:[#allocation2 + $0x1c4] sm:$0xff] }
 0x1b3   : > { %v8357_v22 = vadd.f32 %v2206_v14, %v2180_v32  ;;  %v2018_v56 = vadd.f32 %v2005_v29, %v8300_v49  ;;  %v2050_v61 = vadd.f32 %v2037_v31, %v8313_v12  ;;  %v3234_v52 = vld [vmem:[#allocation3 + $0x160] ss:$2 sm:$0xff]  ;;  %v3326_v21 = vld [vmem:[#allocation3 + $0x161] ss:$2 sm:$0xff]  ;;  %2107 = vst [vmem:[#allocation3 + $0x170] sm:$0xff] %v2094_v63  ;;  %v2070_v27 = vmul.f32 %v6600_v9, %v2057_v15 }
 0x1b4   : > { %2108 = vst [vmem:[#allocation3 + $0x178] sm:$0xff] %v2095_v58  ;;  %v2071_v30 = vmul.f32 %v6600_v9, %v2058_v20  ;;  %v2130_v44 = vmul.f32 %v6403_v28, %v6584_v1  ;;  %v2168_v46 = vmul.f32 %v6586_v2, %v2024_v0  ;;  %v3646_v40 = vld [vmem:[#allocation5 + $0x3a] sm:$0xff]  ;;  %v8365_v38 = vld [vmem:[#allocation5 + $0x42] sm:$0xff]  ;;  %v3395_v49 = vmax.f32 %v3234_v52, %v3326_v21  ;;  %v506_v58 = vpop.xlane.xlu1 %505 }
 0x1b5   : > { %v2051_v12 = vadd.f32 %v2038_v39, %v2018_v56  ;;  %v2169_v17 = vmul.f32 %v6586_v2, %v2025_v55  ;;  %v2207_v25 = vmul.f32 %v6588_v3, %v2057_v15  ;;  %v3658_v59 = vpack.c.bf16 %v3646_v40, %v8177_v34  ;;  %v3677_v37 = vld [vmem:[#allocation5 + $0x3d] sm:$0xff]  ;;  %v3678_v36 = vld [vmem:[#allocation5 + $0x45] sm:$0xff]  ;;  %v503_v39 = vpop.xlane.xlu0 %502  ;;  %628 = vst [vmem:[#allocation2 + $0x2a8] sm:$0xff] %v506_v58 }
 0x1b6   : > { %v3709_v0 = vld [vmem:[#allocation5 + $0x3e] sm:$0xff]  ;;  %v3785_v10 = vpack.c.bf16 %v8365_v38, %v3646_v40  ;;  %v2083_v35 = vadd.f32 %v2070_v27, %v2050_v61  ;;  %v2181_v24 = vadd.f32 %v2168_v46, %v8309_v54  ;;  %v2308_v14 = vld [vmem:[#allocation2 + $0x1be] sm:$0xff]  ;;  %v3690_v18 = vpack.c.bf16 %v3678_v36, %v3677_v37  ;;  %v3710_v55 = vld [vmem:[#allocation5 + $0x46] sm:$0xff]  ;;  %3441 = vst [vmem:[#allocation4 + $0xb0] sm:$0xff] %v3395_v49 }
 0x1b7   : > { %v3803_v48 = vld [vmem:[#allocation5 + $0x3b] sm:$0xff]  ;;  %v2084_v45 = vadd.f32 %v2071_v30, %v2051_v12  ;;  %v2182_v33 = vadd.f32 %v2169_v17, %v2130_v44  ;;  %v2208_v34 = vmul.f32 %v6588_v3, %v2058_v20  ;;  %3666 = vst [vmem:[%s7819_s9 + $0xe8] sm:$0xff] %v3658_v59  ;;  %v3722_v32 = vpack.c.bf16 %v3710_v55, %v3709_v0  ;;  %v3804_v28 = vld [vmem:[#allocation5 + $0x43] sm:$0xff] }
 0x1b8   : > { %v2309_v23 = vld [vmem:[#allocation2 + $0x1c6] sm:$0xff]  ;;  %3793 = vst [vmem:[%s7819_s9 + $0xc0] sm:$0xff] %v3785_v10  ;;  %v2096_v15 = vmax.f32 %v2083_v35, 0.0  ;;  %v8375_v54 = vadd.f32 %v2207_v25, %v2181_v24  ;;  %v2243_v63 = vmul.f32 %v6590_v4, %v2230_v42  ;;  %3698 = vst [vmem:[%s7819_s9 + $0xf0] sm:$0xff] %v3690_v18  ;;  %v3817_v47 = vpack.c.bf16 %v3804_v28, %v3803_v48  ;;  %v2027_v44 = vld [vmem:[#allocation2 + $0x1d1] sm:$0xff] }
 0x1b9   : > { %v3835_v29 = vld [vmem:[#allocation5 + $0x3c] sm:$0xff]  ;;  %v3836_v31 = vld [vmem:[#allocation5 + $0x44] sm:$0xff]  ;;  %v2097_v20 = vmax.f32 %v2084_v45, 0.0  ;;  %v8379_v56 = vadd.f32 %v2208_v34, %v2182_v33  ;;  %627 = vst [vmem:[#allocation2 + $0x2a0] sm:$0xff] %v503_v39  ;;  %3730 = vst [vmem:[%s7819_s9 + $0xf8] sm:$0xff] %v3722_v32  ;;  %v2244_v52 = vmul.f32 %v6590_v4, %v2231_v41  ;;  %v2282_v27 = vmul.f32 %v6592_v5, %v2269_v19 }
 0x1ba   : > { %v3849_v13 = vpack.c.bf16 %v3836_v31, %v3835_v29  ;;  %v2026_v61 = vld [vmem:[#allocation2 + $0x1c9] sm:$0xff]  ;;  %2109 = vst [vmem:[#allocation3 + $0x180] sm:$0xff] %v2096_v15  ;;  %v2256_v21 = vadd.f32 %v2243_v63, %v8318_v11  ;;  %v2283_v30 = vmul.f32 %v6592_v5, %v2270_v26  ;;  %v2060_v42 = vld [vmem:[#allocation2 + $0x1d2] sm:$0xff]  ;;  %3825 = vst [vmem:[%s7819_s9 + $0xc8] sm:$0xff] %v3817_v47 }
 0x1bb   : > { %v2059_v46 = vld [vmem:[#allocation2 + $0x1ca] sm:$0xff]  ;;  %2110 = vst [vmem:[#allocation3 + $0x188] sm:$0xff] %v2097_v20  ;;  %v2321_v12 = vmul.f32 %v6594_v6, %v2308_v14  ;;  %v2322_v17 = vmul.f32 %v6594_v6, %v2309_v23  ;;  %v6404_v25 = vld [vmem:[#allocation2 + $0x1d8] sm:$0xff]  ;;  %v2257_v26 = vadd.f32 %v2244_v52, %v8355_v51  ;;  %v2039_v0 = vmul.f32 %v6598_v8, %v2026_v61 }
 0x1bc   : > { %3857 = vst [vmem:[%s7819_s9 + $0xd0] sm:$0xff] %v3849_v13  ;;  %v3236_v40 = vld [vmem:[#allocation3 + $0x170] ss:$2 sm:$0xff]  ;;  %v3328_v49 = vld [vmem:[#allocation3 + $0x171] ss:$2 sm:$0xff]  ;;  %v8391_v41 = vmul.f32 %v6404_v25, %v6584_v1  ;;  %v2354_v11 = vmul.f32 %v6404_v25, %v6596_v7  ;;  %v2295_v59 = vadd.f32 %v2282_v27, %v2256_v21  ;;  %v2040_v10 = vmul.f32 %v6598_v8, %v2027_v44  ;;  %v2160_v25 = vld [vmem:[#allocation2 + $0x1e1] sm:$0xff] }
 0x1bd   : > { %v3396_v19 = vmax.f32 %v3236_v40, %v3328_v49  ;;  %v6405_v37 = vld [vmem:[#allocation2 + $0x1d0] sm:$0xff]  ;;  %v2072_v35 = vmul.f32 %v6600_v9, %v2059_v46  ;;  %v2073_v24 = vmul.f32 %v6600_v9, %v2060_v42  ;;  %v2296_v14 = vadd.f32 %v2283_v30, %v2257_v26  ;;  %v509_v40 = vpop.xlane.xlu0 %508 }
 0x1be   : > { %v2007_v36 = vmul.f32 %v6405_v37, %v6596_v7  ;;  %v2334_v18 = vadd.f32 %v2321_v12, %v2295_v59  ;;  %v2132_v48 = vmul.f32 %v6405_v37, %v6584_v1  ;;  %v2232_v51 = vld [vmem:[#allocation2 + $0x1cc] sm:$0xff]  ;;  %v2052_v45 = vadd.f32 %v2039_v0, %v8352_v50  ;;  %v2233_v32 = vld [vmem:[#allocation2 + $0x1d4] sm:$0xff]  ;;  %629 = vst [vmem:[#allocation2 + $0x2b0] sm:$0xff] %v509_v40  ;;  %v2234_v0 = vld [vmem:[#allocation2 + $0x1dc] sm:$0xff] }
 0x1bf   : > { %3442 = vst [vmem:[#allocation4 + $0xb8] sm:$0xff] %v3396_v19  ;;  %v2170_v33 = vmul.f32 %v6586_v2, %v2026_v61  ;;  %v2171_v34 = vmul.f32 %v6586_v2, %v2027_v44  ;;  %v2209_v23 = vmul.f32 %v6588_v3, %v2059_v46  ;;  %v2271_v28 = vld [vmem:[#allocation2 + $0x1cd] sm:$0xff]  ;;  %v2272_v29 = vld [vmem:[#allocation2 + $0x1d5] sm:$0xff]  ;;  %v8406_v31 = vadd.f32 %v2322_v17, %v2296_v14  ;;  %v512_v46 = vpop.xlane.xlu1 %511 }
 0x1c0   : > { %v2020_v55 = vadd.f32 %v2007_v36, %v8334_v16  ;;  %v8408_v15 = vadd.f32 %v2354_v11, %v2334_v18  ;;  %v2210_v16 = vmul.f32 %v6588_v3, %v2060_v42  ;;  %v2085_v58 = vadd.f32 %v2072_v35, %v2052_v45  ;;  %v2310_v13 = vld [vmem:[#allocation2 + $0x1ce] sm:$0xff]  ;;  %v2311_v44 = vld [vmem:[#allocation2 + $0x1d6] sm:$0xff]  ;;  %630 = vst [vmem:[#allocation2 + $0x2b8] sm:$0xff] %v512_v46  ;;  %v2199_v36 = vld [vmem:[#allocation2 + $0x1e2] sm:$0xff] }
 0x1c1   : > { %v2183_v39 = vadd.f32 %v2170_v33, %v8347_v57  ;;  %v2184_v50 = vadd.f32 %v2171_v34, %v2132_v48  ;;  %v2245_v47 = vmul.f32 %v6590_v4, %v2232_v51  ;;  %v2246_v21 = vmul.f32 %v6590_v4, %v2233_v32  ;;  %v2159_v17 = vld [vmem:[#allocation2 + $0x1d9] sm:$0xff]  ;;  %v8454_v40 = vld [vmem:[#allocation2 + $0x1e9] sm:$0xff] }
 0x1c2   : > { %v2053_v63 = vadd.f32 %v2040_v10, %v2020_v55  ;;  %v3238_v20 = vld [vmem:[#allocation3 + $0x180] ss:$2 sm:$0xff]  ;;  %v3330_v61 = vld [vmem:[#allocation3 + $0x181] ss:$2 sm:$0xff]  ;;  %v2284_v27 = vmul.f32 %v6592_v5, %v2271_v28  ;;  %v2285_v30 = vmul.f32 %v6592_v5, %v2272_v29  ;;  %v2098_v49 = vmax.f32 %v2085_v58, 0.0 }
 0x1c3   : > { %v3397_v42 = vmax.f32 %v3238_v20, %v3330_v61  ;;  %v2222_v12 = vadd.f32 %v2209_v23, %v2183_v39  ;;  %v8416_v57 = vadd.f32 %v2210_v16, %v2184_v50  ;;  %v2258_v19 = vadd.f32 %v2245_v47, %v8357_v22  ;;  %v2198_v37 = vld [vmem:[#allocation2 + $0x1da] sm:$0xff]  ;;  %v2274_v23 = vld [vmem:[#allocation2 + $0x1e5] sm:$0xff] }
 0x1c4   : > { %v2086_v52 = vadd.f32 %v2073_v24, %v2053_v63  ;;  %v2259_v26 = vadd.f32 %v2246_v21, %v8375_v54  ;;  %v2323_v59 = vmul.f32 %v6594_v6, %v2310_v13  ;;  %2111 = vst [vmem:[#allocation3 + $0x190] sm:$0xff] %v2098_v49  ;;  %v2324_v35 = vmul.f32 %v6594_v6, %v2311_v44  ;;  %v6406_v24 = vld [vmem:[#allocation2 + $0x1e8] sm:$0xff]  ;;  %v6407_v55 = vld [vmem:[#allocation2 + $0x1e0] sm:$0xff] }
 0x1c5   : > { %3443 = vst [vmem:[#allocation4 + $0xc0] sm:$0xff] %v3397_v42  ;;  %v8423_v14 = vmul.f32 %v6406_v24, %v6584_v1  ;;  %v2356_v18 = vmul.f32 %v6406_v24, %v6596_v7  ;;  %v2134_v22 = vmul.f32 %v6407_v55, %v6584_v1  ;;  %v2235_v54 = vld [vmem:[#allocation2 + $0x1e4] sm:$0xff]  ;;  %v2297_v51 = vadd.f32 %v2284_v27, %v2258_v19 }
 0x1c6   : > { %v2099_v11 = vmax.f32 %v2086_v52, 0.0  ;;  %v3515_v10 = vld [vmem:[#allocation4 + $0xb6] sm:$0xff]  ;;  %v2298_v45 = vadd.f32 %v2285_v30, %v2259_v26  ;;  %v2172_v33 = vmul.f32 %v6586_v2, %v2159_v17  ;;  %v2273_v34 = vld [vmem:[#allocation2 + $0x1dd] sm:$0xff]  ;;  %v2173_v32 = vmul.f32 %v6586_v2, %v2160_v25  ;;  %v2313_v39 = vld [vmem:[#allocation2 + $0x1e6] sm:$0xff] }
 0x1c7   : > { %v8430_v48 = vmax.f32 %v3394_v53, %v3515_v10  ;;  %v2211_v28 = vmul.f32 %v6588_v3, %v2198_v37  ;;  %v2212_v29 = vmul.f32 %v6588_v3, %v2199_v36  ;;  %v2247_v63 = vmul.f32 %v6590_v4, %v2234_v0  ;;  %v2312_v16 = vld [vmem:[#allocation2 + $0x1de] sm:$0xff]  ;;  %v8459_v26 = vld [vmem:[#allocation2 + $0x1f1] sm:$0xff] }
 0x1c8   : > { %2112 = vst [vmem:[#allocation3 + $0x198] sm:$0xff] %v2099_v11  ;;  %v2336_v60 = vadd.f32 %v2323_v59, %v2297_v51  ;;  %v8438_v43 = vadd.f32 %v2324_v35, %v2298_v45  ;;  %v2185_v53 = vadd.f32 %v2172_v33, %v8391_v41  ;;  %v2248_v58 = vmul.f32 %v6590_v4, %v2235_v54  ;;  %v8471_v45 = vld [vmem:[#allocation2 + $0x1f2] sm:$0xff] }
 0x1c9   : > { %3519 = vst [vmem:[#allocation5 + $0x4e] sm:$0xff] %v8430_v48  ;;  %v2186_v50 = vadd.f32 %v2173_v32, %v2134_v22  ;;  %v2260_v47 = vadd.f32 %v2247_v63, %v8379_v56  ;;  %v2286_v13 = vmul.f32 %v6592_v5, %v2273_v34  ;;  %v2287_v20 = vmul.f32 %v6592_v5, %v2274_v23  ;;  %v3514_v56 = vld [vmem:[#allocation4 + $0xb0] sm:$0x1f] }
 0x1ca   : > { %v8445_v61 = vadd.f32 %v2356_v18, %v2336_v60  ;;  %v8447_v52 = vadd.f32 %v2211_v28, %v2185_v53  ;;  %v2261_v21 = vadd.f32 %v2248_v58, %v2222_v12  ;;  %v2325_v27 = vmul.f32 %v6594_v6, %v2312_v16  ;;  %v3578_v22 = vld [vmem:[#allocation5 + $0x40] sm:$0xff]  ;;  %v6409_v28 = vld [vmem:[#allocation2 + $0x1f0] sm:$0xff] }
 0x1cb   : > { %v8450_v30 = vadd.f32 %v2212_v29, %v2186_v50  ;;  %v2299_v41 = vadd.f32 %v2286_v13, %v2260_v47  ;;  %v2326_v44 = vmul.f32 %v6594_v6, %v2313_v39  ;;  %v2355_v46 = vmul.f32 %v6407_v55, %v6596_v7  ;;  %v8463_v55 = vld [vmem:[#allocation2 + $0x1ea] sm:$0xff]  ;;  %v2237_v50 = vld [vmem:[#allocation2 + $0x1f4] sm:$0xff]  ;;  %v518_v47 = vpop.xlane.xlu1 %517  ;;  %v515_v13 = vpop.xlane.xlu0 %514 }
 0x1cc   : > { %v3516_v42 = vld [vmem:[#allocation4 + $0xbe] sm:$0x1f]  ;;  %v2300_v49 = vadd.f32 %v2287_v20, %v2261_v21  ;;  %v2387_v11 = vmul.f32 %v6598_v8, %v2159_v17  ;;  %v2388_v19 = vmul.f32 %v6598_v8, %v2160_v25  ;;  %v2420_v12 = vmul.f32 %v6600_v9, %v2198_v37  ;;  %v2236_v33 = vld [vmem:[#allocation2 + $0x1ec] sm:$0xff]  ;;  %632 = vst [vmem:[#allocation2 + $0x2c8] sm:$0xff] %v518_v47 }
 0x1cd   : > { %v3518_v59 = vmax.f32 %v3514_v56, %v3516_v42  ;;  %v2338_v35 = vadd.f32 %v2325_v27, %v2299_v41  ;;  %v2368_v24 = vadd.f32 %v2355_v46, %v8406_v31  ;;  %v2421_v18 = vmul.f32 %v6600_v9, %v2199_v36  ;;  %v6408_v25 = vld [vmem:[#allocation2 + $0x1f8] sm:$0xff]  ;;  %v3741_v63 = vld [vmem:[#allocation5 + $0x3f] sm:$0xff]  ;;  %631 = vst [vmem:[#allocation2 + $0x2c0] sm:$0xff] %v515_v13 }
 0x1ce   : > { %v8465_v51 = vadd.f32 %v2326_v44, %v2300_v49  ;;  %v2400_v17 = vadd.f32 %v2387_v11, %v8408_v15  ;;  %v8469_v37 = vmul.f32 %v6408_v25, %v6584_v1  ;;  %v2358_v32 = vmul.f32 %v6408_v25, %v6596_v7  ;;  %v2275_v41 = vld [vmem:[#allocation2 + $0x1ed] sm:$0xff]  ;;  %v2276_v44 = vld [vmem:[#allocation2 + $0x1f5] sm:$0xff] }
 0x1cf   : > { %v3240_v0 = vld [vmem:[#allocation3 + $0x190] ss:$2 sm:$0xff]  ;;  %v3332_v10 = vld [vmem:[#allocation3 + $0x191] ss:$2 sm:$0xff]  ;;  %3520 = vst [vmem:[#allocation5 + $0x56] sm:$0x1f] %v3518_v59  ;;  %v2401_v36 = vadd.f32 %v2388_v19, %v2368_v24  ;;  %v2136_v29 = vmul.f32 %v6409_v28, %v6584_v1  ;;  %v2174_v15 = vmul.f32 %v6586_v2, %v8454_v40  ;;  %v2213_v42 = vmul.f32 %v6588_v3, %v8463_v55 }
 0x1d0   : > { %v3398_v54 = vmax.f32 %v3240_v0, %v3332_v10  ;;  %v3579_v34 = vld [vmem:[#allocation5 + $0x48] sm:$0xff]  ;;  %v2433_v39 = vadd.f32 %v2420_v12, %v2400_v17  ;;  %v8482_v27 = vadd.f32 %v2358_v32, %v2338_v35  ;;  %v2214_v49 = vmul.f32 %v6588_v3, %v8471_v45  ;;  %v8516_v32 = vld [vmem:[#allocation2 + $0x1f9] sm:$0xff] }
 0x1d1   : > { %v3616_v23 = vld [vmem:[#allocation5 + $0x49] sm:$0xff]  ;;  %v3590_v16 = vpack.c.bf16 %v3579_v34, %v3578_v22  ;;  %v2434_v21 = vadd.f32 %v2421_v18, %v2401_v36  ;;  %v2187_v56 = vadd.f32 %v2174_v15, %v8423_v14  ;;  %v2249_v59 = vmul.f32 %v6590_v4, %v2236_v33 }
 0x1d2   : > { %v8473_v31 = vld [vmem:[#allocation5 + $0x4a] sm:$0xff]  ;;  %v3627_v60 = vpack.c.bf16 %v3616_v23, %v8324_v62  ;;  %3444 = vst [vmem:[#allocation4 + $0xc8] sm:$0xff] %v3398_v54  ;;  %v2175_v62 = vmul.f32 %v6586_v2, %v8459_v26  ;;  %v2446_v46 = vmax.f32 %v2433_v39, 0.0  ;;  %v2250_v0 = vmul.f32 %v6590_v4, %v2237_v50  ;;  %v2203_v39 = vld [vmem:[#allocation2 + $0x202] sm:$0xff] }
 0x1d3   : > { %v3659_v53 = vpack.c.bf16 %v8473_v31, %v8365_v38  ;;  %v3742_v58 = vld [vmem:[#allocation5 + $0x47] sm:$0xff]  ;;  %3603 = vst [vmem:[%s7819_s9 + $0x120] sm:$0xff] %v3590_v16  ;;  %v2447_v19 = vmax.f32 %v2434_v21, 0.0  ;;  %v8497_v10 = vadd.f32 %v2213_v42, %v2187_v56  ;;  %v2288_v35 = vmul.f32 %v6592_v5, %v2275_v41  ;;  %v2238_v50 = vld [vmem:[#allocation2 + $0x1fc] sm:$0xff]  ;;  %v2239_v41 = vld [vmem:[#allocation2 + $0x204] sm:$0xff] }
 0x1d4   : > { %v3754_v20 = vpack.c.bf16 %v3742_v58, %v3741_v63  ;;  %v2314_v38 = vld [vmem:[#allocation2 + $0x1ee] sm:$0xff]  ;;  %3635 = vst [vmem:[%s7819_s9 + $0x128] sm:$0xff] %v3627_v60  ;;  %v2315_v11 = vld [vmem:[#allocation2 + $0x1f6] sm:$0xff]  ;;  %v2188_v12 = vadd.f32 %v2175_v62, %v2136_v29  ;;  %2459 = vst [vmem:[#allocation3 + $0x1a0] sm:$0xff] %v2446_v46  ;;  %v2289_v14 = vmul.f32 %v6592_v5, %v2276_v44  ;;  %v521_v46 = vpop.xlane.xlu0 %520 }
 0x1d5   : > { %3667 = vst [vmem:[%s7819_s9 + $0x130] sm:$0xff] %v3659_v53  ;;  %v2327_v24 = vmul.f32 %v6594_v6, %v2314_v38  ;;  %2460 = vst [vmem:[#allocation3 + $0x1a8] sm:$0xff] %v2447_v19  ;;  %v2262_v22 = vadd.f32 %v2249_v59, %v8416_v57  ;;  %v2263_v54 = vadd.f32 %v2250_v0, %v8447_v52  ;;  %v3805_v57 = vld [vmem:[#allocation5 + $0x4b] sm:$0xff]  ;;  %v6410_v60 = vld [vmem:[#allocation2 + $0x208] sm:$0xff]  ;;  %v524_v38 = vpop.xlane.xlu1 %523 }
 0x1d6   : > { %3762 = vst [vmem:[%s7819_s9 + $0x100] sm:$0xff] %v3754_v20  ;;  %v8502_v18 = vadd.f32 %v2214_v49, %v2188_v12  ;;  %v2328_v17 = vmul.f32 %v6594_v6, %v2315_v11  ;;  %v8507_v25 = vld [vmem:[#allocation5 + $0x52] sm:$0xff]  ;;  %v2357_v33 = vmul.f32 %v6409_v28, %v6596_v7  ;;  %v2389_v34 = vmul.f32 %v6598_v8, %v8454_v40  ;;  %v2278_v19 = vld [vmem:[#allocation2 + $0x205] sm:$0xff] }
 0x1d7   : > { %v2390_v23 = vmul.f32 %v6598_v8, %v8459_v26  ;;  %v2422_v36 = vmul.f32 %v6600_v9, %v8463_v55  ;;  %v3786_v52 = vpack.c.bf16 %v8507_v25, %v8473_v31  ;;  %v3806_v29 = vld [vmem:[#allocation5 + $0x53] sm:$0xff]  ;;  %v2301_v15 = vadd.f32 %v2288_v35, %v2262_v22  ;;  %634 = vst [vmem:[#allocation2 + $0x2d8] sm:$0xff] %v524_v38 }
 0x1d8   : > { %v2302_v63 = vadd.f32 %v2289_v14, %v2263_v54  ;;  %v2423_v28 = vmul.f32 %v6600_v9, %v8471_v45  ;;  %v2164_v40 = vld [vmem:[#allocation2 + $0x201] sm:$0xff]  ;;  %v3818_v16 = vpack.c.bf16 %v3806_v29, %v3805_v57  ;;  %v2370_v26 = vadd.f32 %v2357_v33, %v8438_v43  ;;  %633 = vst [vmem:[#allocation2 + $0x2d0] sm:$0xff] %v521_v46 }
 0x1d9   : > { %v2402_v55 = vadd.f32 %v2389_v34, %v8445_v61  ;;  %v2360_v53 = vmul.f32 %v6410_v60, %v6596_v7  ;;  %v2202_v58 = vld [vmem:[#allocation2 + $0x1fa] sm:$0xff]  ;;  %3794 = vst [vmem:[%s7819_s9 + $0x108] sm:$0xff] %v3786_v52  ;;  %v2340_v31 = vadd.f32 %v2327_v24, %v2301_v15  ;;  %v8529_v13 = vmul.f32 %v6410_v60, %v6584_v1  ;;  %v2317_v54 = vld [vmem:[#allocation2 + $0x206] sm:$0xff] }
 0x1da   : > { %v8526_v47 = vadd.f32 %v2328_v17, %v2302_v63  ;;  %v6411_v45 = vld [vmem:[#allocation2 + $0x200] sm:$0xff]  ;;  %3826 = vst [vmem:[%s7819_s9 + $0x110] sm:$0xff] %v3818_v16  ;;  %v2403_v43 = vadd.f32 %v2390_v23, %v2370_v26  ;;  %v2176_v61 = vmul.f32 %v6586_v2, %v8516_v32  ;;  %v2177_v62 = vmul.f32 %v6586_v2, %v2164_v40  ;;  %v2240_v16 = vld [vmem:[#allocation2 + $0x20c] sm:$0xff] }
 0x1db   : > { %v2138_v20 = vmul.f32 %v6411_v45, %v6584_v1  ;;  %v2435_v21 = vadd.f32 %v2422_v36, %v2402_v55  ;;  %v2277_v44 = vld [vmem:[#allocation2 + $0x1fd] sm:$0xff]  ;;  %v8536_v56 = vadd.f32 %v2360_v53, %v2340_v31  ;;  %v2215_v42 = vmul.f32 %v6588_v3, %v2202_v58  ;;  %v2241_v53 = vld [vmem:[#allocation2 + $0x214] sm:$0xff] }
 0x1dc   : > { %v2216_v49 = vmul.f32 %v6588_v3, %v2203_v39  ;;  %v2251_v11 = vmul.f32 %v6590_v4, %v2238_v50  ;;  %v2316_v12 = vld [vmem:[#allocation2 + $0x1fe] sm:$0xff]  ;;  %v2436_v35 = vadd.f32 %v2423_v28, %v2403_v43  ;;  %v2189_v24 = vadd.f32 %v2176_v61, %v8469_v37  ;;  %v2279_v50 = vld [vmem:[#allocation2 + $0x20d] sm:$0xff]  ;;  %v2280_v61 = vld [vmem:[#allocation2 + $0x215] sm:$0xff] }
 0x1dd   : > { %v3242_v59 = vld [vmem:[#allocation3 + $0x1a0] ss:$2 sm:$0xff]  ;;  %v3334_v0 = vld [vmem:[#allocation3 + $0x1a1] ss:$2 sm:$0xff]  ;;  %v2448_v14 = vmax.f32 %v2435_v21, 0.0  ;;  %v2190_v22 = vadd.f32 %v2177_v62, %v2138_v20  ;;  %v2252_v33 = vmul.f32 %v6590_v4, %v2239_v41  ;;  %v2290_v23 = vmul.f32 %v6592_v5, %v2277_v44  ;;  %v6412_v43 = vld [vmem:[#allocation2 + $0x218] sm:$0xff] }
 0x1de   : > { %v3399_v17 = vmax.f32 %v3242_v59, %v3334_v0  ;;  %v2264_v34 = vadd.f32 %v2251_v11, %v8450_v30  ;;  %v2449_v36 = vmax.f32 %v2436_v35, 0.0  ;;  %v2228_v57 = vadd.f32 %v2215_v42, %v2189_v24  ;;  %v2319_v41 = vld [vmem:[#allocation2 + $0x216] sm:$0xff]  ;;  %v2380_v42 = vld [vmem:[#allocation2 + $0x209] sm:$0xff] }
 0x1df   : > { %2461 = vst [vmem:[#allocation3 + $0x1b0] sm:$0xff] %v2448_v14  ;;  %v8545_v52 = vadd.f32 %v2216_v49, %v2190_v22  ;;  %v2291_v29 = vmul.f32 %v6592_v5, %v2278_v19  ;;  %v2265_v15 = vadd.f32 %v2252_v33, %v8497_v10  ;;  %v2329_v63 = vmul.f32 %v6594_v6, %v2316_v12  ;;  %v530_v49 = vpop.xlane.xlu1 %529  ;;  %v2381_v59 = vld [vmem:[#allocation2 + $0x211] sm:$0xff] }
 0x1e0   : > { %3445 = vst [vmem:[#allocation4 + $0xd0] sm:$0xff] %v3399_v17  ;;  %v2303_v37 = vadd.f32 %v2290_v23, %v2264_v34  ;;  %v2330_v28 = vmul.f32 %v6594_v6, %v2317_v54  ;;  %2462 = vst [vmem:[#allocation3 + $0x1b8] sm:$0xff] %v2449_v36  ;;  %v2359_v30 = vmul.f32 %v6411_v45, %v6596_v7  ;;  %v2413_v0 = vld [vmem:[#allocation2 + $0x20a] sm:$0xff] }
 0x1e1   : > { %v2391_v26 = vmul.f32 %v6598_v8, %v8516_v32  ;;  %v2392_v55 = vmul.f32 %v6598_v8, %v2164_v40  ;;  %v2424_v60 = vmul.f32 %v6600_v9, %v2202_v58  ;;  %v2304_v31 = vadd.f32 %v2291_v29, %v2265_v15  ;;  %v2318_v58 = vld [vmem:[#allocation2 + $0x20e] sm:$0xff]  ;;  %636 = vst [vmem:[#allocation2 + $0x2e8] sm:$0xff] %v530_v49 }
 0x1e2   : > { %v2342_v10 = vadd.f32 %v2329_v63, %v2303_v37  ;;  %v2425_v20 = vmul.f32 %v6600_v9, %v2203_v39  ;;  %v2362_v21 = vmul.f32 %v6412_v43, %v6596_v7  ;;  %v2372_v62 = vadd.f32 %v2359_v30, %v8465_v51  ;;  %v527_v51 = vpop.xlane.xlu0 %526  ;;  %v6413_v22 = vld [vmem:[#allocation2 + $0x210] sm:$0xff] }
 0x1e3   : > { %v2404_v45 = vadd.f32 %v2391_v26, %v8482_v27  ;;  %v8561_v32 = vmul.f32 %v6412_v43, %v6584_v1  ;;  %v2253_v40 = vmul.f32 %v6590_v4, %v2240_v16  ;;  %v8564_v44 = vadd.f32 %v2330_v28, %v2304_v31  ;;  %635 = vst [vmem:[#allocation2 + $0x2e0] sm:$0xff] %v527_v51  ;;  %v2242_v31 = vld [vmem:[#allocation2 + $0x21c] sm:$0xff] }
 0x1e4   : > { %v8566_v38 = vadd.f32 %v2362_v21, %v2342_v10  ;;  %v2254_v39 = vmul.f32 %v6590_v4, %v2241_v53  ;;  %v2292_v46 = vmul.f32 %v6592_v5, %v2279_v50  ;;  %v2405_v11 = vadd.f32 %v2392_v55, %v2372_v62  ;;  %v2281_v21 = vld [vmem:[#allocation2 + $0x21d] sm:$0xff] }
 0x1e5   : > { %v2437_v27 = vadd.f32 %v2424_v60, %v2404_v45  ;;  %v2266_v19 = vadd.f32 %v2253_v40, %v8502_v18  ;;  %v2293_v12 = vmul.f32 %v6592_v5, %v2280_v61  ;;  %v2331_v14 = vmul.f32 %v6594_v6, %v2318_v58  ;;  %v2414_v18 = vld [vmem:[#allocation2 + $0x212] sm:$0xff]  ;;  %v2320_v61 = vld [vmem:[#allocation2 + $0x21e] sm:$0xff]  ;;  %v6414_v58 = vld [vmem:[#allocation2 + $0x228] sm:$0xff] }
 0x1e6   : > { %v2267_v35 = vadd.f32 %v2254_v39, %v2228_v57  ;;  %v2332_v24 = vmul.f32 %v6594_v6, %v2319_v41  ;;  %v2361_v54 = vmul.f32 %v6413_v22, %v6596_v7  ;;  %v2438_v17 = vadd.f32 %v2425_v20, %v2405_v11  ;;  %v533_v62 = vpop.xlane.xlu0 %532 }
 0x1e7   : > { %v2450_v33 = vmax.f32 %v2437_v27, 0.0  ;;  %v2305_v34 = vadd.f32 %v2292_v46, %v2266_v19  ;;  %v2393_v23 = vmul.f32 %v6598_v8, %v2380_v42  ;;  %v3244_v36 = vld [vmem:[#allocation3 + $0x1b0] ss:$2 sm:$0xff]  ;;  %v3336_v29 = vld [vmem:[#allocation3 + $0x1b1] ss:$2 sm:$0xff]  ;;  %v2394_v57 = vmul.f32 %v6598_v8, %v2381_v59  ;;  %637 = vst [vmem:[#allocation2 + $0x2f0] sm:$0xff] %v533_v62 }
 0x1e8   : > { %v2306_v15 = vadd.f32 %v2293_v12, %v2267_v35  ;;  %v2374_v37 = vadd.f32 %v2361_v54, %v8526_v47  ;;  %v2426_v63 = vmul.f32 %v6600_v9, %v2413_v0  ;;  %v3400_v28 = vmax.f32 %v3244_v36, %v3336_v29  ;;  %v2382_v46 = vld [vmem:[#allocation2 + $0x219] sm:$0xff]  ;;  %v2383_v27 = vld [vmem:[#allocation2 + $0x221] sm:$0xff] }
 0x1e9   : > { %v2451_v16 = vmax.f32 %v2438_v17, 0.0  ;;  %2463 = vst [vmem:[#allocation3 + $0x1c0] sm:$0xff] %v2450_v33  ;;  %v2344_v30 = vadd.f32 %v2331_v14, %v2305_v34  ;;  %v2406_v26 = vadd.f32 %v2393_v23, %v8536_v56  ;;  %v2427_v53 = vmul.f32 %v6600_v9, %v2414_v18  ;;  %v536_v56 = vpop.xlane.xlu1 %535  ;;  %v2415_v19 = vld [vmem:[#allocation2 + $0x21a] sm:$0xff]  ;;  %v2416_v12 = vld [vmem:[#allocation2 + $0x222] sm:$0xff] }
 0x1ea   : > { %v8580_v55 = vadd.f32 %v2332_v24, %v2306_v15  ;;  %v2407_v60 = vadd.f32 %v2394_v57, %v2374_v37  ;;  %v2486_v50 = vmul.f32 %v6413_v22, %v6584_v1  ;;  %3446 = vst [vmem:[#allocation4 + $0xd8] sm:$0xff] %v3400_v28  ;;  %v2524_v10 = vmul.f32 %v6586_v2, %v2380_v42  ;;  %v2589_v36 = vld [vmem:[#allocation2 + $0x224] sm:$0xff]  ;;  %v539_v15 = vpop.xlane.xlu0 %538  ;;  %v3521_v57 = vld [vmem:[#allocation4 + $0xc4] sm:$0xff] }
 0x1eb   : > { %2464 = vst [vmem:[#allocation3 + $0x1c8] sm:$0xff] %v2451_v16  ;;  %v2439_v47 = vadd.f32 %v2426_v63, %v2406_v26  ;;  %v2525_v20 = vmul.f32 %v6586_v2, %v2381_v59  ;;  %v2563_v43 = vmul.f32 %v6588_v3, %v2413_v0  ;;  %v2564_v40 = vmul.f32 %v6588_v3, %v2414_v18  ;;  %v2628_v29 = vld [vmem:[#allocation2 + $0x225] sm:$0xff] }
 0x1ec   : > { %v2440_v45 = vadd.f32 %v2427_v53, %v2407_v60  ;;  %v2364_v41 = vmul.f32 %v6414_v58, %v6596_v7  ;;  %v8590_v39 = vmul.f32 %v6414_v58, %v6584_v1  ;;  %638 = vst [vmem:[#allocation2 + $0x2f8] sm:$0xff] %v536_v56  ;;  %v2537_v49 = vadd.f32 %v2524_v10, %v8529_v13  ;;  %v6415_v13 = vld [vmem:[#allocation2 + $0x220] sm:$0xff] }
 0x1ed   : > { %v2452_v42 = vmax.f32 %v2439_v47, 0.0  ;;  %v2538_v51 = vadd.f32 %v2525_v20, %v2486_v50  ;;  %v2255_v11 = vmul.f32 %v6590_v4, %v2242_v31  ;;  %v2294_v35 = vmul.f32 %v6592_v5, %v2281_v21  ;;  %v542_v37 = vpop.xlane.xlu1 %541  ;;  %v3522_v63 = vld [vmem:[#allocation4 + $0xcc] sm:$0x1f]  ;;  %639 = vst [vmem:[#allocation2 + $0x300] sm:$0xff] %v539_v15 }
 0x1ee   : > { %v2453_v59 = vmax.f32 %v2440_v45, 0.0  ;;  %v8594_v0 = vadd.f32 %v2364_v41, %v2344_v30  ;;  %v2333_v14 = vmul.f32 %v6594_v6, %v2320_v61  ;;  %v2576_v24 = vadd.f32 %v2563_v43, %v2537_v49  ;;  %v2667_v26 = vld [vmem:[#allocation2 + $0x226] sm:$0xff]  ;;  %640 = vst [vmem:[#allocation2 + $0x308] sm:$0xff] %v542_v37 }
 0x1ef   : > { %2465 = vst [vmem:[#allocation3 + $0x1d0] sm:$0xff] %v2452_v42  ;;  %v8598_v22 = vadd.f32 %v2564_v40, %v2538_v51  ;;  %v2268_v54 = vadd.f32 %v2255_v11, %v8545_v52  ;;  %v2363_v17 = vmul.f32 %v6415_v13, %v6596_v7  ;;  %v2395_v33 = vmul.f32 %v6598_v8, %v2382_v46  ;;  %v2384_v49 = vld [vmem:[#allocation2 + $0x229] sm:$0xff]  ;;  %v2385_v51 = vld [vmem:[#allocation2 + $0x231] sm:$0xff] }
 0x1f0   : > { %2466 = vst [vmem:[#allocation3 + $0x1d8] sm:$0xff] %v2453_v59  ;;  %v2396_v34 = vmul.f32 %v6598_v8, %v2383_v27  ;;  %v2428_v23 = vmul.f32 %v6600_v9, %v2415_v19  ;;  %v2429_v18 = vmul.f32 %v6600_v9, %v2416_v12  ;;  %v2488_v16 = vmul.f32 %v6415_v13, %v6584_v1  ;;  %v2417_v59 = vld [vmem:[#allocation2 + $0x22a] sm:$0xff] }
 0x1f1   : > { %v2307_v28 = vadd.f32 %v2294_v35, %v2268_v54  ;;  %v2376_v52 = vadd.f32 %v2363_v17, %v8564_v44  ;;  %v2526_v30 = vmul.f32 %v6586_v2, %v2382_v46  ;;  %v3523_v60 = vld [vmem:[#allocation4 + $0xd2] sm:$0xff]  ;;  %v3524_v53 = vld [vmem:[#allocation4 + $0xda] sm:$0x1f]  ;;  %v2408_v31 = vadd.f32 %v2395_v33, %v8566_v38 }
 0x1f2   : > { %v8609_v50 = vld [vmem:[#allocation3 + $0x1c0] ss:$2 sm:$0xff]  ;;  %v2527_v47 = vmul.f32 %v6586_v2, %v2383_v27  ;;  %v2565_v10 = vmul.f32 %v6588_v3, %v2415_v19  ;;  %v2566_v20 = vmul.f32 %v6588_v3, %v2416_v12  ;;  %v8615_v44 = vmax.f32 %v3521_v57, %v3523_v60  ;;  %v8617_v21 = vld [vmem:[#allocation3 + $0x1c1] ss:$2 sm:$0xff]  ;;  %v6416_v12 = vld [vmem:[#allocation2 + $0x238] sm:$0xff] }
 0x1f3   : > { %v3526_v43 = vmax.f32 %v3522_v63, %v3524_v53  ;;  %v2346_v61 = vadd.f32 %v2333_v14, %v2307_v28  ;;  %v2409_v56 = vadd.f32 %v2396_v34, %v2376_v52  ;;  %v3401_v62 = vmax.f32 %v8609_v50, %v8617_v21  ;;  %v2418_v35 = vld [vmem:[#allocation2 + $0x232] sm:$0xff] }
 0x1f4   : > { %v2441_v45 = vadd.f32 %v2428_v23, %v2408_v31  ;;  %v2539_v40 = vadd.f32 %v2526_v30, %v8561_v32  ;;  %v2540_v38 = vadd.f32 %v2527_v47, %v2488_v16  ;;  %3527 = vst [vmem:[#allocation5 + $0x5b] sm:$0xff] %v8615_v44  ;;  %v2602_v41 = vmul.f32 %v6590_v4, %v2589_v36  ;;  %v6417_v34 = vld [vmem:[#allocation2 + $0x230] sm:$0xff]  ;;  %v3580_v53 = vld [vmem:[#allocation5 + $0x50] sm:$0xff] }
 0x1f5   : > { %3528 = vst [vmem:[#allocation5 + $0x63] sm:$0x1f] %v3526_v43  ;;  %v2442_v58 = vadd.f32 %v2429_v18, %v2409_v56  ;;  %v2641_v46 = vmul.f32 %v6592_v5, %v2628_v29  ;;  %v2680_v42 = vmul.f32 %v6594_v6, %v2667_v26  ;;  %v2366_v32 = vmul.f32 %v6416_v12, %v6596_v7  ;;  %v2590_v28 = vld [vmem:[#allocation2 + $0x22c] sm:$0xff]  ;;  %v2591_v60 = vld [vmem:[#allocation2 + $0x234] sm:$0xff] }
 0x1f6   : > { %v2454_v11 = vmax.f32 %v2441_v45, 0.0  ;;  %v8626_v27 = vadd.f32 %v2565_v10, %v2539_v40  ;;  %v8628_v19 = vadd.f32 %v2566_v20, %v2540_v38  ;;  %v2615_v17 = vadd.f32 %v2602_v41, %v2576_v24  ;;  %v2629_v20 = vld [vmem:[#allocation2 + $0x22d] sm:$0xff]  ;;  %v3617_v43 = vld [vmem:[#allocation5 + $0x51] sm:$0xff] }
 0x1f7   : > { %v3248_v14 = vld [vmem:[#allocation3 + $0x1d0] ss:$2 sm:$0xff]  ;;  %v3340_v54 = vld [vmem:[#allocation3 + $0x1d1] ss:$2 sm:$0xff]  ;;  %v2455_v13 = vmax.f32 %v2442_v58, 0.0  ;;  %v8632_v33 = vmul.f32 %v6416_v12, %v6584_v1  ;;  %v2365_v23 = vmul.f32 %v6417_v34, %v6596_v7  ;;  %v8635_v36 = vadd.f32 %v2366_v32, %v2346_v61 }
 0x1f8   : > { %v3402_v18 = vmax.f32 %v3248_v14, %v3340_v54  ;;  %2467 = vst [vmem:[#allocation3 + $0x1e0] sm:$0xff] %v2454_v11  ;;  %v2397_v29 = vmul.f32 %v6598_v8, %v2384_v49  ;;  %v2398_v15 = vmul.f32 %v6598_v8, %v2385_v51  ;;  %v2654_v37 = vadd.f32 %v2641_v46, %v2615_v17  ;;  %v2630_v58 = vld [vmem:[#allocation2 + $0x235] sm:$0xff]  ;;  %v2633_v21 = vld [vmem:[#allocation2 + $0x24d] sm:$0xff] }
 0x1f9   : > { %2468 = vst [vmem:[#allocation3 + $0x1e8] sm:$0xff] %v2455_v13  ;;  %v2378_v57 = vadd.f32 %v2365_v23, %v8580_v55  ;;  %v2430_v24 = vmul.f32 %v6600_v9, %v2417_v59  ;;  %v2431_v63 = vmul.f32 %v6600_v9, %v2418_v35  ;;  %v2490_v16 = vmul.f32 %v6417_v34, %v6584_v1  ;;  %v2668_v41 = vld [vmem:[#allocation2 + $0x22e] sm:$0xff]  ;;  %v2669_v46 = vld [vmem:[#allocation2 + $0x236] sm:$0xff] }
 0x1fa   : > { %3448 = vst [vmem:[#allocation4 + $0xe8] sm:$0xff] %v3402_v18  ;;  %v2410_v52 = vadd.f32 %v2397_v29, %v8594_v0  ;;  %v2528_v30 = vmul.f32 %v6586_v2, %v2384_v49  ;;  %v2529_v26 = vmul.f32 %v6586_v2, %v2385_v51  ;;  %v8646_v31 = vadd.f32 %v2680_v42, %v2654_v37  ;;  %v3679_v42 = vld [vmem:[#allocation5 + $0x4d] sm:$0xff] }
 0x1fb   : > { %v2411_v47 = vadd.f32 %v2398_v15, %v2378_v57  ;;  %v2567_v55 = vmul.f32 %v6588_v3, %v2417_v59  ;;  %v2568_v10 = vmul.f32 %v6588_v3, %v2418_v35  ;;  %v3581_v61 = vld [vmem:[#allocation5 + $0x58] sm:$0xff]  ;;  %v2603_v38 = vmul.f32 %v6590_v4, %v2590_v28  ;;  %v3743_v35 = vld [vmem:[#allocation5 + $0x4f] sm:$0xff] }
 0x1fc   : > { %v3618_v56 = vld [vmem:[#allocation5 + $0x59] sm:$0xff]  ;;  %v2443_v0 = vadd.f32 %v2430_v24, %v2410_v52  ;;  %v2541_v45 = vadd.f32 %v2528_v30, %v8590_v39  ;;  %v2542_v40 = vadd.f32 %v2529_v26, %v2490_v16  ;;  %v3591_v49 = vpack.c.bf16 %v3581_v61, %v3580_v53  ;;  %v3837_v23 = vld [vmem:[#allocation5 + $0x4c] sm:$0xff] }
 0x1fd   : > { %v3628_v51 = vpack.c.bf16 %v3618_v56, %v3617_v43  ;;  %v8652_v11 = vld [vmem:[#allocation5 + $0x5a] sm:$0xff]  ;;  %v2444_v32 = vadd.f32 %v2431_v63, %v2411_v47  ;;  %v2604_v59 = vmul.f32 %v6590_v4, %v2591_v60  ;;  %v2616_v52 = vadd.f32 %v2603_v38, %v8598_v22  ;;  %v2419_v30 = vld [vmem:[#allocation2 + $0x23a] sm:$0xff] }
 0x1fe   : > { %v3680_v12 = vld [vmem:[#allocation5 + $0x55] sm:$0xff]  ;;  %v3660_v39 = vpack.c.bf16 %v8652_v11, %v8507_v25  ;;  %v2456_v17 = vmax.f32 %v2443_v0, 0.0  ;;  %v8657_v34 = vadd.f32 %v2567_v55, %v2541_v45  ;;  %3604 = vst [vmem:[%s7819_s9 + $0x168] sm:$0xff] %v3591_v49  ;;  %v8662_v57 = vadd.f32 %v2568_v10, %v2542_v40  ;;  %v6418_v43 = vld [vmem:[#allocation2 + $0x248] sm:$0xff] }
 0x1ff   : > { %v3691_v14 = vpack.c.bf16 %v3680_v12, %v3679_v42  ;;  %v3712_v54 = vld [vmem:[#allocation5 + $0x56] sm:$0xff]  ;;  %3636 = vst [vmem:[%s7819_s9 + $0x170] sm:$0xff] %v3628_v51  ;;  %v2457_v37 = vmax.f32 %v2444_v32, 0.0  ;;  %v2617_v16 = vadd.f32 %v2604_v59, %v8626_v27  ;;  %v2643_v60 = vmul.f32 %v6592_v5, %v2630_v58 }
 0x200   : > { %v3744_v13 = vld [vmem:[#allocation5 + $0x57] sm:$0xff]  ;;  %v3723_v18 = vpack.c.bf16 %v3712_v54, %v8430_v48  ;;  %3668 = vst [vmem:[%s7819_s9 + $0x178] sm:$0xff] %v3660_v39  ;;  %2469 = vst [vmem:[#allocation3 + $0x1f0] sm:$0xff] %v2456_v17  ;;  %v2642_v48 = vmul.f32 %v6592_v5, %v2629_v20  ;;  %v2681_v53 = vmul.f32 %v6594_v6, %v2668_v41 }
 0x201   : > { %v3755_v29 = vpack.c.bf16 %v3744_v13, %v3743_v35  ;;  %v3838_v15 = vld [vmem:[#allocation5 + $0x54] sm:$0xff]  ;;  %3699 = vst [vmem:[%s7819_s9 + $0x138] sm:$0xff] %v3691_v14  ;;  %2470 = vst [vmem:[#allocation3 + $0x1f8] sm:$0xff] %v2457_v37  ;;  %v2682_v47 = vmul.f32 %v6594_v6, %v2669_v46  ;;  %v8676_v22 = vmul.f32 %v6418_v43, %v6584_v1  ;;  %v2593_v41 = vld [vmem:[#allocation2 + $0x244] sm:$0xff] }
 0x202   : > { %v2386_v25 = vld [vmem:[#allocation2 + $0x239] sm:$0xff]  ;;  %v3850_v24 = vpack.c.bf16 %v3838_v15, %v3837_v23  ;;  %v3342_v28 = vld [vmem:[#allocation3 + $0x1e1] ss:$2 sm:$0xff]  ;;  %3731 = vst [vmem:[%s7819_s9 + $0x140] sm:$0xff] %v3723_v18  ;;  %v2655_v10 = vadd.f32 %v2642_v48, %v2616_v52  ;;  %v2714_v27 = vmul.f32 %v6418_v43, %v6596_v7  ;;  %v2656_v0 = vadd.f32 %v2643_v60, %v2617_v16 }
 0x203   : > { %v3250_v63 = vld [vmem:[#allocation3 + $0x1e0] ss:$2 sm:$0xff]  ;;  %3763 = vst [vmem:[%s7819_s9 + $0x148] sm:$0xff] %v3755_v29  ;;  %v2399_v20 = vmul.f32 %v6598_v8, %v2386_v25  ;;  %v2432_v45 = vmul.f32 %v6600_v9, %v2419_v30  ;;  %v2530_v58 = vmul.f32 %v6586_v2, %v2386_v25  ;;  %v2569_v51 = vmul.f32 %v6588_v3, %v2419_v30 }
 0x204   : > { %v3403_v26 = vmax.f32 %v3250_v63, %v3342_v28  ;;  %v2518_v55 = vld [vmem:[#allocation2 + $0x241] sm:$0xff]  ;;  %3858 = vst [vmem:[%s7819_s9 + $0x118] sm:$0xff] %v3850_v24  ;;  %v2694_v46 = vadd.f32 %v2681_v53, %v2655_v10  ;;  %v8686_v59 = vadd.f32 %v2682_v47, %v2656_v0  ;;  %v2520_v53 = vld [vmem:[#allocation2 + $0x251] sm:$0xff] }
 0x205   : > { %v2557_v61 = vld [vmem:[#allocation2 + $0x242] sm:$0xff]  ;;  %v2412_v42 = vadd.f32 %v2399_v20, %v8635_v36  ;;  %v2531_v49 = vmul.f32 %v6586_v2, %v2518_v55  ;;  %v2543_v35 = vadd.f32 %v2530_v58, %v8632_v33  ;;  %v2606_v36 = vmul.f32 %v6590_v4, %v2593_v41  ;;  %v6420_v20 = vld [vmem:[#allocation2 + $0x258] sm:$0xff]  ;;  %v2594_v41 = vld [vmem:[#allocation2 + $0x24c] sm:$0xff] }
 0x206   : > { %v2592_v56 = vld [vmem:[#allocation2 + $0x23c] sm:$0xff]  ;;  %3449 = vst [vmem:[#allocation4 + $0xf0] sm:$0xff] %v3403_v26  ;;  %v2632_v32 = vld [vmem:[#allocation2 + $0x245] sm:$0xff]  ;;  %v2570_v39 = vmul.f32 %v6588_v3, %v2557_v61  ;;  %v8691_v13 = vadd.f32 %v2714_v27, %v2694_v46  ;;  %v2746_v43 = vmul.f32 %v6598_v8, %v2518_v55  ;;  %v2779_v27 = vmul.f32 %v6600_v9, %v2557_v61  ;;  %v2559_v58 = vld [vmem:[#allocation2 + $0x252] sm:$0xff] }
 0x207   : > { %v6419_v40 = vld [vmem:[#allocation2 + $0x240] sm:$0xff]  ;;  %v2605_v14 = vmul.f32 %v6590_v4, %v2592_v56  ;;  %v2445_v17 = vadd.f32 %v2432_v45, %v2412_v42  ;;  %v2582_v29 = vadd.f32 %v2569_v51, %v2543_v35  ;;  %v2645_v25 = vmul.f32 %v6592_v5, %v2632_v32  ;;  %v2558_v56 = vld [vmem:[#allocation2 + $0x24a] sm:$0xff]  ;;  %v2595_v55 = vld [vmem:[#allocation2 + $0x254] sm:$0xff] }
 0x208   : > { %v2492_v38 = vmul.f32 %v6419_v40, %v6584_v1  ;;  %v2631_v12 = vld [vmem:[#allocation2 + $0x23d] sm:$0xff]  ;;  %v2671_v18 = vld [vmem:[#allocation2 + $0x246] sm:$0xff]  ;;  %v2619_v52 = vadd.f32 %v2606_v36, %v8657_v34  ;;  %v2713_v60 = vmul.f32 %v6419_v40, %v6596_v7  ;;  %v8706_v34 = vmul.f32 %v6420_v20, %v6584_v1  ;;  %v6421_v42 = vld [vmem:[#allocation2 + $0x250] sm:$0xff] }
 0x209   : > { %v2670_v54 = vld [vmem:[#allocation2 + $0x23e] sm:$0xff]  ;;  %v2618_v15 = vadd.f32 %v2605_v14, %v8628_v19  ;;  %v2644_v37 = vmul.f32 %v6592_v5, %v2631_v12  ;;  %v2458_v63 = vmax.f32 %v2445_v17, 0.0  ;;  %v2684_v26 = vmul.f32 %v6594_v6, %v2671_v18  ;;  %v2519_v19 = vld [vmem:[#allocation2 + $0x249] sm:$0xff]  ;;  %v2673_v36 = vld [vmem:[#allocation2 + $0x256] sm:$0xff] }
 0x20a   : > { %v2544_v23 = vadd.f32 %v2531_v49, %v2492_v38  ;;  %v3252_v33 = vld [vmem:[#allocation3 + $0x1f0] ss:$2 sm:$0xff]  ;;  %v3344_v24 = vld [vmem:[#allocation3 + $0x1f1] ss:$2 sm:$0xff]  ;;  %v2683_v16 = vmul.f32 %v6594_v6, %v2670_v54  ;;  %v2658_v10 = vadd.f32 %v2645_v25, %v2619_v52  ;;  %v2726_v40 = vadd.f32 %v2713_v60, %v8646_v31  ;;  %v3582_v46 = vld [vmem:[#allocation5 + $0x60] sm:$0xff] }
 0x20b   : > { %v3404_v48 = vmax.f32 %v3252_v33, %v3344_v24  ;;  %v2657_v30 = vadd.f32 %v2644_v37, %v2618_v15  ;;  %2471 = vst [vmem:[#allocation3 + $0x200] sm:$0xff] %v2458_v63  ;;  %v2716_v38 = vmul.f32 %v6420_v20, %v6596_v7  ;;  %v2494_v49 = vmul.f32 %v6421_v42, %v6584_v1  ;;  %v3681_v20 = vld [vmem:[#allocation5 + $0x5d] sm:$0xff] }
 0x20c   : > { %v8697_v28 = vadd.f32 %v2570_v39, %v2544_v23  ;;  %v8713_v61 = vadd.f32 %v2684_v26, %v2658_v10  ;;  %v2532_v51 = vmul.f32 %v6586_v2, %v2519_v19  ;;  %v2533_v50 = vmul.f32 %v6586_v2, %v2520_v53  ;;  %v2672_v39 = vld [vmem:[#allocation2 + $0x24e] sm:$0xff]  ;;  %v3530_v26 = vld [vmem:[#allocation4 + $0xe8] sm:$0x1f] }
 0x20d   : > { %v3531_v47 = vld [vmem:[#allocation4 + $0xee] sm:$0xff]  ;;  %3450 = vst [vmem:[#allocation4 + $0xf8] sm:$0xff] %v3404_v48  ;;  %v2696_v45 = vadd.f32 %v2683_v16, %v2657_v30  ;;  %v2759_v12 = vadd.f32 %v2746_v43, %v2726_v40  ;;  %v2571_v35 = vmul.f32 %v6588_v3, %v2558_v56  ;;  %v2572_v17 = vmul.f32 %v6588_v3, %v2559_v58 }
 0x20e   : > { %v3533_v0 = vmax.f32 %v3401_v62, %v3531_v47  ;;  %v2634_v62 = vld [vmem:[#allocation2 + $0x255] sm:$0xff]  ;;  %v2545_v14 = vadd.f32 %v2532_v51, %v8676_v22  ;;  %v2546_v54 = vadd.f32 %v2533_v50, %v2494_v49  ;;  %v2607_v23 = vmul.f32 %v6590_v4, %v2594_v41  ;;  %v8743_v41 = vld [vmem:[#allocation2 + $0x261] sm:$0xff] }
 0x20f   : > { %v8718_v32 = vadd.f32 %v2716_v38, %v2696_v45  ;;  %v2792_v18 = vadd.f32 %v2779_v27, %v2759_v12  ;;  %v2608_v15 = vmul.f32 %v6590_v4, %v2595_v55  ;;  %v2646_v37 = vmul.f32 %v6592_v5, %v2633_v21  ;;  %v8741_v38 = vld [vmem:[#allocation2 + $0x259] sm:$0xff]  ;;  %v6422_v49 = vld [vmem:[#allocation2 + $0x268] sm:$0xff] }
 0x210   : > { %3535 = vst [vmem:[#allocation5 + $0x68] sm:$0xff] %v3533_v0  ;;  %v3592_v31 = vpack.c.bf16 %v3533_v0, %v3582_v46  ;;  %v2647_v25 = vmul.f32 %v6592_v5, %v2634_v62  ;;  %v8728_v33 = vadd.f32 %v2571_v35, %v2545_v14  ;;  %v8730_v24 = vadd.f32 %v2572_v17, %v2546_v54  ;;  %v3713_v0 = vld [vmem:[#allocation5 + $0x5e] sm:$0xff]  ;;  %v8745_v55 = vld [vmem:[#allocation2 + $0x25a] sm:$0xff] }
 0x211   : > { %v2620_v22 = vadd.f32 %v2607_v23, %v8662_v57  ;;  %v2685_v63 = vmul.f32 %v6594_v6, %v2672_v39  ;;  %v2805_v52 = vmax.f32 %v2792_v18, 0.0  ;;  %v2621_v16 = vadd.f32 %v2608_v15, %v2582_v29  ;;  %v2596_v50 = vld [vmem:[#allocation2 + $0x25c] sm:$0xff]  ;;  %v3839_v14 = vld [vmem:[#allocation5 + $0x5c] sm:$0xff] }
 0x212   : > { %3605 = vst [vmem:[%s7819_s9 + $0x1b0] sm:$0xff] %v3592_v31  ;;  %v2686_v48 = vmul.f32 %v6594_v6, %v2673_v36  ;;  %v2715_v30 = vmul.f32 %v6421_v42, %v6596_v7  ;;  %v2747_v10 = vmul.f32 %v6598_v8, %v2519_v19  ;;  %v2748_v43 = vmul.f32 %v6598_v8, %v2520_v53  ;;  %v3745_v19 = vld [vmem:[#allocation5 + $0x5f] sm:$0xff] }
 0x213   : > { %v2659_v47 = vadd.f32 %v2646_v37, %v2620_v22  ;;  %v2780_v27 = vmul.f32 %v6600_v9, %v2558_v56  ;;  %2818 = vst [vmem:[#allocation3 + $0x208] sm:$0xff] %v2805_v52  ;;  %v2660_v45 = vadd.f32 %v2647_v25, %v2621_v16  ;;  %v2781_v40 = vmul.f32 %v6600_v9, %v2559_v58  ;;  %v8754_v58 = vld [vmem:[#allocation2 + $0x262] sm:$0xff] }
 0x214   : > { %v3532_v60 = vld [vmem:[#allocation4 + $0xf6] sm:$0x1f]  ;;  %v2728_v29 = vadd.f32 %v2715_v30, %v8686_v59  ;;  %v2760_v42 = vadd.f32 %v2747_v10, %v8691_v13  ;;  %v8751_v51 = vmul.f32 %v6422_v49, %v6584_v1  ;;  %v2718_v59 = vmul.f32 %v6422_v49, %v6596_v7  ;;  %v2597_v15 = vld [vmem:[#allocation2 + $0x264] sm:$0xff] }
 0x215   : > { %v3534_v57 = vmax.f32 %v3530_v26, %v3532_v60  ;;  %v2698_v56 = vadd.f32 %v2685_v63, %v2659_v47  ;;  %v8758_v13 = vadd.f32 %v2686_v48, %v2660_v45  ;;  %v6423_v22 = vld [vmem:[#allocation2 + $0x260] sm:$0xff]  ;;  %v2535_v30 = vmul.f32 %v6586_v2, %v8743_v41 }
 0x216   : > { %v2761_v39 = vadd.f32 %v2748_v43, %v2728_v29  ;;  %v2793_v18 = vadd.f32 %v2780_v27, %v2760_v42  ;;  %v2496_v63 = vmul.f32 %v6423_v22, %v6584_v1  ;;  %v2635_v52 = vld [vmem:[#allocation2 + $0x25d] sm:$0xff]  ;;  %v2636_v16 = vld [vmem:[#allocation2 + $0x265] sm:$0xff]  ;;  %v2573_v26 = vmul.f32 %v6588_v3, %v8745_v55 }
 0x217   : > { %v8747_v46 = vld [vmem:[#allocation5 + $0x62] sm:$0xff]  ;;  %3536 = vst [vmem:[#allocation5 + $0x70] sm:$0x1f] %v3534_v57  ;;  %v8763_v25 = vadd.f32 %v2718_v59, %v2698_v56  ;;  %v2674_v60 = vld [vmem:[#allocation2 + $0x25e] sm:$0xff]  ;;  %v2574_v10 = vmul.f32 %v6588_v3, %v8754_v58  ;;  %v2609_v43 = vmul.f32 %v6590_v4, %v2596_v50  ;;  %v2610_v27 = vmul.f32 %v6590_v4, %v2597_v15 }
 0x218   : > { %v3682_v53 = vld [vmem:[#allocation5 + $0x65] sm:$0xff]  ;;  %v3787_v12 = vpack.c.bf16 %v8747_v46, %v8652_v11  ;;  %v2794_v37 = vadd.f32 %v2781_v40, %v2761_v39  ;;  %v2806_v48 = vmax.f32 %v2793_v18, 0.0  ;;  %v2548_v29 = vadd.f32 %v2535_v30, %v2496_v63 }
 0x219   : > { %v3692_v21 = vpack.c.bf16 %v3682_v53, %v3681_v20  ;;  %v3714_v62 = vld [vmem:[#allocation5 + $0x66] sm:$0xff]  ;;  %v2675_v20 = vld [vmem:[#allocation2 + $0x266] sm:$0xff]  ;;  %v2648_v40 = vmul.f32 %v6592_v5, %v2635_v52  ;;  %v2622_v56 = vadd.f32 %v2609_v43, %v8697_v28  ;;  %v2623_v42 = vadd.f32 %v2610_v27, %v8728_v33 }
 0x21a   : > { %v3746_v31 = vld [vmem:[#allocation5 + $0x67] sm:$0xff]  ;;  %v3724_v54 = vpack.c.bf16 %v3714_v62, %v3713_v0  ;;  %3795 = vst [vmem:[%s7819_s9 + $0x150] sm:$0xff] %v3787_v12  ;;  %v2807_v47 = vmax.f32 %v2794_v37, 0.0  ;;  %v3254_v0 = vld [vmem:[#allocation3 + $0x200] ss:$2 sm:$0xff]  ;;  %2819 = vst [vmem:[#allocation3 + $0x210] sm:$0xff] %v2806_v48  ;;  %v2687_v49 = vmul.f32 %v6594_v6, %v2674_v60  ;;  %v2717_v12 = vmul.f32 %v6423_v22, %v6596_v7 }
 0x21b   : > { %v3808_v35 = vld [vmem:[#allocation5 + $0x63] sm:$0xff]  ;;  %v3756_v17 = vpack.c.bf16 %v3746_v31, %v3745_v19  ;;  %3700 = vst [vmem:[%s7819_s9 + $0x180] sm:$0xff] %v3692_v21  ;;  %v2649_v19 = vmul.f32 %v6592_v5, %v2636_v16  ;;  %v8788_v31 = vadd.f32 %v2574_v10, %v2548_v29  ;;  %v2661_v33 = vadd.f32 %v2648_v40, %v2622_v56  ;;  %v6424_v22 = vld [vmem:[#allocation2 + $0x278] sm:$0xff] }
 0x21c   : > { %v3819_v23 = vpack.c.bf16 %v3808_v35, %v8615_v44  ;;  %v3840_v36 = vld [vmem:[#allocation5 + $0x64] sm:$0xff]  ;;  %3732 = vst [vmem:[%s7819_s9 + $0x188] sm:$0xff] %v3724_v54  ;;  %v2534_v44 = vmul.f32 %v6586_v2, %v8741_v38  ;;  %2820 = vst [vmem:[#allocation3 + $0x218] sm:$0xff] %v2807_v47  ;;  %v2730_v54 = vadd.f32 %v2717_v12, %v8713_v61  ;;  %v2638_v48 = vld [vmem:[#allocation2 + $0x275] sm:$0xff] }
 0x21d   : > { %v3851_v11 = vpack.c.bf16 %v3840_v36, %v3839_v14  ;;  %3764 = vst [vmem:[%s7819_s9 + $0x190] sm:$0xff] %v3756_v17  ;;  %v3346_v57 = vld [vmem:[#allocation3 + $0x201] ss:$2 sm:$0xff]  ;;  %v2662_v39 = vadd.f32 %v2649_v19, %v2623_v42  ;;  %v2749_v17 = vmul.f32 %v6598_v8, %v8741_v38  ;;  %v2782_v36 = vmul.f32 %v6600_v9, %v8745_v55  ;;  %v2739_v19 = vld [vmem:[#allocation2 + $0x271] sm:$0xff] }
 0x21e   : > { %3827 = vst [vmem:[%s7819_s9 + $0x158] sm:$0xff] %v3819_v23  ;;  %v2547_v45 = vadd.f32 %v2534_v44, %v8706_v34  ;;  %v3405_v53 = vmax.f32 %v3254_v0, %v3346_v57  ;;  %v3619_v59 = vld [vmem:[#allocation5 + $0x61] sm:$0xff]  ;;  %v3620_v50 = vld [vmem:[#allocation5 + $0x69] sm:$0xff]  ;;  %v2688_v34 = vmul.f32 %v6594_v6, %v2675_v20  ;;  %v2750_v23 = vmul.f32 %v6598_v8, %v8743_v41 }
 0x21f   : > { %3859 = vst [vmem:[%s7819_s9 + $0x160] sm:$0xff] %v3851_v11  ;;  %v8786_v21 = vld [vmem:[#allocation5 + $0x6a] sm:$0xff]  ;;  %v3629_v35 = vpack.c.bf16 %v3620_v50, %v3619_v59  ;;  %v2523_v14 = vld [vmem:[#allocation2 + $0x269] sm:$0xff]  ;;  %v2783_v61 = vmul.f32 %v6600_v9, %v8754_v58  ;;  %v2720_v38 = vmul.f32 %v6424_v22, %v6596_v7  ;;  %v2762_v41 = vadd.f32 %v2749_v17, %v8718_v32 }
 0x220   : > { %v2586_v62 = vadd.f32 %v2573_v26, %v2547_v45  ;;  %v3661_v28 = vpack.c.bf16 %v8786_v21, %v8747_v46  ;;  %3451 = vst [vmem:[#allocation4 + $0x100] sm:$0xff] %v3405_v53  ;;  %v2562_v18 = vld [vmem:[#allocation2 + $0x26a] sm:$0xff]  ;;  %v2599_v11 = vld [vmem:[#allocation2 + $0x274] sm:$0xff]  ;;  %v2700_v46 = vadd.f32 %v2687_v49, %v2661_v33  ;;  %v8803_v37 = vadd.f32 %v2688_v34, %v2662_v39  ;;  %v2600_v39 = vld [vmem:[#allocation2 + $0x27c] sm:$0xff] }
 0x221   : > { %v2598_v15 = vld [vmem:[#allocation2 + $0x26c] sm:$0xff]  ;;  %3637 = vst [vmem:[%s7819_s9 + $0x1b8] sm:$0xff] %v3629_v35  ;;  %v2763_v52 = vadd.f32 %v2750_v23, %v2730_v54  ;;  %v8810_v55 = vmul.f32 %v6424_v22, %v6584_v1  ;;  %v2536_v16 = vmul.f32 %v6586_v2, %v2523_v14  ;;  %v2575_v30 = vmul.f32 %v6588_v3, %v2562_v18  ;;  %v2677_v0 = vld [vmem:[#allocation2 + $0x276] sm:$0xff]  ;;  %v2601_v54 = vld [vmem:[#allocation2 + $0x284] sm:$0xff] }
 0x222   : > { %3669 = vst [vmem:[%s7819_s9 + $0x1c0] sm:$0xff] %v3661_v28  ;;  %v2637_v63 = vld [vmem:[#allocation2 + $0x26d] sm:$0xff]  ;;  %v8813_v44 = vadd.f32 %v2720_v38, %v2700_v46  ;;  %v2611_v26 = vmul.f32 %v6590_v4, %v2598_v15  ;;  %v2612_v58 = vmul.f32 %v6590_v4, %v2599_v11  ;;  %v2795_v43 = vadd.f32 %v2782_v36, %v2762_v41  ;;  %v2639_v11 = vld [vmem:[#allocation2 + $0x27d] sm:$0xff]  ;;  %v2640_v38 = vld [vmem:[#allocation2 + $0x285] sm:$0xff] }
 0x223   : > { %v2676_v60 = vld [vmem:[#allocation2 + $0x26e] sm:$0xff]  ;;  %v2796_v32 = vadd.f32 %v2783_v61, %v2763_v52  ;;  %v2549_v27 = vadd.f32 %v2536_v16, %v8751_v51  ;;  %v2650_v20 = vmul.f32 %v6592_v5, %v2637_v63  ;;  %v2651_v40 = vmul.f32 %v6592_v5, %v2638_v48  ;;  %v2678_v16 = vld [vmem:[#allocation2 + $0x27e] sm:$0xff]  ;;  %v2679_v48 = vld [vmem:[#allocation2 + $0x286] sm:$0xff] }
 0x224   : > { %v3256_v47 = vld [vmem:[#allocation3 + $0x210] ss:$2 sm:$0xff]  ;;  %v3348_v10 = vld [vmem:[#allocation3 + $0x211] ss:$2 sm:$0xff]  ;;  %v2624_v45 = vadd.f32 %v2611_v26, %v8730_v24  ;;  %v2625_v29 = vadd.f32 %v2612_v58, %v2586_v62  ;;  %v2808_v56 = vmax.f32 %v2795_v43, 0.0  ;;  %v2689_v59 = vmul.f32 %v6594_v6, %v2676_v60  ;;  %v6426_v22 = vld [vmem:[#allocation2 + $0x288] sm:$0xff] }
 0x225   : > { %v3406_v57 = vmax.f32 %v3256_v47, %v3348_v10  ;;  %v2772_v53 = vld [vmem:[#allocation2 + $0x272] sm:$0xff]  ;;  %v2809_v42 = vmax.f32 %v2796_v32, 0.0  ;;  %v2588_v49 = vadd.f32 %v2575_v30, %v2549_v27  ;;  %v2690_v51 = vmul.f32 %v6594_v6, %v2677_v0  ;;  %v2741_v27 = vld [vmem:[#allocation2 + $0x281] sm:$0xff] }
 0x226   : > { %v2663_v50 = vadd.f32 %v2650_v20, %v2624_v45  ;;  %v2664_v34 = vadd.f32 %v2651_v40, %v2625_v29  ;;  %v6425_v12 = vld [vmem:[#allocation2 + $0x270] sm:$0xff]  ;;  %2821 = vst [vmem:[#allocation3 + $0x220] sm:$0xff] %v2808_v56  ;;  %v2751_v24 = vmul.f32 %v6598_v8, %v2523_v14  ;;  %v2752_v62 = vmul.f32 %v6598_v8, %v2739_v19  ;;  %v2740_v32 = vld [vmem:[#allocation2 + $0x279] sm:$0xff]  ;;  %v2774_v40 = vld [vmem:[#allocation2 + $0x282] sm:$0xff] }
 0x227   : > { %3452 = vst [vmem:[#allocation4 + $0x108] sm:$0xff] %v3406_v57  ;;  %v2719_v35 = vmul.f32 %v6425_v12, %v6596_v7  ;;  %2822 = vst [vmem:[#allocation3 + $0x228] sm:$0xff] %v2809_v42  ;;  %v2784_v28 = vmul.f32 %v6600_v9, %v2562_v18  ;;  %v2785_v33 = vmul.f32 %v6600_v9, %v2772_v53  ;;  %v2773_v20 = vld [vmem:[#allocation2 + $0x27a] sm:$0xff] }
 0x228   : > { %v2702_v17 = vadd.f32 %v2689_v59, %v2663_v50  ;;  %v8829_v23 = vadd.f32 %v2690_v51, %v2664_v34  ;;  %v2844_v15 = vmul.f32 %v6425_v12, %v6584_v1  ;;  %v2764_v46 = vadd.f32 %v2751_v24, %v8763_v25 }
 0x229   : > { %v2732_v36 = vadd.f32 %v2719_v35, %v8758_v13  ;;  %v2883_v14 = vmul.f32 %v6586_v2, %v2739_v19  ;;  %v2922_v61 = vmul.f32 %v6588_v3, %v2772_v53  ;;  %v2722_v18 = vmul.f32 %v6426_v22, %v6596_v7 }
 0x22a   : > { %v8838_v41 = vmul.f32 %v6426_v22, %v6584_v1  ;;  %v2613_v52 = vmul.f32 %v6590_v4, %v2600_v39  ;;  %v2614_v13 = vmul.f32 %v6590_v4, %v2601_v54  ;;  %v2797_v30 = vadd.f32 %v2784_v28, %v2764_v46 }
 0x22b   : > { %v2765_v63 = vadd.f32 %v2752_v62, %v2732_v36  ;;  %v2896_v25 = vadd.f32 %v2883_v14, %v2844_v15  ;;  %v2735_v26 = vadd.f32 %v2722_v18, %v2702_v17  ;;  %v2652_v58 = vmul.f32 %v6592_v5, %v2639_v11  ;;  %v2742_v36 = vld [vmem:[#allocation2 + $0x289] sm:$0xff]  ;;  %v6428_v14 = vld [vmem:[#allocation2 + $0x298] sm:$0xff] }
 0x22c   : > { %v2626_v47 = vadd.f32 %v2613_v52, %v8788_v31  ;;  %v2627_v10 = vadd.f32 %v2614_v13, %v2588_v49  ;;  %v2653_v43 = vmul.f32 %v6592_v5, %v2640_v38  ;;  %v2810_v0 = vmax.f32 %v2797_v30, 0.0  ;;  %v6427_v31 = vld [vmem:[#allocation2 + $0x280] sm:$0xff] }
 0x22d   : > { %v2798_v60 = vadd.f32 %v2785_v33, %v2765_v63  ;;  %v8845_v57 = vadd.f32 %v2922_v61, %v2896_v25  ;;  %v2691_v45 = vmul.f32 %v6594_v6, %v2678_v16  ;;  %v2692_v29 = vmul.f32 %v6594_v6, %v2679_v48  ;;  %v2743_v61 = vld [vmem:[#allocation2 + $0x291] sm:$0xff] }
 0x22e   : > { %v3258_v19 = vld [vmem:[#allocation3 + $0x220] ss:$2 sm:$0xff]  ;;  %v3350_v53 = vld [vmem:[#allocation3 + $0x221] ss:$2 sm:$0xff]  ;;  %v2665_v42 = vadd.f32 %v2652_v58, %v2626_v47  ;;  %v2666_v59 = vadd.f32 %v2653_v43, %v2627_v10  ;;  %v2721_v49 = vmul.f32 %v6427_v31, %v6596_v7  ;;  %2823 = vst [vmem:[#allocation3 + $0x230] sm:$0xff] %v2810_v0  ;;  %v2753_v34 = vmul.f32 %v6598_v8, %v2740_v32  ;;  %v6429_v16 = vld [vmem:[#allocation2 + $0x290] sm:$0xff] }
 0x22f   : > { %v2811_v56 = vmax.f32 %v2798_v60, 0.0  ;;  %v3407_v50 = vmax.f32 %v3258_v19, %v3350_v53  ;;  %v2754_v51 = vmul.f32 %v6598_v8, %v2741_v27  ;;  %v2786_v12 = vmul.f32 %v6600_v9, %v2773_v20  ;;  %v2775_v63 = vld [vmem:[#allocation2 + $0x28a] sm:$0xff]  ;;  %v2776_v25 = vld [vmem:[#allocation2 + $0x292] sm:$0xff] }
 0x230   : > { %v2704_v35 = vadd.f32 %v2691_v45, %v2665_v42  ;;  %v8853_v24 = vadd.f32 %v2692_v29, %v2666_v59  ;;  %v2734_v62 = vadd.f32 %v2721_v49, %v8803_v37  ;;  %v2787_v28 = vmul.f32 %v6600_v9, %v2774_v40  ;;  %v2949_v0 = vld [vmem:[#allocation2 + $0x294] sm:$0xff] }
 0x231   : > { %2824 = vst [vmem:[#allocation3 + $0x238] sm:$0xff] %v2811_v56  ;;  %3453 = vst [vmem:[#allocation4 + $0x110] sm:$0xff] %v3407_v50  ;;  %v2766_v33 = vadd.f32 %v2753_v34, %v8813_v44  ;;  %v2846_v39 = vmul.f32 %v6427_v31, %v6584_v1  ;;  %v2884_v54 = vmul.f32 %v6586_v2, %v2740_v32  ;;  %v2987_v45 = vld [vmem:[#allocation2 + $0x28d] sm:$0xff] }
 0x232   : > { %v2885_v17 = vmul.f32 %v6586_v2, %v2741_v27  ;;  %v2767_v15 = vadd.f32 %v2754_v51, %v2734_v62  ;;  %v2923_v11 = vmul.f32 %v6588_v3, %v2773_v20  ;;  %v2924_v46 = vmul.f32 %v6588_v3, %v2774_v40  ;;  %v2948_v20 = vld [vmem:[#allocation2 + $0x28c] sm:$0xff]  ;;  %v3537_v29 = vld [vmem:[#allocation4 + $0xfc] sm:$0xff] }
 0x233   : > { %v2724_v37 = vmul.f32 %v6428_v14, %v6596_v7  ;;  %v2799_v22 = vadd.f32 %v2786_v12, %v2766_v33  ;;  %v2897_v18 = vadd.f32 %v2884_v54, %v8810_v55  ;;  %v8866_v38 = vmul.f32 %v6428_v14, %v6584_v1  ;;  %v2988_v33 = vld [vmem:[#allocation2 + $0x295] sm:$0xff] }
 0x234   : > { %v2898_v44 = vadd.f32 %v2885_v17, %v2846_v39  ;;  %v2800_v52 = vadd.f32 %v2787_v28, %v2767_v15  ;;  %v2723_v48 = vmul.f32 %v6429_v16, %v6596_v7  ;;  %v2755_v30 = vmul.f32 %v6598_v8, %v2742_v36  ;;  %v3683_v39 = vld [vmem:[#allocation5 + $0x6d] sm:$0xff] }
 0x235   : > { %v8868_v13 = vadd.f32 %v2724_v37, %v2704_v35  ;;  %v2812_v58 = vmax.f32 %v2799_v22, 0.0  ;;  %v2936_v60 = vadd.f32 %v2923_v11, %v2897_v18  ;;  %v2756_v55 = vmul.f32 %v6598_v8, %v2743_v61  ;;  %v3026_v11 = vld [vmem:[#allocation2 + $0x28e] sm:$0xff]  ;;  %v2744_v22 = vld [vmem:[#allocation2 + $0x299] sm:$0xff] }
 0x236   : > { %v8872_v47 = vadd.f32 %v2924_v46, %v2898_v44  ;;  %v2813_v10 = vmax.f32 %v2800_v52, 0.0  ;;  %v2736_v43 = vadd.f32 %v2723_v48, %v8829_v23  ;;  %v2768_v32 = vadd.f32 %v2755_v30, %v2735_v26  ;;  %v3538_v26 = vld [vmem:[#allocation4 + $0x104] sm:$0x1f]  ;;  %v2778_v30 = vld [vmem:[#allocation2 + $0x2a2] sm:$0xff] }
 0x237   : > { %v2788_v27 = vmul.f32 %v6600_v9, %v2775_v63  ;;  %2825 = vst [vmem:[#allocation3 + $0x240] sm:$0xff] %v2812_v58  ;;  %v2789_v53 = vmul.f32 %v6600_v9, %v2776_v25  ;;  %v2848_v56 = vmul.f32 %v6429_v16, %v6584_v1  ;;  %v2886_v42 = vmul.f32 %v6586_v2, %v2742_v36  ;;  %v3027_v46 = vld [vmem:[#allocation2 + $0x296] sm:$0xff]  ;;  %v2745_v16 = vld [vmem:[#allocation2 + $0x2a1] sm:$0xff] }
 0x238   : > { %v8877_v40 = vld [vmem:[#allocation3 + $0x230] ss:$2 sm:$0xff]  ;;  %v8879_v19 = vld [vmem:[#allocation3 + $0x231] ss:$2 sm:$0xff]  ;;  %v2887_v23 = vmul.f32 %v6586_v2, %v2743_v61  ;;  %v3539_v59 = vld [vmem:[#allocation4 + $0x10a] sm:$0xff]  ;;  %2826 = vst [vmem:[#allocation3 + $0x248] sm:$0xff] %v2813_v10  ;;  %v2769_v50 = vadd.f32 %v2756_v55, %v2736_v43  ;;  %v2925_v51 = vmul.f32 %v6588_v3, %v2775_v63  ;;  %v2926_v36 = vmul.f32 %v6588_v3, %v2776_v25 }
 0x239   : > { %v3540_v31 = vld [vmem:[#allocation4 + $0x112] sm:$0x1f]  ;;  %v3408_v49 = vmax.f32 %v8877_v40, %v8879_v19  ;;  %v2801_v34 = vadd.f32 %v2788_v27, %v2768_v32  ;;  %v3541_v12 = vmax.f32 %v3537_v29, %v3539_v59  ;;  %v2899_v62 = vadd.f32 %v2886_v42, %v8838_v41  ;;  %v2777_v48 = vld [vmem:[#allocation2 + $0x29a] sm:$0xff]  ;;  %v2919_v40 = vld [vmem:[#allocation2 + $0x2c2] sm:$0xff] }
 0x23a   : > { %v3542_v35 = vmax.f32 %v3538_v26, %v3540_v31  ;;  %v2900_v28 = vadd.f32 %v2887_v23, %v2848_v56  ;;  %v2802_v54 = vadd.f32 %v2789_v53, %v2769_v50  ;;  %v2961_v15 = vmul.f32 %v6590_v4, %v2948_v20  ;;  %v6430_v10 = vld [vmem:[#allocation2 + $0x2a8] sm:$0xff]  ;;  %v2954_v19 = vld [vmem:[#allocation2 + $0x2bc] sm:$0xff] }
 0x23b   : > { %v2814_v17 = vmax.f32 %v2801_v34, 0.0  ;;  %3543 = vst [vmem:[#allocation5 + $0x75] sm:$0xff] %v3541_v12  ;;  %v3693_v14 = vpack.c.bf16 %v3541_v12, %v3683_v39  ;;  %v8891_v37 = vadd.f32 %v2925_v51, %v2899_v62  ;;  %v2962_v61 = vmul.f32 %v6590_v4, %v2949_v0 }
 0x23c   : > { %3544 = vst [vmem:[#allocation5 + $0x7d] sm:$0x1f] %v3542_v35  ;;  %v3000_v41 = vmul.f32 %v6592_v5, %v2987_v45  ;;  %v2815_v18 = vmax.f32 %v2802_v54, 0.0  ;;  %v8895_v44 = vadd.f32 %v2926_v36, %v2900_v28  ;;  %v2974_v63 = vadd.f32 %v2961_v15, %v8845_v57  ;;  %v6431_v57 = vld [vmem:[#allocation2 + $0x2a0] sm:$0xff]  ;;  %v3809_v15 = vld [vmem:[#allocation5 + $0x6b] sm:$0xff] }
 0x23d   : > { %2827 = vst [vmem:[#allocation3 + $0x250] sm:$0xff] %v2814_v17  ;;  %v3001_v52 = vmul.f32 %v6592_v5, %v2988_v33  ;;  %3701 = vst [vmem:[%s7819_s9 + $0x1c8] sm:$0xff] %v3693_v14  ;;  %v2975_v25 = vadd.f32 %v2962_v61, %v2936_v60  ;;  %v3039_v58 = vmul.f32 %v6594_v6, %v3026_v11  ;;  %v2950_v17 = vld [vmem:[#allocation2 + $0x29c] sm:$0xff]  ;;  %v3841_v11 = vld [vmem:[#allocation5 + $0x6c] sm:$0xff] }
 0x23e   : > { %v3040_v55 = vmul.f32 %v6594_v6, %v3027_v46  ;;  %v8903_v43 = vmul.f32 %v6430_v10, %v6584_v1  ;;  %2828 = vst [vmem:[#allocation3 + $0x258] sm:$0xff] %v2815_v18  ;;  %v3013_v32 = vadd.f32 %v3000_v41, %v2974_v63  ;;  %v3072_v27 = vmul.f32 %v6430_v10, %v6596_v7  ;;  %v2989_v36 = vld [vmem:[#allocation2 + $0x29d] sm:$0xff] }
 0x23f   : > { %v2725_v20 = vmul.f32 %v6431_v57, %v6596_v7  ;;  %v2757_v0 = vmul.f32 %v6598_v8, %v2744_v22  ;;  %v3262_v45 = vld [vmem:[#allocation3 + $0x240] ss:$2 sm:$0xff]  ;;  %v3354_v29 = vld [vmem:[#allocation3 + $0x241] ss:$2 sm:$0xff]  ;;  %v3014_v60 = vadd.f32 %v3001_v52, %v2975_v25  ;;  %v2758_v53 = vmul.f32 %v6598_v8, %v2745_v16 }
 0x240   : > { %v2790_v56 = vmul.f32 %v6600_v9, %v2777_v48  ;;  %v2791_v42 = vmul.f32 %v6600_v9, %v2778_v30  ;;  %v3409_v23 = vmax.f32 %v3262_v45, %v3354_v29  ;;  %v3052_v26 = vadd.f32 %v3039_v58, %v3013_v32  ;;  %v2990_v52 = vld [vmem:[#allocation2 + $0x2a5] sm:$0xff] }
 0x241   : > { %v2738_v59 = vadd.f32 %v2725_v20, %v8853_v24  ;;  %v2770_v31 = vadd.f32 %v2757_v0, %v8868_v13  ;;  %v8913_v50 = vadd.f32 %v3040_v55, %v3014_v60  ;;  %v2850_v34 = vmul.f32 %v6431_v57, %v6584_v1  ;;  %v2951_v13 = vld [vmem:[#allocation2 + $0x2a4] sm:$0xff] }
 0x242   : > { %v2888_v51 = vmul.f32 %v6586_v2, %v2744_v22  ;;  %v2889_v12 = vmul.f32 %v6586_v2, %v2745_v16  ;;  %v3584_v35 = vld [vmem:[#allocation5 + $0x70] sm:$0xff]  ;;  %3455 = vst [vmem:[#allocation4 + $0x120] sm:$0xff] %v3409_v23  ;;  %v8918_v33 = vadd.f32 %v3072_v27, %v3052_v26  ;;  %v2927_v24 = vmul.f32 %v6588_v3, %v2777_v48  ;;  %v3029_v25 = vld [vmem:[#allocation2 + $0x2a6] sm:$0xff] }
 0x243   : > { %v3585_v62 = vld [vmem:[#allocation5 + $0x78] sm:$0xff]  ;;  %v2771_v39 = vadd.f32 %v2758_v53, %v2738_v59  ;;  %v2803_v54 = vadd.f32 %v2790_v56, %v2770_v31  ;;  %v2928_v63 = vmul.f32 %v6588_v3, %v2778_v30  ;;  %v3715_v55 = vld [vmem:[#allocation5 + $0x6e] sm:$0xff]  ;;  %v2877_v59 = vld [vmem:[#allocation2 + $0x2a9] sm:$0xff] }
 0x244   : > { %v3621_v28 = vld [vmem:[#allocation5 + $0x71] sm:$0xff]  ;;  %v3593_v46 = vpack.c.bf16 %v3585_v62, %v3584_v35  ;;  %v3622_v14 = vld [vmem:[#allocation5 + $0x79] sm:$0xff]  ;;  %v2901_v22 = vadd.f32 %v2888_v51, %v8866_v38  ;;  %v2902_v18 = vadd.f32 %v2889_v12, %v2850_v34  ;;  %v2963_v34 = vmul.f32 %v6590_v4, %v2950_v17  ;;  %v2878_v35 = vld [vmem:[#allocation2 + $0x2b1] sm:$0xff] }
 0x245   : > { %v3653_v61 = vld [vmem:[#allocation5 + $0x72] sm:$0xff]  ;;  %v8921_v41 = vld [vmem:[#allocation5 + $0x7a] sm:$0xff]  ;;  %v3630_v48 = vpack.c.bf16 %v3622_v14, %v3621_v28  ;;  %v2804_v57 = vadd.f32 %v2791_v42, %v2771_v39  ;;  %v2816_v45 = vmax.f32 %v2803_v54, 0.0  ;;  %v2964_v51 = vmul.f32 %v6590_v4, %v2951_v13  ;;  %v2916_v62 = vld [vmem:[#allocation2 + $0x2aa] sm:$0xff] }
 0x246   : > { %v3028_v16 = vld [vmem:[#allocation2 + $0x29e] sm:$0xff]  ;;  %v3662_v58 = vpack.c.bf16 %v8921_v41, %v3653_v61  ;;  %v3788_v27 = vpack.c.bf16 %v3653_v61, %v8786_v21  ;;  %3606 = vst [vmem:[%s7819_s9 + $0x1f8] sm:$0xff] %v3593_v46  ;;  %v2940_v29 = vadd.f32 %v2927_v24, %v2901_v22  ;;  %v8928_v60 = vadd.f32 %v2928_v63, %v2902_v18  ;;  %v2917_v28 = vld [vmem:[#allocation2 + $0x2b2] sm:$0xff] }
 0x247   : > { %v3716_v10 = vld [vmem:[#allocation5 + $0x76] sm:$0xff]  ;;  %3638 = vst [vmem:[%s7819_s9 + $0x200] sm:$0xff] %v3630_v48  ;;  %v2817_v26 = vmax.f32 %v2804_v57, 0.0  ;;  %2829 = vst [vmem:[#allocation3 + $0x260] sm:$0xff] %v2816_v45  ;;  %v3002_v12 = vmul.f32 %v6592_v5, %v2989_v36  ;;  %v3003_v39 = vmul.f32 %v6592_v5, %v2990_v52  ;;  %v3041_v54 = vmul.f32 %v6594_v6, %v3028_v16  ;;  %v2952_v13 = vld [vmem:[#allocation2 + $0x2ac] sm:$0xff] }
 0x248   : > { %v3747_v32 = vld [vmem:[#allocation5 + $0x6f] sm:$0xff]  ;;  %v3725_v38 = vpack.c.bf16 %v3716_v10, %v3715_v55  ;;  %v3748_v20 = vld [vmem:[#allocation5 + $0x77] sm:$0xff]  ;;  %3670 = vst [vmem:[%s7819_s9 + $0x208] sm:$0xff] %v3662_v58  ;;  %3796 = vst [vmem:[%s7819_s9 + $0x198] sm:$0xff] %v3788_v27  ;;  %v3042_v24 = vmul.f32 %v6594_v6, %v3029_v25  ;;  %v2976_v36 = vadd.f32 %v2963_v34, %v8872_v47 }
 0x249   : > { %v3810_v30 = vld [vmem:[#allocation5 + $0x73] sm:$0xff]  ;;  %v3757_v53 = vpack.c.bf16 %v3748_v20, %v3747_v32  ;;  %2830 = vst [vmem:[#allocation3 + $0x268] sm:$0xff] %v2817_v26  ;;  %v2977_v46 = vadd.f32 %v2964_v51, %v8891_v37  ;;  %v6433_v61 = vld [vmem:[#allocation2 + $0x2b0] sm:$0xff]  ;;  %v2890_v52 = vmul.f32 %v6586_v2, %v2877_v59  ;;  %v2891_v16 = vmul.f32 %v6586_v2, %v2878_v35 }
 0x24a   : > { %v3842_v0 = vld [vmem:[#allocation5 + $0x74] sm:$0xff]  ;;  %v3820_v56 = vpack.c.bf16 %v3810_v30, %v3809_v15  ;;  %3733 = vst [vmem:[%s7819_s9 + $0x1d0] sm:$0xff] %v3725_v38  ;;  %v2852_v22 = vmul.f32 %v6433_v61, %v6584_v1  ;;  %v2991_v18 = vld [vmem:[#allocation2 + $0x2ad] sm:$0xff]  ;;  %v2929_v25 = vmul.f32 %v6588_v3, %v2916_v62  ;;  %v2930_v48 = vmul.f32 %v6588_v3, %v2917_v28 }
 0x24b   : > { %v3852_v23 = vpack.c.bf16 %v3842_v0, %v3841_v11  ;;  %v3264_v21 = vld [vmem:[#allocation3 + $0x250] ss:$2 sm:$0xff]  ;;  %v3356_v42 = vld [vmem:[#allocation3 + $0x251] ss:$2 sm:$0xff]  ;;  %3765 = vst [vmem:[%s7819_s9 + $0x1d8] sm:$0xff] %v3757_v53  ;;  %v3015_v58 = vadd.f32 %v3002_v12, %v2976_v36  ;;  %v3016_v55 = vadd.f32 %v3003_v39, %v2977_v46  ;;  %v2965_v47 = vmul.f32 %v6590_v4, %v2952_v13 }
 0x24c   : > { %v3410_v31 = vmax.f32 %v3264_v21, %v3356_v42  ;;  %3828 = vst [vmem:[%s7819_s9 + $0x1a0] sm:$0xff] %v3820_v56  ;;  %v6432_v15 = vld [vmem:[#allocation2 + $0x2b8] sm:$0xff]  ;;  %v3030_v10 = vld [vmem:[#allocation2 + $0x2ae] sm:$0xff]  ;;  %v2903_v27 = vadd.f32 %v2890_v52, %v8903_v43  ;;  %v2904_v57 = vadd.f32 %v2891_v16, %v2852_v22  ;;  %v3004_v38 = vmul.f32 %v6592_v5, %v2991_v18  ;;  %v2955_v16 = vld [vmem:[#allocation2 + $0x2c4] sm:$0xff] }
 0x24d   : > { %3860 = vst [vmem:[%s7819_s9 + $0x1a8] sm:$0xff] %v3852_v23  ;;  %v8944_v17 = vmul.f32 %v6432_v15, %v6584_v1  ;;  %v2953_v11 = vld [vmem:[#allocation2 + $0x2b4] sm:$0xff]  ;;  %v3074_v14 = vmul.f32 %v6432_v15, %v6596_v7  ;;  %v3054_v30 = vadd.f32 %v3041_v54, %v3015_v58  ;;  %v8959_v0 = vadd.f32 %v3042_v24, %v3016_v55 }
 0x24e   : > { %3456 = vst [vmem:[#allocation4 + $0x128] sm:$0xff] %v3410_v31  ;;  %v2992_v63 = vld [vmem:[#allocation2 + $0x2b5] sm:$0xff]  ;;  %v2966_v37 = vmul.f32 %v6590_v4, %v2953_v11  ;;  %v2978_v45 = vadd.f32 %v2965_v47, %v8895_v44  ;;  %v2942_v56 = vadd.f32 %v2929_v25, %v2903_v27  ;;  %v8962_v23 = vadd.f32 %v2930_v48, %v2904_v57  ;;  %v2994_v47 = vld [vmem:[#allocation2 + $0x2c5] sm:$0xff] }
 0x24f   : > { %v3031_v32 = vld [vmem:[#allocation2 + $0x2b6] sm:$0xff]  ;;  %v3005_v20 = vmul.f32 %v6592_v5, %v2992_v63  ;;  %v3043_v21 = vmul.f32 %v6594_v6, %v3030_v10  ;;  %v8966_v31 = vadd.f32 %v3074_v14, %v3054_v30  ;;  %v3073_v12 = vmul.f32 %v6433_v61, %v6596_v7  ;;  %v2880_v14 = vld [vmem:[#allocation2 + $0x2c1] sm:$0xff] }
 0x250   : > { %v2979_v53 = vadd.f32 %v2966_v37, %v2940_v29  ;;  %v3044_v42 = vmul.f32 %v6594_v6, %v3031_v32  ;;  %v3266_v26 = vld [vmem:[#allocation3 + $0x260] ss:$2 sm:$0xff]  ;;  %v3358_v43 = vld [vmem:[#allocation3 + $0x261] ss:$2 sm:$0xff]  ;;  %v3017_v34 = vadd.f32 %v3004_v38, %v2978_v45  ;;  %v3105_v44 = vmul.f32 %v6598_v8, %v2877_v59 }
 0x251   : > { %v3411_v54 = vmax.f32 %v3266_v26, %v3358_v43  ;;  %v3106_v29 = vmul.f32 %v6598_v8, %v2878_v35  ;;  %v3138_v24 = vmul.f32 %v6600_v9, %v2916_v62  ;;  %v2879_v15 = vld [vmem:[#allocation2 + $0x2b9] sm:$0xff]  ;;  %v3086_v46 = vadd.f32 %v3073_v12, %v8913_v50  ;;  %v6434_v35 = vld [vmem:[#allocation2 + $0x2c8] sm:$0xff] }
 0x252   : > { %v3018_v51 = vadd.f32 %v3005_v20, %v2979_v53  ;;  %v3056_v11 = vadd.f32 %v3043_v21, %v3017_v34  ;;  %v2918_v61 = vld [vmem:[#allocation2 + $0x2ba] sm:$0xff]  ;;  %v3118_v22 = vadd.f32 %v3105_v44, %v8918_v33  ;;  %v3139_v59 = vmul.f32 %v6600_v9, %v2917_v28  ;;  %v3033_v57 = vld [vmem:[#allocation2 + $0x2c6] sm:$0xff] }
 0x253   : > { %3457 = vst [vmem:[#allocation4 + $0x130] sm:$0xff] %v3411_v54  ;;  %v8981_v62 = vmul.f32 %v6434_v35, %v6584_v1  ;;  %v3076_v18 = vmul.f32 %v6434_v35, %v6596_v7  ;;  %v3119_v50 = vadd.f32 %v3106_v29, %v3086_v46  ;;  %v6435_v63 = vld [vmem:[#allocation2 + $0x2c0] sm:$0xff]  ;;  %v2892_v33 = vmul.f32 %v6586_v2, %v2879_v15  ;;  %v9003_v12 = vld [vmem:[#allocation2 + $0x2c9] sm:$0xff] }
 0x254   : > { %v8975_v36 = vadd.f32 %v3044_v42, %v3018_v51  ;;  %v2854_v52 = vmul.f32 %v6435_v63, %v6584_v1  ;;  %v2993_v28 = vld [vmem:[#allocation2 + $0x2bd] sm:$0xff]  ;;  %v3151_v25 = vadd.f32 %v3138_v24, %v3118_v22  ;;  %v2893_v58 = vmul.f32 %v6586_v2, %v2880_v14 }
 0x255   : > { %v3547_v39 = vld [vmem:[#allocation4 + $0x126] sm:$0xff]  ;;  %v8987_v48 = vadd.f32 %v3076_v18, %v3056_v11  ;;  %v2931_v55 = vmul.f32 %v6588_v3, %v2918_v61  ;;  %v3152_v37 = vadd.f32 %v3139_v59, %v3119_v50  ;;  %v2932_v10 = vmul.f32 %v6588_v3, %v2919_v40  ;;  %v2920_v59 = vld [vmem:[#allocation2 + $0x2ca] sm:$0xff] }
 0x256   : > { %v3549_v13 = vmax.f32 %v3408_v49, %v3547_v39  ;;  %v2967_v32 = vmul.f32 %v6590_v4, %v2954_v19  ;;  %v3032_v27 = vld [vmem:[#allocation2 + $0x2be] sm:$0xff]  ;;  %v3164_v38 = vmax.f32 %v3151_v25, 0.0  ;;  %v2906_v20 = vadd.f32 %v2893_v58, %v2854_v52  ;;  %v3546_v39 = vld [vmem:[#allocation4 + $0x120] sm:$0x1f]  ;;  %v6437_v52 = vld [vmem:[#allocation2 + $0x2d0] sm:$0xff] }
 0x257   : > { %v2968_v30 = vmul.f32 %v6590_v4, %v2955_v16  ;;  %v3006_v45 = vmul.f32 %v6592_v5, %v2993_v28  ;;  %v3165_v53 = vmax.f32 %v3152_v37, 0.0  ;;  %v3007_v26 = vmul.f32 %v6592_v5, %v2994_v47  ;;  %v2995_v16 = vld [vmem:[#allocation2 + $0x2cd] sm:$0xff] }
 0x258   : > { %3551 = vst [vmem:[#allocation5 + $0x82] sm:$0xff] %v3549_v13  ;;  %v3789_v49 = vpack.c.bf16 %v3549_v13, %v8921_v41  ;;  %v2905_v41 = vadd.f32 %v2892_v33, %v8944_v17  ;;  %v2980_v42 = vadd.f32 %v2967_v32, %v8928_v60  ;;  %3177 = vst [vmem:[#allocation3 + $0x270] sm:$0xff] %v3164_v38  ;;  %v9008_v13 = vld [vmem:[#allocation2 + $0x2d1] sm:$0xff] }
 0x259   : > { %v8999_v17 = vadd.f32 %v2932_v10, %v2906_v20  ;;  %v2981_v43 = vadd.f32 %v2968_v30, %v2942_v56  ;;  %v3045_v34 = vmul.f32 %v6594_v6, %v3032_v27  ;;  %v3046_v51 = vmul.f32 %v6594_v6, %v3033_v57  ;;  %3178 = vst [vmem:[#allocation3 + $0x278] sm:$0xff] %v3165_v53  ;;  %v3034_v32 = vld [vmem:[#allocation2 + $0x2ce] sm:$0xff]  ;;  %v3035_v30 = vld [vmem:[#allocation2 + $0x2d6] sm:$0xff] }
 0x25a   : > { %3797 = vst [vmem:[%s7819_s9 + $0x1e0] sm:$0xff] %v3789_v49  ;;  %v2944_v21 = vadd.f32 %v2931_v55, %v2905_v41  ;;  %v3548_v54 = vld [vmem:[#allocation4 + $0x12e] sm:$0x1f]  ;;  %v3019_v44 = vadd.f32 %v3006_v45, %v2980_v42  ;;  %v3075_v29 = vmul.f32 %v6435_v63, %v6596_v7  ;;  %v3107_v60 = vmul.f32 %v6598_v8, %v2879_v15  ;;  %v6436_v49 = vld [vmem:[#allocation2 + $0x2d8] sm:$0xff]  ;;  %v2956_v63 = vld [vmem:[#allocation2 + $0x2cc] sm:$0xff] }
 0x25b   : > { %v3108_v24 = vmul.f32 %v6598_v8, %v2880_v14  ;;  %v3550_v11 = vmax.f32 %v3546_v39, %v3548_v54  ;;  %v3020_v56 = vadd.f32 %v3007_v26, %v2981_v43  ;;  %v3140_v46 = vmul.f32 %v6600_v9, %v2918_v61  ;;  %v2921_v15 = vld [vmem:[#allocation2 + $0x2d2] sm:$0xff] }
 0x25c   : > { %v3141_v22 = vmul.f32 %v6600_v9, %v2919_v40  ;;  %v3058_v35 = vadd.f32 %v3045_v34, %v3019_v44  ;;  %v3088_v18 = vadd.f32 %v3075_v29, %v8959_v0  ;;  %v3120_v19 = vadd.f32 %v3107_v60, %v8966_v31  ;;  %v2957_v0 = vld [vmem:[#allocation2 + $0x2d4] sm:$0xff]  ;;  %v2958_v29 = vld [vmem:[#allocation2 + $0x2dc] sm:$0xff]  ;;  %v2959_v60 = vld [vmem:[#allocation2 + $0x2e4] sm:$0xff] }
 0x25d   : > { %v3078_v50 = vmul.f32 %v6436_v49, %v6596_v7  ;;  %3552 = vst [vmem:[#allocation5 + $0x8a] sm:$0x1f] %v3550_v11  ;;  %v9015_v14 = vadd.f32 %v3046_v51, %v3020_v56  ;;  %v2856_v33 = vmul.f32 %v6437_v52, %v6584_v1  ;;  %v2894_v61 = vmul.f32 %v6586_v2, %v9003_v12  ;;  %v2996_v55 = vld [vmem:[#allocation2 + $0x2d5] sm:$0xff]  ;;  %v3036_v49 = vld [vmem:[#allocation2 + $0x2de] sm:$0xff] }
 0x25e   : > { %v2895_v40 = vmul.f32 %v6586_v2, %v9008_v13  ;;  %v3121_v31 = vadd.f32 %v3108_v24, %v3088_v18  ;;  %v3153_v28 = vadd.f32 %v3140_v46, %v3120_v19  ;;  %v2933_v58 = vmul.f32 %v6588_v3, %v2920_v59  ;;  %v2997_v18 = vld [vmem:[#allocation2 + $0x2dd] sm:$0xff]  ;;  %v2998_v19 = vld [vmem:[#allocation2 + $0x2e5] sm:$0xff]  ;;  %v6448_v1 = vld [vmem:[%s9832_s2 + $0x50] sm:$0xff] (%p42_p8)  }
 0x25f   : > { %v9022_v25 = vadd.f32 %v3078_v50, %v3058_v35  ;;  %v2907_v47 = vadd.f32 %v2894_v61, %v8981_v62  ;;  %v2934_v41 = vmul.f32 %v6588_v3, %v2921_v15  ;;  %v2969_v10 = vmul.f32 %v6590_v4, %v2956_v63  ;;  %v3685_v34 = vld [vmem:[#allocation5 + $0x7d] sm:$0xff]  ;;  %v6449_v2 = vld [vmem:[%s9832_s2 + $0x10] sm:$0xff] (%p42_p8)   ;;  %v6450_v3 = vld [vmem:[%s9832_s2 + $0x58] sm:$0xff] (%p42_p8)  }
 0x260   : > { %v2908_v37 = vadd.f32 %v2895_v40, %v2856_v33  ;;  %v3154_v27 = vadd.f32 %v3141_v22, %v3121_v31  ;;  %v3166_v57 = vmax.f32 %v3153_v28, 0.0  ;;  %v2970_v38 = vmul.f32 %v6590_v4, %v2957_v0  ;;  %v3268_v45 = vld [vmem:[#allocation3 + $0x270] ss:$2 sm:$0xff]  ;;  %v3360_v53 = vld [vmem:[#allocation3 + $0x271] ss:$2 sm:$0xff]  ;;  %v3717_v24 = vld [vmem:[#allocation5 + $0x7e] sm:$0xff] }
 0x261   : > { %v3008_v20 = vmul.f32 %v6592_v5, %v2995_v16  ;;  %v2946_v42 = vadd.f32 %v2933_v58, %v2907_v47  ;;  %v2982_v62 = vadd.f32 %v2969_v10, %v8962_v23  ;;  %v3009_v43 = vmul.f32 %v6592_v5, %v2996_v55  ;;  %v3749_v11 = vld [vmem:[#allocation5 + $0x7f] sm:$0xff] }
 0x262   : > { %v9030_v26 = vadd.f32 %v2934_v41, %v2908_v37  ;;  %v3412_v51 = vmax.f32 %v3268_v45, %v3360_v53  ;;  %v3167_v39 = vmax.f32 %v3154_v27, 0.0  ;;  %3179 = vst [vmem:[#allocation3 + $0x280] sm:$0xff] %v3166_v57  ;;  %v2983_v54 = vadd.f32 %v2970_v38, %v2944_v21  ;;  %v3811_v56 = vld [vmem:[#allocation5 + $0x7b] sm:$0xff]  ;;  %v3098_v38 = vld [vmem:[#allocation2 + $0x2d9] sm:$0xff] }
 0x263   : > { %v3047_v44 = vmul.f32 %v6594_v6, %v3034_v32  ;;  %v3021_v46 = vadd.f32 %v3008_v20, %v2982_v62  ;;  %v3048_v22 = vmul.f32 %v6594_v6, %v3035_v30  ;;  %v3077_v35 = vmul.f32 %v6437_v52, %v6596_v7  ;;  %v3037_v57 = vld [vmem:[#allocation2 + $0x2e6] sm:$0xff] }
 0x264   : > { %v3109_v23 = vmul.f32 %v6598_v8, %v9003_v12  ;;  %v3686_v50 = vld [vmem:[#allocation5 + $0x85] sm:$0xff]  ;;  %3458 = vst [vmem:[#allocation4 + $0x138] sm:$0xff] %v3412_v51  ;;  %3180 = vst [vmem:[#allocation3 + $0x288] sm:$0xff] %v3167_v39  ;;  %v3022_v33 = vadd.f32 %v3009_v43, %v2983_v54  ;;  %v3110_v61 = vmul.f32 %v6598_v8, %v9008_v13  ;;  %v3843_v12 = vld [vmem:[#allocation5 + $0x7c] sm:$0xff] }
 0x265   : > { %v3718_v21 = vld [vmem:[#allocation5 + $0x86] sm:$0xff]  ;;  %v3142_v52 = vmul.f32 %v6600_v9, %v2920_v59  ;;  %v3143_v40 = vmul.f32 %v6600_v9, %v2921_v15  ;;  %v3694_v0 = vpack.c.bf16 %v3686_v50, %v3685_v34  ;;  %v3060_v55 = vadd.f32 %v3047_v44, %v3021_v46  ;;  %v3099_v53 = vld [vmem:[#allocation2 + $0x2e1] sm:$0xff] }
 0x266   : > { %v3750_v63 = vld [vmem:[#allocation5 + $0x87] sm:$0xff]  ;;  %v3726_v16 = vpack.c.bf16 %v3718_v21, %v3717_v24  ;;  %v9043_v41 = vadd.f32 %v3048_v22, %v3022_v33  ;;  %v3090_v13 = vadd.f32 %v3077_v35, %v8975_v36  ;;  %v3122_v59 = vadd.f32 %v3109_v23, %v8987_v48  ;;  %v6439_v54 = vld [vmem:[#allocation2 + $0x2e0] sm:$0xff] }
 0x267   : > { %v3758_v31 = vpack.c.bf16 %v3750_v63, %v3749_v11  ;;  %v3812_v28 = vld [vmem:[#allocation5 + $0x83] sm:$0xff]  ;;  %3702 = vst [vmem:[%s7819_s9 + $0x210] sm:$0xff] %v3694_v0  ;;  %v2971_v32 = vmul.f32 %v6590_v4, %v2958_v29  ;;  %v2972_v27 = vmul.f32 %v6590_v4, %v2959_v60  ;;  %v3010_v30 = vmul.f32 %v6592_v5, %v2997_v18  ;;  %v3131_v60 = vld [vmem:[#allocation2 + $0x2da] sm:$0xff]  ;;  %v3132_v24 = vld [vmem:[#allocation2 + $0x2e2] sm:$0xff] }
 0x268   : > { %v3844_v58 = vld [vmem:[#allocation5 + $0x84] sm:$0xff]  ;;  %v3821_v47 = vpack.c.bf16 %v3812_v28, %v3811_v56  ;;  %3734 = vst [vmem:[%s7819_s9 + $0x218] sm:$0xff] %v3726_v16  ;;  %v3123_v20 = vadd.f32 %v3110_v61, %v3090_v13  ;;  %v3011_v36 = vmul.f32 %v6592_v5, %v2998_v19  ;;  %v3049_v45 = vmul.f32 %v6594_v6, %v3036_v49  ;;  %v6440_v16 = vld [vmem:[#allocation2 + $0x2f8] sm:$0xff] }
 0x269   : > { %v3853_v37 = vpack.c.bf16 %v3844_v58, %v3843_v12  ;;  %3766 = vst [vmem:[%s7819_s9 + $0x220] sm:$0xff] %v3758_v31  ;;  %v6438_v15 = vld [vmem:[#allocation2 + $0x2e8] sm:$0xff]  ;;  %v3155_v48 = vadd.f32 %v3142_v52, %v3122_v59  ;;  %v2984_v43 = vadd.f32 %v2971_v32, %v8999_v17  ;;  %v2985_v34 = vadd.f32 %v2972_v27, %v2946_v42  ;;  %v3101_v12 = vld [vmem:[#allocation2 + $0x2f1] sm:$0xff] }
 0x26a   : > { %v3080_v10 = vmul.f32 %v6438_v15, %v6596_v7  ;;  %3829 = vst [vmem:[%s7819_s9 + $0x1e8] sm:$0xff] %v3821_v47  ;;  %v3156_v51 = vadd.f32 %v3143_v40, %v3123_v20  ;;  %v3050_v39 = vmul.f32 %v6594_v6, %v3037_v57  ;;  %v3079_v44 = vmul.f32 %v6439_v54, %v6596_v7  ;;  %v2960_v11 = vld [vmem:[#allocation2 + $0x2ec] sm:$0xff]  ;;  %v3102_v57 = vld [vmem:[#allocation2 + $0x2f9] sm:$0xff] }
 0x26b   : > { %3861 = vst [vmem:[%s7819_s9 + $0x1f0] sm:$0xff] %v3853_v37  ;;  %v3111_v29 = vmul.f32 %v6598_v8, %v3098_v38  ;;  %v3270_v56 = vld [vmem:[#allocation3 + $0x280] ss:$2 sm:$0xff]  ;;  %v3362_v46 = vld [vmem:[#allocation3 + $0x281] ss:$2 sm:$0xff]  ;;  %v3168_v22 = vmax.f32 %v3155_v48, 0.0  ;;  %v3023_v35 = vadd.f32 %v3010_v30, %v2984_v43  ;;  %v3024_v23 = vadd.f32 %v3011_v36, %v2985_v34 }
 0x26c   : > { %v3093_v62 = vadd.f32 %v3080_v10, %v3060_v55  ;;  %v3112_v18 = vmul.f32 %v6598_v8, %v3099_v53  ;;  %v2999_v17 = vld [vmem:[#allocation2 + $0x2ed] sm:$0xff]  ;;  %v3413_v42 = vmax.f32 %v3270_v56, %v3362_v46  ;;  %v3169_v19 = vmax.f32 %v3156_v51, 0.0  ;;  %v3135_v38 = vld [vmem:[#allocation2 + $0x2fa] sm:$0xff] }
 0x26d   : > { %v3092_v49 = vadd.f32 %v3079_v44, %v9015_v14  ;;  %v3124_v50 = vadd.f32 %v3111_v29, %v9022_v25  ;;  %v3038_v21 = vld [vmem:[#allocation2 + $0x2ee] sm:$0xff]  ;;  %3181 = vst [vmem:[#allocation3 + $0x290] sm:$0xff] %v3168_v22  ;;  %v3062_v33 = vadd.f32 %v3049_v45, %v3023_v35  ;;  %v3063_v61 = vadd.f32 %v3050_v39, %v3024_v23  ;;  %v3103_v53 = vld [vmem:[#allocation2 + $0x301] sm:$0xff] }
 0x26e   : > { %v3100_v63 = vld [vmem:[#allocation2 + $0x2e9] sm:$0xff]  ;;  %v3144_v52 = vmul.f32 %v6600_v9, %v3131_v60  ;;  %v3145_v40 = vmul.f32 %v6600_v9, %v3132_v24  ;;  %3459 = vst [vmem:[#allocation4 + $0x140] sm:$0xff] %v3413_v42  ;;  %3182 = vst [vmem:[#allocation3 + $0x298] sm:$0xff] %v3169_v19  ;;  %v3082_v31 = vmul.f32 %v6440_v16, %v6596_v7  ;;  %v3134_v59 = vld [vmem:[#allocation2 + $0x2f2] sm:$0xff] }
 0x26f   : > { %v3125_v0 = vadd.f32 %v3112_v18, %v3092_v49  ;;  %v2973_v14 = vmul.f32 %v6590_v4, %v2960_v11  ;;  %v3012_v25 = vmul.f32 %v6592_v5, %v2999_v17  ;;  %v3133_v28 = vld [vmem:[#allocation2 + $0x2ea] sm:$0xff]  ;;  %v3051_v55 = vmul.f32 %v6594_v6, %v3038_v21  ;;  %v6442_v51 = vld [vmem:[#allocation2 + $0x300] sm:$0xff]  ;;  %v6451_v4 = vld [vmem:[%s9832_s2 + $0x18] sm:$0xff] (%p42_p8)  }
 0x270   : > { %v3157_v58 = vadd.f32 %v3144_v52, %v3124_v50  ;;  %v6441_v47 = vld [vmem:[#allocation2 + $0x2f0] sm:$0xff]  ;;  %v3113_v13 = vmul.f32 %v6598_v8, %v3100_v63  ;;  %v3095_v10 = vadd.f32 %v3082_v31, %v3062_v33  ;;  %v3114_v27 = vmul.f32 %v6598_v8, %v3101_v12  ;;  %v6443_v11 = vld [vmem:[#allocation2 + $0x308] sm:$0xff]  ;;  %v6452_v5 = vld [vmem:[%s9832_s2 + $0x60] sm:$0xff] (%p42_p8)  }
 0x271   : > { %v3081_v37 = vmul.f32 %v6441_v47, %v6596_v7  ;;  %v3158_v15 = vadd.f32 %v3145_v40, %v3125_v0  ;;  %v2986_v32 = vadd.f32 %v2973_v14, %v9030_v26  ;;  %v3146_v45 = vmul.f32 %v6600_v9, %v3133_v28  ;;  %v3104_v54 = vld [vmem:[#allocation2 + $0x309] sm:$0xff]  ;;  %v6453_v6 = vld [vmem:[%s9832_s2 + $0x20] sm:$0xff] (%p42_p8)  }
 0x272   : > { %v3170_v20 = vmax.f32 %v3157_v58, 0.0  ;;  %v3126_v36 = vadd.f32 %v3113_v13, %v3093_v62  ;;  %v3147_v34 = vmul.f32 %v6600_v9, %v3134_v59  ;;  %v3083_v39 = vmul.f32 %v6442_v51, %v6596_v7  ;;  %v3136_v26 = vld [vmem:[#allocation2 + $0x302] sm:$0xff]  ;;  %v3137_v42 = vld [vmem:[#allocation2 + $0x30a] sm:$0xff] }
 0x273   : > { %v3094_v30 = vadd.f32 %v3081_v37, %v9043_v41  ;;  %v3171_v48 = vmax.f32 %v3158_v15, 0.0  ;;  %v3025_v43 = vadd.f32 %v3012_v25, %v2986_v32  ;;  %v3115_v60 = vmul.f32 %v6598_v8, %v3102_v57  ;;  %v3553_v25 = vld [vmem:[#allocation4 + $0x134] sm:$0xff] }
 0x274   : > { %3183 = vst [vmem:[#allocation3 + $0x2a0] sm:$0xff] %v3170_v20  ;;  %v3159_v29 = vadd.f32 %v3146_v45, %v3126_v36  ;;  %v3148_v41 = vmul.f32 %v6600_v9, %v3135_v38  ;;  %v3096_v24 = vadd.f32 %v3083_v39, %v3063_v61  ;;  %v3084_v56 = vmul.f32 %v6443_v11, %v6596_v7  ;;  %v6454_v7 = vld [vmem:[%s9832_s2 + $0x68] sm:$0xff] (%p42_p8)   ;;  %v6459_v11 = vld [vmem:[%s9832_s2 + $0x38] sm:$0xff] (%p42_p8)  }
 0x275   : > { %v3127_v44 = vadd.f32 %v3114_v27, %v3094_v30  ;;  %3184 = vst [vmem:[#allocation3 + $0x2a8] sm:$0xff] %v3171_v48  ;;  %v3064_v62 = vadd.f32 %v3051_v55, %v3025_v43  ;;  %v3116_v46 = vmul.f32 %v6598_v8, %v3103_v53  ;;  %v3272_v22 = vld [vmem:[#allocation3 + $0x290] ss:$2 sm:$0xff]  ;;  %v3364_v35 = vld [vmem:[#allocation3 + $0x291] ss:$2 sm:$0xff]  ;;  %v3128_v18 = vadd.f32 %v3115_v60, %v3095_v10  ;;  %v6455_v60 = vld [vmem:[%s9832_s2 + $0x28] sm:$0xff] (%p42_p8)  }
 0x276   : > { %v3117_v17 = vmul.f32 %v6598_v8, %v3104_v54  ;;  %v3149_v19 = vmul.f32 %v6600_v9, %v3136_v26  ;;  %v3414_v49 = vmax.f32 %v3272_v22, %v3364_v35  ;;  %v3172_v50 = vmax.f32 %v3159_v29, 0.0  ;;  %v3554_v28 = vld [vmem:[#allocation4 + $0x13c] sm:$0x1f]  ;;  %v6444_v54 = vld [vmem:[%s9832_s2 + $0x40] sm:$0xff] (%p42_p8)   ;;  %v6447_v29 = vld [vmem:[%s9832_s2 + $0x8] sm:$0xff] (%p42_p8)  }
 0x277   : > { %v3160_v23 = vadd.f32 %v3147_v34, %v3127_v44  ;;  %v3097_v21 = vadd.f32 %v3084_v56, %v3064_v62  ;;  %v3129_v63 = vadd.f32 %v3116_v46, %v3096_v24  ;;  %v3161_v61 = vadd.f32 %v3148_v41, %v3128_v18  ;;  %v6445_v26 = vld [vmem:[%s9832_s2] sm:$0xff] (%p42_p8)   ;;  %5832 = vmatprep.subr.bf16.mxu0 (%p42_p8), %v6444_v54  ;;  %v6446_v44 = vld [vmem:[%s9832_s2 + $0x48] sm:$0xff] (%p42_p8)   ;;  %v6456_v41 = vld [vmem:[%s9832_s2 + $0x70] sm:$0xff] (%p42_p8)  }
 0x278   : > { %3460 = vst [vmem:[#allocation4 + $0x148] sm:$0xff] %v3414_v49  ;;  %3185 = vst [vmem:[#allocation3 + $0x2b0] sm:$0xff] %v3172_v50  ;;  %v3150_v40 = vmul.f32 %v6600_v9, %v3137_v42  ;;  %6352 = vmatprep.subr.bf16.mxu1 (%p42_p8), %v6444_v54  ;;  %5833 = vmatpush3.bf16.msra.mxu0 (%p42_p8), %v6445_v26  ;;  %v6457_v62 = vld [vmem:[%s9832_s2 + $0x30] sm:$0xff] (%p42_p8)   ;;  %v6458_v24 = vld [vmem:[%s9832_s2 + $0x78] sm:$0xff] (%p42_p8)  }
 0x279   : > { %v3173_v33 = vmax.f32 %v3160_v23, 0.0  ;;  %v3130_v52 = vadd.f32 %v3117_v17, %v3097_v21  ;;  %v3162_v12 = vadd.f32 %v3149_v19, %v3129_v63  ;;  %v3174_v0 = vmax.f32 %v3161_v61, 0.0  ;;  %6360 = vmatpush3.bf16.msra.mxu1 (%p42_p8), %v6445_v26  ;;  %5834 = vmatprep.subr.bf16.mxu0 (%p42_p8), %v6446_v44  ;;  %v6460_v56 = vld [vmem:[%s9832_s2 + $0xc0] sm:$0xff] (%p42_p8)   ;;  %v6463_v18 = vld [vmem:[%s9832_s2 + $0xc8] sm:$0xff] (%p42_p8)   ;;  %v6466_v63 = vld [vmem:[%s9832_s2 + $0xd0] sm:$0xff] (%p42_p8)  }
 0x27a   :  { %6353 = vmatprep.subr.bf16.mxu1 (%p42_p8), %v6446_v44  ;;  %v6462_v46 = vld [vmem:[%s9832_s2 + $0x140] sm:$0xff] (%p42_p8)   ;;  %v6465_v19 = vld [vmem:[%s9832_s2 + $0x88] sm:$0xff] (%p42_p8)  }
 0x27b   : > { %3186 = vst [vmem:[#allocation3 + $0x2b8] sm:$0xff] %v3173_v33  ;;  %v3163_v16 = vadd.f32 %v3150_v40, %v3130_v52  ;;  %v3175_v31 = vmax.f32 %v3162_v12, 0.0  ;;  %3187 = vst [vmem:[#allocation3 + $0x2c0] sm:$0xff] %v3174_v0  ;;  %v6461_v23 = vld [vmem:[%s9832_s2 + $0x80] sm:$0xff] (%p42_p8)   ;;  %v6470_v49 = vld [vmem:[%s9832_s2 + $0x148] sm:$0xff] (%p42_p8)  }
 0x27c   :  { %5835 = vmatpush3.bf16.msra.mxu0 (%p42_p8), %v6447_v29  ;;  %v6464_v17 = vld [vmem:[%s9832_s2 + $0x100] sm:$0xff] (%p42_p8)   ;;  %v6472_v21 = vld [vmem:[%s9832_s2 + $0x108] sm:$0xff] (%p42_p8)   ;;  %v6467_v52 = vld [vmem:[%s9832_s2 + $0x90] sm:$0xff] (%p42_p8)  }
 0x27d   : > { %v3176_v14 = vmax.f32 %v3163_v16, 0.0  ;;  %3188 = vst [vmem:[#allocation3 + $0x2c8] sm:$0xff] %v3175_v31  ;;  %6361 = vmatpush3.bf16.msra.mxu1 (%p42_p8), %v6447_v29  ;;  %5836 = vmatprep.subr.bf16.mxu0 (%p42_p8), %v6448_v1  ;;  %v6468_v40 = vld [vmem:[%s9832_s2 + $0xd8] sm:$0xff] (%p42_p8)   ;;  %v6478_v16 = vld [vmem:[%s9832_s2 + $0x150] sm:$0xff] (%p42_p8)   ;;  %v6483_v26 = vld [vmem:[%s9832_s2 + $0x180] sm:$0xff] (%p42_p8)  }
 0x27e   :  { %6354 = vmatprep.subr.bf16.mxu1 (%p42_p8), %v6448_v1  ;;  %v6480_v31 = vld [vmem:[%s9832_s2 + $0x110] sm:$0xff] (%p42_p8)   ;;  %v6486_v29 = vld [vmem:[%s9832_s2 + $0x1c8] sm:$0xff] (%p42_p8)  }
 0x27f   : > { %3189 = vst [vmem:[#allocation3 + $0x2d0] sm:$0xff] %v3176_v14  ;;  %v3555_v58 = vld [vmem:[#allocation4 + $0x142] sm:$0xff]  ;;  %v3556_v55 = vld [vmem:[#allocation4 + $0x14a] sm:$0x1f] }
 0x280   : > { %v3557_v47 = vmax.f32 %v3553_v25, %v3555_v58  ;;  %v3558_v37 = vmax.f32 %v3554_v28, %v3556_v55  ;;  %5837 = vmatpush3.bf16.msra.mxu0 (%p42_p8), %v6449_v2  ;;  %v6469_v14 = vld [vmem:[%s9832_s2 + $0x98] sm:$0xff] (%p42_p8)   ;;  %v6471_v25 = vld [vmem:[%s9832_s2 + $0xe0] sm:$0xff] (%p42_p8)  }
 0x281   :  { %6362 = vmatpush3.bf16.msra.mxu1 (%p42_p8), %v6449_v2  ;;  %5838 = vmatprep.subr.bf16.mxu0 (%p42_p8), %v6450_v3  ;;  %v6473_v55 = vld [vmem:[%s9832_s2 + $0xa0] sm:$0xff] (%p42_p8)   ;;  %v6494_v2 = vld [vmem:[%s9832_s2 + $0x170] sm:$0xff] (%p42_p8)  }
 0x282   : > { %v3276_v13 = vld [vmem:[#allocation3 + $0x2b0] ss:$2 sm:$0xff]  ;;  %v3368_v59 = vld [vmem:[#allocation3 + $0x2b1] ss:$2 sm:$0xff]  ;;  %3559 = vst [vmem:[#allocation5 + $0x8f] sm:$0xff] %v3557_v47  ;;  %6355 = vmatprep.subr.bf16.mxu1 (%p42_p8), %v6450_v3  ;;  %v6474_v47 = vld [vmem:[%s9832_s2 + $0xe8] sm:$0xff] (%p42_p8)  }
 0x283   : > { %v3416_v15 = vmax.f32 %v3276_v13, %v3368_v59  ;;  %3560 = vst [vmem:[#allocation5 + $0x97] sm:$0x1f] %v3558_v37  ;;  %v6484_v59 = vld [vmem:[%s9832_s2 + $0x158] sm:$0xff] (%p42_p8)   ;;  %v6495_v3 = vld [vmem:[%s9832_s2 + $0x130] sm:$0xff] (%p42_p8)  }
 0x284   : > { %v3278_v10 = vld [vmem:[#allocation3 + $0x2c0] ss:$2 sm:$0xff]  ;;  %v3370_v32 = vld [vmem:[#allocation3 + $0x2c1] ss:$2 sm:$0xff]  ;;  %5839 = vmatpush3.bf16.msra.mxu0 (%p42_p8), %v6451_v4 }
 0x285   : > { %3462 = vst [vmem:[#allocation4 + $0x158] sm:$0xff] %v3416_v15  ;;  %v3417_v27 = vmax.f32 %v3278_v10, %v3370_v32  ;;  %6363 = vmatpush3.bf16.msra.mxu1 (%p42_p8), %v6451_v4  ;;  %5840 = vmatprep.subr.bf16.mxu0 (%p42_p8), %v6452_v5  ;;  %v6485_v15 = vld [vmem:[%s9832_s2 + $0x118] sm:$0xff] (%p42_p8)   ;;  %v6475_v10 = vld [vmem:[%s9832_s2 + $0xa8] sm:$0xff] (%p42_p8)   ;;  %v6476_v32 = vld [vmem:[%s9832_s2 + $0xf0] sm:$0xff] (%p42_p8)  }
 0x286   : > { %v3280_v57 = vld [vmem:[#allocation3 + $0x2d0] ss:$2 sm:$0xf]  ;;  %v3372_v38 = vld [vmem:[#allocation3 + $0x2d1] ss:$2 sm:$0xf]  ;;  %6356 = vmatprep.subr.bf16.mxu1 (%p42_p8), %v6452_v5 }
 0x287   : > { %v3418_v20 = vmax.f32 %v3280_v57, %v3372_v38  ;;  %3463 = vst [vmem:[#allocation4 + $0x160] sm:$0xff] %v3417_v27  ;;  %v6488_v27 = vld [vmem:[%s9832_s2 + $0x160] sm:$0xff] (%p42_p8)   ;;  %v6487_v4 = vld [vmem:[%s9832_s2 + $0x188] sm:$0xff] (%p42_p8)   ;;  %v6492_v5 = vld [vmem:[%s9832_s2 + $0x1d0] sm:$0xff] (%p42_p8)  }
 0x288   :  { %5841 = vmatpush3.bf16.msra.mxu0 (%p42_p8), %v6453_v6 }
 0x289   : > { %3464 = vst [vmem:[#allocation4 + $0x168] sm:$0xf] %v3418_v20  ;;  %v3781_v30 = vld [vmem:[#allocation5 + $0x8a] sm:$0xff]  ;;  %44 = sbr.rel (!%p42_p8) target bundleno = 22 (0x16), region = 175  ;;  %6364 = vmatpush3.bf16.msra.mxu1 (%p42_p8), %v6453_v6  ;;  %5842 = vmatprep.subr.bf16.mxu0 (%p42_p8), %v6454_v7 }
 0x28a   : > { %v3782_v36 = vld [vmem:[#allocation5 + $0x92] sm:$0xff]  ;;  %6357 = vmatprep.subr.bf16.mxu1 (%p42_p8), %v6454_v7  ;;  %v6477_v20 = vld [vmem:[%s9832_s2 + $0xb0] sm:$0xff] (%p42_p8)  }
 0x28b   : > { %v3813_v45 = vld [vmem:[#allocation5 + $0x8b] sm:$0xff]  ;;  %v3790_v53 = vpack.c.bf16 %v3782_v36, %v3781_v30  ;;  %v3814_v48 = vld [vmem:[#allocation5 + $0x93] sm:$0xff] }
 0x28c   : > { %v3845_v43 = vld [vmem:[#allocation5 + $0x8c] sm:$0xff]  ;;  %v3846_v34 = vld [vmem:[#allocation5 + $0x94] sm:$0xff]  ;;  %v3822_v51 = vpack.c.bf16 %v3814_v48, %v3813_v45  ;;  %5843 = vmatpush3.bf16.msra.mxu0 (%p42_p8), %v6455_v60  ;;  %v6490_v48 = vld [vmem:[%s9832_s2 + $0x168] sm:$0xff] (%p42_p8)  }
 0x28d   : > { %v3854_v39 = vpack.c.bf16 %v3846_v34, %v3845_v43  ;;  %3798 = vst [vmem:[%s7819_s9 + $0x228] sm:$0xff] %v3790_v53  ;;  %6365 = vmatpush3.bf16.msra.mxu1 (%p42_p8), %v6455_v60  ;;  %5844 = vmatprep.subr.bf16.mxu0 (%p42_p8), %v6456_v41  ;;  %v6479_v30 = vld [vmem:[%s9832_s2 + $0xf8] sm:$0xff] (%p42_p8)   ;;  %v6489_v53 = vld [vmem:[%s9832_s2 + $0x120] sm:$0xff] (%p42_p8)  }
 0x28e   : > { %3830 = vst [vmem:[%s7819_s9 + $0x230] sm:$0xff] %v3822_v51  ;;  %6358 = vmatprep.subr.bf16.mxu1 (%p42_p8), %v6456_v41  ;;  %v6481_v43 = vld [vmem:[%s9832_s2 + $0xb8] sm:$0xff] (%p42_p8)   ;;  %v6482_v34 = vld [vmem:[%s9832_s2 + $0x1c0] sm:$0xff] (%p42_p8)   ;;  %v6491_v51 = vld [vmem:[%s9832_s2 + $0x128] sm:$0xff] (%p42_p8)  }
 0x28f   : > { %3862 = vst [vmem:[%s7819_s9 + $0x238] sm:$0xff] %v3854_v39  ;;  %v6493_v41 = vld [vmem:[%s9832_s2 + $0x190] sm:$0xff] (%p42_p8)  }
 0x290   :  { %5845 = vmatpush3.bf16.msra.mxu0 %v6457_v62 }
 0x291   :  { %6366 = vmatpush3.bf16.msra.mxu1 %v6457_v62  ;;  %5846 = vmatprep.subr.bf16.mxu0 %v6458_v24  ;;  %v6499_v62 = vld [vmem:[%s9832_s2 + $0x138] sm:$0xff]  }
 0x292   :  { %6359 = vmatprep.subr.bf16.mxu1 %v6458_v24  ;;  %v6496_v24 = vld [vmem:[%s9832_s2 + $0x1d8] sm:$0xff]  }
 0x294   :  { %5847 = vmatpush3.bf16.msra.mxu0 %v6459_v11 }
 0x295   :  { %6367 = vmatpush3.bf16.msra.mxu1 %v6459_v11  ;;  %6056 = vmatprep.subr.bf16.mxu0 %v6462_v46  ;;  %v6497_v11 = vld [vmem:[%s9832_s2 + $0x198] sm:$0xff]   ;;  %v6500_v46 = vld [vmem:[%s9832_s2 + $0x1e0] sm:$0xff]  }
 0x296   :  { %v3864_v8 = vld [vmem:[#allocation6 + $0x8] sm:$0xff]  ;;  %v3863_v22 = vld [vmem:[#allocation6] sm:$0xff]  ;;  %5944 = vmatprep.subr.bf16.mxu1 %v6460_v56  ;;  %v3873_v42 = vld [vmem:[#allocation6 + $0x50] sm:$0xff] }
 0x297   :  { %v3972_v9 = vld [vmem:[#allocation6 + $0x368] sm:$0xff]  ;;  %4615 = vmatprep.mubr.bf16.mxu0 %v3864_v8  ;;  %v3971_v35 = vld [vmem:[#allocation6 + $0x360] sm:$0xff]  ;;  %v3981_v50 = vld [vmem:[#allocation6 + $0x3b0] sm:$0xff] }
 0x298   :  { %4711 = vmatprep.mubr.bf16.mxu1 %v3972_v9  ;;  %4616 = vmatmul.mubr.bf16.vlgmr.msra.gmra.mrb[0].mxu0 %v3863_v22  ;;  %v3872_v33 = vld [vmem:[#allocation6 + $0x48] sm:$0xff]  ;;  %v3882_v12 = vld [vmem:[#allocation6 + $0x98] sm:$0xff]  ;;  %v3881_v28 = vld [vmem:[#allocation6 + $0x90] sm:$0xff] }
 0x299   :  { %4712 = vmatmul.mubr.bf16.vlgmr.msra.gmra.mrb[0].mxu1 %v3971_v35  ;;  %6057 = vmatpush3.bf16.msra.mxu0 %v6464_v17  ;;  %v3980_v61 = vld [vmem:[#allocation6 + $0x3a8] sm:$0xff]  ;;  %v3990_v0 = vld [vmem:[#allocation6 + $0x3f8] sm:$0xff]  ;;  %v3989_v58 = vld [vmem:[#allocation6 + $0x3f0] sm:$0xff] }
 0x29a   :  { %5945 = vmatpush3.bf16.msra.mxu1 %v6461_v23  ;;  %4623 = vmatprep.mubr.bf16.mxu0 %v3873_v42  ;;  %v3891_v37 = vld [vmem:[#allocation6 + $0xe0] sm:$0xff]  ;;  %v3890_v57 = vld [vmem:[#allocation6 + $0xd8] sm:$0xff]  ;;  %v3900_v36 = vld [vmem:[#allocation6 + $0x128] sm:$0xff] }
 0x29b   :  { %5946 = vmatprep.subr.bf16.mxu1 %v6463_v18  ;;  %4719 = vmatprep.mubr.bf16.mxu1 %v3981_v50  ;;  %v3999_v13 = vld [vmem:[#allocation6 + $0x440] sm:$0xff]  ;;  %v3998_v38 = vld [vmem:[#allocation6 + $0x438] sm:$0xff]  ;;  %v3865_v54 = vld [vmem:[#allocation6 + $0x10] sm:$0xff] }
 0x29c   :  { %6058 = vmatprep.subr.bf16.mxu0 %v6470_v49  ;;  %v3866_v45 = vld [vmem:[#allocation6 + $0x18] sm:$0xff]  ;;  %v3899_v39 = vld [vmem:[#allocation6 + $0x120] sm:$0xff]  ;;  %v3909_v44 = vld [vmem:[#allocation6 + $0x170] sm:$0xff] }
 0x29d   :  { %6059 = vmatpush3.bf16.msra.mxu0 %v6472_v21  ;;  %v3875_v1 = vld [vmem:[#allocation6 + $0x60] sm:$0xff]  ;;  %v3908_v6 = vld [vmem:[#allocation6 + $0x168] sm:$0xff]  ;;  %v3874_v7 = vld [vmem:[#allocation6 + $0x58] sm:$0xff] }
 0x29e   :  { %5947 = vmatpush3.bf16.msra.mxu1 %v6465_v19  ;;  %6060 = vmatprep.subr.bf16.mxu0 %v6478_v16  ;;  %v6498_v8 = vld [vmem:[%s9832_s2 + $0x178] sm:$0xff]   ;;  %v3918_v9 = vld [vmem:[#allocation6 + $0x1b8] sm:$0xff]  ;;  %v3884_v60 = vld [vmem:[#allocation6 + $0xa8] sm:$0xff] }
 0x29f   :  { %5948 = vmatprep.subr.bf16.mxu1 %v6466_v63  ;;  %v9263_v56 = vld [vmem:[%s9832_s2 + $0x200] sm:$0xff]   ;;  %v3917_v22 = vld [vmem:[#allocation6 + $0x1b0] sm:$0xff]  ;;  %v3883_v35 = vld [vmem:[#allocation6 + $0xa0] sm:$0xff] }
 0x2a0   :  { %4624 = vmatmul.mubr.bf16.gmra.mrb[4].mxu0 %v3872_v33  ;;  %v3927_v23 = vld [vmem:[#allocation6 + $0x200] sm:$0xff]  ;;  %v3893_v18 = vld [vmem:[#allocation6 + $0xf0] sm:$0xff]  ;;  %v6501_v17 = vld [vmem:[%s9832_s2 + $0x1a0] sm:$0xff]  }
 0x2a1   :  { %4720 = vmatmul.mubr.bf16.gmra.mrb[4].mxu1 %v3980_v61  ;;  %4631 = vmatprep.mubr.bf16.mxu0 %v3882_v12  ;;  %v6503_v42 = vld [vmem:[%s9832_s2 + $0x1e8] sm:$0xff]   ;;  %v6506_v49 = vld [vmem:[%s9832_s2 + $0x1f0] sm:$0xff]   ;;  %v3892_v21 = vld [vmem:[#allocation6 + $0xe8] sm:$0xff] }
 0x2a2   :  { %5949 = vmatpush3.bf16.msra.mxu1 %v6467_v52  ;;  %4727 = vmatprep.mubr.bf16.mxu1 %v3990_v0  ;;  %v6504_v19 = vld [vmem:[%s9832_s2 + $0x1a8] sm:$0xff]   ;;  %v3926_v50 = vld [vmem:[#allocation6 + $0x1f8] sm:$0xff]  ;;  %v3936_v63 = vld [vmem:[#allocation6 + $0x248] sm:$0xff] }
 0x2a3   :  { %5950 = vmatprep.subr.bf16.mxu1 %v6468_v40  ;;  %6061 = vmatpush3.bf16.msra.mxu0 %v6480_v31  ;;  %v3902_v33 = vld [vmem:[#allocation6 + $0x138] sm:$0xff]  ;;  %v6509_v52 = vld [vmem:[%s9832_s2 + $0x1f8] sm:$0xff]   ;;  %v3901_v0 = vld [vmem:[#allocation6 + $0x130] sm:$0xff] }
 0x2a4   :  { %6062 = vmatprep.subr.bf16.mxu0 %v6484_v59  ;;  %v6507_v61 = vld [vmem:[%s9832_s2 + $0x1b0] sm:$0xff]   ;;  %v6510_v40 = vld [vmem:[%s9832_s2 + $0x1b8] sm:$0xff]   ;;  %v3945_v16 = vld [vmem:[#allocation6 + $0x290] sm:$0xff] }
 0x2a5   :  { %v3935_v12 = vld [vmem:[#allocation6 + $0x240] sm:$0xff]  ;;  %v3962_v59 = vld [vmem:[#allocation6 + $0x318] sm:$0xff] }
 0x2a6   :  { %5951 = vmatpush3.bf16.msra.mxu1 %v6469_v14  ;;  %v3911_v31 = vld [vmem:[#allocation6 + $0x180] sm:$0xff]  ;;  %v3944_v14 = vld [vmem:[#allocation6 + $0x288] sm:$0xff] }
 0x2a7   :  { %5952 = vmatprep.subr.bf16.mxu1 %v6471_v25  ;;  %6063 = vmatpush3.bf16.msra.mxu0 %v6485_v15  ;;  %v3910_v25 = vld [vmem:[#allocation6 + $0x178] sm:$0xff]  ;;  %v3928_v15 = vld [vmem:[#allocation6 + $0x208] sm:$0xff] }
 0x2a8   :  { %4632 = vmatmul.mubr.bf16.gmra.mrb[8].mxu0 %v3881_v28  ;;  %6064 = vmatprep.subr.bf16.mxu0 %v6488_v27  ;;  %v3954_v28 = vld [vmem:[#allocation6 + $0x2d8] sm:$0xff]  ;;  %v3937_v27 = vld [vmem:[#allocation6 + $0x250] sm:$0xff] }
 0x2a9   :  { %4728 = vmatmul.mubr.bf16.gmra.mrb[8].mxu1 %v3989_v58  ;;  %4639 = vmatprep.mubr.bf16.mxu0 %v3891_v37  ;;  %v3920_v58 = vld [vmem:[#allocation6 + $0x1c8] sm:$0xff]  ;;  %v3963_v37 = vld [vmem:[#allocation6 + $0x320] sm:$0xff] }
 0x2aa   :  { %5953 = vmatpush3.bf16.msra.mxu1 %v6473_v55  ;;  %4735 = vmatprep.mubr.bf16.mxu1 %v3999_v13  ;;  %v3953_v55 = vld [vmem:[#allocation6 + $0x2d0] sm:$0xff] }
 0x2ab   :  { %5954 = vmatprep.subr.bf16.mxu1 %v6474_v47  ;;  %6065 = vmatpush3.bf16.msra.mxu0 %v6489_v53  ;;  %v3919_v47 = vld [vmem:[#allocation6 + $0x1c0] sm:$0xff]  ;;  %v3929_v13 = vld [vmem:[#allocation6 + $0x210] sm:$0xff]  ;;  %v3876_v53 = vld [vmem:[#allocation6 + $0x68] sm:$0xff] }
 0x2ac   :  { %6066 = vmatprep.subr.bf16.mxu0 %v6490_v48  ;;  %v3956_v48 = vld [vmem:[#allocation6 + $0x2e8] sm:$0xff] }
 0x2ae   :  { %5955 = vmatpush3.bf16.msra.mxu1 %v6475_v10  ;;  %v3938_v10 = vld [vmem:[#allocation6 + $0x258] sm:$0xff] }
 0x2af   :  { %5956 = vmatprep.subr.bf16.mxu1 %v6476_v32  ;;  %6067 = vmatpush3.bf16.msra.mxu0 %v6491_v51  ;;  %v3868_v32 = vld [vmem:[#allocation6 + $0x28] sm:$0xff] }
 0x2b0   :  { %4640 = vmatmul.mubr.bf16.gmra.mrb[12].mxu0 %v3890_v57  ;;  %6068 = vmatprep.subr.bf16.mxu0 %v6494_v2  ;;  %v3867_v57 = vld [vmem:[#allocation6 + $0x20] sm:$0xff]  ;;  %v6512_v51 = vld [vmem:[%s9832_s2 + $0x220] sm:$0xff]  }
 0x2b1   :  { %4736 = vmatmul.mubr.bf16.gmra.mrb[12].mxu1 %v3998_v38  ;;  %4647 = vmatprep.mubr.bf16.mxu0 %v3900_v36  ;;  %v3947_v38 = vld [vmem:[#allocation6 + $0x2a0] sm:$0xff]  ;;  %v6508_v36 = vld [vmem:[%s9832_s2 + $0x210] sm:$0xff]   ;;  %v3964_v2 = vld [vmem:[#allocation6 + $0x328] sm:$0xff] }
 0x2b2   :  { %5957 = vmatpush3.bf16.msra.mxu1 %v6477_v20  ;;  %4776 = vmatprep.mubr.bf16.mxu1 %v3866_v45  ;;  %v6505_v20 = vld [vmem:[%s9832_s2 + $0x208] sm:$0xff]   ;;  %v3946_v45 = vld [vmem:[#allocation6 + $0x298] sm:$0xff] }
 0x2b3   :  { %5958 = vmatprep.subr.bf16.mxu1 %v6479_v30  ;;  %6069 = vmatpush3.bf16.msra.mxu0 %v6495_v3  ;;  %v3877_v30 = vld [vmem:[#allocation6 + $0x70] sm:$0xff]  ;;  %v3894_v3 = vld [vmem:[#allocation6 + $0xf8] sm:$0xff] }
 0x2b4   :  { %6070 = vmatprep.subr.bf16.mxu0 %v6498_v8  ;;  %v3903_v8 = vld [vmem:[#allocation6 + $0x140] sm:$0xff] }
 0x2b6   :  { %5959 = vmatpush3.bf16.msra.mxu1 %v6481_v43  ;;  %v3886_v43 = vld [vmem:[#allocation6 + $0xb8] sm:$0xff] }
 0x2b7   :  { %6168 = vmatprep.subr.bf16.mxu1 %v6482_v34  ;;  %6071 = vmatpush3.bf16.msra.mxu0 %v6499_v62  ;;  %v6511_v34 = vld [vmem:[%s9832_s2 + $0x218] sm:$0xff]   ;;  %v3912_v62 = vld [vmem:[#allocation6 + $0x188] sm:$0xff] }
 0x2b8   :  { %4648 = vmatmul.mubr.bf16.gmra.mrb[16].mxu0 %v3899_v39  ;;  %6304 = vmatprep.subr.bf16.mxu0 %v9263_v56  ;;  %v3955_v39 = vld [vmem:[#allocation6 + $0x2e0] sm:$0xff] }
 0x2b9   :  { %4777 = vmatmul.mubr.bf16.vlgmr.msra.gmra.mrb[16].mxu1 %v3865_v54  ;;  %4655 = vmatprep.mubr.bf16.mxu0 %v3909_v44  ;;  %v3885_v54 = vld [vmem:[#allocation6 + $0xb0] sm:$0xff]  ;;  %v3895_v44 = vld [vmem:[#allocation6 + $0x100] sm:$0xff] }
 0x2ba   :  { %6169 = vmatpush3.bf16.msra.mxu1 %v6483_v26  ;;  %4784 = vmatprep.mubr.bf16.mxu1 %v3875_v1  ;;  %v3965_v26 = vld [vmem:[#allocation6 + $0x330] sm:$0xff]  ;;  %v6514_v1 = vld [vmem:[%s9832_s2 + $0x230] sm:$0xff]  }
 0x2bb   :  { %6170 = vmatprep.subr.bf16.mxu1 %v6486_v29  ;;  %v6513_v29 = vld [vmem:[%s9832_s2 + $0x228] sm:$0xff]  }
 0x2be   :  { %6171 = vmatpush3.bf16.msra.mxu1 %v6487_v4  ;;  %v3974_v4 = vld [vmem:[#allocation6 + $0x378] sm:$0xff] }
 0x2bf   :  { %6172 = vmatprep.subr.bf16.mxu1 %v6492_v5  ;;  %v3904_v5 = vld [vmem:[#allocation6 + $0x148] sm:$0xff] }
 0x2c0   :  { %4656 = vmatmul.mubr.bf16.gmra.mrb[20].mxu0 %v3908_v6  ;;  %v6515_v6 = vld [vmem:[%s9832_s2 + $0x238] sm:$0xff]  }
 0x2c1   :  { %4785 = vmatmul.mubr.bf16.gmra.mrb[20].mxu1 %v3874_v7  ;;  %4663 = vmatprep.mubr.bf16.mxu0 %v3918_v9  ;;  %v3973_v7 = vld [vmem:[#allocation6 + $0x370] sm:$0xff]  ;;  %v3983_v9 = vld [vmem:[#allocation6 + $0x3c0] sm:$0xff] }
 0x2c2   :  { %4792 = vmatprep.mubr.bf16.mxu1 %v3884_v60  ;;  %6173 = vmatpush3.bf16.msra.mxu1 %v6493_v41  ;;  %v3913_v60 = vld [vmem:[#allocation6 + $0x190] sm:$0xff]  ;;  %v3982_v41 = vld [vmem:[#allocation6 + $0x3b8] sm:$0xff] }
 0x2c3   :  { %6174 = vmatprep.subr.bf16.mxu1 %v6496_v24  ;;  %v3992_v24 = vld [vmem:[#allocation6 + $0x408] sm:$0xff] }
 0x2c6   :  { %6175 = vmatpush3.bf16.msra.mxu1 %v6497_v11  ;;  %v3922_v11 = vld [vmem:[#allocation6 + $0x1d8] sm:$0xff] }
 0x2c7   :  { %6176 = vmatprep.subr.bf16.mxu1 %v6500_v46  ;;  %v3921_v46 = vld [vmem:[#allocation6 + $0x1d0] sm:$0xff] }
 0x2c8   :  { %4664 = vmatmul.mubr.bf16.gmra.mrb[24].mxu0 %v3917_v22  ;;  %v4001_v22 = vld [vmem:[#allocation6 + $0x450] sm:$0xff] }
 0x2c9   :  { %4793 = vmatmul.mubr.bf16.gmra.mrb[24].mxu1 %v3883_v35  ;;  %4671 = vmatprep.mubr.bf16.mxu0 %v3927_v23  ;;  %v3931_v35 = vld [vmem:[#allocation6 + $0x220] sm:$0xff]  ;;  %v4000_v23 = vld [vmem:[#allocation6 + $0x448] sm:$0xff] }
 0x2ca   :  { %4800 = vmatprep.mubr.bf16.mxu1 %v3893_v18  ;;  %6177 = vmatpush3.bf16.msra.mxu1 %v6501_v17  ;;  %v3930_v18 = vld [vmem:[#allocation6 + $0x218] sm:$0xff]  ;;  %v3940_v17 = vld [vmem:[#allocation6 + $0x268] sm:$0xff] }
 0x2cb   :  { %6178 = vmatprep.subr.bf16.mxu1 %v6503_v42  ;;  %v3870_v42 = vld [vmem:[#allocation6 + $0x38] sm:$0xff] }
 0x2ce   :  { %6179 = vmatpush3.bf16.msra.mxu1 %v6504_v19  ;;  %v3939_v19 = vld [vmem:[#allocation6 + $0x260] sm:$0xff] }
 0x2cf   :  { %6180 = vmatprep.subr.bf16.mxu1 %v6506_v49  ;;  %v3869_v49 = vld [vmem:[#allocation6 + $0x30] sm:$0xff] }
 0x2d0   :  { %4672 = vmatmul.mubr.bf16.gmra.mrb[28].mxu0 %v3926_v50  ;;  %v3949_v50 = vld [vmem:[#allocation6 + $0x2b0] sm:$0xff] }
 0x2d1   :  { %4801 = vmatmul.mubr.bf16.gmra.mrb[28].mxu1 %v3892_v21  ;;  %4679 = vmatprep.mubr.bf16.mxu0 %v3936_v63  ;;  %v3879_v21 = vld [vmem:[#allocation6 + $0x80] sm:$0xff]  ;;  %v3948_v63 = vld [vmem:[#allocation6 + $0x2a8] sm:$0xff] }
 0x2d2   :  { %4808 = vmatprep.mubr.bf16.mxu1 %v3902_v33  ;;  %6181 = vmatpush3.bf16.msra.mxu1 %v6507_v61  ;;  %v3878_v33 = vld [vmem:[#allocation6 + $0x78] sm:$0xff] }
 0x2d3   :  { %6182 = vmatprep.subr.bf16.mxu1 %v6509_v52  ;;  %v3958_v61 = vld [vmem:[#allocation6 + $0x2f8] sm:$0xff]  ;;  %v3888_v52 = vld [vmem:[#allocation6 + $0xc8] sm:$0xff] }
 0x2d6   :  { %6183 = vmatpush3.bf16.msra.mxu1 %v6510_v40  ;;  %v3957_v40 = vld [vmem:[#allocation6 + $0x2f0] sm:$0xff] }
 0x2d8   :  { %4680 = vmatmul.mubr.bf16.gmra.mrb[32].mxu0 %v3935_v12  ;;  %v3887_v12 = vld [vmem:[#allocation6 + $0xc0] sm:$0xff] }
 0x2d9   :  { %4809 = vmatmul.mubr.bf16.gmra.mrb[32].mxu1 %v3901_v0  ;;  %4687 = vmatprep.mubr.bf16.mxu0 %v3945_v16  ;;  %v3967_v0 = vld [vmem:[#allocation6 + $0x340] sm:$0xff]  ;;  %v3897_v16 = vld [vmem:[#allocation6 + $0x110] sm:$0xff] }
 0x2da   :  { %4816 = vmatprep.mubr.bf16.mxu1 %v3911_v31  ;;  %v3966_v31 = vld [vmem:[#allocation6 + $0x338] sm:$0xff] }
 0x2e0   :  { %4688 = vmatmul.mubr.bf16.gmra.mrb[36].mxu0 %v3944_v14  ;;  %v3896_v14 = vld [vmem:[#allocation6 + $0x108] sm:$0xff] }
 0x2e1   :  { %4817 = vmatmul.mubr.bf16.gmra.mrb[36].mxu1 %v3910_v25  ;;  %4695 = vmatprep.mubr.bf16.mxu0 %v3954_v28  ;;  %v3976_v25 = vld [vmem:[#allocation6 + $0x388] sm:$0xff]  ;;  %v3906_v28 = vld [vmem:[#allocation6 + $0x158] sm:$0xff] }
 0x2e2   :  { %4824 = vmatprep.mubr.bf16.mxu1 %v3920_v58  ;;  %v3975_v58 = vld [vmem:[#allocation6 + $0x380] sm:$0xff] }
 0x2e8   :  { %4696 = vmatmul.mubr.bf16.gmra.mrb[40].mxu0 %v3953_v55  ;;  %v3905_v55 = vld [vmem:[#allocation6 + $0x150] sm:$0xff] }
 0x2e9   :  { %4825 = vmatmul.mubr.bf16.gmra.mrb[40].mxu1 %v3919_v47  ;;  %4703 = vmatprep.mubr.bf16.mxu0 %v3963_v37  ;;  %v3985_v47 = vld [vmem:[#allocation6 + $0x3d0] sm:$0xff]  ;;  %v3915_v37 = vld [vmem:[#allocation6 + $0x1a0] sm:$0xff] }
 0x2ea   :  { %4832 = vmatprep.mubr.bf16.mxu1 %v3929_v13  ;;  %v3984_v13 = vld [vmem:[#allocation6 + $0x3c8] sm:$0xff] }
 0x2f0   :  { %4704 = vmatmul.mubr.bf16.gmra.mrb[44].mxu0 %v3962_v59  ;;  %v3914_v59 = vld [vmem:[#allocation6 + $0x198] sm:$0xff] }
 0x2f1   :  { %4833 = vmatmul.mubr.bf16.gmra.mrb[44].mxu1 %v3928_v15  ;;  %4937 = vmatprep.mubr.bf16.mxu0 %v3868_v32  ;;  %v3994_v15 = vld [vmem:[#allocation6 + $0x418] sm:$0xff]  ;;  %v3993_v32 = vld [vmem:[#allocation6 + $0x410] sm:$0xff] }
 0x2f2   :  { %4840 = vmatprep.mubr.bf16.mxu1 %v3938_v10  ;;  %v3924_v10 = vld [vmem:[#allocation6 + $0x1e8] sm:$0xff] }
 0x2f8   :  { %4938 = vmatmul.mubr.bf16.vlgmr.msra.gmra.mrb[48].mxu0 %v3867_v57  ;;  %v4003_v57 = vld [vmem:[#allocation6 + $0x460] sm:$0xff] }
 0x2f9   :  { %4841 = vmatmul.mubr.bf16.gmra.mrb[48].mxu1 %v3937_v27  ;;  %6305 = vmatpush3.bf16.msra.mxu0 %v9263_v56  ;;  %v3991_v56 = vld [vmem:[#allocation6 + $0x400] sm:$0xff] }
 0x2fa   :  { %4848 = vmatprep.mubr.bf16.mxu1 %v3947_v38  ;;  %4945 = vmatprep.mubr.bf16.mxu0 %v3877_v30  ;;  %v3923_v27 = vld [vmem:[#allocation6 + $0x1e0] sm:$0xff]  ;;  %v3933_v38 = vld [vmem:[#allocation6 + $0x230] sm:$0xff] }
 0x2fb   :  { %6306 = vmatprep.subr.bf16.mxu0 %v6505_v20 }
 0x2fd   :  { %6307 = vmatpush3.bf16.msra.mxu0 %v6505_v20 }
 0x2fe   :  { %6308 = vmatprep.subr.bf16.mxu0 %v6508_v36 }
 0x300   :  { %4946 = vmatmul.mubr.bf16.gmra.mrb[52].mxu0 %v3876_v53 }
 0x301   :  { %4849 = vmatmul.mubr.bf16.gmra.mrb[52].mxu1 %v3946_v45  ;;  %4953 = vmatprep.mubr.bf16.mxu0 %v3886_v43 }
 0x302   :  { %4856 = vmatprep.mubr.bf16.mxu1 %v3956_v48  ;;  %6309 = vmatpush3.bf16.msra.mxu0 %v6508_v36 }
 0x303   :  { %6310 = vmatprep.subr.bf16.mxu0 %v6511_v34 }
 0x306   :  { %6311 = vmatpush3.bf16.msra.mxu0 %v6511_v34 }
 0x307   :  { %6312 = vmatprep.subr.bf16.mxu0 %v6512_v51 }
 0x308   :  { %4954 = vmatmul.mubr.bf16.gmra.mrb[56].mxu0 %v3885_v54 }
 0x309   :  { %4857 = vmatmul.mubr.bf16.gmra.mrb[56].mxu1 %v3955_v39  ;;  %4961 = vmatprep.mubr.bf16.mxu0 %v3895_v44  ;;  %v3932_v39 = vld [vmem:[#allocation6 + $0x228] sm:$0xff]  ;;  %v3942_v44 = vld [vmem:[#allocation6 + $0x278] sm:$0xff] }
 0x30a   :  { %4864 = vmatprep.mubr.bf16.mxu1 %v3965_v26  ;;  %6313 = vmatpush3.bf16.msra.mxu0 %v6512_v51  ;;  %v4002_v51 = vld [vmem:[#allocation6 + $0x458] sm:$0xff] }
 0x30b   :  { %6314 = vmatprep.subr.bf16.mxu0 %v6513_v29 }
 0x30e   :  { %6315 = vmatpush3.bf16.msra.mxu0 %v6513_v29  ;;  %v3871_v29 = vld [vmem:[#allocation6 + $0x40] sm:$0xff] }
 0x30f   :  { %6316 = vmatprep.subr.bf16.mxu0 %v6514_v1 }
 0x310   :  { %4962 = vmatmul.mubr.bf16.gmra.mrb[60].mxu0 %v3894_v3 }
 0x311   :  { %4865 = vmatmul.mubr.bf16.gmra.mrb[60].mxu1 %v3964_v2  ;;  %4969 = vmatprep.mubr.bf16.mxu0 %v3904_v5 }
 0x312   :  { %4872 = vmatprep.mubr.bf16.mxu1 %v3974_v4  ;;  %6317 = vmatpush3.bf16.msra.mxu0 %v6514_v1 }
 0x313   :  { %6318 = vmatprep.subr.bf16.mxu0 %v6515_v6 }
 0x316   :  { %6319 = vmatpush3.bf16.msra.mxu0 %v6515_v6 }
 0x318   :  { %4970 = vmatmul.mubr.bf16.gmra.mrb[64].mxu0 %v3903_v8 }
 0x319   :  { %4873 = vmatmul.mubr.bf16.gmra.mrb[64].mxu1 %v3973_v7  ;;  %4977 = vmatprep.mubr.bf16.mxu0 %v3913_v60 }
 0x31a   :  { %4880 = vmatprep.mubr.bf16.mxu1 %v3983_v9 }
 0x320   :  { %4978 = vmatmul.mubr.bf16.gmra.mrb[68].mxu0 %v3912_v62  ;;  %v3880_v62 = vld [vmem:[#allocation6 + $0x88] sm:$0xff] }
 0x321   :  { %4881 = vmatmul.mubr.bf16.gmra.mrb[68].mxu1 %v3982_v41  ;;  %4985 = vmatprep.mubr.bf16.mxu0 %v3922_v11  ;;  %v3941_v41 = vld [vmem:[#allocation6 + $0x270] sm:$0xff] }
 0x322   :  { %4888 = vmatprep.mubr.bf16.mxu1 %v3992_v24 }
 0x328   :  { %4986 = vmatmul.mubr.bf16.gmra.mrb[72].mxu0 %v3921_v46  ;;  %v3889_v46 = vld [vmem:[#allocation6 + $0xd0] sm:$0xff] }
 0x329   :  { %4889 = vmatmul.mubr.bf16.gmra.mrb[72].mxu1 %v3991_v56  ;;  %4993 = vmatprep.mubr.bf16.mxu0 %v3931_v35  ;;  %v3951_v56 = vld [vmem:[#allocation6 + $0x2c0] sm:$0xff] }
 0x32a   :  { %4896 = vmatprep.mubr.bf16.mxu1 %v4001_v22 }
 0x330   :  { %4994 = vmatmul.mubr.bf16.gmra.mrb[76].mxu0 %v3930_v18 }
 0x331   :  { %4897 = vmatmul.mubr.bf16.gmra.mrb[76].mxu1 %v4000_v23  ;;  %5001 = vmatprep.mubr.bf16.mxu0 %v3940_v17 }
 0x332   :  { %5098 = vmatprep.mubr.bf16.mxu1 %v3870_v42 }
 0x338   :  { %5002 = vmatmul.mubr.bf16.gmra.mrb[80].mxu0 %v3939_v19 }
 0x339   :  { %5099 = vmatmul.mubr.bf16.vlgmr.msra.gmra.mrb[80].mxu1 %v3869_v49  ;;  %5009 = vmatprep.mubr.bf16.mxu0 %v3949_v50 }
 0x33a   :  { %5106 = vmatprep.mubr.bf16.mxu1 %v3879_v21 }
 0x340   :  { %5010 = vmatmul.mubr.bf16.gmra.mrb[84].mxu0 %v3948_v63  ;;  %v3950_v63 = vld [vmem:[#allocation6 + $0x2b8] sm:$0xff] }
 0x341   :  { %5107 = vmatmul.mubr.bf16.gmra.mrb[84].mxu1 %v3878_v33  ;;  %5017 = vmatprep.mubr.bf16.mxu0 %v3958_v61  ;;  %v3898_v33 = vld [vmem:[#allocation6 + $0x118] sm:$0xff] }
 0x342   :  { %5114 = vmatprep.mubr.bf16.mxu1 %v3888_v52 }
 0x348   :  { %5018 = vmatmul.mubr.bf16.gmra.mrb[88].mxu0 %v3957_v40  ;;  %v3960_v40 = vld [vmem:[#allocation6 + $0x308] sm:$0xff] }
 0x349   :  { %5115 = vmatmul.mubr.bf16.gmra.mrb[88].mxu1 %v3887_v12  ;;  %5025 = vmatprep.mubr.bf16.mxu0 %v3967_v0  ;;  %v3907_v12 = vld [vmem:[#allocation6 + $0x160] sm:$0xff] }
 0x34a   :  { %5122 = vmatprep.mubr.bf16.mxu1 %v3897_v16 }
 0x350   :  { %5026 = vmatmul.mubr.bf16.gmra.mrb[92].mxu0 %v3966_v31 }
 0x351   :  { %5123 = vmatmul.mubr.bf16.gmra.mrb[92].mxu1 %v3896_v14  ;;  %5033 = vmatprep.mubr.bf16.mxu0 %v3976_v25 }
 0x352   :  { %5130 = vmatprep.mubr.bf16.mxu1 %v3906_v28 }
 0x358   :  { %5034 = vmatmul.mubr.bf16.gmra.mrb[96].mxu0 %v3975_v58 }
 0x359   :  { %5131 = vmatmul.mubr.bf16.gmra.mrb[96].mxu1 %v3905_v55  ;;  %5041 = vmatprep.mubr.bf16.mxu0 %v3985_v47 }
 0x35a   :  { %5138 = vmatprep.mubr.bf16.mxu1 %v3915_v37 }
 0x360   :  { %5042 = vmatmul.mubr.bf16.gmra.mrb[100].mxu0 %v3984_v13  ;;  %v3959_v13 = vld [vmem:[#allocation6 + $0x300] sm:$0xff] }
 0x361   :  { %5139 = vmatmul.mubr.bf16.gmra.mrb[100].mxu1 %v3914_v59  ;;  %5049 = vmatprep.mubr.bf16.mxu0 %v3994_v15  ;;  %v3916_v59 = vld [vmem:[#allocation6 + $0x1a8] sm:$0xff] }
 0x362   :  { %5146 = vmatprep.mubr.bf16.mxu1 %v3924_v10 }
 0x368   :  { %5050 = vmatmul.mubr.bf16.gmra.mrb[104].mxu0 %v3993_v32  ;;  %v3969_v32 = vld [vmem:[#allocation6 + $0x350] sm:$0xff] }
 0x369   :  { %5147 = vmatmul.mubr.bf16.gmra.mrb[104].mxu1 %v3923_v27  ;;  %5057 = vmatprep.mubr.bf16.mxu0 %v4003_v57  ;;  %v3925_v27 = vld [vmem:[#allocation6 + $0x1f0] sm:$0xff] }
 0x36a   :  { %5154 = vmatprep.mubr.bf16.mxu1 %v3933_v38 }
 0x36b   :  { %v5848_v30 = vpop.f32.mrb[0].mxu0 }
 0x36c   :  { %v5920_v20 = vpop.f32.mrb[0].mxu1  ;;  %v5849_v45 = vpop.f32.mrb[1].mxu0 }
 0x36d   :  { %v5921_v36 = vpop.f32.mrb[1].mxu1  ;;  %v9314_v48 = vadd.f32 %v5849_v45, %v5848_v30  ;;  %v5851_v34 = vpop.f32.mrb[2].mxu0 }
 0x36e   :  { %v9312_v53 = vadd.f32 %v5921_v36, %v5920_v20  ;;  %v5923_v43 = vpop.f32.mrb[2].mxu1  ;;  %v5852_v26 = vpop.f32.mrb[3].mxu0 }
 0x36f   :  { %v5924_v54 = vpop.f32.mrb[3].mxu1  ;;  %v9318_v2 = vadd.f32 %v5852_v26, %v5851_v34  ;;  %v3934_v26 = vld [vmem:[#allocation6 + $0x238] sm:$0xff] }
 0x370   :  { %v9316_v1 = vadd.f32 %v5924_v54, %v5923_v43  ;;  %5058 = vmatmul.mubr.bf16.gmra.mrb[108].mxu0 %v4002_v51  ;;  %v3968_v54 = vld [vmem:[#allocation6 + $0x348] sm:$0xff] }
 0x371   :  { %5155 = vmatmul.mubr.bf16.gmra.mrb[108].mxu1 %v3932_v39  ;;  %6320 = vmatprep.mubr.bf16.mxu0 %v3871_v29 }
 0x372   :  { %5162 = vmatprep.mubr.bf16.mxu1 %v3942_v44 }
 0x373   :  { %v5854_v4 = vpop.f32.mrb[4].mxu0 }
 0x374   :  { %v5926_v3 = vpop.f32.mrb[4].mxu1  ;;  %v5855_v6 = vpop.f32.mrb[5].mxu0 }
 0x375   :  { %v5927_v5 = vpop.f32.mrb[5].mxu1  ;;  %v9322_v8 = vadd.f32 %v5855_v6, %v5854_v4  ;;  %v5857_v60 = vpop.f32.mrb[6].mxu0  ;;  %v3943_v4 = vld [vmem:[#allocation6 + $0x280] sm:$0xff] }
 0x376   :  { %v9320_v7 = vadd.f32 %v5927_v5, %v5926_v3  ;;  %v5929_v9 = vpop.f32.mrb[6].mxu1  ;;  %v5858_v11 = vpop.f32.mrb[7].mxu0  ;;  %v3978_v3 = vld [vmem:[#allocation6 + $0x398] sm:$0xff] }
 0x377   :  { %v5930_v24 = vpop.f32.mrb[7].mxu1  ;;  %v9326_v35 = vadd.f32 %v5858_v11, %v5857_v60 }
 0x378   :  { %v9324_v22 = vadd.f32 %v5930_v24, %v5929_v9  ;;  %6321 = vmatmul.mubr.bf16.vlgmr.msra.gmra.mrb[112].mxu0 %v3880_v62 }
 0x379   :  { %5163 = vmatmul.mubr.bf16.gmra.mrb[112].mxu1 %v3941_v41  ;;  %6324 = vmatprep.mubr.bf16.mxu0 %v3889_v46 }
 0x37a   :  { %5170 = vmatprep.mubr.bf16.mxu1 %v3951_v56 }
 0x37b   :  { %v5860_v18 = vpop.f32.mrb[8].mxu0 }
 0x37c   :  { %v5932_v23 = vpop.f32.mrb[8].mxu1  ;;  %v5861_v42 = vpop.f32.mrb[9].mxu0 }
 0x37d   :  { %v5933_v17 = vpop.f32.mrb[9].mxu1  ;;  %v9330_v49 = vadd.f32 %v5861_v42, %v5860_v18  ;;  %v5863_v21 = vpop.f32.mrb[10].mxu0  ;;  %v3977_v18 = vld [vmem:[#allocation6 + $0x390] sm:$0xff] }
 0x37e   :  { %v9328_v19 = vadd.f32 %v5933_v17, %v5932_v23  ;;  %v5935_v50 = vpop.f32.mrb[10].mxu1  ;;  %v5864_v52 = vpop.f32.mrb[11].mxu0  ;;  %v3952_v17 = vld [vmem:[#allocation6 + $0x2c8] sm:$0xff] }
 0x37f   :  { %v5936_v61 = vpop.f32.mrb[11].mxu1  ;;  %v9334_v16 = vadd.f32 %v5864_v52, %v5863_v21  ;;  %v3987_v21 = vld [vmem:[#allocation6 + $0x3e0] sm:$0xff] }
 0x380   :  { %v9332_v0 = vadd.f32 %v5936_v61, %v5935_v50  ;;  %6325 = vmatmul.mubr.bf16.gmra.mrb[116].mxu0 %v3898_v33 }
 0x381   :  { %5171 = vmatmul.mubr.bf16.gmra.mrb[116].mxu1 %v3950_v63  ;;  %6328 = vmatprep.mubr.bf16.mxu0 %v3907_v12  ;;  %v3961_v63 = vld [vmem:[#allocation6 + $0x310] sm:$0xff] }
 0x382   :  { %5178 = vmatprep.mubr.bf16.mxu1 %v3960_v40 }
 0x383   :  { %v5866_v14 = vpop.f32.mrb[12].mxu0 }
 0x384   :  { %v5938_v31 = vpop.f32.mrb[12].mxu1  ;;  %v5867_v28 = vpop.f32.mrb[13].mxu0 }
 0x385   :  { %v5939_v25 = vpop.f32.mrb[13].mxu1  ;;  %v9338_v55 = vadd.f32 %v5867_v28, %v5866_v14  ;;  %v5869_v37 = vpop.f32.mrb[14].mxu0 }
 0x386   :  { %v9336_v58 = vadd.f32 %v5939_v25, %v5938_v31  ;;  %v5941_v47 = vpop.f32.mrb[14].mxu1  ;;  %v5870_v10 = vpop.f32.mrb[15].mxu0 }
 0x387   :  { %v5942_v15 = vpop.f32.mrb[15].mxu1  ;;  %v9342_v38 = vadd.f32 %v5870_v10, %v5869_v37  ;;  %v3986_v37 = vld [vmem:[#allocation6 + $0x3d8] sm:$0xff]  ;;  %v3996_v10 = vld [vmem:[#allocation6 + $0x428] sm:$0xff] }
 0x388   :  { %v9340_v57 = vadd.f32 %v5942_v15, %v5941_v47  ;;  %6329 = vmatmul.mubr.bf16.gmra.mrb[120].mxu0 %v3916_v59 }
 0x389   :  { %5179 = vmatmul.mubr.bf16.gmra.mrb[120].mxu1 %v3959_v13  ;;  %6332 = vmatprep.mubr.bf16.mxu0 %v3925_v27  ;;  %v3970_v13 = vld [vmem:[#allocation6 + $0x358] sm:$0xff] }
 0x38a   :  { %5186 = vmatprep.mubr.bf16.mxu1 %v3969_v32  ;;  %v3979_v32 = vld [vmem:[#allocation6 + $0x3a0] sm:$0xff] }
 0x38b   :  { %v5872_v30 = vpop.f32.mrb[16].mxu0 }
 0x38c   :  { %v5960_v20 = vpop.f32.mrb[16].mxu1  ;;  %v5873_v45 = vpop.f32.mrb[17].mxu0 }
 0x38d   :  { %v5961_v36 = vpop.f32.mrb[17].mxu1  ;;  %v9344_v34 = vadd.f32 %v5873_v45, %v5872_v30  ;;  %v5875_v39 = vpop.f32.mrb[18].mxu0 }
 0x38e   :  { %v5962_v43 = vadd.f32 %v5961_v36, %v5960_v20  ;;  %v5963_v51 = vpop.f32.mrb[18].mxu1  ;;  %v5876_v29 = vpop.f32.mrb[19].mxu0 }
 0x38f   :  { %v5964_v44 = vpop.f32.mrb[19].mxu1  ;;  %v9349_v9 = vadd.f32 %v5876_v29, %v5875_v39  ;;  %v3988_v29 = vld [vmem:[#allocation6 + $0x3e8] sm:$0xff] }
 0x390   :  { %v9347_v5 = vadd.f32 %v5962_v43, %v9314_v48  ;;  %v5965_v6 = vadd.f32 %v5964_v44, %v5963_v51  ;;  %6333 = vmatmul.mubr.bf16.gmra.mrb[124].mxu0 %v3934_v26  ;;  %v3995_v44 = vld [vmem:[#allocation6 + $0x420] sm:$0xff] }
 0x391   :  { %5187 = vmatmul.mubr.bf16.gmra.mrb[124].mxu1 %v3968_v54  ;;  %6336 = vmatprep.mubr.bf16.mxu0 %v3943_v4 }
 0x392   :  { %v9352_v60 = vadd.f32 %v5965_v6, %v9318_v2  ;;  %5194 = vmatprep.mubr.bf16.mxu1 %v3978_v3  ;;  %v4005_v6 = vld [vmem:[#allocation6 + $0x470] sm:$0xff] }
 0x393   :  { %v5878_v62 = vpop.f32.mrb[20].mxu0 }
 0x394   :  { %v5966_v41 = vpop.f32.mrb[20].mxu1  ;;  %v5879_v11 = vpop.f32.mrb[21].mxu0 }
 0x395   :  { %v5967_v24 = vpop.f32.mrb[21].mxu1  ;;  %v9354_v46 = vadd.f32 %v5879_v11, %v5878_v62  ;;  %v5881_v48 = vpop.f32.mrb[22].mxu0 }
 0x396   :  { %v5968_v56 = vadd.f32 %v5967_v24, %v5966_v41  ;;  %v5969_v23 = vpop.f32.mrb[22].mxu1  ;;  %v5882_v50 = vpop.f32.mrb[23].mxu0  ;;  %v3997_v41 = vld [vmem:[#allocation6 + $0x430] sm:$0xff] }
 0x397   :  { %v5970_v42 = vpop.f32.mrb[23].mxu1  ;;  %v9359_v61 = vadd.f32 %v5882_v50, %v5881_v48 }
 0x398   :  { %v9357_v2 = vadd.f32 %v5968_v56, %v9322_v8  ;;  %v5971_v33 = vadd.f32 %v5970_v42, %v5969_v23  ;;  %6337 = vmatmul.mubr.bf16.gmra.mrb[128].mxu0 %v3952_v17 }
 0x399   :  { %5195 = vmatmul.mubr.bf16.gmra.mrb[128].mxu1 %v3977_v18  ;;  %6340 = vmatprep.mubr.bf16.mxu0 %v3961_v63  ;;  %v4006_v63 = vld [vmem:[#allocation6 + $0x478] sm:$0xff] }
 0x39a   :  { %v9362_v52 = vadd.f32 %v5971_v33, %v9326_v35  ;;  %5202 = vmatprep.mubr.bf16.mxu1 %v3987_v21  ;;  %v4004_v21 = vld [vmem:[#allocation6 + $0x468] sm:$0xff] }
 0x39b   :  { %v5884_v12 = vpop.f32.mrb[24].mxu0 }
 0x39c   :  { %v5972_v40 = vpop.f32.mrb[24].mxu1  ;;  %v5885_v14 = vpop.f32.mrb[25].mxu0 }
 0x39d   :  { %v5973_v31 = vpop.f32.mrb[25].mxu1  ;;  %v9364_v28 = vadd.f32 %v5885_v14, %v5884_v12  ;;  %v5887_v8 = vpop.f32.mrb[26].mxu0 }
 0x39e   :  { %v5974_v25 = vadd.f32 %v5973_v31, %v5972_v40  ;;  %v5975_v47 = vpop.f32.mrb[26].mxu1  ;;  %v5888_v15 = vpop.f32.mrb[27].mxu0 }
 0x39f   :  { %v5976_v59 = vpop.f32.mrb[27].mxu1  ;;  %v9369_v20 = vadd.f32 %v5888_v15, %v5887_v8 }
 0x3a0   :  { %v9367_v35 = vadd.f32 %v5974_v25, %v9330_v49  ;;  %v5977_v27 = vadd.f32 %v5976_v59, %v5975_v47  ;;  %6341 = vmatmul.mubr.bf16.gmra.mrb[132].mxu0 %v3970_v13 }
 0x3a1   :  { %5203 = vmatmul.mubr.bf16.gmra.mrb[132].mxu1 %v3986_v37  ;;  %6344 = vmatprep.mubr.bf16.mxu0 %v3979_v32 }
 0x3a2   :  { %v9372_v30 = vadd.f32 %v5977_v27, %v9334_v16  ;;  %5210 = vmatprep.mubr.bf16.mxu1 %v3996_v10 }
 0x3a3   :  { %v5890_v45 = vpop.f32.mrb[28].mxu0 }
 0x3a4   :  { %v5978_v36 = vpop.f32.mrb[28].mxu1  ;;  %v5891_v51 = vpop.f32.mrb[29].mxu0 }
 0x3a5   :  { %v5979_v43 = vpop.f32.mrb[29].mxu1  ;;  %v9374_v54 = vadd.f32 %v5891_v51, %v5890_v45  ;;  %v5893_v49 = vpop.f32.mrb[30].mxu0 }
 0x3a6   :  { %v5980_v39 = vadd.f32 %v5979_v43, %v5978_v36  ;;  %v5981_v26 = vpop.f32.mrb[30].mxu1  ;;  %v5894_v4 = vpop.f32.mrb[31].mxu0 }
 0x3a7   :  { %v5982_v3 = vpop.f32.mrb[31].mxu1  ;;  %v9379_v24 = vadd.f32 %v5894_v4, %v5893_v49 }
 0x3a8   :  { %v9377_v16 = vadd.f32 %v5980_v39, %v9338_v55  ;;  %v5983_v62 = vadd.f32 %v5982_v3, %v5981_v26  ;;  %6345 = vmatmul.mubr.bf16.gmra.mrb[136].mxu0 %v3988_v29 }
 0x3a9   :  { %5211 = vmatmul.mubr.bf16.gmra.mrb[136].mxu1 %v3995_v44  ;;  %6348 = vmatprep.mubr.bf16.mxu0 %v3997_v41 }
 0x3aa   :  { %v9382_v11 = vadd.f32 %v5983_v62, %v9342_v38  ;;  %5218 = vmatprep.mubr.bf16.mxu1 %v4005_v6 }
 0x3ab   :  { %v5896_v23 = vpop.f32.mrb[32].mxu0 }
 0x3ac   :  { %v5984_v56 = vpop.f32.mrb[32].mxu1  ;;  %v5897_v18 = vpop.f32.mrb[33].mxu0 }
 0x3ad   :  { %v5985_v48 = vpop.f32.mrb[33].mxu1  ;;  %v9384_v42 = vadd.f32 %v5897_v18, %v5896_v23  ;;  %v5899_v55 = vpop.f32.mrb[34].mxu0 }
 0x3ae   :  { %v5986_v17 = vadd.f32 %v5985_v48, %v5984_v56  ;;  %v5987_v50 = vpop.f32.mrb[34].mxu1  ;;  %v5900_v40 = vpop.f32.mrb[35].mxu0 }
 0x3af   :  { %v5988_v33 = vpop.f32.mrb[35].mxu1  ;;  %v5901_v31 = vadd.f32 %v5900_v40, %v5899_v55 }
 0x3b0   :  { %v9387_v12 = vadd.f32 %v5986_v17, %v9344_v34  ;;  %v5989_v38 = vadd.f32 %v5988_v33, %v5987_v50  ;;  %6349 = vmatmul.mubr.bf16.gmra.mrb[140].mxu0 %v4006_v63 }
 0x3b1   :  { %5219 = vmatmul.mubr.bf16.gmra.mrb[140].mxu1 %v4004_v21 }
 0x3b2   :  { %v9390_v14 = vadd.f32 %v5989_v38, %v9349_v9 }
 0x3b3   :  { %v5902_v47 = vpop.f32.mrb[36].mxu0 }
 0x3b4   :  { %v5990_v25 = vpop.f32.mrb[36].mxu1  ;;  %v5903_v37 = vpop.f32.mrb[37].mxu0 }
 0x3b5   :  { %v5991_v8 = vpop.f32.mrb[37].mxu1  ;;  %v9392_v59 = vadd.f32 %v5903_v37, %v5902_v47  ;;  %v5905_v10 = vpop.f32.mrb[38].mxu0 }
 0x3b6   :  { %v5992_v13 = vadd.f32 %v5991_v8, %v5990_v25  ;;  %v5993_v15 = vpop.f32.mrb[38].mxu1  ;;  %v5906_v27 = vpop.f32.mrb[39].mxu0 }
 0x3b7   :  { %v5994_v32 = vpop.f32.mrb[39].mxu1  ;;  %v5907_v45 = vadd.f32 %v5906_v27, %v5905_v10 }
 0x3b8   :  { %v9395_v34 = vadd.f32 %v5992_v13, %v9354_v46  ;;  %v5995_v36 = vadd.f32 %v5994_v32, %v5993_v15 }
 0x3ba   :  { %v9398_v43 = vadd.f32 %v5995_v36, %v9359_v61 }
 0x3bb   :  { %v5908_v51 = vpop.f32.mrb[40].mxu0 }
 0x3bc   :  { %v5996_v9 = vpop.f32.mrb[40].mxu1  ;;  %v5909_v26 = vpop.f32.mrb[41].mxu0 }
 0x3bd   :  { %v5997_v39 = vpop.f32.mrb[41].mxu1  ;;  %v9400_v44 = vadd.f32 %v5909_v26, %v5908_v51  ;;  %v5911_v3 = vpop.f32.mrb[42].mxu0 }
 0x3be   :  { %v5998_v49 = vadd.f32 %v5997_v39, %v5996_v9  ;;  %v5999_v29 = vpop.f32.mrb[42].mxu1  ;;  %v5912_v6 = vpop.f32.mrb[43].mxu0 }
 0x3bf   :  { %v6000_v4 = vpop.f32.mrb[43].mxu1  ;;  %v5913_v62 = vadd.f32 %v5912_v6, %v5911_v3 }
 0x3c0   :  { %v9403_v41 = vadd.f32 %v5998_v49, %v9364_v28  ;;  %v6001_v46 = vadd.f32 %v6000_v4, %v5999_v29 }
 0x3c2   :  { %v9406_v56 = vadd.f32 %v6001_v46, %v9369_v20 }
 0x3c3   :  { %v5914_v23 = vpop.f32.mrb[44].mxu0 }
 0x3c4   :  { %v6002_v61 = vpop.f32.mrb[44].mxu1  ;;  %v5915_v18 = vpop.f32.mrb[45].mxu0 }
 0x3c5   :  { %v6003_v48 = vpop.f32.mrb[45].mxu1  ;;  %v9408_v50 = vadd.f32 %v5915_v18, %v5914_v23  ;;  %v5917_v21 = vpop.f32.mrb[46].mxu0 }
 0x3c6   :  { %v6004_v17 = vadd.f32 %v6003_v48, %v6002_v61  ;;  %v6005_v55 = vpop.f32.mrb[46].mxu1  ;;  %v5918_v33 = vpop.f32.mrb[47].mxu0 }
 0x3c7   :  { %v6006_v63 = vpop.f32.mrb[47].mxu1  ;;  %v9413_v38 = vadd.f32 %v5918_v33, %v5917_v21 }
 0x3c8   :  { %v9411_v40 = vadd.f32 %v6004_v17, %v9374_v54  ;;  %v6007_v28 = vadd.f32 %v6006_v63, %v6005_v55 }
 0x3ca   :  { %v9416_v20 = vadd.f32 %v6007_v28, %v9379_v24 }
 0x3cb   :  { %v6072_v47 = vpop.f32.mrb[48].mxu0 }
 0x3cc   :  { %v6008_v25 = vpop.f32.mrb[48].mxu1  ;;  %v6073_v37 = vpop.f32.mrb[49].mxu0 }
 0x3cd   :  { %v6009_v8 = vpop.f32.mrb[49].mxu1  ;;  %v6074_v15 = vadd.f32 %v6073_v37, %v6072_v47  ;;  %v6075_v32 = vpop.f32.mrb[50].mxu0 }
 0x3ce   :  { %v6010_v13 = vadd.f32 %v6009_v8, %v6008_v25  ;;  %v6011_v10 = vpop.f32.mrb[50].mxu1  ;;  %v6076_v36 = vpop.f32.mrb[51].mxu0 }
 0x3cf   :  { %v6012_v27 = vpop.f32.mrb[51].mxu1  ;;  %v9422_v54 = vadd.f32 %v6074_v15, %v9347_v5  ;;  %v6077_v39 = vadd.f32 %v6076_v36, %v6075_v32 }
 0x3d0   :  { %v9419_v9 = vadd.f32 %v6010_v13, %v9384_v42  ;;  %v6013_v51 = vadd.f32 %v6012_v27, %v6011_v10 }
 0x3d1   :  { %v9427_v26 = vadd.f32 %v6077_v39, %v9352_v60 }
 0x3d2   :  { %v9424_v24 = vadd.f32 %v6013_v51, %v5901_v31 }
 0x3d3   :  { %v6078_v29 = vpop.f32.mrb[52].mxu0 }
 0x3d4   :  { %v6014_v49 = vpop.f32.mrb[52].mxu1  ;;  %v6079_v4 = vpop.f32.mrb[53].mxu0 }
 0x3d5   :  { %v6015_v3 = vpop.f32.mrb[53].mxu1  ;;  %v6080_v46 = vadd.f32 %v6079_v4, %v6078_v29  ;;  %v6081_v23 = vpop.f32.mrb[54].mxu0 }
 0x3d6   :  { %v6016_v6 = vadd.f32 %v6015_v3, %v6014_v49  ;;  %v6017_v61 = vpop.f32.mrb[54].mxu1  ;;  %v6082_v48 = vpop.f32.mrb[55].mxu0 }
 0x3d7   :  { %v6018_v42 = vpop.f32.mrb[55].mxu1  ;;  %v9433_v18 = vadd.f32 %v6080_v46, %v9357_v2  ;;  %v6083_v17 = vadd.f32 %v6082_v48, %v6081_v23 }
 0x3d8   :  { %v9430_v5 = vadd.f32 %v6016_v6, %v9392_v59  ;;  %v6019_v31 = vadd.f32 %v6018_v42, %v6017_v61 }
 0x3d9   :  { %v9438_v55 = vadd.f32 %v6083_v17, %v9362_v52 }
 0x3da   :  { %v9435_v60 = vadd.f32 %v6019_v31, %v5907_v45 }
 0x3db   :  { %v6084_v63 = vpop.f32.mrb[56].mxu0 }
 0x3dc   :  { %v6020_v21 = vpop.f32.mrb[56].mxu1  ;;  %v6085_v28 = vpop.f32.mrb[57].mxu0 }
 0x3dd   :  { %v6021_v33 = vpop.f32.mrb[57].mxu1  ;;  %v6086_v47 = vadd.f32 %v6085_v28, %v6084_v63  ;;  %v6087_v37 = vpop.f32.mrb[58].mxu0 }
 0x3de   :  { %v6022_v25 = vadd.f32 %v6021_v33, %v6020_v21  ;;  %v6023_v8 = vpop.f32.mrb[58].mxu1  ;;  %v6088_v13 = vpop.f32.mrb[59].mxu0 }
 0x3df   :  { %v6024_v59 = vpop.f32.mrb[59].mxu1  ;;  %v9444_v15 = vadd.f32 %v6086_v47, %v9367_v35  ;;  %v6089_v10 = vadd.f32 %v6088_v13, %v6087_v37 }
 0x3e0   :  { %v9441_v2 = vadd.f32 %v6022_v25, %v9400_v44  ;;  %v6025_v45 = vadd.f32 %v6024_v59, %v6023_v8 }
 0x3e1   :  { %v9449_v32 = vadd.f32 %v6089_v10, %v9372_v30 }
 0x3e2   :  { %v9446_v52 = vadd.f32 %v6025_v45, %v5913_v62 }
 0x3e3   :  { %v6090_v36 = vpop.f32.mrb[60].mxu0 }
 0x3e4   :  { %v6026_v27 = vpop.f32.mrb[60].mxu1  ;;  %v6091_v39 = vpop.f32.mrb[61].mxu0 }
 0x3e5   :  { %v6027_v51 = vpop.f32.mrb[61].mxu1  ;;  %v6092_v29 = vadd.f32 %v6091_v39, %v6090_v36  ;;  %v6093_v4 = vpop.f32.mrb[62].mxu0 }
 0x3e6   :  { %v6028_v49 = vadd.f32 %v6027_v51, %v6026_v27  ;;  %v6029_v3 = vpop.f32.mrb[62].mxu1  ;;  %v6094_v6 = vpop.f32.mrb[63].mxu0 }
 0x3e7   :  { %v6030_v44 = vpop.f32.mrb[63].mxu1  ;;  %v9455_v46 = vadd.f32 %v6092_v29, %v9377_v16  ;;  %v6095_v61 = vadd.f32 %v6094_v6, %v6093_v4 }
 0x3e8   :  { %v9452_v35 = vadd.f32 %v6028_v49, %v9408_v50  ;;  %v6031_v62 = vadd.f32 %v6030_v44, %v6029_v3 }
 0x3e9   :  { %v9461_v23 = vadd.f32 %v6095_v61, %v9382_v11 }
 0x3ea   :  { %v9458_v30 = vadd.f32 %v6031_v62, %v9413_v38 }
 0x3eb   :  { %v6096_v48 = vpop.f32.mrb[64].mxu0 }
 0x3ec   :  { %v6032_v42 = vpop.f32.mrb[64].mxu1  ;;  %v6097_v17 = vpop.f32.mrb[65].mxu0 }
 0x3ed   :  { %v6033_v31 = vpop.f32.mrb[65].mxu1  ;;  %v6098_v63 = vadd.f32 %v6097_v17, %v6096_v48  ;;  %v6099_v50 = vpop.f32.mrb[66].mxu0 }
 0x3ee   :  { %v6034_v21 = vadd.f32 %v6033_v31, %v6032_v42  ;;  %v6035_v33 = vpop.f32.mrb[66].mxu1  ;;  %v6100_v25 = vpop.f32.mrb[67].mxu0 }
 0x3ef   :  { %v6036_v28 = vpop.f32.mrb[67].mxu1  ;;  %v9467_v47 = vadd.f32 %v6098_v63, %v9387_v12  ;;  %v6101_v8 = vadd.f32 %v6100_v25, %v6099_v50 }
 0x3f0   :  { %v9464_v16 = vadd.f32 %v6034_v21, %v9312_v53  ;;  %v6037_v38 = vadd.f32 %v6036_v28, %v6035_v33 }
 0x3f1   :  { %v9473_v37 = vadd.f32 %v6101_v8, %v9390_v14 }
 0x3f2   :  { %v9470_v11 = vadd.f32 %v6037_v38, %v9316_v1 }
 0x3f3   :  { %v6102_v13 = vpop.f32.mrb[68].mxu0 }
 0x3f4   :  { %v6038_v59 = vpop.f32.mrb[68].mxu1  ;;  %v6103_v10 = vpop.f32.mrb[69].mxu0 }
 0x3f5   :  { %v6039_v45 = vpop.f32.mrb[69].mxu1  ;;  %v6104_v36 = vadd.f32 %v6103_v10, %v6102_v13  ;;  %v6105_v53 = vpop.f32.mrb[70].mxu0 }
 0x3f6   :  { %v6040_v27 = vadd.f32 %v6039_v45, %v6038_v59  ;;  %v6041_v51 = vpop.f32.mrb[70].mxu1  ;;  %v6106_v49 = vpop.f32.mrb[71].mxu0 }
 0x3f7   :  { %v6042_v39 = vpop.f32.mrb[71].mxu1  ;;  %v9479_v29 = vadd.f32 %v6104_v36, %v9395_v34  ;;  %v6107_v3 = vadd.f32 %v6106_v49, %v6105_v53 }
 0x3f8   :  { %v9476_v12 = vadd.f32 %v6040_v27, %v9320_v7  ;;  %v6043_v1 = vadd.f32 %v6042_v39, %v6041_v51 }
 0x3f9   :  { %v9485_v4 = vadd.f32 %v6107_v3, %v9398_v43 }
 0x3fa   :  { %v9482_v14 = vadd.f32 %v6043_v1, %v9324_v22 }
 0x3fb   :  { %v6108_v6 = vpop.f32.mrb[72].mxu0 }
 0x3fc   :  { %v6044_v44 = vpop.f32.mrb[72].mxu1  ;;  %v6109_v61 = vpop.f32.mrb[73].mxu0 }
 0x3fd   :  { %v6045_v62 = vpop.f32.mrb[73].mxu1  ;;  %v6110_v48 = vadd.f32 %v6109_v61, %v6108_v6  ;;  %v6111_v7 = vpop.f32.mrb[74].mxu0 }
 0x3fe   :  { %v6046_v42 = vadd.f32 %v6045_v62, %v6044_v44  ;;  %v6047_v31 = vpop.f32.mrb[74].mxu1  ;;  %v6112_v21 = vpop.f32.mrb[75].mxu0 }
 0x3ff   :  { %v6048_v17 = vpop.f32.mrb[75].mxu1  ;;  %v9491_v63 = vadd.f32 %v6110_v48, %v9403_v41  ;;  %v6113_v33 = vadd.f32 %v6112_v21, %v6111_v7 }
 0x400   :  { %v9488_v34 = vadd.f32 %v6046_v42, %v9328_v19  ;;  %v6049_v22 = vadd.f32 %v6048_v17, %v6047_v31 }
 0x401   :  { %v9497_v50 = vadd.f32 %v6113_v33, %v9406_v56 }
 0x402   :  { %v9494_v43 = vadd.f32 %v6049_v22, %v9332_v0 }
 0x403   :  { %v6114_v25 = vpop.f32.mrb[76].mxu0 }
 0x404   :  { %v6050_v28 = vpop.f32.mrb[76].mxu1  ;;  %v6115_v8 = vpop.f32.mrb[77].mxu0 }
 0x405   :  { %v6051_v38 = vpop.f32.mrb[77].mxu1  ;;  %v6116_v13 = vadd.f32 %v6115_v8, %v6114_v25  ;;  %v6117_v19 = vpop.f32.mrb[78].mxu0 }
 0x406   :  { %v6052_v59 = vadd.f32 %v6051_v38, %v6050_v28  ;;  %v6053_v45 = vpop.f32.mrb[78].mxu1  ;;  %v6118_v27 = vpop.f32.mrb[79].mxu0 }
 0x407   :  { %v6054_v10 = vpop.f32.mrb[79].mxu1  ;;  %v9503_v36 = vadd.f32 %v6116_v13, %v9411_v40  ;;  %v6119_v51 = vadd.f32 %v6118_v27, %v6117_v19 }
 0x408   :  { %v9500_v41 = vadd.f32 %v6052_v59, %v9336_v58  ;;  %v6055_v0 = vadd.f32 %v6054_v10, %v6053_v45 }
 0x409   :  { %v9509_v53 = vadd.f32 %v6119_v51, %v9416_v20 }
 0x40a   :  { %v9506_v56 = vadd.f32 %v6055_v0, %v9340_v57 }
 0x40b   :  { %v6120_v39 = vpop.f32.mrb[80].mxu0 }
 0x40c   :  { %v6184_v49 = vpop.f32.mrb[80].mxu1  ;;  %v6121_v1 = vpop.f32.mrb[81].mxu0 }
 0x40d   :  { %v6185_v3 = vpop.f32.mrb[81].mxu1  ;;  %v6122_v44 = vadd.f32 %v6121_v1, %v6120_v39  ;;  %v6123_v62 = vpop.f32.mrb[82].mxu0 }
 0x40e   :  { %v6186_v6 = vadd.f32 %v6185_v3, %v6184_v49  ;;  %v6187_v58 = vpop.f32.mrb[82].mxu1  ;;  %v6124_v61 = vpop.f32.mrb[83].mxu0 }
 0x40f   :  { %v6188_v42 = vpop.f32.mrb[83].mxu1  ;;  %v9512_v40 = vadd.f32 %v6122_v44, %v9419_v9  ;;  %v6125_v48 = vadd.f32 %v6124_v61, %v6123_v62 }
 0x410   :  { %v6189_v31 = vadd.f32 %v6188_v42, %v6187_v58  ;;  %v9515_v57 = vadd.f32 %v6186_v6, %v9422_v54 }
 0x411   :  { %v9518_v20 = vadd.f32 %v6125_v48, %v9424_v24 }
 0x412   :  { %v9521_v7 = vadd.f32 %v6189_v31, %v9427_v26 }
 0x413   :  { %v6126_v17 = vpop.f32.mrb[84].mxu0 }
 0x414   :  { %v6190_v21 = vpop.f32.mrb[84].mxu1  ;;  %v6127_v22 = vpop.f32.mrb[85].mxu0 }
 0x415   :  { %v6191_v33 = vpop.f32.mrb[85].mxu1  ;;  %v6128_v28 = vadd.f32 %v6127_v22, %v6126_v17  ;;  %v6129_v38 = vpop.f32.mrb[86].mxu0 }
 0x416   :  { %v6192_v25 = vadd.f32 %v6191_v33, %v6190_v21  ;;  %v6193_v9 = vpop.f32.mrb[86].mxu1  ;;  %v6130_v8 = vpop.f32.mrb[87].mxu0 }
 0x417   :  { %v6194_v59 = vpop.f32.mrb[87].mxu1  ;;  %v9524_v13 = vadd.f32 %v6128_v28, %v9430_v5  ;;  %v6131_v54 = vadd.f32 %v6130_v8, %v6129_v38 }
 0x418   :  { %v6195_v45 = vadd.f32 %v6194_v59, %v6193_v9  ;;  %v9527_v24 = vadd.f32 %v6192_v25, %v9433_v18 }
 0x419   :  { %v9530_v26 = vadd.f32 %v6131_v54, %v9435_v60 }
 0x41a   :  { %v9533_v19 = vadd.f32 %v6195_v45, %v9438_v55 }
 0x41b   :  { %v6132_v10 = vpop.f32.mrb[88].mxu0 }
 0x41c   :  { %v6196_v27 = vpop.f32.mrb[88].mxu1  ;;  %v6133_v0 = vpop.f32.mrb[89].mxu0 }
 0x41d   :  { %v6197_v51 = vpop.f32.mrb[89].mxu1  ;;  %v6134_v39 = vadd.f32 %v6133_v0, %v6132_v10  ;;  %v6135_v1 = vpop.f32.mrb[90].mxu0 }
 0x41e   :  { %v6198_v49 = vadd.f32 %v6197_v51, %v6196_v27  ;;  %v6199_v5 = vpop.f32.mrb[90].mxu1  ;;  %v6136_v3 = vpop.f32.mrb[91].mxu0 }
 0x41f   :  { %v6200_v44 = vpop.f32.mrb[91].mxu1  ;;  %v9536_v6 = vadd.f32 %v6134_v39, %v9441_v2  ;;  %v6137_v18 = vadd.f32 %v6136_v3, %v6135_v1 }
 0x420   :  { %v6201_v62 = vadd.f32 %v6200_v44, %v6199_v5  ;;  %v9539_v60 = vadd.f32 %v6198_v49, %v9444_v15 }
 0x421   :  { %v9542_v55 = vadd.f32 %v6137_v18, %v9446_v52 }
 0x422   :  { %v9545_v58 = vadd.f32 %v6201_v62, %v9449_v32 }
 0x423   :  { %v6138_v61 = vpop.f32.mrb[92].mxu0 }
 0x424   :  { %v6202_v42 = vpop.f32.mrb[92].mxu1  ;;  %v6139_v48 = vpop.f32.mrb[93].mxu0 }
 0x425   :  { %v6203_v31 = vpop.f32.mrb[93].mxu1  ;;  %v6140_v17 = vadd.f32 %v6139_v48, %v6138_v61  ;;  %v6141_v22 = vpop.f32.mrb[94].mxu0 }
 0x426   :  { %v6204_v21 = vadd.f32 %v6203_v31, %v6202_v42  ;;  %v6205_v2 = vpop.f32.mrb[94].mxu1  ;;  %v6142_v33 = vpop.f32.mrb[95].mxu0 }
 0x427   :  { %v6206_v28 = vpop.f32.mrb[95].mxu1  ;;  %v9548_v25 = vadd.f32 %v6140_v17, %v9452_v35  ;;  %v6143_v15 = vadd.f32 %v6142_v33, %v6141_v22 }
 0x428   :  { %v6207_v38 = vadd.f32 %v6206_v28, %v6205_v2  ;;  %v9551_v52 = vadd.f32 %v6204_v21, %v9455_v46 }
 0x429   :  { %v9554_v32 = vadd.f32 %v6143_v15, %v9458_v30 }
 0x42a   :  { %v9557_v9 = vadd.f32 %v6207_v38, %v9461_v23 }
 0x42b   :  { %v6144_v8 = vpop.f32.mrb[96].mxu0 }
 0x42c   :  { %v6208_v59 = vpop.f32.mrb[96].mxu1  ;;  %v6145_v54 = vpop.f32.mrb[97].mxu0 }
 0x42d   :  { %v6209_v45 = vpop.f32.mrb[97].mxu1  ;;  %v6146_v10 = vadd.f32 %v6145_v54, %v6144_v8  ;;  %v6147_v0 = vpop.f32.mrb[98].mxu0 }
 0x42e   :  { %v6210_v27 = vadd.f32 %v6209_v45, %v6208_v59  ;;  %v6211_v35 = vpop.f32.mrb[98].mxu1  ;;  %v6148_v51 = vpop.f32.mrb[99].mxu0 }
 0x42f   :  { %v6212_v39 = vpop.f32.mrb[99].mxu1  ;;  %v9560_v49 = vadd.f32 %v6146_v10, %v9464_v16  ;;  %v6149_v46 = vadd.f32 %v6148_v51, %v6147_v0 }
 0x430   :  { %v6213_v1 = vadd.f32 %v6212_v39, %v6211_v35  ;;  %v9563_v30 = vadd.f32 %v6210_v27, %v9467_v47 }
 0x431   :  { %v9566_v23 = vadd.f32 %v6149_v46, %v9470_v11 }
 0x432   :  { %v9569_v5 = vadd.f32 %v6213_v1, %v9473_v37 }
 0x433   :  { %v6150_v3 = vpop.f32.mrb[100].mxu0 }
 0x434   :  { %v6214_v44 = vpop.f32.mrb[100].mxu1  ;;  %v6151_v18 = vpop.f32.mrb[101].mxu0 }
 0x435   :  { %v6215_v62 = vpop.f32.mrb[101].mxu1  ;;  %v6152_v61 = vadd.f32 %v6151_v18, %v6150_v3  ;;  %v6153_v48 = vpop.f32.mrb[102].mxu0 }
 0x436   :  { %v6216_v42 = vadd.f32 %v6215_v62, %v6214_v44  ;;  %v6217_v16 = vpop.f32.mrb[102].mxu1  ;;  %v6154_v31 = vpop.f32.mrb[103].mxu0 }
 0x437   :  { %v6218_v17 = vpop.f32.mrb[103].mxu1  ;;  %v9572_v21 = vadd.f32 %v6152_v61, %v9476_v12  ;;  %v6155_v47 = vadd.f32 %v6154_v31, %v6153_v48 }
 0x438   :  { %v6219_v22 = vadd.f32 %v6218_v17, %v6217_v16  ;;  %v9575_v11 = vadd.f32 %v6216_v42, %v9479_v29 }
 0x439   :  { %v9578_v37 = vadd.f32 %v6155_v47, %v9482_v14 }
 0x43a   :  { %v9581_v2 = vadd.f32 %v6219_v22, %v9485_v4 }
 0x43b   :  { %v6156_v33 = vpop.f32.mrb[104].mxu0 }
 0x43c   :  { %v6220_v28 = vpop.f32.mrb[104].mxu1  ;;  %v6157_v15 = vpop.f32.mrb[105].mxu0 }
 0x43d   :  { %v6221_v38 = vpop.f32.mrb[105].mxu1  ;;  %v6158_v8 = vadd.f32 %v6157_v15, %v6156_v33  ;;  %v6159_v54 = vpop.f32.mrb[106].mxu0 }
 0x43e   :  { %v6222_v59 = vadd.f32 %v6221_v38, %v6220_v28  ;;  %v6223_v12 = vpop.f32.mrb[106].mxu1  ;;  %v6160_v45 = vpop.f32.mrb[107].mxu0 }
 0x43f   :  { %v6224_v10 = vpop.f32.mrb[107].mxu1  ;;  %v9584_v27 = vadd.f32 %v6158_v8, %v9488_v34  ;;  %v6161_v29 = vadd.f32 %v6160_v45, %v6159_v54 }
 0x440   :  { %v6225_v0 = vadd.f32 %v6224_v10, %v6223_v12  ;;  %v9587_v14 = vadd.f32 %v6222_v59, %v9491_v63 }
 0x441   :  { %v9590_v4 = vadd.f32 %v6161_v29, %v9494_v43 }
 0x442   :  { %v9593_v35 = vadd.f32 %v6225_v0, %v9497_v50 }
 0x443   :  { %v6162_v51 = vpop.f32.mrb[108].mxu0 }
 0x444   :  { %v6226_v39 = vpop.f32.mrb[108].mxu1  ;;  %v6163_v46 = vpop.f32.mrb[109].mxu0 }
 0x445   :  { %v6227_v1 = vpop.f32.mrb[109].mxu1  ;;  %v6164_v3 = vadd.f32 %v6163_v46, %v6162_v51  ;;  %v6165_v18 = vpop.f32.mrb[110].mxu0 }
 0x446   :  { %v6228_v44 = vadd.f32 %v6227_v1, %v6226_v39  ;;  %v6229_v34 = vpop.f32.mrb[110].mxu1  ;;  %v6166_v62 = vpop.f32.mrb[111].mxu0 }
 0x447   :  { %v6230_v61 = vpop.f32.mrb[111].mxu1  ;;  %v9596_v42 = vadd.f32 %v6164_v3, %v9500_v41  ;;  %v6167_v63 = vadd.f32 %v6166_v62, %v6165_v18 }
 0x448   :  { %v6231_v48 = vadd.f32 %v6230_v61, %v6229_v34  ;;  %v9599_v43 = vadd.f32 %v6228_v44, %v9503_v36 }
 0x449   :  { %v9602_v50 = vadd.f32 %v6167_v63, %v9506_v56 }
 0x44a   :  { %v9605_v16 = vadd.f32 %v6231_v48, %v9509_v53 }
 0x44b   :  { %v6322_v17 = vpop.f32.mrb[112].mxu0 }
 0x44c   :  { %v6232_v31 = vpop.f32.mrb[112].mxu1  ;;  %v5270_v47 = vadd.f32 %v6322_v17, %v9527_v24  ;;  %v5261_v33 = vpop.f32.mrb[113].mxu0 }
 0x44d   :  { %v6233_v22 = vpop.f32.mrb[113].mxu1  ;;  %v5262_v28 = vadd.f32 %v5261_v33, %v9515_v57  ;;  %v6323_v38 = vpop.f32.mrb[114].mxu0 }
 0x44e   :  { %v6234_v41 = vadd.f32 %v6233_v22, %v6232_v31  ;;  %v6235_v15 = vpop.f32.mrb[114].mxu1  ;;  %v5390_v36 = vmax.f32 %v5270_v47, 0.0  ;;  %v5273_v8 = vadd.f32 %v6323_v38, %v9533_v19  ;;  %v5264_v59 = vpop.f32.mrb[115].mxu0 }
 0x44f   :  { %v6236_v56 = vpop.f32.mrb[115].mxu1  ;;  %v5388_v54 = vmax.f32 %v5262_v28, 0.0  ;;  %v5265_v12 = vadd.f32 %v5264_v59, %v9521_v7 }
 0x450   :  { %v6237_v53 = vadd.f32 %v6236_v56, %v6235_v15  ;;  %v9612_v45 = vadd.f32 %v6234_v41, %v9512_v40  ;;  %5423 = vst.msk [vmem:[#allocation7 + $0x10] sm:$0xff] %vm5420_vm2, %v5390_v36  ;;  %v5391_v24 = vmax.f32 %v5273_v8, 0.0 }
 0x451   :  { %5421 = vst.msk [vmem:[#allocation7] sm:$0xff] %vm5420_vm2, %v5388_v54  ;;  %v5389_v57 = vmax.f32 %v5265_v12, 0.0  ;;  %v5467_v54 = vld [vmem:[%s9833_s3] sm:$0x7] }
 0x452   :  { %v9617_v10 = vadd.f32 %v6237_v53, %v9518_v20  ;;  %5424 = vst.msk [vmem:[#allocation7 + $0x18] sm:$0xff] %vm5420_vm2, %v5391_v24 }
 0x453   :  { %5422 = vst.msk [vmem:[#allocation7 + $0x8] sm:$0xff] %vm5420_vm2, %v5389_v57  ;;  %v6326_v29 = vpop.f32.mrb[116].mxu0 }
 0x454   :  { %v6238_v19 = vpop.f32.mrb[116].mxu1  ;;  %v5286_v7 = vadd.f32 %v6326_v29, %v9551_v52  ;;  %v5277_v40 = vpop.f32.mrb[117].mxu0 }
 0x455   :  { %v6239_v0 = vpop.f32.mrb[117].mxu1  ;;  %v5278_v39 = vadd.f32 %v5277_v40, %v9539_v60  ;;  %v6327_v1 = vpop.f32.mrb[118].mxu0 }
 0x456   :  { %v6240_v51 = vadd.f32 %v6239_v0, %v6238_v19  ;;  %v6241_v46 = vpop.f32.mrb[118].mxu1  ;;  %v5394_v3 = vmax.f32 %v5286_v7, 0.0  ;;  %v5289_v44 = vadd.f32 %v6327_v1, %v9557_v9  ;;  %v5280_v18 = vpop.f32.mrb[119].mxu0 }
 0x457   :  { %v6242_v20 = vpop.f32.mrb[119].mxu1  ;;  %v5392_v34 = vmax.f32 %v5278_v39, 0.0  ;;  %v5281_v61 = vadd.f32 %v5280_v18, %v9545_v58 }
 0x458   :  { %v6243_v62 = vadd.f32 %v6242_v20, %v6241_v46  ;;  %v9626_v63 = vadd.f32 %v6240_v51, %v9524_v13  ;;  %5427 = vst.msk [vmem:[#allocation7 + $0x30] sm:$0xff] %vm5420_vm2, %v5394_v3  ;;  %v5395_v52 = vmax.f32 %v5289_v44, 0.0 }
 0x459   :  { %5425 = vst.msk [vmem:[#allocation7 + $0x20] sm:$0xff] %vm5420_vm2, %v5392_v34  ;;  %v5393_v60 = vmax.f32 %v5281_v61, 0.0 }
 0x45a   :  { %v9631_v48 = vadd.f32 %v6243_v62, %v9530_v26  ;;  %v5453_v31 = vld [vmem:[#allocation7] ss:$2 sm:$0x1f]  ;;  %v5455_v9 = vld [vmem:[#allocation7 + $0x1] ss:$2 sm:$0x1f] }
 0x45b   :  { %5428 = vst.msk [vmem:[#allocation7 + $0x38] sm:$0xff] %vm5420_vm2, %v5395_v52  ;;  %v5457_v17 = vld [vmem:[#allocation7 + $0xd] ss:$2 sm:$0x1f]  ;;  %v5460_v22 = vmax.f32 %v5453_v31, %v5455_v9  ;;  %5426 = vst.msk [vmem:[#allocation7 + $0x28] sm:$0xff] %vm5420_vm2, %v5393_v60  ;;  %v6330_v33 = vpop.f32.mrb[120].mxu0 }
 0x45c   :  { %v5459_v47 = vld [vmem:[#allocation7 + $0xe] ss:$2 sm:$0x1f]  ;;  %v6244_v58 = vpop.f32.mrb[120].mxu1  ;;  %v5302_v41 = vadd.f32 %v6330_v33, %v9575_v11  ;;  %v5293_v15 = vpop.f32.mrb[121].mxu0 }
 0x45d   :  { %v5461_v13 = vmax.f32 %v5457_v17, %v5459_v47  ;;  %v6245_v28 = vpop.f32.mrb[121].mxu1  ;;  %v5294_v36 = vadd.f32 %v5293_v15, %v9563_v30  ;;  %v6331_v56 = vpop.f32.mrb[122].mxu0 }
 0x45e   :  { %v6246_v38 = vadd.f32 %v6245_v28, %v6244_v58  ;;  %v6247_v8 = vpop.f32.mrb[122].mxu1  ;;  %v5398_v53 = vmax.f32 %v5302_v41, 0.0  ;;  %v5305_v12 = vadd.f32 %v6331_v56, %v9581_v2  ;;  %v5296_v24 = vpop.f32.mrb[123].mxu0 }
 0x45f   :  { %v5462_v26 = vmax.f32 %v5460_v22, %v5461_v13  ;;  %v6248_v11 = vpop.f32.mrb[123].mxu1  ;;  %v5297_v30 = vadd.f32 %v5296_v24, %v9569_v5  ;;  %v5396_v5 = vmax.f32 %v5294_v36, 0.0 }
 0x460   :  { %v5471_v19 = vld [vmem:[#allocation7 + $0x1a] ss:$2 sm:$0x1f]  ;;  %v5473_v29 = vld [vmem:[#allocation7 + $0x1b] ss:$2 sm:$0x1f]  ;;  %v6249_v7 = vadd.f32 %v6248_v11, %v6247_v8  ;;  %v9647_v0 = vadd.f32 %v6246_v38, %v9536_v6 }
 0x461   :  { %v5463_v57 = vpack.c.bf16 %v5462_v26, %v5462_v26  ;;  %5431 = vst.msk [vmem:[#allocation7 + $0x50] sm:$0xff] %vm5420_vm2, %v5398_v53  ;;  %v5478_v51 = vmax.f32 %v5471_v19, %v5473_v29  ;;  %v5399_v3 = vmax.f32 %v5305_v12, 0.0  ;;  %v5397_v6 = vmax.f32 %v5297_v30, 0.0  ;;  %5429 = vst.msk [vmem:[#allocation7 + $0x40] sm:$0xff] %vm5420_vm2, %v5396_v5 }
 0x462   :  { %v5475_v39 = vld [vmem:[#allocation7 + $0x27] ss:$2 sm:$0x1f]  ;;  %v5477_v46 = vld [vmem:[#allocation7 + $0x28] ss:$2 sm:$0x1f]  ;;  %v9653_v2 = vadd.f32 %v6249_v7, %v9542_v55 }
 0x463   :  { %v5468_v40 = vsel %vm9637_vm5, %v5463_v57, %v5467_v54  ;;  %v5479_v1 = vmax.f32 %v5475_v39, %v5477_v46  ;;  %v6334_v20 = vpop.f32.mrb[124].mxu0  ;;  %5432 = vst.msk [vmem:[#allocation7 + $0x58] sm:$0xff] %vm5420_vm2, %v5399_v3  ;;  %5430 = vst.msk [vmem:[#allocation7 + $0x48] sm:$0xff] %vm5420_vm2, %v5397_v6  ;;  %v5505_v38 = vld [vmem:[#allocation7 + $0x34] ss:$2 sm:$0x1f] }
 0x464   :  { %5469 = vst [vmem:[%s9833_s3] sm:$0x7] %v5468_v40  ;;  %v6250_v44 = vpop.f32.mrb[124].mxu1  ;;  %v5318_v18 = vadd.f32 %v6334_v20, %v9599_v43  ;;  %v5309_v62 = vpop.f32.mrb[125].mxu0  ;;  %v5507_v36 = vld [vmem:[#allocation7 + $0x35] ss:$2 sm:$0x1f] }
 0x465   :  { %v6251_v34 = vpop.f32.mrb[125].mxu1  ;;  %v5480_v61 = vmax.f32 %v5478_v51, %v5479_v1  ;;  %v5310_v52 = vadd.f32 %v5309_v62, %v9587_v14  ;;  %v6335_v31 = vpop.f32.mrb[126].mxu0  ;;  %v5512_v11 = vmax.f32 %v5505_v38, %v5507_v36  ;;  %v5524_v6 = vld [vmem:[%s9833_s3 + $0x4] sm:$0xe] }
 0x466   :  { %v6252_v55 = vadd.f32 %v6251_v34, %v6250_v44  ;;  %v6253_v60 = vpop.f32.mrb[126].mxu1  ;;  %v5402_v9 = vmax.f32 %v5318_v18, 0.0  ;;  %v5321_v17 = vadd.f32 %v6335_v31, %v9605_v16  ;;  %v5312_v43 = vpop.f32.mrb[127].mxu0 }
 0x467   :  { %v6254_v47 = vpop.f32.mrb[127].mxu1  ;;  %v5824_v22 = vpack.c.bf16 %v5480_v61, %v5480_v61  ;;  %v5400_v13 = vmax.f32 %v5310_v52, 0.0  ;;  %v5313_v33 = vadd.f32 %v5312_v43, %v9593_v35 }
 0x468   :  { %v6255_v58 = vadd.f32 %v6254_v47, %v6253_v60  ;;  %5435 = vst.msk [vmem:[#allocation7 + $0x70] sm:$0xff] %vm5420_vm2, %v5402_v9  ;;  %v5403_v41 = vmax.f32 %v5321_v17, 0.0  ;;  %v9667_v14 = vadd.f32 %v6252_v55, %v9548_v25 }
 0x469   :  { %v5486_v28 = vshrl.u32 %v5824_v22, 16  ;;  %v5489_v15 = vshll.u32 %v5824_v22, 16  ;;  %5433 = vst.msk [vmem:[#allocation7 + $0x60] sm:$0xff] %vm5420_vm2, %v5400_v13  ;;  %v5401_v16 = vmax.f32 %v5313_v33, 0.0 }
 0x46a   :  { %v9671_v26 = vadd.f32 %v6255_v58, %v9554_v32  ;;  %5436 = vst.msk [vmem:[#allocation7 + $0x78] sm:$0xff] %vm5420_vm2, %v5403_v41  ;;  %v5509_v54 = vld [vmem:[#allocation7 + $0x41] ss:$2 sm:$0x1f] }
 0x46b   :  { %v5488_v35 = vrot.slane %v5486_v28, 5  ;;  %v5491_v8 = vrot.slane %v5489_v15, 6  ;;  %5434 = vst.msk [vmem:[#allocation7 + $0x68] sm:$0xff] %vm5420_vm2, %v5401_v16  ;;  %v6338_v25 = vpop.f32.mrb[128].mxu0  ;;  %v5499_v29 = vld [vmem:[%s9833_s3] sm:$0xc] }
 0x46c   :  { %v6256_v56 = vpop.f32.mrb[128].mxu1  ;;  %v5511_v53 = vld [vmem:[#allocation7 + $0x42] ss:$2 sm:$0x1f]  ;;  %v5334_v32 = vadd.f32 %v6338_v25, %v9626_v63  ;;  %v5325_v51 = vpop.f32.mrb[129].mxu0 }
 0x46d   :  { %v5492_v24 = vor.u32 %v5491_v8, %v5488_v35  ;;  %v5513_v57 = vmax.f32 %v5509_v54, %v5511_v53  ;;  %v5528_v19 = vld [vmem:[#allocation7 + $0x4e] ss:$2 sm:$0x1f]  ;;  %v5530_v7 = vld [vmem:[#allocation7 + $0x4f] ss:$2 sm:$0x1f]  ;;  %v5326_v18 = vadd.f32 %v5325_v51, %v9612_v45 }
 0x46e   :  { %v5406_v30 = vmax.f32 %v5334_v32, 0.0  ;;  %v6257_v40 = vpop.f32.mrb[129].mxu1  ;;  %v6339_v3 = vpop.f32.mrb[130].mxu0  ;;  %v5535_v61 = vmax.f32 %v5528_v19, %v5530_v7 }
 0x46f   :  { %v5493_v39 = vrot.slane %v5492_v24, 4  ;;  %v5514_v46 = vmax.f32 %v5512_v11, %v5513_v57  ;;  %v5500_v1 = vsel %vm9677_vm10, %v5492_v24, %v5499_v29  ;;  %v6258_v5 = vadd.f32 %v6257_v40, %v6256_v56  ;;  %v6259_v63 = vpop.f32.mrb[130].mxu1  ;;  %v5328_v33 = vpop.f32.mrb[131].mxu0 }
 0x470   :  { %v5532_v44 = vld [vmem:[#allocation7 + $0x5b] ss:$2 sm:$0x1f]  ;;  %v5534_v20 = vld [vmem:[#allocation7 + $0x5c] ss:$2 sm:$0x1f]  ;;  %v5337_v34 = vadd.f32 %v6339_v3, %v9631_v48 }
 0x471   :  { %5501 = vst [vmem:[%s9833_s3] sm:$0xc] %v5500_v1  ;;  %5439 = vst.msk [vmem:[#allocation7 + $0x90] sm:$0xff] %vm5420_vm2, %v5406_v30  ;;  %v5825_v62 = vpack.c.bf16 %v5514_v46, %v5514_v46  ;;  %v5536_v55 = vmax.f32 %v5532_v44, %v5534_v20  ;;  %v5566_v52 = vld [vmem:[#allocation7 + $0x75] ss:$2 sm:$0x1f]  ;;  %v9701_v31 = vadd.f32 %v6258_v5, %v9560_v49  ;;  %v5404_v13 = vmax.f32 %v5326_v18, 0.0 }
 0x472   :  { %5503 = vst.msk [vmem:[%s9833_s3 + $0x4] sm:$0x1] %vm5502_vm6, %v5493_v39  ;;  %v5568_v60 = vld [vmem:[#allocation7 + $0x76] ss:$2 sm:$0x1f]  ;;  %v6260_v58 = vpop.f32.mrb[131].mxu1  ;;  %v5329_v49 = vadd.f32 %v5328_v33, %v9617_v10 }
 0x473   :  { %v5570_v45 = vmax.f32 %v5566_v52, %v5568_v60  ;;  %v5562_v48 = vld [vmem:[#allocation7 + $0x68] ss:$2 sm:$0x1f]  ;;  %v5564_v17 = vld [vmem:[#allocation7 + $0x69] ss:$2 sm:$0x1f]  ;;  %v5537_v43 = vmax.f32 %v5535_v61, %v5536_v55  ;;  %v6261_v28 = vadd.f32 %v6260_v58, %v6259_v63 }
 0x474   :  { %v5519_v47 = vrot.slane %v5825_v62, 7  ;;  %v5569_v22 = vmax.f32 %v5562_v48, %v5564_v17  ;;  %v5407_v41 = vmax.f32 %v5337_v34, 0.0  ;;  %v6262_v15 = vpop.f32.mrb[132].mxu1  ;;  %v6342_v16 = vpop.f32.mrb[132].mxu0  ;;  %5437 = vst.msk [vmem:[#allocation7 + $0x80] sm:$0xff] %vm5420_vm2, %v5404_v13  ;;  %v5405_v10 = vmax.f32 %v5329_v49, 0.0 }
 0x475   :  { %v5826_v36 = vpack.c.bf16 %v5537_v43, %v5537_v43  ;;  %v5350_v8 = vadd.f32 %v6342_v16, %v9667_v14  ;;  %v6263_v56 = vpop.f32.mrb[133].mxu1  ;;  %v5341_v25 = vpop.f32.mrb[133].mxu0  ;;  %v5200_v24 = vadd.f32 %v6261_v28, %v9566_v23 }
 0x476   :  { %v5525_v38 = vsel %vm9705_vm14, %v5519_v47, %v5524_v6  ;;  %v5571_v35 = vmax.f32 %v5569_v22, %v5570_v45  ;;  %5440 = vst.msk [vmem:[#allocation7 + $0x98] sm:$0xff] %vm5420_vm2, %v5407_v41  ;;  %v6264_v54 = vadd.f32 %v6263_v56, %v6262_v15  ;;  %v5342_v53 = vadd.f32 %v5341_v25, %v9647_v0  ;;  %v6265_v32 = vpop.f32.mrb[134].mxu1  ;;  %v6343_v11 = vpop.f32.mrb[134].mxu0 }
 0x477   :  { %5526 = vst [vmem:[%s9833_s3 + $0x4] sm:$0xe] %v5525_v38  ;;  %v5543_v57 = vshll.u32 %v5826_v36, 16  ;;  %v5546_v19 = vshrl.u32 %v5826_v36, 16  ;;  %v5410_v14 = vmax.f32 %v5350_v8, 0.0  ;;  %v6266_v7 = vpop.f32.mrb[135].mxu1  ;;  %v5353_v51 = vadd.f32 %v6343_v11, %v9671_v26 }
 0x478   :  { %v5827_v29 = vpack.c.bf16 %v5571_v35, %v5571_v35  ;;  %v5344_v30 = vpop.f32.mrb[135].mxu0  ;;  %5438 = vst.msk [vmem:[#allocation7 + $0x88] sm:$0xff] %vm5420_vm2, %v5405_v10  ;;  %v5408_v40 = vmax.f32 %v5342_v53, 0.0  ;;  %v6267_v39 = vadd.f32 %v6266_v7, %v6265_v32  ;;  %v5205_v23 = vadd.f32 %v6264_v54, %v9572_v21  ;;  %v5585_v26 = vld [vmem:[%s9833_s3 + $0xc] sm:$0x1] }
 0x479   :  { %v5345_v46 = vadd.f32 %v5344_v30, %v9653_v2  ;;  %v5545_v1 = vrot.slane %v5543_v57, 5  ;;  %v5548_v0 = vrot.slane %v5546_v19, 4  ;;  %5443 = vst.msk [vmem:[#allocation7 + $0xb0] sm:$0xff] %vm5420_vm2, %v5410_v14  ;;  %v5411_v2 = vmax.f32 %v5353_v51, 0.0  ;;  %v5806_v11 = vld [vmem:[%s9833_s3 + $0x10] sm:$0x7] }
 0x47a   :  { %v5576_v5 = vrot.slane %v5827_v29, 6  ;;  %5441 = vst.msk [vmem:[#allocation7 + $0xa0] sm:$0xff] %vm5420_vm2, %v5408_v40  ;;  %v5208_v6 = vadd.f32 %v6267_v39, %v9578_v37 }
 0x47b   :  { %v5409_v3 = vmax.f32 %v5345_v46, 0.0  ;;  %v5549_v44 = vor.u32 %v5548_v0, %v5545_v1  ;;  %v6346_v34 = vpop.f32.mrb[136].mxu0  ;;  %5444 = vst.msk [vmem:[#allocation7 + $0xb8] sm:$0xff] %vm5420_vm2, %v5411_v2 }
 0x47c   :  { %v5577_v20 = vrot.slane %v5576_v5, 4  ;;  %5581 = vst.msk [vmem:[%s9833_s3 + $0x8] sm:$0xc] %vm5496_vm7, %v5576_v5  ;;  %v6268_v18 = vpop.f32.mrb[136].mxu1  ;;  %v5366_v37 = vadd.f32 %v6346_v34, %v5205_v23  ;;  %v5357_v61 = vpop.f32.mrb[137].mxu0 }
 0x47d   :  { %5442 = vst.msk [vmem:[#allocation7 + $0xa8] sm:$0xff] %vm5420_vm2, %v5409_v3  ;;  %v6269_v62 = vpop.f32.mrb[137].mxu1  ;;  %v5550_v55 = vrot.slane %v5549_v44, 4  ;;  %v5358_v48 = vadd.f32 %v5357_v61, %v9701_v31  ;;  %v6347_v47 = vpop.f32.mrb[138].mxu0 }
 0x47e   :  { %v5556_v52 = vld [vmem:[%s9833_s3 + $0x4] sm:$0x8]  ;;  %v5586_v60 = vsel %vm9727_vm0, %v5577_v20, %v5585_v26  ;;  %v6270_v45 = vadd.f32 %v6269_v62, %v6268_v18  ;;  %v6271_v17 = vpop.f32.mrb[138].mxu1  ;;  %v5414_v22 = vmax.f32 %v5366_v37, 0.0  ;;  %v5369_v13 = vadd.f32 %v6347_v47, %v5208_v6  ;;  %v5360_v33 = vpop.f32.mrb[139].mxu0 }
 0x47f   :  { %v5557_v43 = vsel %vm9738_vm1, %v5545_v1, %v5556_v52  ;;  %5587 = vst [vmem:[%s9833_s3 + $0xc] sm:$0x1] %v5586_v60  ;;  %v6272_v58 = vpop.f32.mrb[139].mxu1  ;;  %5560 = vst.msk [vmem:[%s9833_s3 + $0x8] sm:$0x3] %vm5559_vm3, %v5550_v55  ;;  %v5361_v49 = vadd.f32 %v5360_v33, %v5200_v24  ;;  %v5412_v10 = vmax.f32 %v5358_v48, 0.0 }
 0x480   :  { %5558 = vst [vmem:[%s9833_s3 + $0x4] sm:$0x8] %v5557_v43  ;;  %v5589_v31 = vld [vmem:[#allocation7 + $0x80] ss:$2 sm:$0x1f]  ;;  %v6273_v28 = vadd.f32 %v6272_v58, %v6271_v17  ;;  %v5213_v15 = vadd.f32 %v6270_v45, %v9584_v27  ;;  %5447 = vst.msk [vmem:[#allocation7 + $0xd0] sm:$0xff] %vm5420_vm2, %v5414_v22 }
 0x481   :  { %v5591_v41 = vld [vmem:[#allocation7 + $0x81] ss:$2 sm:$0x1f]  ;;  %v5593_v16 = vld [vmem:[#allocation7 + $0x8d] ss:$2 sm:$0x1f] }
 0x482   :  { %v5595_v38 = vld [vmem:[#allocation7 + $0x8e] ss:$2 sm:$0x1f]  ;;  %v5596_v36 = vmax.f32 %v5589_v31, %v5591_v41  ;;  %v5605_v8 = vld [vmem:[#allocation7 + $0x9a] ss:$2 sm:$0x1f]  ;;  %v5216_v56 = vadd.f32 %v6273_v28, %v9590_v4 }
 0x483   :  { %v5597_v35 = vmax.f32 %v5593_v16, %v5595_v38  ;;  %v5607_v25 = vld [vmem:[#allocation7 + $0x9b] ss:$2 sm:$0x1f]  ;;  %v5415_v54 = vmax.f32 %v5369_v13, 0.0  ;;  %v5413_v53 = vmax.f32 %v5361_v49, 0.0  ;;  %5445 = vst.msk [vmem:[#allocation7 + $0xc0] sm:$0xff] %vm5420_vm2, %v5412_v10 }
 0x484   :  { %v5609_v24 = vld [vmem:[#allocation7 + $0xa7] ss:$2 sm:$0x1f]  ;;  %v5611_v27 = vld [vmem:[#allocation7 + $0xa8] ss:$2 sm:$0x1f]  ;;  %v5612_v19 = vmax.f32 %v5605_v8, %v5607_v25 }
 0x485   :  { %v5598_v32 = vmax.f32 %v5596_v36, %v5597_v35  ;;  %5448 = vst.msk [vmem:[#allocation7 + $0xd8] sm:$0xff] %vm5420_vm2, %v5415_v54  ;;  %5446 = vst.msk [vmem:[#allocation7 + $0xc8] sm:$0xff] %vm5420_vm2, %v5413_v53  ;;  %v5613_v4 = vmax.f32 %v5609_v24, %v5611_v27  ;;  %v6274_v29 = vpop.f32.mrb[140].mxu1  ;;  %v6350_v14 = vpop.f32.mrb[140].mxu0  ;;  %v5813_v49 = vld [vmem:[%s9833_s3 + $0x14] sm:$0xe] }
 0x486   :  { %v6275_v7 = vpop.f32.mrb[141].mxu1  ;;  %v5373_v30 = vpop.f32.mrb[141].mxu0  ;;  %v5635_v5 = vld [vmem:[#allocation7 + $0xb4] ss:$2 sm:$0x1f] }
 0x487   :  { %v5599_v57 = vpack.c.bf16 %v5598_v32, %v5598_v32  ;;  %v5614_v51 = vmax.f32 %v5612_v19, %v5613_v4  ;;  %v6276_v39 = vadd.f32 %v6275_v7, %v6274_v29  ;;  %v5374_v46 = vadd.f32 %v5373_v30, %v5213_v15  ;;  %v6277_v1 = vpop.f32.mrb[142].mxu1  ;;  %v6351_v0 = vpop.f32.mrb[142].mxu0  ;;  %v5637_v2 = vld [vmem:[#allocation7 + $0xb5] ss:$2 sm:$0x1f] }
 0x488   :  { %v6278_v23 = vpop.f32.mrb[143].mxu1  ;;  %v5376_v26 = vpop.f32.mrb[143].mxu0  ;;  %v5642_v55 = vmax.f32 %v5635_v5, %v5637_v2 }
 0x489   :  { %v5602_v40 = vsel %vm9637_vm5, %v5599_v57, %v5806_v11  ;;  %v5828_v3 = vpack.c.bf16 %v5614_v51, %v5614_v51  ;;  %v5221_v6 = vadd.f32 %v6276_v39, %v9596_v42  ;;  %v5416_v44 = vmax.f32 %v5374_v46, 0.0  ;;  %v5821_v51 = vld [vmem:[%s9833_s3 + $0x1c] sm:$0x1] }
 0x48a   :  { %5807 = vst [vmem:[%s9833_s3 + $0x10] sm:$0x7] %v5602_v40  ;;  %v6279_v20 = vadd.f32 %v6278_v23, %v6277_v1  ;;  %v5377_v59 = vadd.f32 %v5376_v26, %v5216_v56 }
 0x48b   :  { %v5620_v18 = vshrl.u32 %v5828_v3, 16  ;;  %v5623_v34 = vshll.u32 %v5828_v3, 16  ;;  %v5382_v62 = vadd.f32 %v6350_v14, %v5221_v6  ;;  %5449 = vst.msk [vmem:[#allocation7 + $0xe0] sm:$0xff] %vm5420_vm2, %v5416_v44 }
 0x48c   :  { %v5639_v37 = vld [vmem:[#allocation7 + $0xc1] ss:$2 sm:$0x1f]  ;;  %v5224_v61 = vadd.f32 %v6279_v20, %v9602_v50  ;;  %v5641_v52 = vld [vmem:[#allocation7 + $0xc2] ss:$2 sm:$0x1f] }
 0x48d   :  { %v5622_v60 = vrot.slane %v5620_v18, 5  ;;  %v5625_v45 = vrot.slane %v5623_v34, 6  ;;  %v5643_v48 = vmax.f32 %v5639_v37, %v5641_v52  ;;  %v5418_v17 = vmax.f32 %v5382_v62, 0.0  ;;  %v5655_v13 = vld [vmem:[#allocation7 + $0xce] ss:$2 sm:$0x1f] }
 0x48e   :  { %v5385_v47 = vadd.f32 %v6351_v0, %v5224_v61  ;;  %v5417_v43 = vmax.f32 %v5377_v59, 0.0  ;;  %v5657_v33 = vld [vmem:[#allocation7 + $0xcf] ss:$2 sm:$0x1f] }
 0x48f   :  { %v5626_v42 = vor.u32 %v5625_v45, %v5622_v60  ;;  %v5644_v22 = vmax.f32 %v5642_v55, %v5643_v48  ;;  %5451 = vst.msk [vmem:[#allocation7 + $0xf0] sm:$0xff] %vm5420_vm2, %v5418_v17  ;;  %v5662_v38 = vmax.f32 %v5655_v13, %v5657_v33 }
 0x490   :  { %v5419_v31 = vmax.f32 %v5385_v47, 0.0  ;;  %5450 = vst.msk [vmem:[#allocation7 + $0xe8] sm:$0xff] %vm5420_vm2, %v5417_v43 }
 0x491   :  { %v5809_v58 = vld [vmem:[%s9833_s3 + $0x10] sm:$0xc]  ;;  %v5627_v50 = vrot.slane %v5626_v42, 4  ;;  %v5829_v28 = vpack.c.bf16 %v5644_v22, %v5644_v22 }
 0x492   :  { %v5631_v41 = vsel %vm9677_vm10, %v5626_v42, %v5809_v58  ;;  %v5659_v15 = vld [vmem:[#allocation7 + $0xdb] ss:$2 sm:$0x1f]  ;;  %v5661_v16 = vld [vmem:[#allocation7 + $0xdc] ss:$2 sm:$0x1f] }
 0x493   :  { %5810 = vst [vmem:[%s9833_s3 + $0x10] sm:$0xc] %v5631_v41  ;;  %5452 = vst.msk [vmem:[#allocation7 + $0xf8] sm:$0xff] %vm5420_vm2, %v5419_v31  ;;  %v5649_v12 = vrot.slane %v5829_v28, 7  ;;  %v5663_v36 = vmax.f32 %v5659_v15, %v5661_v16 }
 0x494   :  { %5811 = vst.msk [vmem:[%s9833_s3 + $0x14] sm:$0x1] %vm5502_vm6, %v5627_v50 }
 0x495   :  { %v5652_v35 = vsel %vm9705_vm14, %v5649_v12, %v5813_v49  ;;  %v5664_v8 = vmax.f32 %v5662_v38, %v5663_v36 }
 0x496   :  { %5814 = vst [vmem:[%s9833_s3 + $0x14] sm:$0xe] %v5652_v35 }
 0x497   :  { %v5830_v56 = vpack.c.bf16 %v5664_v8, %v5664_v8  ;;  %v5685_v25 = vld [vmem:[#allocation7 + $0xe8] ss:$2 sm:$0x1f]  ;;  %v5687_v10 = vld [vmem:[#allocation7 + $0xe9] ss:$2 sm:$0x1f] }
 0x498   :  { %v5692_v57 = vmax.f32 %v5685_v25, %v5687_v10 }
 0x499   :  { %v5670_v54 = vshll.u32 %v5830_v56, 16  ;;  %v5673_v53 = vshrl.u32 %v5830_v56, 16 }
 0x49a   :  { %v5689_v32 = vld [vmem:[#allocation7 + $0xf5] ss:$2 sm:$0x1f]  ;;  %v5691_v11 = vld [vmem:[#allocation7 + $0xf6] ss:$2 sm:$0x1f] }
 0x49b   :  { %v5672_v24 = vrot.slane %v5670_v54, 5  ;;  %v5675_v27 = vrot.slane %v5673_v53, 4  ;;  %v5693_v19 = vmax.f32 %v5689_v32, %v5691_v11 }
 0x49d   :  { %v5676_v4 = vor.u32 %v5675_v27, %v5672_v24  ;;  %v5816_v9 = vld [vmem:[%s9833_s3 + $0x14] sm:$0x8]  ;;  %v5694_v29 = vmax.f32 %v5692_v57, %v5693_v19 }
 0x49e   :  { %v5681_v14 = vsel %vm9738_vm1, %v5672_v24, %v5816_v9 }
 0x49f   :  { %v5677_v7 = vrot.slane %v5676_v4, 4  ;;  %5817 = vst [vmem:[%s9833_s3 + $0x14] sm:$0x8] %v5681_v14  ;;  %v5831_v30 = vpack.c.bf16 %v5694_v29, %v5694_v29 }
 0x4a1   :  { %5818 = vst.msk [vmem:[%s9833_s3 + $0x18] sm:$0x3] %vm5559_vm3, %v5677_v7  ;;  %v5699_v40 = vrot.slane %v5831_v30, 6 }
 0x4a3   :  { %v5700_v39 = vrot.slane %v5699_v40, 4  ;;  %5820 = vst.msk [vmem:[%s9833_s3 + $0x18] sm:$0xc] %vm5496_vm7, %v5699_v40 }
 0x4a5   :  { %v5705_v21 = vsel %vm9727_vm0, %v5700_v39, %v5821_v51 }
 0x4a6   :  { %5822 = vst [vmem:[%s9833_s3 + $0x1c] sm:$0x1] %v5705_v21 }
 0x4a7   :  { %5711 = vsyncpa [#allocation9], 1 }

</bundles_post_ra>
